<compile_context>
chip_gen: v7x
topology: tpu7x:2x2x1
jax: 0.10.0
libtpu: 0.0.40
codegen_flags: <defaults>
</compile_context>

<pallas_src>
import math
import functools

import jax
import jax.numpy as jnp
import jax.image
from jax.experimental import pallas as pl
from jax.experimental.pallas import tpu as pltpu


# ----------------------------------------------------------------------------
# tiling helpers
# ----------------------------------------------------------------------------
def _pick_tile(M, target=256):
    """Largest power-of-two row tile <= target that divides M, preferring >=2
    grid programs (v7x has two TensorCores)."""
    if M % 8 != 0:
        return M
    cands = [t for t in (512, 256, 128, 64, 32, 16, 8) if t <= target]
    for t in cands:
        if M % t == 0 and M // t >= 2:
            return t
    for t in cands:
        if M % t == 0:
            return t
    return M


def _pick_lane_tile(n, target=512):
    """Lane tile for the batched scan: a multiple of 128 that divides n."""
    for t in (512, 256, 128):
        if t <= target and n % t == 0:
            return t
    return n


def _pick_seq_tile(L, target=64):
    """L-chunk for the scan grid (sublane-aligned where possible)."""
    for t in (128, 64, 32, 16, 8):
        if t <= target and L % t == 0:
            return t
    return L


_VMEM_LIMIT = 32 * 1024 * 1024   # safe on v5e/v6e (128 MiB) and v7x (64 MiB)


# ----------------------------------------------------------------------------
# Kernel 1: M-tiled batched matmul (1x1 Conv2d_BN fused, folded x_proj/dt_proj)
#           bf16 inputs -> f32 MXU accumulation -> configurable output dtype.
# ----------------------------------------------------------------------------
def _mm_kernel(x_ref, w_ref, b_ref, o_ref):
    acc = jnp.dot(x_ref[0], w_ref[0], preferred_element_type=jnp.float32)
    acc = acc + b_ref[0]
    o_ref[0] = acc.astype(o_ref.dtype)


def matmul(x, w, b, out_dtype=jnp.bfloat16):
    """x: [G, M, K], w: [G, K, N], b: [G, N] -> [G, M, N]."""
    G, M, K = x.shape
    N = w.shape[-1]
    tm = _pick_tile(M)
    return pl.pallas_call(
        _mm_kernel,
        out_shape=jax.ShapeDtypeStruct((G, M, N), out_dtype),
        grid=(G, M // tm),
        in_specs=[
            pl.BlockSpec((1, tm, K), lambda g, m: (g, m, 0)),
            pl.BlockSpec((1, K, N), lambda g, m: (g, 0, 0)),
            pl.BlockSpec((1, 1, N), lambda g, m: (g, 0, 0)),
        ],
        out_specs=pl.BlockSpec((1, tm, N), lambda g, m: (g, m, 0)),
        compiler_params=pltpu.CompilerParams(
            dimension_semantics=("parallel", "parallel"),
            vmem_limit_bytes=_VMEM_LIMIT),
    )(x.astype(jnp.bfloat16), w.astype(jnp.bfloat16),
      b.reshape(G, 1, N).astype(jnp.float32))


def pointwise(x, w, b):
    """1x1 conv (Conv2d_BN fused) on NHWC input via the matmul kernel."""
    B, H, W, C = x.shape
    N = w.shape[-1]
    out = matmul(x.reshape(1, B * H * W, C), w[None], b[None])
    return out.reshape(B, H, W, N)


# ----------------------------------------------------------------------------
# Kernel 2: fused multi-input matmul (out_proj on concat([y_low, x_high_a,
#           x_high_b]) without ever materializing the concat in HBM).
# ----------------------------------------------------------------------------
def _mm_multi_kernel(*refs, n_in):
    x_refs = refs[:n_in]
    w_refs = refs[n_in:2 * n_in]
    b_ref = refs[2 * n_in]
    o_ref = refs[2 * n_in + 1]
    acc = b_ref[...].astype(jnp.float32)
    for xr, wr in zip(x_refs, w_refs):
        acc = acc + jnp.dot(xr[...], wr[...],
                            preferred_element_type=jnp.float32)
    o_ref[...] = acc.astype(o_ref.dtype)


def matmul_multi(xs, ws, b, out_dtype=jnp.bfloat16):
    M = xs[0].shape[0]
    N = ws[0].shape[1]
    tm = _pick_tile(M)
    in_specs = ([pl.BlockSpec((tm, x.shape[1]), lambda m: (m, 0)) for x in xs]
                + [pl.BlockSpec(w.shape, lambda m: (0, 0)) for w in ws]
                + [pl.BlockSpec((1, N), lambda m: (0, 0))])
    args = ([x.astype(jnp.bfloat16) for x in xs]
            + [w.astype(jnp.bfloat16) for w in ws]
            + [b.reshape(1, N).astype(jnp.float32)])
    # TODO(synk): out lane width = hidden_dim (<128) forces masked stores;
    # padding the output to 128 lanes would need an extra slice pass.
    return pl.pallas_call(
        functools.partial(_mm_multi_kernel, n_in=len(xs)),
        out_shape=jax.ShapeDtypeStruct((M, N), out_dtype),
        grid=(M // tm,),
        in_specs=in_specs,
        out_specs=pl.BlockSpec((tm, N), lambda m: (m, 0)),
        compiler_params=pltpu.CompilerParams(
            dimension_semantics=("parallel",),
            vmem_limit_bytes=_VMEM_LIMIT),
    )(*args)


# ----------------------------------------------------------------------------
# Kernel 3: fused FFN (fc1 + GELU + fc2); mid activation never hits HBM.
# ----------------------------------------------------------------------------
def _ffn_kernel(x_ref, w1_ref, b1_ref, w2_ref, b2_ref, o_ref):
    h = jnp.dot(x_ref[...], w1_ref[...], preferred_element_type=jnp.float32)
    h = h + b1_ref[...]
    # TODO(synk): PyTorch nn.GELU defaults to the exact erf form; tanh-approx
    # GELU is used for robust Mosaic lowering.
    h = jax.nn.gelu(h, approximate=True)
    o = jnp.dot(h.astype(jnp.bfloat16), w2_ref[...],
                preferred_element_type=jnp.float32)
    o = o + b2_ref[...]
    o_ref[...] = o.astype(o_ref.dtype)


def ffn(x, w1, b1, w2, b2):
    B, H, W, C = x.shape
    M = B * H * W
    Mid = w1.shape[1]
    Cout = w2.shape[1]
    tm = _pick_tile(M)
    out = pl.pallas_call(
        _ffn_kernel,
        out_shape=jax.ShapeDtypeStruct((M, Cout), jnp.bfloat16),
        grid=(M // tm,),
        in_specs=[
            pl.BlockSpec((tm, C), lambda m: (m, 0)),
            pl.BlockSpec((C, Mid), lambda m: (0, 0)),
            pl.BlockSpec((1, Mid), lambda m: (0, 0)),
            pl.BlockSpec((Mid, Cout), lambda m: (0, 0)),
            pl.BlockSpec((1, Cout), lambda m: (0, 0)),
        ],
        out_specs=pl.BlockSpec((tm, Cout), lambda m: (m, 0)),
        compiler_params=pltpu.CompilerParams(
            dimension_semantics=("parallel",),
            vmem_limit_bytes=_VMEM_LIMIT),
    )(x.reshape(M, C).astype(jnp.bfloat16), w1.astype(jnp.bfloat16),
      b1.reshape(1, Mid).astype(jnp.float32), w2.astype(jnp.bfloat16),
      b2.reshape(1, Cout).astype(jnp.float32))
    return out.reshape(B, H, W, Cout)


# ----------------------------------------------------------------------------
# Kernel 4: lane-dense general depthwise conv (KH x KW).  Data layout
# [B, H+2*ph, (W+2*pw)*C]: the W axis (and channels) live on lanes, the H axis
# on sublanes.  A single padded block is DMA'd per batch element; all KH*KW
# taps are done with in-kernel static sublane/lane slices (no XLA pre-shift,
# no transposes).
# ----------------------------------------------------------------------------
def _dw_kernel(x_ref, w_ref, b_ref, o_ref, *, KH, KW, C, act):
    Hout = o_ref.shape[1]
    WC = o_ref.shape[2]
    x = x_ref[0].astype(jnp.float32)          # [Hp, (W+2*pw)*C]
    wv = w_ref[...]                           # [KH*KW, WC]
    acc = jnp.zeros((Hout, WC), jnp.float32)
    for i in range(KH):
        for j in range(KW):
            # TODO(synk): lane-offset slices could be pltpu.roll (XLU slot) to
            # avoid relayout copies; static slices kept for robust lowering.
            xij = x[i:i + Hout, j * C:j * C + WC]
            acc = acc + xij * wv[i * KW + j]
    acc = acc + b_ref[...]
    if act == "silu":
        acc = acc * jax.nn.sigmoid(acc)
    o_ref[0] = acc.astype(o_ref.dtype)


def dwconv(x, w_taps, b_c, KH, KW, act="none"):
    """Depthwise (KH, KW) conv with 'same' padding on NHWC input.
    w_taps: [KH*KW, C] (tap order i*KW + j), b_c: [C]."""
    B, H, W, C = x.shape
    ph, pw = KH // 2, KW // 2
    xp = jnp.pad(x, ((0, 0), (ph, ph), (pw, pw), (0, 0)))
    Hp, Wp = H + 2 * ph, W + 2 * pw
    x3 = xp.reshape(B, Hp, Wp * C)
    WC = W * C
    w_full = jnp.tile(w_taps[:, None, :], (1, W, 1)).reshape(KH * KW, WC)
    b_full = jnp.tile(b_c[None, None, :], (1, W, 1)).reshape(1, WC)
    out = pl.pallas_call(
        functools.partial(_dw_kernel, KH=KH, KW=KW, C=C, act=act),
        out_shape=jax.ShapeDtypeStruct((B, H, WC), jnp.bfloat16),
        grid=(B,),
        in_specs=[
            pl.BlockSpec((1, Hp, Wp * C), lambda b: (b, 0, 0)),
            pl.BlockSpec((KH * KW, WC), lambda b: (0, 0)),
            pl.BlockSpec((1, WC), lambda b: (0, 0)),
        ],
        out_specs=pl.BlockSpec((1, H, WC), lambda b: (b, 0, 0)),
        compiler_params=pltpu.CompilerParams(dimension_semantics=("parallel",)),
    )(x3.astype(jnp.bfloat16), w_full.astype(jnp.float32),
      b_full.astype(jnp.float32))
    return out.reshape(B, H, W, C)


# ----------------------------------------------------------------------------
# Kernel 5: LayerNorm over the last dim (SS2D.out_norm), row-tiled.
# ----------------------------------------------------------------------------
def _ln_kernel(x_ref, g_ref, b_ref, o_ref, *, eps):
    x = x_ref[...].astype(jnp.float32)
    mu = jnp.mean(x, axis=-1, keepdims=True)
    xc = x - mu
    var = jnp.mean(xc * xc, axis=-1, keepdims=True)
    y = xc * jax.lax.rsqrt(var + eps)
    o_ref[...] = (y * g_ref[...] + b_ref[...]).astype(o_ref.dtype)


def layernorm(x, gamma, beta, eps=1e-5, out_dtype=jnp.bfloat16):
    M, D = x.shape
    tm = _pick_tile(M)
    return pl.pallas_call(
        functools.partial(_ln_kernel, eps=eps),
        out_shape=jax.ShapeDtypeStruct((M, D), out_dtype),
        grid=(M // tm,),
        in_specs=[
            pl.BlockSpec((tm, D), lambda m: (m, 0)),
            pl.BlockSpec((1, D), lambda m: (0, 0)),
            pl.BlockSpec((1, D), lambda m: (0, 0)),
        ],
        out_specs=pl.BlockSpec((tm, D), lambda m: (m, 0)),
        compiler_params=pltpu.CompilerParams(dimension_semantics=("parallel",)),
    )(x.astype(jnp.float32), gamma.reshape(1, D).astype(jnp.float32),
      beta.reshape(1, D).astype(jnp.float32))


# ----------------------------------------------------------------------------
# Kernel 6: batched selective scan (Mamba recurrence).
# All B*K directional scans are packed along the lane axis (GD = B*K*Dm,
# ordered (b, k, d)).  B/C come in UNEXPANDED as [L, N, B*K] and are expanded
# over Dm inside the kernel with a 0/1 expansion matmul (MXU, idle otherwise).
# The grid is (GD tiles "parallel", L chunks "arbitrary"); the state h lives in
# VMEM scratch and is carried across L chunks.  All non-recurrent math is
# hoisted out of the serial fori_loop; per-step work is a VALU mul/add plus one
# aligned [N, gdt] scratch store.
# ----------------------------------------------------------------------------
def _scan_kernel(e_ref, u_ref, dt_ref, b_ref, c_ref, a_ref, d_ref, dtb_ref,
                 y_ref, h_ref, da_ref, hbuf_ref, *, TL, N, unroll):
    li = pl.program_id(1)

    @pl.when(li == 0)
    def _():
        h_ref[...] = jnp.zeros_like(h_ref)

    gdt = u_ref.shape[1]
    bk = e_ref.shape[0]

    u = u_ref[...]                                   # [TL, gdt]
    z = dt_ref[...] + dtb_ref[...]
    # stable softplus (delta_softplus=True)
    dt = jnp.maximum(z, 0.0) + jnp.log(1.0 + jnp.exp(-jnp.abs(z)))
    dtu = dt * u                                     # [TL, gdt]

    E = e_ref[...]                                   # [bk, gdt] 0/1 expansion
    A = a_ref[...]                                   # [N, gdt] (negative)

    bexp = jnp.dot(b_ref[...].reshape(TL * N, bk), E,
                   preferred_element_type=jnp.float32)     # [TL*N, gdt]
    cexp = jnp.dot(c_ref[...].reshape(TL * N, bk), E,
                   preferred_element_type=jnp.float32)     # [TL*N, gdt]

    # hoist exp / input term out of the serial recurrence (vectorized over L)
    for t in range(TL):
        da_ref[t] = jnp.exp(A * dt[t])                          # [N, gdt]
        hbuf_ref[t] = bexp[t * N:(t + 1) * N, :] * dtu[t]       # [N, gdt]

    def step(i, h):
        h = da_ref[i] * h + hbuf_ref[i]
        hbuf_ref[i] = h
        return h

    h = jax.lax.fori_loop(0, TL, step, h_ref[...], unroll=unroll)
    h_ref[...] = h

    hs = hbuf_ref[...]                                          # [TL, N, gdt]
    y = jnp.sum(cexp.reshape(TL, N, gdt) * hs, axis=1)          # [TL, gdt]
    y_ref[...] = (y + d_ref[...] * u).astype(y_ref.dtype)


def selective_scan(u, dt, Bc, Cc, A_full, D_full, dtb_full, E_full):
    L, GD = u.shape
    N = A_full.shape[0]
    BK = Bc.shape[-1]
    gdt = _pick_lane_tile(GD)
    TL = _pick_seq_tile(L)
    unroll = True if TL <= 32 else (8 if TL % 8 == 0 else 1)
    return pl.pallas_call(
        functools.partial(_scan_kernel, TL=TL, N=N, unroll=unroll),
        out_shape=jax.ShapeDtypeStruct((L, GD), jnp.float32),
        grid=(GD // gdt, L // TL),
        in_specs=[
            pl.BlockSpec((BK, gdt), lambda g, l: (0, g)),        # E
            pl.BlockSpec((TL, gdt), lambda g, l: (l, g)),        # u
            pl.BlockSpec((TL, gdt), lambda g, l: (l, g)),        # dt (raw)
            pl.BlockSpec((TL, N, BK), lambda g, l: (l, 0, 0)),   # B (unexpanded)
            pl.BlockSpec((TL, N, BK), lambda g, l: (l, 0, 0)),   # C (unexpanded)
            pl.BlockSpec((N, gdt), lambda g, l: (0, g)),         # A
            pl.BlockSpec((1, gdt), lambda g, l: (0, g)),         # D
            pl.BlockSpec((1, gdt), lambda g, l: (0, g)),         # dt_bias
        ],
        out_specs=pl.BlockSpec((TL, gdt), lambda g, l: (l, g)),
        scratch_shapes=[
            pltpu.VMEM((N, gdt), jnp.float32),        # h (carried over L)
            pltpu.VMEM((TL, N, gdt), jnp.float32),    # exp(dt*A)
            pltpu.VMEM((TL, N, gdt), jnp.float32),    # B*dt*u -> then h history
        ],
        compiler_params=pltpu.CompilerParams(
            dimension_semantics=("parallel", "arbitrary"),
            vmem_limit_bytes=_VMEM_LIMIT),
    )(E_full.astype(jnp.float32), u.astype(jnp.float32),
      dt.astype(jnp.float32), Bc.astype(jnp.float32), Cc.astype(jnp.float32),
      A_full.astype(jnp.float32), D_full.astype(jnp.float32),
      dtb_full.astype(jnp.float32))


# ----------------------------------------------------------------------------
# cross_selective_scan (CrossScan / projections / scan / CrossMerge / LN)
# ----------------------------------------------------------------------------
def cross_selective_scan_jax(x_low, p, cfg):
    # x_low: [B, Hp, Wp, Dm]  (NHWC, f32)
    B, Hp, Wp, Dm = x_low.shape
    L = Hp * Wp
    N = cfg["d_state"]
    K = 4
    GD = B * K * Dm
    C2 = Dm + 2 * N

    # CrossScan: directions 2/3 are L-flips of 0/1; only 0/1 feed the GEMM.
    xs0 = x_low.reshape(B, L, Dm)
    xs1 = jnp.transpose(x_low, (0, 2, 1, 3)).reshape(B, L, Dm)

    # x_proj with dt_proj folded in; direction pairs (0,2)/(1,3) share
    # activations (weights concatenated along the output axis), the L-flip is
    # applied to the GEMM output.
    xdbl_f = matmul(jnp.stack([xs0, xs1]).reshape(2, B * L, Dm),
                    p["wc_pair"], p["wc_bias"], out_dtype=jnp.float32)
    xdbl_f = xdbl_f.reshape(2, B, L, 2, C2)
    xdbl = jnp.stack([xdbl_f[0, :, :, 0], xdbl_f[1, :, :, 0],
                      xdbl_f[0, :, ::-1, 1], xdbl_f[1, :, ::-1, 1]],
                     axis=0)                                   # [K,B,L,C2]
    dt_raw = xdbl[..., :Dm]                                    # [K,B,L,Dm]
    Bsr = xdbl[..., Dm:Dm + N]                                 # [K,B,L,N]
    Csr = xdbl[..., Dm + N:]                                   # [K,B,L,N]

    # Pack all B*K scans along lanes; GD lane order = (b, k, d).
    xs = jnp.stack([xs0, xs1, xs0[:, ::-1], xs1[:, ::-1]], axis=1)  # [B,K,L,Dm]
    u = jnp.transpose(xs, (2, 0, 1, 3)).reshape(L, GD)
    dt = jnp.transpose(dt_raw, (2, 1, 0, 3)).reshape(L, GD)
    Bc = jnp.transpose(Bsr, (2, 3, 1, 0)).reshape(L, N, B * K)
    Cc = jnp.transpose(Csr, (2, 3, 1, 0)).reshape(L, N, B * K)
    A_full = jnp.broadcast_to(p["A_negT"].transpose(1, 0, 2)[:, None],
                              (N, B, K, Dm)).reshape(N, GD)
    D_full = jnp.broadcast_to(p["Ds"][None], (B, K, Dm)).reshape(1, GD)
    dtb_full = jnp.broadcast_to(p["dt_bias"][None], (B, K, Dm)).reshape(1, GD)
    # 0/1 expansion matrix: E[p, j] = 1 iff lane j belongs to (b,k) pair p.
    E_full = jnp.repeat(jnp.eye(B * K, dtype=jnp.float32), Dm, axis=1)

    ys = selective_scan(u, dt, Bc, Cc, A_full, D_full, dtb_full, E_full)
    ys = jnp.transpose(ys.reshape(L, B, K, Dm), (1, 2, 0, 3))      # [B,K,L,Dm]

    # CrossMerge (glue)
    ys = ys[:, 0:2] + ys[:, 2:4, ::-1]
    part0 = ys[:, 0]
    part1 = jnp.transpose(ys[:, 1].reshape(B, Wp, Hp, Dm),
                          (0, 2, 1, 3)).reshape(B, L, Dm)
    y = part0 + part1

    # out_norm (LayerNorm over Dm), emitted in bf16 to halve downstream traffic
    y = layernorm(y.reshape(B * L, Dm), p["ln_gamma"], p["ln_beta"], eps=1e-5,
                  out_dtype=jnp.bfloat16)
    return y.reshape(B, Hp, Wp, Dm)


# ----------------------------------------------------------------------------
# SS2D forward + TViMBlock forward
# ----------------------------------------------------------------------------
def ss2d_forward(x, p, cfg):
    B, H, W, _ = x.shape
    de = cfg["d_expand"]
    d_inner = cfg["d_inner"]
    gc = cfg["gc"]
    ca = de - gc - d_inner

    t = pointwise(x, p["in_w"], p["in_b"])                 # in_proj (1x1 + BN)

    # Rep_Inception(d_expand, 7): first de-gc channels -> (7,1) conv along H,
    # last gc -> (1,7) along W; the module's SiLU is fused into both kernels.
    # The concat of the two halves is never materialized.
    t_w = dwconv(t[..., :de - gc], p["incep_w_w"], p["incep_w_b"],
                 KH=7, KW=1, act="silu")
    t_h = dwconv(t[..., de - gc:], p["incep_h_w"], p["incep_h_b"],
                 KH=1, KW=7, act="silu")

    x_low = t_w[..., :d_inner]                             # bf16

    s = cfg["pool"]                                        # 2 ** (3 - index)
    Hp, Wp = H // s, W // s
    pooled = x_low.astype(jnp.float32).reshape(
        B, Hp, s, Wp, s, d_inner).mean(axis=(2, 4))
    res = x_low - jnp.repeat(jnp.repeat(pooled.astype(x_low.dtype), s, axis=1),
                             s, axis=2)

    y = cross_selective_scan_jax(pooled, p, cfg)           # [B,Hp,Wp,d_inner]
    y_low = jax.image.resize(y, (B, H, W, d_inner), method="bilinear") + res

    # local 3x3 depthwise (RepDW) on x_high, kept as the two channel groups;
    # out_proj consumes them directly as a fused multi-input matmul so neither
    # x_high nor concat([y_low, x_high]) is ever materialized in HBM.
    M = B * H * W
    xs_list = [y_low.reshape(M, d_inner)]
    ws_list = [p["out_w_lo"]]
    if ca > 0:
        xh_a = dwconv(t_w[..., d_inner:], p["w3_a"], p["b3_a"], KH=3, KW=3)
        xs_list.append(xh_a.reshape(M, ca))
        ws_list.append(p["out_w_a"])
    xh_b = dwconv(t_h, p["w3_b"], p["b3_b"], KH=3, KW=3)
    xs_list.append(xh_b.reshape(M, gc))
    ws_list.append(p["out_w_b"])

    out = matmul_multi(xs_list, ws_list, p["out_b"])
    return out.reshape(B, H, W, p["out_b"].shape[0])


def tvim_block_forward(x_nchw, p, cfg):
    # NCHW in (PyTorch convention) -> NHWC bf16 inside -> NCHW f32 out.
    x = jnp.transpose(x_nchw, (0, 2, 3, 1)).astype(jnp.bfloat16)
    x = x + ss2d_forward(x, p, cfg)                        # SSM branch residual
    x = x + ffn(x, p["fc1_w"], p["fc1_b"], p["fc2_w"], p["fc2_b"])  # MLP branch
    return jnp.transpose(x, (0, 3, 1, 2)).astype(jnp.float32)


# ----------------------------------------------------------------------------
# Deterministic parameter construction (shapes follow the PyTorch __init__)
# ----------------------------------------------------------------------------
def trunc_normal(key, shape, std=0.02):
    return jnp.clip(jax.random.normal(key, shape, jnp.float32) * std,
                    -2.0 * std, 2.0 * std)


def make_conv_bn_1x1(key, cin, cout, eps=1e-5):
    # Conv2d(cin, cout, 1, bias=False) + BN(gamma=1, beta=0, mean=0, var=1)
    s = 1.0 / math.sqrt(1.0 + eps)
    w = trunc_normal(key, (cout, cin)) * s
    return w.T, jnp.zeros((cout,), jnp.float32)   # matmul form [Cin,Cout], bias


def make_rep_dw_axial(key, C, k, eps=1e-5):
    # RepDW_Axias fused to a single k-tap depthwise kernel + bias (eval BN).
    k1, k2 = jax.random.split(key)
    w = trunc_normal(k1, (C, k))
    w1 = trunc_normal(k2, (C,))
    s1 = 1.0 / math.sqrt(1.0 + eps)               # Conv2d_BN's BN
    wf = w * s1
    wf = wf.at[:, k // 2].add(w1 + 1.0)           # + 1x1 dw conv + identity
    wf = wf / math.sqrt(1.0 + eps)                # outer BatchNorm
    return jnp.transpose(wf), jnp.zeros((C,), jnp.float32)   # [k, C], [C]


def make_rep_dw_3x3(key, C, eps=1e-5):
    # RepDW fused to a single 3x3 depthwise kernel + bias (eval BN).
    k1, k2 = jax.random.split(key)
    w = trunc_normal(k1, (C, 3, 3))
    w1 = trunc_normal(k2, (C,))
    s1 = 1.0 / math.sqrt(1.0 + eps)
    wf = w * s1
    wf = wf.at[:, 1, 1].add(w1 + 1.0)
    wf = wf / math.sqrt(1.0 + eps)
    return jnp.transpose(wf, (1, 2, 0)), jnp.zeros((C,), jnp.float32)  # [KH,KW,C]


def make_dt_proj(key, dt_rank, d_inner, dt_min=0.001, dt_max=0.1, floor=1e-4):
    k1, k2 = jax.random.split(key)
    std = dt_rank ** -0.5
    w = jax.random.uniform(k1, (d_inner, dt_rank), jnp.float32, -std, std)
    dt = jnp.exp(jax.random.uniform(k2, (d_inner,), jnp.float32)
                 * (math.log(dt_max) - math.log(dt_min)) + math.log(dt_min))
    dt = jnp.maximum(dt, floor)
    inv_dt = dt + jnp.log(-jnp.expm1(-dt))
    return w, inv_dt


def make_params(key, hidden_dim=32, index=0, d_state=16, ssm_ratio=2.0,
                mlp_ratio=4.0):
    keys = jax.random.split(key, 12)
    d_expand = int(ssm_ratio * hidden_dim)
    split_list = [0.25, 0.5, 0.5, 0.75]
    d_inner = int(d_expand * split_list[index])
    dt_rank = math.ceil(hidden_dim / 16)
    K = 4
    gc = int(d_expand * 0.5)

    cfg = {"d_expand": d_expand, "d_inner": d_inner, "d_state": d_state,
           "dt_rank": dt_rank, "pool": 2 ** (3 - index), "gc": gc}
    p = {}

    p["in_w"], p["in_b"] = make_conv_bn_1x1(keys[0], hidden_dim, d_expand)

    p["incep_w_w"], p["incep_w_b"] = make_rep_dw_axial(keys[1], d_expand - gc, 7)
    p["incep_h_w"], p["incep_h_b"] = make_rep_dw_axial(keys[2], gc, 7)
    p["local_w"], p["local_b"] = make_rep_dw_3x3(keys[3], d_expand - d_inner)

    bound = 1.0 / math.sqrt(d_inner)
    p["x_proj_weight"] = jax.random.uniform(
        keys[4], (K, dt_rank + 2 * d_state, d_inner), jnp.float32, -bound, bound)

    dtw, dtb = [], []
    for k_i in range(K):
        w_, b_ = make_dt_proj(jax.random.fold_in(keys[5], k_i), dt_rank, d_inner)
        dtw.append(w_)
        dtb.append(b_)
    p["dt_projs_weight"] = jnp.stack(dtw)                    # [K, d_inner, R]
    p["dt_bias"] = jnp.stack(dtb)                            # [K, d_inner]

    # A_logs = log(arange(1..N)) tiled over (K*d_inner); As = -exp(A_logs)
    A = jnp.tile(jnp.arange(1, d_state + 1, dtype=jnp.float32)[None, :],
                 (d_inner, 1))                               # [d_inner, N]
    p["A_negT"] = jnp.tile(jnp.transpose(-A)[None], (K, 1, 1))  # [K,N,d_inner]
    p["Ds"] = jnp.ones((K, d_inner), jnp.float32)

    p["ln_gamma"] = jnp.ones((d_inner,), jnp.float32)
    p["ln_beta"] = jnp.zeros((d_inner,), jnp.float32)

    p["out_w"], p["out_b"] = make_conv_bn_1x1(keys[6], d_expand, hidden_dim)

    mid = int(hidden_dim * mlp_ratio)
    p["fc1_w"], p["fc1_b"] = make_conv_bn_1x1(keys[7], hidden_dim, mid)
    p["fc2_w"], p["fc2_b"] = make_conv_bn_1x1(keys[8], mid, hidden_dim)
    return p, cfg


def prepare_params(raw, cfg):
    """One-time parameter folding / dtype casting (review item: no per-forward
    weight casts or dt_proj folding)."""
    de = cfg["d_expand"]
    d_inner = cfg["d_inner"]
    gc = cfg["gc"]
    N = cfg["d_state"]
    R = cfg["dt_rank"]
    Dm = d_inner
    ca = de - gc - d_inner

    p = {}
    p["in_w"] = raw["in_w"].astype(jnp.bfloat16)
    p["in_b"] = raw["in_b"].astype(jnp.float32)

    p["incep_w_w"] = raw["incep_w_w"].astype(jnp.float32)    # [7, de-gc]
    p["incep_w_b"] = raw["incep_w_b"].astype(jnp.float32)
    p["incep_h_w"] = raw["incep_h_w"].astype(jnp.float32)    # [7, gc]
    p["incep_h_b"] = raw["incep_h_b"].astype(jnp.float32)

    lw, lb = raw["local_w"], raw["local_b"]                  # [3,3,de-d_inner]
    if ca > 0:
        p["w3_a"] = lw[..., :ca].reshape(9, ca).astype(jnp.float32)
        p["b3_a"] = lb[:ca].astype(jnp.float32)
    else:
        p["w3_a"] = None
        p["b3_a"] = None
    p["w3_b"] = lw[..., ca:].reshape(9, gc).astype(jnp.float32)
    p["b3_b"] = lb[ca:].astype(jnp.float32)

    # fold dt_proj into x_proj; pair directions (0,2)/(1,3) along output lanes
    Wx = raw["x_proj_weight"]                                # [K, R+2N, Dm]
    Wdt = raw["dt_projs_weight"]                             # [K, Dm, R]
    Wc = jnp.concatenate([
        jnp.einsum("krd,kmr->kdm", Wx[:, :R, :], Wdt),       # [K, Dm, Dm]
        jnp.transpose(Wx[:, R:R + N, :], (0, 2, 1)),         # [K, Dm, N]
        jnp.transpose(Wx[:, R + N:, :], (0, 2, 1)),          # [K, Dm, N]
    ], axis=2)                                               # [K, Dm, Dm+2N]
    p["wc_pair"] = jnp.stack([
        jnp.concatenate([Wc[0], Wc[2]], axis=1),
        jnp.concatenate([Wc[1], Wc[3]], axis=1)], axis=0).astype(jnp.bfloat16)
    p["wc_bias"] = jnp.zeros((2, 2 * (Dm + 2 * N)), jnp.float32)

    p["A_negT"] = raw["A_negT"].astype(jnp.float32)
    p["Ds"] = raw["Ds"].astype(jnp.float32)
    p["dt_bias"] = raw["dt_bias"].astype(jnp.float32)
    p["ln_gamma"] = raw["ln_gamma"].astype(jnp.float32)
    p["ln_beta"] = raw["ln_beta"].astype(jnp.float32)

    ow = raw["out_w"]                                        # [de, hidden]
    p["out_w_lo"] = ow[:d_inner].astype(jnp.bfloat16)
    p["out_w_a"] = (ow[d_inner:de - gc].astype(jnp.bfloat16) if ca > 0 else None)
    p["out_w_b"] = ow[de - gc:].astype(jnp.bfloat16)
    p["out_b"] = raw["out_b"].astype(jnp.float32)

    p["fc1_w"] = raw["fc1_w"].astype(jnp.bfloat16)
    p["fc1_b"] = raw["fc1_b"].astype(jnp.float32)
    p["fc2_w"] = raw["fc2_w"].astype(jnp.bfloat16)
    p["fc2_b"] = raw["fc2_b"].astype(jnp.float32)
    return p


if __name__ == "__main__":
    key = jax.random.PRNGKey(0)
    kp, kx = jax.random.split(key)

    B, C, H, W = 2, 32, 16, 16          # NCHW, like the PyTorch module
    raw_params, cfg = make_params(kp, hidden_dim=C, index=0)
    params = prepare_params(raw_params, cfg)
    x = jax.random.normal(kx, (B, C, H, W), jnp.float32)

    fwd = jax.jit(functools.partial(tvim_block_forward, cfg=cfg))
    out = jax.block_until_ready(fwd(x, params))

    assert out.shape == (B, C, H, W), out.shape
    assert bool(jnp.all(jnp.isfinite(out)))
    print("KERNEL_OK")
</pallas_src>

<mosaic_0001>
module attributes {stable_mosaic.version = 11 : i64} {
  func.func @_mm_kernel(%arg0: i32, %arg1: i32, %arg2: memref<1x256x32xbf16, #tpu.memory_space<vmem>>, %arg3: memref<1x32x64xbf16, #tpu.memory_space<vmem>>, %arg4: memref<1x1x64xf32, #tpu.memory_space<vmem>>, %arg5: memref<1x256x64xbf16, #tpu.memory_space<vmem>>) attributes {dimension_semantics = [#tpu.dimension_semantics<parallel>, #tpu.dimension_semantics<parallel>], iteration_bounds = array<i64: 1, 2>, scalar_prefetch = 0 : i64, scratch_operands = 0 : i64, tpu.core_type = #tpu.core_type<tc>, window_params = [{transform_indices = @transform_0, window_bounds = array<i64: 1, 256, 32>}, {transform_indices = @transform_1, window_bounds = array<i64: 1, 32, 64>}, {transform_indices = @transform_2, window_bounds = array<i64: 1, 1, 64>}, {transform_indices = @transform_3, window_bounds = array<i64: 1, 256, 64>}]} {
    %c0 = arith.constant 0 : index
    %c0_0 = arith.constant 0 : index
    %c0_1 = arith.constant 0 : index
    %0 = vector.load %arg2[%c0, %c0_0, %c0_1] : memref<1x256x32xbf16, #tpu.memory_space<vmem>>, vector<1x256x32xbf16>
    %1 = vector.shape_cast %0 : vector<1x256x32xbf16> to vector<256x32xbf16>
    %c0_2 = arith.constant 0 : index
    %c0_3 = arith.constant 0 : index
    %c0_4 = arith.constant 0 : index
    %2 = vector.load %arg3[%c0_2, %c0_3, %c0_4] : memref<1x32x64xbf16, #tpu.memory_space<vmem>>, vector<1x32x64xbf16>
    %3 = vector.shape_cast %2 : vector<1x32x64xbf16> to vector<32x64xbf16>
    %cst = arith.constant dense<0.000000e+00> : vector<256x64xf32>
    %4 = tpu.matmul %1, %3, %cst {dimension_numbers = #tpu.dot_dimension_numbers<[1], [0], [0], [1], [0, 0, 1, 1], [], []>} : vector<256x32xbf16>, vector<32x64xbf16>, vector<256x64xf32> -> vector<256x64xf32>
    %c0_5 = arith.constant 0 : index
    %c0_6 = arith.constant 0 : index
    %c0_7 = arith.constant 0 : index
    %5 = vector.load %arg4[%c0_5, %c0_6, %c0_7] : memref<1x1x64xf32, #tpu.memory_space<vmem>>, vector<1x1x64xf32>
    %6 = vector.shape_cast %5 : vector<1x1x64xf32> to vector<1x64xf32>
    %7 = vector.broadcast %6 : vector<1x64xf32> to vector<256x64xf32>
    %8 = arith.addf %4, %7 : vector<256x64xf32>
    %9 = arith.truncf %8 : vector<256x64xf32> to vector<256x64xbf16>
    %c0_8 = arith.constant 0 : index
    %c0_9 = arith.constant 0 : index
    %c0_10 = arith.constant 0 : index
    %10 = vector.load %arg5[%c0_8, %c0_9, %c0_10] : memref<1x256x64xbf16, #tpu.memory_space<vmem>>, vector<1x256x64xbf16>
    %11 = vector.shape_cast %10 : vector<1x256x64xbf16> to vector<256x64xbf16>
    %12 = vector.shape_cast %9 : vector<256x64xbf16> to vector<1x256x64xbf16>
    tpu.vector_store %arg5[%c0_8, %c0_9, %c0_10], %12 {strides = array<i32>} : memref<1x256x64xbf16, #tpu.memory_space<vmem>>, vector<1x256x64xbf16>,
    return
  }
  func.func @transform_0(%arg0: i32, %arg1: i32) -> (i32, i32, i32) {
    %c0_i32 = arith.constant 0 : i32
    %c0_i32_0 = arith.constant 0 : i32
    return %arg0, %arg1, %c0_i32 : i32, i32, i32
  }
  func.func @transform_1(%arg0: i32, %arg1: i32) -> (i32, i32, i32) {
    %c0_i32 = arith.constant 0 : i32
    %c0_i32_0 = arith.constant 0 : i32
    %c0_i32_1 = arith.constant 0 : i32
    return %arg0, %c0_i32, %c0_i32_0 : i32, i32, i32
  }
  func.func @transform_2(%arg0: i32, %arg1: i32) -> (i32, i32, i32) {
    %c0_i32 = arith.constant 0 : i32
    %c0_i32_0 = arith.constant 0 : i32
    %c0_i32_1 = arith.constant 0 : i32
    return %arg0, %c0_i32, %c0_i32_0 : i32, i32, i32
  }
  func.func @transform_3(%arg0: i32, %arg1: i32) -> (i32, i32, i32) {
    %c0_i32 = arith.constant 0 : i32
    %c0_i32_0 = arith.constant 0 : i32
    return %arg0, %arg1, %c0_i32 : i32, i32, i32
  }
}

module attributes {stable_mosaic.version = 11 : i64} {
  func.func @_dw_kernel(%arg0: i32, %arg1: memref<1x22x512xbf16, #tpu.memory_space<vmem>>, %arg2: memref<7x512xf32, #tpu.memory_space<vmem>>, %arg3: memref<1x512xf32, #tpu.memory_space<vmem>>, %arg4: memref<1x16x512xbf16, #tpu.memory_space<vmem>>) attributes {dimension_semantics = [#tpu.dimension_semantics<parallel>], iteration_bounds = array<i64: 2>, scalar_prefetch = 0 : i64, scratch_operands = 0 : i64, tpu.core_type = #tpu.core_type<tc>, window_params = [{transform_indices = @transform_0, window_bounds = array<i64: 1, 22, 512>}, {pipeline_mode = #tpu.pipeline_mode<synchronous>, transform_indices = @transform_1, window_bounds = array<i64: 7, 512>}, {pipeline_mode = #tpu.pipeline_mode<synchronous>, transform_indices = @transform_2, window_bounds = array<i64: 1, 512>}, {transform_indices = @transform_3, window_bounds = array<i64: 1, 16, 512>}]} {
    %c0 = arith.constant 0 : index
    %c0_0 = arith.constant 0 : index
    %c0_1 = arith.constant 0 : index
    %0 = vector.load %arg1[%c0, %c0_0, %c0_1] : memref<1x22x512xbf16, #tpu.memory_space<vmem>>, vector<1x22x512xbf16>
    %1 = vector.shape_cast %0 : vector<1x22x512xbf16> to vector<22x512xbf16>
    %2 = arith.extf %1 : vector<22x512xbf16> to vector<22x512xf32>
    %c0_2 = arith.constant 0 : index
    %c0_3 = arith.constant 0 : index
    %3 = vector.load %arg2[%c0_2, %c0_3] : memref<7x512xf32, #tpu.memory_space<vmem>>, vector<7x512xf32>
    %cst = arith.constant 0.000000e+00 : f32
    %4 = vector.broadcast %cst : f32 to vector<16x512xf32>
    %5 = vector.extract_strided_slice %2 {offsets = [0, 0], sizes = [16, 512], strides = [1, 1]} : vector<22x512xf32> to vector<16x512xf32>
    %6 = vector.extract_strided_slice %3 {offsets = [0, 0], sizes = [1, 512], strides = [1, 1]} : vector<7x512xf32> to vector<1x512xf32>
    %7 = vector.shape_cast %6 : vector<1x512xf32> to vector<512xf32>
    %8 = vector.shape_cast %7 : vector<512xf32> to vector<1x512xf32>
    %9 = vector.broadcast %8 : vector<1x512xf32> to vector<16x512xf32>
    %10 = arith.mulf %5, %9 : vector<16x512xf32>
    %11 = arith.addf %4, %10 : vector<16x512xf32>
    %12 = vector.extract_strided_slice %2 {offsets = [1, 0], sizes = [16, 512], strides = [1, 1]} : vector<22x512xf32> to vector<16x512xf32>
    %13 = vector.extract_strided_slice %3 {offsets = [1, 0], sizes = [1, 512], strides = [1, 1]} : vector<7x512xf32> to vector<1x512xf32>
    %14 = vector.shape_cast %13 : vector<1x512xf32> to vector<512xf32>
    %15 = vector.shape_cast %14 : vector<512xf32> to vector<1x512xf32>
    %16 = vector.broadcast %15 : vector<1x512xf32> to vector<16x512xf32>
    %17 = arith.mulf %12, %16 : vector<16x512xf32>
    %18 = arith.addf %11, %17 : vector<16x512xf32>
    %19 = vector.extract_strided_slice %2 {offsets = [2, 0], sizes = [16, 512], strides = [1, 1]} : vector<22x512xf32> to vector<16x512xf32>
    %20 = vector.extract_strided_slice %3 {offsets = [2, 0], sizes = [1, 512], strides = [1, 1]} : vector<7x512xf32> to vector<1x512xf32>
    %21 = vector.shape_cast %20 : vector<1x512xf32> to vector<512xf32>
    %22 = vector.shape_cast %21 : vector<512xf32> to vector<1x512xf32>
    %23 = vector.broadcast %22 : vector<1x512xf32> to vector<16x512xf32>
    %24 = arith.mulf %19, %23 : vector<16x512xf32>
    %25 = arith.addf %18, %24 : vector<16x512xf32>
    %26 = vector.extract_strided_slice %2 {offsets = [3, 0], sizes = [16, 512], strides = [1, 1]} : vector<22x512xf32> to vector<16x512xf32>
    %27 = vector.extract_strided_slice %3 {offsets = [3, 0], sizes = [1, 512], strides = [1, 1]} : vector<7x512xf32> to vector<1x512xf32>
    %28 = vector.shape_cast %27 : vector<1x512xf32> to vector<512xf32>
    %29 = vector.shape_cast %28 : vector<512xf32> to vector<1x512xf32>
    %30 = vector.broadcast %29 : vector<1x512xf32> to vector<16x512xf32>
    %31 = arith.mulf %26, %30 : vector<16x512xf32>
    %32 = arith.addf %25, %31 : vector<16x512xf32>
    %33 = vector.extract_strided_slice %2 {offsets = [4, 0], sizes = [16, 512], strides = [1, 1]} : vector<22x512xf32> to vector<16x512xf32>
    %34 = vector.extract_strided_slice %3 {offsets = [4, 0], sizes = [1, 512], strides = [1, 1]} : vector<7x512xf32> to vector<1x512xf32>
    %35 = vector.shape_cast %34 : vector<1x512xf32> to vector<512xf32>
    %36 = vector.shape_cast %35 : vector<512xf32> to vector<1x512xf32>
    %37 = vector.broadcast %36 : vector<1x512xf32> to vector<16x512xf32>
    %38 = arith.mulf %33, %37 : vector<16x512xf32>
    %39 = arith.addf %32, %38 : vector<16x512xf32>
    %40 = vector.extract_strided_slice %2 {offsets = [5, 0], sizes = [16, 512], strides = [1, 1]} : vector<22x512xf32> to vector<16x512xf32>
    %41 = vector.extract_strided_slice %3 {offsets = [5, 0], sizes = [1, 512], strides = [1, 1]} : vector<7x512xf32> to vector<1x512xf32>
    %42 = vector.shape_cast %41 : vector<1x512xf32> to vector<512xf32>
    %43 = vector.shape_cast %42 : vector<512xf32> to vector<1x512xf32>
    %44 = vector.broadcast %43 : vector<1x512xf32> to vector<16x512xf32>
    %45 = arith.mulf %40, %44 : vector<16x512xf32>
    %46 = arith.addf %39, %45 : vector<16x512xf32>
    %47 = vector.extract_strided_slice %2 {offsets = [6, 0], sizes = [16, 512], strides = [1, 1]} : vector<22x512xf32> to vector<16x512xf32>
    %48 = vector.extract_strided_slice %3 {offsets = [6, 0], sizes = [1, 512], strides = [1, 1]} : vector<7x512xf32> to vector<1x512xf32>
    %49 = vector.shape_cast %48 : vector<1x512xf32> to vector<512xf32>
    %50 = vector.shape_cast %49 : vector<512xf32> to vector<1x512xf32>
    %51 = vector.broadcast %50 : vector<1x512xf32> to vector<16x512xf32>
    %52 = arith.mulf %47, %51 : vector<16x512xf32>
    %53 = arith.addf %46, %52 : vector<16x512xf32>
    %c0_4 = arith.constant 0 : index
    %c0_5 = arith.constant 0 : index
    %54 = vector.load %arg3[%c0_4, %c0_5] : memref<1x512xf32, #tpu.memory_space<vmem>>, vector<1x512xf32>
    %55 = vector.broadcast %54 : vector<1x512xf32> to vector<16x512xf32>
    %56 = arith.addf %53, %55 : vector<16x512xf32>
    %57 = arith.negf %56 : vector<16x512xf32>
    %58 = math.exp %57 : vector<16x512xf32>
    %cst_6 = arith.constant 1.000000e+00 : f32
    %59 = vector.broadcast %cst_6 : f32 to vector<16x512xf32>
    %60 = arith.addf %59, %58 : vector<16x512xf32>
    %61 = arith.divf %59, %60 : vector<16x512xf32>
    %62 = arith.mulf %56, %61 : vector<16x512xf32>
    %63 = arith.truncf %62 : vector<16x512xf32> to vector<16x512xbf16>
    %c0_7 = arith.constant 0 : index
    %c0_8 = arith.constant 0 : index
    %c0_9 = arith.constant 0 : index
    %64 = vector.load %arg4[%c0_7, %c0_8, %c0_9] : memref<1x16x512xbf16, #tpu.memory_space<vmem>>, vector<1x16x512xbf16>
    %65 = vector.shape_cast %64 : vector<1x16x512xbf16> to vector<16x512xbf16>
    %66 = vector.shape_cast %63 : vector<16x512xbf16> to vector<1x16x512xbf16>
    tpu.vector_store %arg4[%c0_7, %c0_8, %c0_9], %66 {strides = array<i32>} : memref<1x16x512xbf16, #tpu.memory_space<vmem>>, vector<1x16x512xbf16>,
    return
  }
  func.func @transform_0(%arg0: i32) -> (i32, i32, i32) {
    %c0_i32 = arith.constant 0 : i32
    %c0_i32_0 = arith.constant 0 : i32
    %c0_i32_1 = arith.constant 0 : i32
    return %arg0, %c0_i32, %c0_i32_0 : i32, i32, i32
  }
  func.func @transform_1(%arg0: i32) -> (i32, i32) {
    %c0_i32 = arith.constant 0 : i32
    %c0_i32_0 = arith.constant 0 : i32
    %c0_i32_1 = arith.constant 0 : i32
    return %c0_i32, %c0_i32_0 : i32, i32
  }
  func.func @transform_2(%arg0: i32) -> (i32, i32) {
    %c0_i32 = arith.constant 0 : i32
    %c0_i32_0 = arith.constant 0 : i32
    %c0_i32_1 = arith.constant 0 : i32
    return %c0_i32, %c0_i32_0 : i32, i32
  }
  func.func @transform_3(%arg0: i32) -> (i32, i32, i32) {
    %c0_i32 = arith.constant 0 : i32
    %c0_i32_0 = arith.constant 0 : i32
    %c0_i32_1 = arith.constant 0 : i32
    return %arg0, %c0_i32, %c0_i32_0 : i32, i32, i32
  }
}

module attributes {stable_mosaic.version = 11 : i64} {
  func.func @_mm_kernel(%arg0: i32, %arg1: i32, %arg2: memref<1x8x16xbf16, #tpu.memory_space<vmem>>, %arg3: memref<1x16x96xbf16, #tpu.memory_space<vmem>>, %arg4: memref<1x1x96xf32, #tpu.memory_space<vmem>>, %arg5: memref<1x8x96xf32, #tpu.memory_space<vmem>>) attributes {dimension_semantics = [#tpu.dimension_semantics<parallel>, #tpu.dimension_semantics<parallel>], iteration_bounds = array<i64: 2, 1>, scalar_prefetch = 0 : i64, scratch_operands = 0 : i64, tpu.core_type = #tpu.core_type<tc>, window_params = [{transform_indices = @transform_0, window_bounds = array<i64: 1, 8, 16>}, {transform_indices = @transform_1, window_bounds = array<i64: 1, 16, 96>}, {transform_indices = @transform_2, window_bounds = array<i64: 1, 1, 96>}, {transform_indices = @transform_3, window_bounds = array<i64: 1, 8, 96>}]} {
    %c0 = arith.constant 0 : index
    %c0_0 = arith.constant 0 : index
    %c0_1 = arith.constant 0 : index
    %0 = vector.load %arg2[%c0, %c0_0, %c0_1] : memref<1x8x16xbf16, #tpu.memory_space<vmem>>, vector<1x8x16xbf16>
    %1 = vector.shape_cast %0 : vector<1x8x16xbf16> to vector<8x16xbf16>
    %c0_2 = arith.constant 0 : index
    %c0_3 = arith.constant 0 : index
    %c0_4 = arith.constant 0 : index
    %2 = vector.load %arg3[%c0_2, %c0_3, %c0_4] : memref<1x16x96xbf16, #tpu.memory_space<vmem>>, vector<1x16x96xbf16>
    %3 = vector.shape_cast %2 : vector<1x16x96xbf16> to vector<16x96xbf16>
    %cst = arith.constant dense<0.000000e+00> : vector<8x96xf32>
    %4 = tpu.matmul %1, %3, %cst {dimension_numbers = #tpu.dot_dimension_numbers<[1], [0], [0], [1], [0, 0, 1, 1], [], []>} : vector<8x16xbf16>, vector<16x96xbf16>, vector<8x96xf32> -> vector<8x96xf32>
    %c0_5 = arith.constant 0 : index
    %c0_6 = arith.constant 0 : index
    %c0_7 = arith.constant 0 : index
    %5 = vector.load %arg4[%c0_5, %c0_6, %c0_7] : memref<1x1x96xf32, #tpu.memory_space<vmem>>, vector<1x1x96xf32>
    %6 = vector.shape_cast %5 : vector<1x1x96xf32> to vector<1x96xf32>
    %7 = vector.broadcast %6 : vector<1x96xf32> to vector<8x96xf32>
    %8 = arith.addf %4, %7 : vector<8x96xf32>
    %c0_8 = arith.constant 0 : index
    %c0_9 = arith.constant 0 : index
    %c0_10 = arith.constant 0 : index
    %9 = vector.load %arg5[%c0_8, %c0_9, %c0_10] : memref<1x8x96xf32, #tpu.memory_space<vmem>>, vector<1x8x96xf32>
    %10 = vector.shape_cast %9 : vector<1x8x96xf32> to vector<8x96xf32>
    %11 = vector.shape_cast %8 : vector<8x96xf32> to vector<1x8x96xf32>
    tpu.vector_store %arg5[%c0_8, %c0_9, %c0_10], %11 {strides = array<i32>} : memref<1x8x96xf32, #tpu.memory_space<vmem>>, vector<1x8x96xf32>,
    return
  }
  func.func @transform_0(%arg0: i32, %arg1: i32) -> (i32, i32, i32) {
    %c0_i32 = arith.constant 0 : i32
    %c0_i32_0 = arith.constant 0 : i32
    return %arg0, %arg1, %c0_i32 : i32, i32, i32
  }
  func.func @transform_1(%arg0: i32, %arg1: i32) -> (i32, i32, i32) {
    %c0_i32 = arith.constant 0 : i32
    %c0_i32_0 = arith.constant 0 : i32
    %c0_i32_1 = arith.constant 0 : i32
    return %arg0, %c0_i32, %c0_i32_0 : i32, i32, i32
  }
  func.func @transform_2(%arg0: i32, %arg1: i32) -> (i32, i32, i32) {
    %c0_i32 = arith.constant 0 : i32
    %c0_i32_0 = arith.constant 0 : i32
    %c0_i32_1 = arith.constant 0 : i32
    return %arg0, %c0_i32, %c0_i32_0 : i32, i32, i32
  }
  func.func @transform_3(%arg0: i32, %arg1: i32) -> (i32, i32, i32) {
    %c0_i32 = arith.constant 0 : i32
    %c0_i32_0 = arith.constant 0 : i32
    return %arg0, %arg1, %c0_i32 : i32, i32, i32
  }
}

module attributes {stable_mosaic.version = 11 : i64} {
  func.func @_ln_kernel(%arg0: i32, %arg1: memref<8x16xf32, #tpu.memory_space<vmem>>, %arg2: memref<1x16xf32, #tpu.memory_space<vmem>>, %arg3: memref<1x16xf32, #tpu.memory_space<vmem>>, %arg4: memref<8x16xbf16, #tpu.memory_space<vmem>>) attributes {dimension_semantics = [#tpu.dimension_semantics<parallel>], iteration_bounds = array<i64: 1>, scalar_prefetch = 0 : i64, scratch_operands = 0 : i64, tpu.core_type = #tpu.core_type<tc>, window_params = [{transform_indices = @transform_0, window_bounds = array<i64: 8, 16>}, {pipeline_mode = #tpu.pipeline_mode<synchronous>, transform_indices = @transform_1, window_bounds = array<i64: 1, 16>}, {pipeline_mode = #tpu.pipeline_mode<synchronous>, transform_indices = @transform_2, window_bounds = array<i64: 1, 16>}, {transform_indices = @transform_3, window_bounds = array<i64: 8, 16>}]} {
    %c0 = arith.constant 0 : index
    %c0_0 = arith.constant 0 : index
    %0 = vector.load %arg1[%c0, %c0_0] : memref<8x16xf32, #tpu.memory_space<vmem>>, vector<8x16xf32>
    %cst = arith.constant dense<0.000000e+00> : vector<8xf32>
    %1 = vector.multi_reduction <add>, %0, %cst [1] : vector<8x16xf32> to vector<8xf32>
    %2 = vector.shape_cast %1 : vector<8xf32> to vector<8x1xf32>
    %cst_1 = arith.constant 1.600000e+01 : f32
    %3 = vector.broadcast %cst_1 : f32 to vector<8x1xf32>
    %4 = arith.divf %2, %3 : vector<8x1xf32>
    %5 = vector.broadcast %4 : vector<8x1xf32> to vector<8x16xf32>
    %6 = arith.subf %0, %5 : vector<8x16xf32>
    %7 = arith.mulf %6, %6 : vector<8x16xf32>
    %cst_2 = arith.constant dense<0.000000e+00> : vector<8xf32>
    %8 = vector.multi_reduction <add>, %7, %cst_2 [1] : vector<8x16xf32> to vector<8xf32>
    %9 = vector.shape_cast %8 : vector<8xf32> to vector<8x1xf32>
    %cst_3 = arith.constant 1.600000e+01 : f32
    %10 = vector.broadcast %cst_3 : f32 to vector<8x1xf32>
    %11 = arith.divf %9, %10 : vector<8x1xf32>
    %cst_4 = arith.constant 9.99999974E-6 : f32
    %12 = vector.broadcast %cst_4 : f32 to vector<8x1xf32>
    %13 = arith.addf %11, %12 : vector<8x1xf32>
    %14 = math.rsqrt %13 : vector<8x1xf32>
    %15 = vector.broadcast %14 : vector<8x1xf32> to vector<8x16xf32>
    %16 = arith.mulf %6, %15 : vector<8x16xf32>
    %c0_5 = arith.constant 0 : index
    %c0_6 = arith.constant 0 : index
    %17 = vector.load %arg2[%c0_5, %c0_6] : memref<1x16xf32, #tpu.memory_space<vmem>>, vector<1x16xf32>
    %18 = vector.broadcast %17 : vector<1x16xf32> to vector<8x16xf32>
    %19 = arith.mulf %16, %18 : vector<8x16xf32>
    %c0_7 = arith.constant 0 : index
    %c0_8 = arith.constant 0 : index
    %20 = vector.load %arg3[%c0_7, %c0_8] : memref<1x16xf32, #tpu.memory_space<vmem>>, vector<1x16xf32>
    %21 = vector.broadcast %20 : vector<1x16xf32> to vector<8x16xf32>
    %22 = arith.addf %19, %21 : vector<8x16xf32>
    %23 = arith.truncf %22 : vector<8x16xf32> to vector<8x16xbf16>
    %c0_9 = arith.constant 0 : index
    %c0_10 = arith.constant 0 : index
    %24 = vector.load %arg4[%c0_9, %c0_10] : memref<8x16xbf16, #tpu.memory_space<vmem>>, vector<8x16xbf16>
    tpu.vector_store %arg4[%c0_9, %c0_10], %23 {strides = array<i32>} : memref<8x16xbf16, #tpu.memory_space<vmem>>, vector<8x16xbf16>,
    return
  }
  func.func @transform_0(%arg0: i32) -> (i32, i32) {
    %c0_i32 = arith.constant 0 : i32
    %c0_i32_0 = arith.constant 0 : i32
    return %arg0, %c0_i32 : i32, i32
  }
  func.func @transform_1(%arg0: i32) -> (i32, i32) {
    %c0_i32 = arith.constant 0 : i32
    %c0_i32_0 = arith.constant 0 : i32
    %c0_i32_1 = arith.constant 0 : i32
    return %c0_i32, %c0_i32_0 : i32, i32
  }
  func.func @transform_2(%arg0: i32) -> (i32, i32) {
    %c0_i32 = arith.constant 0 : i32
    %c0_i32_0 = arith.constant 0 : i32
    %c0_i32_1 = arith.constant 0 : i32
    return %c0_i32, %c0_i32_0 : i32, i32
  }
  func.func @transform_3(%arg0: i32) -> (i32, i32) {
    %c0_i32 = arith.constant 0 : i32
    %c0_i32_0 = arith.constant 0 : i32
    return %arg0, %c0_i32 : i32, i32
  }
}

module attributes {stable_mosaic.version = 11 : i64} {
  func.func @_scan_kernel(%arg0: i32, %arg1: i32, %arg2: memref<8x128xf32, #tpu.memory_space<vmem>>, %arg3: memref<4x128xf32, #tpu.memory_space<vmem>>, %arg4: memref<4x128xf32, #tpu.memory_space<vmem>>, %arg5: memref<4x16x8xf32, #tpu.memory_space<vmem>>, %arg6: memref<4x16x8xf32, #tpu.memory_space<vmem>>, %arg7: memref<16x128xf32, #tpu.memory_space<vmem>>, %arg8: memref<1x128xf32, #tpu.memory_space<vmem>>, %arg9: memref<1x128xf32, #tpu.memory_space<vmem>>, %arg10: memref<4x128xf32, #tpu.memory_space<vmem>>, %arg11: memref<16x128xf32, #tpu.memory_space<vmem>>, %arg12: memref<4x16x128xf32, #tpu.memory_space<vmem>>, %arg13: memref<4x16x128xf32, #tpu.memory_space<vmem>>) attributes {dimension_semantics = [#tpu.dimension_semantics<parallel>, #tpu.dimension_semantics<arbitrary>], iteration_bounds = array<i64: 1, 1>, scalar_prefetch = 0 : i64, scratch_operands = 3 : i64, tpu.core_type = #tpu.core_type<tc>, window_params = [{transform_indices = @transform_0, window_bounds = array<i64: 8, 128>}, {transform_indices = @transform_1, window_bounds = array<i64: 4, 128>}, {transform_indices = @transform_2, window_bounds = array<i64: 4, 128>}, {transform_indices = @transform_3, window_bounds = array<i64: 4, 16, 8>}, {transform_indices = @transform_4, window_bounds = array<i64: 4, 16, 8>}, {transform_indices = @transform_5, window_bounds = array<i64: 16, 128>}, {transform_indices = @transform_6, window_bounds = array<i64: 1, 128>}, {transform_indices = @transform_7, window_bounds = array<i64: 1, 128>}, {transform_indices = @transform_8, window_bounds = array<i64: 4, 128>}]} {
    %c0_i32 = arith.constant 0 : i32
    %0 = arith.cmpi eq, %arg1, %c0_i32 : i32
    %1 = arith.extui %0 : i1 to i32
    %c0_i32_0 = arith.constant 0 : i32
    %2 = arith.cmpi ne, %1, %c0_i32_0 : i32
    scf.if %2 {
      %cst_78 = arith.constant 0.000000e+00 : f32
      %158 = vector.broadcast %cst_78 : f32 to vector<16x128xf32>
      %c0_79 = arith.constant 0 : index
      %c0_80 = arith.constant 0 : index
      %159 = vector.load %arg11[%c0_79, %c0_80] : memref<16x128xf32, #tpu.memory_space<vmem>>, vector<16x128xf32>
      tpu.vector_store %arg11[%c0_79, %c0_80], %158 {strides = array<i32>} : memref<16x128xf32, #tpu.memory_space<vmem>>, vector<16x128xf32>,
    } else {
    }
    %c0 = arith.constant 0 : index
    %c0_1 = arith.constant 0 : index
    %3 = vector.load %arg3[%c0, %c0_1] : memref<4x128xf32, #tpu.memory_space<vmem>>, vector<4x128xf32>
    %c0_2 = arith.constant 0 : index
    %c0_3 = arith.constant 0 : index
    %4 = vector.load %arg4[%c0_2, %c0_3] : memref<4x128xf32, #tpu.memory_space<vmem>>, vector<4x128xf32>
    %c0_4 = arith.constant 0 : index
    %c0_5 = arith.constant 0 : index
    %5 = vector.load %arg9[%c0_4, %c0_5] : memref<1x128xf32, #tpu.memory_space<vmem>>, vector<1x128xf32>
    %6 = vector.broadcast %5 : vector<1x128xf32> to vector<4x128xf32>
    %7 = arith.addf %4, %6 : vector<4x128xf32>
    %cst = arith.constant 0.000000e+00 : f32
    %8 = vector.broadcast %cst : f32 to vector<4x128xf32>
    %9 = arith.maximumf %7, %8 : vector<4x128xf32>
    %10 = math.absf %7 : vector<4x128xf32>
    %cst_6 = arith.constant 0.000000e+00 : f32
    %11 = vector.broadcast %cst_6 : f32 to vector<4x128xf32>
    %12 = arith.subf %11, %10 : vector<4x128xf32>
    %13 = math.exp %12 : vector<4x128xf32>
    %cst_7 = arith.constant 1.000000e+00 : f32
    %14 = vector.broadcast %cst_7 : f32 to vector<4x128xf32>
    %15 = arith.addf %14, %13 : vector<4x128xf32>
    %16 = math.log %15 : vector<4x128xf32>
    %17 = arith.addf %9, %16 : vector<4x128xf32>
    %18 = arith.mulf %17, %3 : vector<4x128xf32>
    %c0_8 = arith.constant 0 : index
    %c0_9 = arith.constant 0 : index
    %19 = vector.load %arg2[%c0_8, %c0_9] : memref<8x128xf32, #tpu.memory_space<vmem>>, vector<8x128xf32>
    %c0_10 = arith.constant 0 : index
    %c0_11 = arith.constant 0 : index
    %20 = vector.load %arg7[%c0_10, %c0_11] : memref<16x128xf32, #tpu.memory_space<vmem>>, vector<16x128xf32>
    %c0_12 = arith.constant 0 : index
    %c0_13 = arith.constant 0 : index
    %c0_14 = arith.constant 0 : index
    %21 = vector.load %arg5[%c0_12, %c0_13, %c0_14] : memref<4x16x8xf32, #tpu.memory_space<vmem>>, vector<4x16x8xf32>
    %22 = vector.shape_cast %21 : vector<4x16x8xf32> to vector<64x8xf32>
    %cst_15 = arith.constant dense<0.000000e+00> : vector<64x128xf32>
    %23 = tpu.matmul %22, %19, %cst_15 {dimension_numbers = #tpu.dot_dimension_numbers<[1], [0], [0], [1], [0, 0, 1, 1], [], []>} : vector<64x8xf32>, vector<8x128xf32>, vector<64x128xf32> -> vector<64x128xf32>
    %c0_16 = arith.constant 0 : index
    %c0_17 = arith.constant 0 : index
    %c0_18 = arith.constant 0 : index
    %24 = vector.load %arg6[%c0_16, %c0_17, %c0_18] : memref<4x16x8xf32, #tpu.memory_space<vmem>>, vector<4x16x8xf32>
    %25 = vector.shape_cast %24 : vector<4x16x8xf32> to vector<64x8xf32>
    %cst_19 = arith.constant dense<0.000000e+00> : vector<64x128xf32>
    %26 = tpu.matmul %25, %19, %cst_19 {dimension_numbers = #tpu.dot_dimension_numbers<[1], [0], [0], [1], [0, 0, 1, 1], [], []>} : vector<64x8xf32>, vector<8x128xf32>, vector<64x128xf32> -> vector<64x128xf32>
    %27 = vector.extract_strided_slice %17 {offsets = [0, 0], sizes = [1, 128], strides = [1, 1]} : vector<4x128xf32> to vector<1x128xf32>
    %28 = vector.shape_cast %27 : vector<1x128xf32> to vector<128xf32>
    %29 = vector.shape_cast %28 : vector<128xf32> to vector<1x128xf32>
    %30 = vector.broadcast %29 : vector<1x128xf32> to vector<16x128xf32>
    %31 = arith.mulf %20, %30 : vector<16x128xf32>
    %32 = math.exp %31 : vector<16x128xf32>
    %c0_20 = arith.constant 0 : index
    %c0_21 = arith.constant 0 : index
    %c0_22 = arith.constant 0 : index
    %33 = vector.load %arg12[%c0_20, %c0_21, %c0_22] : memref<4x16x128xf32, #tpu.memory_space<vmem>>, vector<1x16x128xf32>
    %34 = vector.shape_cast %33 : vector<1x16x128xf32> to vector<16x128xf32>
    %35 = vector.shape_cast %32 : vector<16x128xf32> to vector<1x16x128xf32>
    tpu.vector_store %arg12[%c0_20, %c0_21, %c0_22], %35 {strides = array<i32>} : memref<4x16x128xf32, #tpu.memory_space<vmem>>, vector<1x16x128xf32>,
    %36 = vector.extract_strided_slice %23 {offsets = [0, 0], sizes = [16, 128], strides = [1, 1]} : vector<64x128xf32> to vector<16x128xf32>
    %37 = vector.extract_strided_slice %18 {offsets = [0, 0], sizes = [1, 128], strides = [1, 1]} : vector<4x128xf32> to vector<1x128xf32>
    %38 = vector.shape_cast %37 : vector<1x128xf32> to vector<128xf32>
    %39 = vector.shape_cast %38 : vector<128xf32> to vector<1x128xf32>
    %40 = vector.broadcast %39 : vector<1x128xf32> to vector<16x128xf32>
    %41 = arith.mulf %36, %40 : vector<16x128xf32>
    %c0_23 = arith.constant 0 : index
    %c0_24 = arith.constant 0 : index
    %c0_25 = arith.constant 0 : index
    %42 = vector.load %arg13[%c0_23, %c0_24, %c0_25] : memref<4x16x128xf32, #tpu.memory_space<vmem>>, vector<1x16x128xf32>
    %43 = vector.shape_cast %42 : vector<1x16x128xf32> to vector<16x128xf32>
    %44 = vector.shape_cast %41 : vector<16x128xf32> to vector<1x16x128xf32>
    tpu.vector_store %arg13[%c0_23, %c0_24, %c0_25], %44 {strides = array<i32>} : memref<4x16x128xf32, #tpu.memory_space<vmem>>, vector<1x16x128xf32>,
    %45 = vector.extract_strided_slice %17 {offsets = [1, 0], sizes = [1, 128], strides = [1, 1]} : vector<4x128xf32> to vector<1x128xf32>
    %46 = vector.shape_cast %45 : vector<1x128xf32> to vector<128xf32>
    %47 = vector.shape_cast %46 : vector<128xf32> to vector<1x128xf32>
    %48 = vector.broadcast %47 : vector<1x128xf32> to vector<16x128xf32>
    %49 = arith.mulf %20, %48 : vector<16x128xf32>
    %50 = math.exp %49 : vector<16x128xf32>
    %c1 = arith.constant 1 : index
    %c0_26 = arith.constant 0 : index
    %c0_27 = arith.constant 0 : index
    %51 = vector.load %arg12[%c1, %c0_26, %c0_27] : memref<4x16x128xf32, #tpu.memory_space<vmem>>, vector<1x16x128xf32>
    %52 = vector.shape_cast %51 : vector<1x16x128xf32> to vector<16x128xf32>
    %53 = vector.shape_cast %50 : vector<16x128xf32> to vector<1x16x128xf32>
    tpu.vector_store %arg12[%c1, %c0_26, %c0_27], %53 {strides = array<i32>} : memref<4x16x128xf32, #tpu.memory_space<vmem>>, vector<1x16x128xf32>,
    %54 = vector.extract_strided_slice %23 {offsets = [16, 0], sizes = [16, 128], strides = [1, 1]} : vector<64x128xf32> to vector<16x128xf32>
    %55 = vector.extract_strided_slice %18 {offsets = [1, 0], sizes = [1, 128], strides = [1, 1]} : vector<4x128xf32> to vector<1x128xf32>
    %56 = vector.shape_cast %55 : vector<1x128xf32> to vector<128xf32>
    %57 = vector.shape_cast %56 : vector<128xf32> to vector<1x128xf32>
    %58 = vector.broadcast %57 : vector<1x128xf32> to vector<16x128xf32>
    %59 = arith.mulf %54, %58 : vector<16x128xf32>
    %c1_28 = arith.constant 1 : index
    %c0_29 = arith.constant 0 : index
    %c0_30 = arith.constant 0 : index
    %60 = vector.load %arg13[%c1_28, %c0_29, %c0_30] : memref<4x16x128xf32, #tpu.memory_space<vmem>>, vector<1x16x128xf32>
    %61 = vector.shape_cast %60 : vector<1x16x128xf32> to vector<16x128xf32>
    %62 = vector.shape_cast %59 : vector<16x128xf32> to vector<1x16x128xf32>
    tpu.vector_store %arg13[%c1_28, %c0_29, %c0_30], %62 {strides = array<i32>} : memref<4x16x128xf32, #tpu.memory_space<vmem>>, vector<1x16x128xf32>,
    %63 = vector.extract_strided_slice %17 {offsets = [2, 0], sizes = [1, 128], strides = [1, 1]} : vector<4x128xf32> to vector<1x128xf32>
    %64 = vector.shape_cast %63 : vector<1x128xf32> to vector<128xf32>
    %65 = vector.shape_cast %64 : vector<128xf32> to vector<1x128xf32>
    %66 = vector.broadcast %65 : vector<1x128xf32> to vector<16x128xf32>
    %67 = arith.mulf %20, %66 : vector<16x128xf32>
    %68 = math.exp %67 : vector<16x128xf32>
    %c2 = arith.constant 2 : index
    %c0_31 = arith.constant 0 : index
    %c0_32 = arith.constant 0 : index
    %69 = vector.load %arg12[%c2, %c0_31, %c0_32] : memref<4x16x128xf32, #tpu.memory_space<vmem>>, vector<1x16x128xf32>
    %70 = vector.shape_cast %69 : vector<1x16x128xf32> to vector<16x128xf32>
    %71 = vector.shape_cast %68 : vector<16x128xf32> to vector<1x16x128xf32>
    tpu.vector_store %arg12[%c2, %c0_31, %c0_32], %71 {strides = array<i32>} : memref<4x16x128xf32, #tpu.memory_space<vmem>>, vector<1x16x128xf32>,
    %72 = vector.extract_strided_slice %23 {offsets = [32, 0], sizes = [16, 128], strides = [1, 1]} : vector<64x128xf32> to vector<16x128xf32>
    %73 = vector.extract_strided_slice %18 {offsets = [2, 0], sizes = [1, 128], strides = [1, 1]} : vector<4x128xf32> to vector<1x128xf32>
    %74 = vector.shape_cast %73 : vector<1x128xf32> to vector<128xf32>
    %75 = vector.shape_cast %74 : vector<128xf32> to vector<1x128xf32>
    %76 = vector.broadcast %75 : vector<1x128xf32> to vector<16x128xf32>
    %77 = arith.mulf %72, %76 : vector<16x128xf32>
    %c2_33 = arith.constant 2 : index
    %c0_34 = arith.constant 0 : index
    %c0_35 = arith.constant 0 : index
    %78 = vector.load %arg13[%c2_33, %c0_34, %c0_35] : memref<4x16x128xf32, #tpu.memory_space<vmem>>, vector<1x16x128xf32>
    %79 = vector.shape_cast %78 : vector<1x16x128xf32> to vector<16x128xf32>
    %80 = vector.shape_cast %77 : vector<16x128xf32> to vector<1x16x128xf32>
    tpu.vector_store %arg13[%c2_33, %c0_34, %c0_35], %80 {strides = array<i32>} : memref<4x16x128xf32, #tpu.memory_space<vmem>>, vector<1x16x128xf32>,
    %81 = vector.extract_strided_slice %17 {offsets = [3, 0], sizes = [1, 128], strides = [1, 1]} : vector<4x128xf32> to vector<1x128xf32>
    %82 = vector.shape_cast %81 : vector<1x128xf32> to vector<128xf32>
    %83 = vector.shape_cast %82 : vector<128xf32> to vector<1x128xf32>
    %84 = vector.broadcast %83 : vector<1x128xf32> to vector<16x128xf32>
    %85 = arith.mulf %20, %84 : vector<16x128xf32>
    %86 = math.exp %85 : vector<16x128xf32>
    %c3 = arith.constant 3 : index
    %c0_36 = arith.constant 0 : index
    %c0_37 = arith.constant 0 : index
    %87 = vector.load %arg12[%c3, %c0_36, %c0_37] : memref<4x16x128xf32, #tpu.memory_space<vmem>>, vector<1x16x128xf32>
    %88 = vector.shape_cast %87 : vector<1x16x128xf32> to vector<16x128xf32>
    %89 = vector.shape_cast %86 : vector<16x128xf32> to vector<1x16x128xf32>
    tpu.vector_store %arg12[%c3, %c0_36, %c0_37], %89 {strides = array<i32>} : memref<4x16x128xf32, #tpu.memory_space<vmem>>, vector<1x16x128xf32>,
    %90 = vector.extract_strided_slice %23 {offsets = [48, 0], sizes = [16, 128], strides = [1, 1]} : vector<64x128xf32> to vector<16x128xf32>
    %91 = vector.extract_strided_slice %18 {offsets = [3, 0], sizes = [1, 128], strides = [1, 1]} : vector<4x128xf32> to vector<1x128xf32>
    %92 = vector.shape_cast %91 : vector<1x128xf32> to vector<128xf32>
    %93 = vector.shape_cast %92 : vector<128xf32> to vector<1x128xf32>
    %94 = vector.broadcast %93 : vector<1x128xf32> to vector<16x128xf32>
    %95 = arith.mulf %90, %94 : vector<16x128xf32>
    %c3_38 = arith.constant 3 : index
    %c0_39 = arith.constant 0 : index
    %c0_40 = arith.constant 0 : index
    %96 = vector.load %arg13[%c3_38, %c0_39, %c0_40] : memref<4x16x128xf32, #tpu.memory_space<vmem>>, vector<1x16x128xf32>
    %97 = vector.shape_cast %96 : vector<1x16x128xf32> to vector<16x128xf32>
    %98 = vector.shape_cast %95 : vector<16x128xf32> to vector<1x16x128xf32>
    tpu.vector_store %arg13[%c3_38, %c0_39, %c0_40], %98 {strides = array<i32>} : memref<4x16x128xf32, #tpu.memory_space<vmem>>, vector<1x16x128xf32>,
    %c0_41 = arith.constant 0 : index
    %c0_42 = arith.constant 0 : index
    %99 = vector.load %arg11[%c0_41, %c0_42] : memref<16x128xf32, #tpu.memory_space<vmem>>, vector<16x128xf32>
    %c0_i32_43 = arith.constant 0 : i32
    %100 = arith.index_cast %c0_i32_43 : i32 to index
    %c0_44 = arith.constant 0 : index
    %c0_45 = arith.constant 0 : index
    %101 = vector.load %arg12[%100, %c0_44, %c0_45] : memref<4x16x128xf32, #tpu.memory_space<vmem>>, vector<1x16x128xf32>
    %102 = vector.shape_cast %101 : vector<1x16x128xf32> to vector<16x128xf32>
    %103 = arith.mulf %102, %99 : vector<16x128xf32>
    %104 = arith.index_cast %c0_i32_43 : i32 to index
    %c0_46 = arith.constant 0 : index
    %c0_47 = arith.constant 0 : index
    %105 = vector.load %arg13[%104, %c0_46, %c0_47] : memref<4x16x128xf32, #tpu.memory_space<vmem>>, vector<1x16x128xf32>
    %106 = vector.shape_cast %105 : vector<1x16x128xf32> to vector<16x128xf32>
    %107 = arith.addf %103, %106 : vector<16x128xf32>
    %108 = arith.index_cast %c0_i32_43 : i32 to index
    %c0_48 = arith.constant 0 : index
    %c0_49 = arith.constant 0 : index
    %109 = vector.load %arg13[%108, %c0_48, %c0_49] : memref<4x16x128xf32, #tpu.memory_space<vmem>>, vector<1x16x128xf32>
    %110 = vector.shape_cast %109 : vector<1x16x128xf32> to vector<16x128xf32>
    %111 = vector.shape_cast %107 : vector<16x128xf32> to vector<1x16x128xf32>
    tpu.vector_store %arg13[%108, %c0_48, %c0_49], %111 {strides = array<i32>} : memref<4x16x128xf32, #tpu.memory_space<vmem>>, vector<1x16x128xf32>,
    %c1_i32 = arith.constant 1 : i32
    %112 = arith.index_cast %c1_i32 : i32 to index
    %c0_50 = arith.constant 0 : index
    %c0_51 = arith.constant 0 : index
    %113 = vector.load %arg12[%112, %c0_50, %c0_51] : memref<4x16x128xf32, #tpu.memory_space<vmem>>, vector<1x16x128xf32>
    %114 = vector.shape_cast %113 : vector<1x16x128xf32> to vector<16x128xf32>
    %115 = arith.mulf %114, %107 : vector<16x128xf32>
    %116 = arith.index_cast %c1_i32 : i32 to index
    %c0_52 = arith.constant 0 : index
    %c0_53 = arith.constant 0 : index
    %117 = vector.load %arg13[%116, %c0_52, %c0_53] : memref<4x16x128xf32, #tpu.memory_space<vmem>>, vector<1x16x128xf32>
    %118 = vector.shape_cast %117 : vector<1x16x128xf32> to vector<16x128xf32>
    %119 = arith.addf %115, %118 : vector<16x128xf32>
    %120 = arith.index_cast %c1_i32 : i32 to index
    %c0_54 = arith.constant 0 : index
    %c0_55 = arith.constant 0 : index
    %121 = vector.load %arg13[%120, %c0_54, %c0_55] : memref<4x16x128xf32, #tpu.memory_space<vmem>>, vector<1x16x128xf32>
    %122 = vector.shape_cast %121 : vector<1x16x128xf32> to vector<16x128xf32>
    %123 = vector.shape_cast %119 : vector<16x128xf32> to vector<1x16x128xf32>
    tpu.vector_store %arg13[%120, %c0_54, %c0_55], %123 {strides = array<i32>} : memref<4x16x128xf32, #tpu.memory_space<vmem>>, vector<1x16x128xf32>,
    %c2_i32 = arith.constant 2 : i32
    %124 = arith.index_cast %c2_i32 : i32 to index
    %c0_56 = arith.constant 0 : index
    %c0_57 = arith.constant 0 : index
    %125 = vector.load %arg12[%124, %c0_56, %c0_57] : memref<4x16x128xf32, #tpu.memory_space<vmem>>, vector<1x16x128xf32>
    %126 = vector.shape_cast %125 : vector<1x16x128xf32> to vector<16x128xf32>
    %127 = arith.mulf %126, %119 : vector<16x128xf32>
    %128 = arith.index_cast %c2_i32 : i32 to index
    %c0_58 = arith.constant 0 : index
    %c0_59 = arith.constant 0 : index
    %129 = vector.load %arg13[%128, %c0_58, %c0_59] : memref<4x16x128xf32, #tpu.memory_space<vmem>>, vector<1x16x128xf32>
    %130 = vector.shape_cast %129 : vector<1x16x128xf32> to vector<16x128xf32>
    %131 = arith.addf %127, %130 : vector<16x128xf32>
    %132 = arith.index_cast %c2_i32 : i32 to index
    %c0_60 = arith.constant 0 : index
    %c0_61 = arith.constant 0 : index
    %133 = vector.load %arg13[%132, %c0_60, %c0_61] : memref<4x16x128xf32, #tpu.memory_space<vmem>>, vector<1x16x128xf32>
    %134 = vector.shape_cast %133 : vector<1x16x128xf32> to vector<16x128xf32>
    %135 = vector.shape_cast %131 : vector<16x128xf32> to vector<1x16x128xf32>
    tpu.vector_store %arg13[%132, %c0_60, %c0_61], %135 {strides = array<i32>} : memref<4x16x128xf32, #tpu.memory_space<vmem>>, vector<1x16x128xf32>,
    %c3_i32 = arith.constant 3 : i32
    %136 = arith.index_cast %c3_i32 : i32 to index
    %c0_62 = arith.constant 0 : index
    %c0_63 = arith.constant 0 : index
    %137 = vector.load %arg12[%136, %c0_62, %c0_63] : memref<4x16x128xf32, #tpu.memory_space<vmem>>, vector<1x16x128xf32>
    %138 = vector.shape_cast %137 : vector<1x16x128xf32> to vector<16x128xf32>
    %139 = arith.mulf %138, %131 : vector<16x128xf32>
    %140 = arith.index_cast %c3_i32 : i32 to index
    %c0_64 = arith.constant 0 : index
    %c0_65 = arith.constant 0 : index
    %141 = vector.load %arg13[%140, %c0_64, %c0_65] : memref<4x16x128xf32, #tpu.memory_space<vmem>>, vector<1x16x128xf32>
    %142 = vector.shape_cast %141 : vector<1x16x128xf32> to vector<16x128xf32>
    %143 = arith.addf %139, %142 : vector<16x128xf32>
    %144 = arith.index_cast %c3_i32 : i32 to index
    %c0_66 = arith.constant 0 : index
    %c0_67 = arith.constant 0 : index
    %145 = vector.load %arg13[%144, %c0_66, %c0_67] : memref<4x16x128xf32, #tpu.memory_space<vmem>>, vector<1x16x128xf32>
    %146 = vector.shape_cast %145 : vector<1x16x128xf32> to vector<16x128xf32>
    %147 = vector.shape_cast %143 : vector<16x128xf32> to vector<1x16x128xf32>
    tpu.vector_store %arg13[%144, %c0_66, %c0_67], %147 {strides = array<i32>} : memref<4x16x128xf32, #tpu.memory_space<vmem>>, vector<1x16x128xf32>,
    %c4_i32 = arith.constant 4 : i32
    %c0_68 = arith.constant 0 : index
    %c0_69 = arith.constant 0 : index
    %148 = vector.load %arg11[%c0_68, %c0_69] : memref<16x128xf32, #tpu.memory_space<vmem>>, vector<16x128xf32>
    tpu.vector_store %arg11[%c0_68, %c0_69], %143 {strides = array<i32>} : memref<16x128xf32, #tpu.memory_space<vmem>>, vector<16x128xf32>,
    %c0_70 = arith.constant 0 : index
    %c0_71 = arith.constant 0 : index
    %c0_72 = arith.constant 0 : index
    %149 = vector.load %arg13[%c0_70, %c0_71, %c0_72] : memref<4x16x128xf32, #tpu.memory_space<vmem>>, vector<4x16x128xf32>
    %150 = vector.shape_cast %26 : vector<64x128xf32> to vector<4x16x128xf32>
    %151 = arith.mulf %150, %149 : vector<4x16x128xf32>
    %cst_73 = arith.constant dense<0.000000e+00> : vector<4x128xf32>
    %152 = vector.multi_reduction <add>, %151, %cst_73 [1] : vector<4x16x128xf32> to vector<4x128xf32>
    %c0_74 = arith.constant 0 : index
    %c0_75 = arith.constant 0 : index
    %153 = vector.load %arg8[%c0_74, %c0_75] : memref<1x128xf32, #tpu.memory_space<vmem>>, vector<1x128xf32>
    %154 = vector.broadcast %153 : vector<1x128xf32> to vector<4x128xf32>
    %155 = arith.mulf %154, %3 : vector<4x128xf32>
    %156 = arith.addf %152, %155 : vector<4x128xf32>
    %c0_76 = arith.constant 0 : index
    %c0_77 = arith.constant 0 : index
    %157 = vector.load %arg10[%c0_76, %c0_77] : memref<4x128xf32, #tpu.memory_space<vmem>>, vector<4x128xf32>
    tpu.vector_store %arg10[%c0_76, %c0_77], %156 {strides = array<i32>} : memref<4x128xf32, #tpu.memory_space<vmem>>, vector<4x128xf32>,
    return
  }
  func.func @transform_0(%arg0: i32, %arg1: i32) -> (i32, i32) {
    %c0_i32 = arith.constant 0 : i32
    %c0_i32_0 = arith.constant 0 : i32
    return %c0_i32, %arg0 : i32, i32
  }
  func.func @transform_1(%arg0: i32, %arg1: i32) -> (i32, i32) {
    %c0_i32 = arith.constant 0 : i32
    return %arg1, %arg0 : i32, i32
  }
  func.func @transform_2(%arg0: i32, %arg1: i32) -> (i32, i32) {
    %c0_i32 = arith.constant 0 : i32
    return %arg1, %arg0 : i32, i32
  }
  func.func @transform_3(%arg0: i32, %arg1: i32) -> (i32, i32, i32) {
    %c0_i32 = arith.constant 0 : i32
    %c0_i32_0 = arith.constant 0 : i32
    %c0_i32_1 = arith.constant 0 : i32
    return %arg1, %c0_i32, %c0_i32_0 : i32, i32, i32
  }
  func.func @transform_4(%arg0: i32, %arg1: i32) -> (i32, i32, i32) {
    %c0_i32 = arith.constant 0 : i32
    %c0_i32_0 = arith.constant 0 : i32
    %c0_i32_1 = arith.constant 0 : i32
    return %arg1, %c0_i32, %c0_i32_0 : i32, i32, i32
  }
  func.func @transform_5(%arg0: i32, %arg1: i32) -> (i32, i32) {
    %c0_i32 = arith.constant 0 : i32
    %c0_i32_0 = arith.constant 0 : i32
    return %c0_i32, %arg0 : i32, i32
  }
  func.func @transform_6(%arg0: i32, %arg1: i32) -> (i32, i32) {
    %c0_i32 = arith.constant 0 : i32
    %c0_i32_0 = arith.constant 0 : i32
    return %c0_i32, %arg0 : i32, i32
  }
  func.func @transform_7(%arg0: i32, %arg1: i32) -> (i32, i32) {
    %c0_i32 = arith.constant 0 : i32
    %c0_i32_0 = arith.constant 0 : i32
    return %c0_i32, %arg0 : i32, i32
  }
  func.func @transform_8(%arg0: i32, %arg1: i32) -> (i32, i32) {
    %c0_i32 = arith.constant 0 : i32
    return %arg1, %arg0 : i32, i32
  }
}

module attributes {stable_mosaic.version = 11 : i64} {
  func.func @_dw_kernel(%arg0: i32, %arg1: memref<1x18x288xbf16, #tpu.memory_space<vmem>>, %arg2: memref<9x256xf32, #tpu.memory_space<vmem>>, %arg3: memref<1x256xf32, #tpu.memory_space<vmem>>, %arg4: memref<1x16x256xbf16, #tpu.memory_space<vmem>>) attributes {dimension_semantics = [#tpu.dimension_semantics<parallel>], iteration_bounds = array<i64: 2>, scalar_prefetch = 0 : i64, scratch_operands = 0 : i64, tpu.core_type = #tpu.core_type<tc>, window_params = [{transform_indices = @transform_0, window_bounds = array<i64: 1, 18, 288>}, {pipeline_mode = #tpu.pipeline_mode<synchronous>, transform_indices = @transform_1, window_bounds = array<i64: 9, 256>}, {pipeline_mode = #tpu.pipeline_mode<synchronous>, transform_indices = @transform_2, window_bounds = array<i64: 1, 256>}, {transform_indices = @transform_3, window_bounds = array<i64: 1, 16, 256>}]} {
    %c0 = arith.constant 0 : index
    %c0_0 = arith.constant 0 : index
    %c0_1 = arith.constant 0 : index
    %0 = vector.load %arg1[%c0, %c0_0, %c0_1] : memref<1x18x288xbf16, #tpu.memory_space<vmem>>, vector<1x18x288xbf16>
    %1 = vector.shape_cast %0 : vector<1x18x288xbf16> to vector<18x288xbf16>
    %2 = arith.extf %1 : vector<18x288xbf16> to vector<18x288xf32>
    %c0_2 = arith.constant 0 : index
    %c0_3 = arith.constant 0 : index
    %3 = vector.load %arg2[%c0_2, %c0_3] : memref<9x256xf32, #tpu.memory_space<vmem>>, vector<9x256xf32>
    %cst = arith.constant 0.000000e+00 : f32
    %4 = vector.broadcast %cst : f32 to vector<16x256xf32>
    %5 = vector.extract_strided_slice %2 {offsets = [0, 0], sizes = [16, 256], strides = [1, 1]} : vector<18x288xf32> to vector<16x256xf32>
    %6 = vector.extract_strided_slice %3 {offsets = [0, 0], sizes = [1, 256], strides = [1, 1]} : vector<9x256xf32> to vector<1x256xf32>
    %7 = vector.shape_cast %6 : vector<1x256xf32> to vector<256xf32>
    %8 = vector.shape_cast %7 : vector<256xf32> to vector<1x256xf32>
    %9 = vector.broadcast %8 : vector<1x256xf32> to vector<16x256xf32>
    %10 = arith.mulf %5, %9 : vector<16x256xf32>
    %11 = arith.addf %4, %10 : vector<16x256xf32>
    %12 = vector.extract_strided_slice %2 {offsets = [0, 16], sizes = [16, 256], strides = [1, 1]} : vector<18x288xf32> to vector<16x256xf32>
    %13 = vector.extract_strided_slice %3 {offsets = [1, 0], sizes = [1, 256], strides = [1, 1]} : vector<9x256xf32> to vector<1x256xf32>
    %14 = vector.shape_cast %13 : vector<1x256xf32> to vector<256xf32>
    %15 = vector.shape_cast %14 : vector<256xf32> to vector<1x256xf32>
    %16 = vector.broadcast %15 : vector<1x256xf32> to vector<16x256xf32>
    %17 = arith.mulf %12, %16 : vector<16x256xf32>
    %18 = arith.addf %11, %17 : vector<16x256xf32>
    %19 = vector.extract_strided_slice %2 {offsets = [0, 32], sizes = [16, 256], strides = [1, 1]} : vector<18x288xf32> to vector<16x256xf32>
    %20 = vector.extract_strided_slice %3 {offsets = [2, 0], sizes = [1, 256], strides = [1, 1]} : vector<9x256xf32> to vector<1x256xf32>
    %21 = vector.shape_cast %20 : vector<1x256xf32> to vector<256xf32>
    %22 = vector.shape_cast %21 : vector<256xf32> to vector<1x256xf32>
    %23 = vector.broadcast %22 : vector<1x256xf32> to vector<16x256xf32>
    %24 = arith.mulf %19, %23 : vector<16x256xf32>
    %25 = arith.addf %18, %24 : vector<16x256xf32>
    %26 = vector.extract_strided_slice %2 {offsets = [1, 0], sizes = [16, 256], strides = [1, 1]} : vector<18x288xf32> to vector<16x256xf32>
    %27 = vector.extract_strided_slice %3 {offsets = [3, 0], sizes = [1, 256], strides = [1, 1]} : vector<9x256xf32> to vector<1x256xf32>
    %28 = vector.shape_cast %27 : vector<1x256xf32> to vector<256xf32>
    %29 = vector.shape_cast %28 : vector<256xf32> to vector<1x256xf32>
    %30 = vector.broadcast %29 : vector<1x256xf32> to vector<16x256xf32>
    %31 = arith.mulf %26, %30 : vector<16x256xf32>
    %32 = arith.addf %25, %31 : vector<16x256xf32>
    %33 = vector.extract_strided_slice %2 {offsets = [1, 16], sizes = [16, 256], strides = [1, 1]} : vector<18x288xf32> to vector<16x256xf32>
    %34 = vector.extract_strided_slice %3 {offsets = [4, 0], sizes = [1, 256], strides = [1, 1]} : vector<9x256xf32> to vector<1x256xf32>
    %35 = vector.shape_cast %34 : vector<1x256xf32> to vector<256xf32>
    %36 = vector.shape_cast %35 : vector<256xf32> to vector<1x256xf32>
    %37 = vector.broadcast %36 : vector<1x256xf32> to vector<16x256xf32>
    %38 = arith.mulf %33, %37 : vector<16x256xf32>
    %39 = arith.addf %32, %38 : vector<16x256xf32>
    %40 = vector.extract_strided_slice %2 {offsets = [1, 32], sizes = [16, 256], strides = [1, 1]} : vector<18x288xf32> to vector<16x256xf32>
    %41 = vector.extract_strided_slice %3 {offsets = [5, 0], sizes = [1, 256], strides = [1, 1]} : vector<9x256xf32> to vector<1x256xf32>
    %42 = vector.shape_cast %41 : vector<1x256xf32> to vector<256xf32>
    %43 = vector.shape_cast %42 : vector<256xf32> to vector<1x256xf32>
    %44 = vector.broadcast %43 : vector<1x256xf32> to vector<16x256xf32>
    %45 = arith.mulf %40, %44 : vector<16x256xf32>
    %46 = arith.addf %39, %45 : vector<16x256xf32>
    %47 = vector.extract_strided_slice %2 {offsets = [2, 0], sizes = [16, 256], strides = [1, 1]} : vector<18x288xf32> to vector<16x256xf32>
    %48 = vector.extract_strided_slice %3 {offsets = [6, 0], sizes = [1, 256], strides = [1, 1]} : vector<9x256xf32> to vector<1x256xf32>
    %49 = vector.shape_cast %48 : vector<1x256xf32> to vector<256xf32>
    %50 = vector.shape_cast %49 : vector<256xf32> to vector<1x256xf32>
    %51 = vector.broadcast %50 : vector<1x256xf32> to vector<16x256xf32>
    %52 = arith.mulf %47, %51 : vector<16x256xf32>
    %53 = arith.addf %46, %52 : vector<16x256xf32>
    %54 = vector.extract_strided_slice %2 {offsets = [2, 16], sizes = [16, 256], strides = [1, 1]} : vector<18x288xf32> to vector<16x256xf32>
    %55 = vector.extract_strided_slice %3 {offsets = [7, 0], sizes = [1, 256], strides = [1, 1]} : vector<9x256xf32> to vector<1x256xf32>
    %56 = vector.shape_cast %55 : vector<1x256xf32> to vector<256xf32>
    %57 = vector.shape_cast %56 : vector<256xf32> to vector<1x256xf32>
    %58 = vector.broadcast %57 : vector<1x256xf32> to vector<16x256xf32>
    %59 = arith.mulf %54, %58 : vector<16x256xf32>
    %60 = arith.addf %53, %59 : vector<16x256xf32>
    %61 = vector.extract_strided_slice %2 {offsets = [2, 32], sizes = [16, 256], strides = [1, 1]} : vector<18x288xf32> to vector<16x256xf32>
    %62 = vector.extract_strided_slice %3 {offsets = [8, 0], sizes = [1, 256], strides = [1, 1]} : vector<9x256xf32> to vector<1x256xf32>
    %63 = vector.shape_cast %62 : vector<1x256xf32> to vector<256xf32>
    %64 = vector.shape_cast %63 : vector<256xf32> to vector<1x256xf32>
    %65 = vector.broadcast %64 : vector<1x256xf32> to vector<16x256xf32>
    %66 = arith.mulf %61, %65 : vector<16x256xf32>
    %67 = arith.addf %60, %66 : vector<16x256xf32>
    %c0_4 = arith.constant 0 : index
    %c0_5 = arith.constant 0 : index
    %68 = vector.load %arg3[%c0_4, %c0_5] : memref<1x256xf32, #tpu.memory_space<vmem>>, vector<1x256xf32>
    %69 = vector.broadcast %68 : vector<1x256xf32> to vector<16x256xf32>
    %70 = arith.addf %67, %69 : vector<16x256xf32>
    %71 = arith.truncf %70 : vector<16x256xf32> to vector<16x256xbf16>
    %c0_6 = arith.constant 0 : index
    %c0_7 = arith.constant 0 : index
    %c0_8 = arith.constant 0 : index
    %72 = vector.load %arg4[%c0_6, %c0_7, %c0_8] : memref<1x16x256xbf16, #tpu.memory_space<vmem>>, vector<1x16x256xbf16>
    %73 = vector.shape_cast %72 : vector<1x16x256xbf16> to vector<16x256xbf16>
    %74 = vector.shape_cast %71 : vector<16x256xbf16> to vector<1x16x256xbf16>
    tpu.vector_store %arg4[%c0_6, %c0_7, %c0_8], %74 {strides = array<i32>} : memref<1x16x256xbf16, #tpu.memory_space<vmem>>, vector<1x16x256xbf16>,
    return
  }
  func.func @transform_0(%arg0: i32) -> (i32, i32, i32) {
    %c0_i32 = arith.constant 0 : i32
    %c0_i32_0 = arith.constant 0 : i32
    %c0_i32_1 = arith.constant 0 : i32
    return %arg0, %c0_i32, %c0_i32_0 : i32, i32, i32
  }
  func.func @transform_1(%arg0: i32) -> (i32, i32) {
    %c0_i32 = arith.constant 0 : i32
    %c0_i32_0 = arith.constant 0 : i32
    %c0_i32_1 = arith.constant 0 : i32
    return %c0_i32, %c0_i32_0 : i32, i32
  }
  func.func @transform_2(%arg0: i32) -> (i32, i32) {
    %c0_i32 = arith.constant 0 : i32
    %c0_i32_0 = arith.constant 0 : i32
    %c0_i32_1 = arith.constant 0 : i32
    return %c0_i32, %c0_i32_0 : i32, i32
  }
  func.func @transform_3(%arg0: i32) -> (i32, i32, i32) {
    %c0_i32 = arith.constant 0 : i32
    %c0_i32_0 = arith.constant 0 : i32
    %c0_i32_1 = arith.constant 0 : i32
    return %arg0, %c0_i32, %c0_i32_0 : i32, i32, i32
  }
}

module attributes {stable_mosaic.version = 11 : i64} {
  func.func @_dw_kernel(%arg0: i32, %arg1: memref<1x16x704xbf16, #tpu.memory_space<vmem>>, %arg2: memref<7x512xf32, #tpu.memory_space<vmem>>, %arg3: memref<1x512xf32, #tpu.memory_space<vmem>>, %arg4: memref<1x16x512xbf16, #tpu.memory_space<vmem>>) attributes {dimension_semantics = [#tpu.dimension_semantics<parallel>], iteration_bounds = array<i64: 2>, scalar_prefetch = 0 : i64, scratch_operands = 0 : i64, tpu.core_type = #tpu.core_type<tc>, window_params = [{transform_indices = @transform_0, window_bounds = array<i64: 1, 16, 704>}, {pipeline_mode = #tpu.pipeline_mode<synchronous>, transform_indices = @transform_1, window_bounds = array<i64: 7, 512>}, {pipeline_mode = #tpu.pipeline_mode<synchronous>, transform_indices = @transform_2, window_bounds = array<i64: 1, 512>}, {transform_indices = @transform_3, window_bounds = array<i64: 1, 16, 512>}]} {
    %c0 = arith.constant 0 : index
    %c0_0 = arith.constant 0 : index
    %c0_1 = arith.constant 0 : index
    %0 = vector.load %arg1[%c0, %c0_0, %c0_1] : memref<1x16x704xbf16, #tpu.memory_space<vmem>>, vector<1x16x704xbf16>
    %1 = vector.shape_cast %0 : vector<1x16x704xbf16> to vector<16x704xbf16>
    %2 = arith.extf %1 : vector<16x704xbf16> to vector<16x704xf32>
    %c0_2 = arith.constant 0 : index
    %c0_3 = arith.constant 0 : index
    %3 = vector.load %arg2[%c0_2, %c0_3] : memref<7x512xf32, #tpu.memory_space<vmem>>, vector<7x512xf32>
    %cst = arith.constant 0.000000e+00 : f32
    %4 = vector.broadcast %cst : f32 to vector<16x512xf32>
    %5 = vector.extract_strided_slice %2 {offsets = [0, 0], sizes = [16, 512], strides = [1, 1]} : vector<16x704xf32> to vector<16x512xf32>
    %6 = vector.extract_strided_slice %3 {offsets = [0, 0], sizes = [1, 512], strides = [1, 1]} : vector<7x512xf32> to vector<1x512xf32>
    %7 = vector.shape_cast %6 : vector<1x512xf32> to vector<512xf32>
    %8 = vector.shape_cast %7 : vector<512xf32> to vector<1x512xf32>
    %9 = vector.broadcast %8 : vector<1x512xf32> to vector<16x512xf32>
    %10 = arith.mulf %5, %9 : vector<16x512xf32>
    %11 = arith.addf %4, %10 : vector<16x512xf32>
    %12 = vector.extract_strided_slice %2 {offsets = [0, 32], sizes = [16, 512], strides = [1, 1]} : vector<16x704xf32> to vector<16x512xf32>
    %13 = vector.extract_strided_slice %3 {offsets = [1, 0], sizes = [1, 512], strides = [1, 1]} : vector<7x512xf32> to vector<1x512xf32>
    %14 = vector.shape_cast %13 : vector<1x512xf32> to vector<512xf32>
    %15 = vector.shape_cast %14 : vector<512xf32> to vector<1x512xf32>
    %16 = vector.broadcast %15 : vector<1x512xf32> to vector<16x512xf32>
    %17 = arith.mulf %12, %16 : vector<16x512xf32>
    %18 = arith.addf %11, %17 : vector<16x512xf32>
    %19 = vector.extract_strided_slice %2 {offsets = [0, 64], sizes = [16, 512], strides = [1, 1]} : vector<16x704xf32> to vector<16x512xf32>
    %20 = vector.extract_strided_slice %3 {offsets = [2, 0], sizes = [1, 512], strides = [1, 1]} : vector<7x512xf32> to vector<1x512xf32>
    %21 = vector.shape_cast %20 : vector<1x512xf32> to vector<512xf32>
    %22 = vector.shape_cast %21 : vector<512xf32> to vector<1x512xf32>
    %23 = vector.broadcast %22 : vector<1x512xf32> to vector<16x512xf32>
    %24 = arith.mulf %19, %23 : vector<16x512xf32>
    %25 = arith.addf %18, %24 : vector<16x512xf32>
    %26 = vector.extract_strided_slice %2 {offsets = [0, 96], sizes = [16, 512], strides = [1, 1]} : vector<16x704xf32> to vector<16x512xf32>
    %27 = vector.extract_strided_slice %3 {offsets = [3, 0], sizes = [1, 512], strides = [1, 1]} : vector<7x512xf32> to vector<1x512xf32>
    %28 = vector.shape_cast %27 : vector<1x512xf32> to vector<512xf32>
    %29 = vector.shape_cast %28 : vector<512xf32> to vector<1x512xf32>
    %30 = vector.broadcast %29 : vector<1x512xf32> to vector<16x512xf32>
    %31 = arith.mulf %26, %30 : vector<16x512xf32>
    %32 = arith.addf %25, %31 : vector<16x512xf32>
    %33 = vector.extract_strided_slice %2 {offsets = [0, 128], sizes = [16, 512], strides = [1, 1]} : vector<16x704xf32> to vector<16x512xf32>
    %34 = vector.extract_strided_slice %3 {offsets = [4, 0], sizes = [1, 512], strides = [1, 1]} : vector<7x512xf32> to vector<1x512xf32>
    %35 = vector.shape_cast %34 : vector<1x512xf32> to vector<512xf32>
    %36 = vector.shape_cast %35 : vector<512xf32> to vector<1x512xf32>
    %37 = vector.broadcast %36 : vector<1x512xf32> to vector<16x512xf32>
    %38 = arith.mulf %33, %37 : vector<16x512xf32>
    %39 = arith.addf %32, %38 : vector<16x512xf32>
    %40 = vector.extract_strided_slice %2 {offsets = [0, 160], sizes = [16, 512], strides = [1, 1]} : vector<16x704xf32> to vector<16x512xf32>
    %41 = vector.extract_strided_slice %3 {offsets = [5, 0], sizes = [1, 512], strides = [1, 1]} : vector<7x512xf32> to vector<1x512xf32>
    %42 = vector.shape_cast %41 : vector<1x512xf32> to vector<512xf32>
    %43 = vector.shape_cast %42 : vector<512xf32> to vector<1x512xf32>
    %44 = vector.broadcast %43 : vector<1x512xf32> to vector<16x512xf32>
    %45 = arith.mulf %40, %44 : vector<16x512xf32>
    %46 = arith.addf %39, %45 : vector<16x512xf32>
    %47 = vector.extract_strided_slice %2 {offsets = [0, 192], sizes = [16, 512], strides = [1, 1]} : vector<16x704xf32> to vector<16x512xf32>
    %48 = vector.extract_strided_slice %3 {offsets = [6, 0], sizes = [1, 512], strides = [1, 1]} : vector<7x512xf32> to vector<1x512xf32>
    %49 = vector.shape_cast %48 : vector<1x512xf32> to vector<512xf32>
    %50 = vector.shape_cast %49 : vector<512xf32> to vector<1x512xf32>
    %51 = vector.broadcast %50 : vector<1x512xf32> to vector<16x512xf32>
    %52 = arith.mulf %47, %51 : vector<16x512xf32>
    %53 = arith.addf %46, %52 : vector<16x512xf32>
    %c0_4 = arith.constant 0 : index
    %c0_5 = arith.constant 0 : index
    %54 = vector.load %arg3[%c0_4, %c0_5] : memref<1x512xf32, #tpu.memory_space<vmem>>, vector<1x512xf32>
    %55 = vector.broadcast %54 : vector<1x512xf32> to vector<16x512xf32>
    %56 = arith.addf %53, %55 : vector<16x512xf32>
    %57 = arith.negf %56 : vector<16x512xf32>
    %58 = math.exp %57 : vector<16x512xf32>
    %cst_6 = arith.constant 1.000000e+00 : f32
    %59 = vector.broadcast %cst_6 : f32 to vector<16x512xf32>
    %60 = arith.addf %59, %58 : vector<16x512xf32>
    %61 = arith.divf %59, %60 : vector<16x512xf32>
    %62 = arith.mulf %56, %61 : vector<16x512xf32>
    %63 = arith.truncf %62 : vector<16x512xf32> to vector<16x512xbf16>
    %c0_7 = arith.constant 0 : index
    %c0_8 = arith.constant 0 : index
    %c0_9 = arith.constant 0 : index
    %64 = vector.load %arg4[%c0_7, %c0_8, %c0_9] : memref<1x16x512xbf16, #tpu.memory_space<vmem>>, vector<1x16x512xbf16>
    %65 = vector.shape_cast %64 : vector<1x16x512xbf16> to vector<16x512xbf16>
    %66 = vector.shape_cast %63 : vector<16x512xbf16> to vector<1x16x512xbf16>
    tpu.vector_store %arg4[%c0_7, %c0_8, %c0_9], %66 {strides = array<i32>} : memref<1x16x512xbf16, #tpu.memory_space<vmem>>, vector<1x16x512xbf16>,
    return
  }
  func.func @transform_0(%arg0: i32) -> (i32, i32, i32) {
    %c0_i32 = arith.constant 0 : i32
    %c0_i32_0 = arith.constant 0 : i32
    %c0_i32_1 = arith.constant 0 : i32
    return %arg0, %c0_i32, %c0_i32_0 : i32, i32, i32
  }
  func.func @transform_1(%arg0: i32) -> (i32, i32) {
    %c0_i32 = arith.constant 0 : i32
    %c0_i32_0 = arith.constant 0 : i32
    %c0_i32_1 = arith.constant 0 : i32
    return %c0_i32, %c0_i32_0 : i32, i32
  }
  func.func @transform_2(%arg0: i32) -> (i32, i32) {
    %c0_i32 = arith.constant 0 : i32
    %c0_i32_0 = arith.constant 0 : i32
    %c0_i32_1 = arith.constant 0 : i32
    return %c0_i32, %c0_i32_0 : i32, i32
  }
  func.func @transform_3(%arg0: i32) -> (i32, i32, i32) {
    %c0_i32 = arith.constant 0 : i32
    %c0_i32_0 = arith.constant 0 : i32
    %c0_i32_1 = arith.constant 0 : i32
    return %arg0, %c0_i32, %c0_i32_0 : i32, i32, i32
  }
}

module attributes {stable_mosaic.version = 11 : i64} {
  func.func @_dw_kernel(%arg0: i32, %arg1: memref<1x18x576xbf16, #tpu.memory_space<vmem>>, %arg2: memref<9x512xf32, #tpu.memory_space<vmem>>, %arg3: memref<1x512xf32, #tpu.memory_space<vmem>>, %arg4: memref<1x16x512xbf16, #tpu.memory_space<vmem>>) attributes {dimension_semantics = [#tpu.dimension_semantics<parallel>], iteration_bounds = array<i64: 2>, scalar_prefetch = 0 : i64, scratch_operands = 0 : i64, tpu.core_type = #tpu.core_type<tc>, window_params = [{transform_indices = @transform_0, window_bounds = array<i64: 1, 18, 576>}, {pipeline_mode = #tpu.pipeline_mode<synchronous>, transform_indices = @transform_1, window_bounds = array<i64: 9, 512>}, {pipeline_mode = #tpu.pipeline_mode<synchronous>, transform_indices = @transform_2, window_bounds = array<i64: 1, 512>}, {transform_indices = @transform_3, window_bounds = array<i64: 1, 16, 512>}]} {
    %c0 = arith.constant 0 : index
    %c0_0 = arith.constant 0 : index
    %c0_1 = arith.constant 0 : index
    %0 = vector.load %arg1[%c0, %c0_0, %c0_1] : memref<1x18x576xbf16, #tpu.memory_space<vmem>>, vector<1x18x576xbf16>
    %1 = vector.shape_cast %0 : vector<1x18x576xbf16> to vector<18x576xbf16>
    %2 = arith.extf %1 : vector<18x576xbf16> to vector<18x576xf32>
    %c0_2 = arith.constant 0 : index
    %c0_3 = arith.constant 0 : index
    %3 = vector.load %arg2[%c0_2, %c0_3] : memref<9x512xf32, #tpu.memory_space<vmem>>, vector<9x512xf32>
    %cst = arith.constant 0.000000e+00 : f32
    %4 = vector.broadcast %cst : f32 to vector<16x512xf32>
    %5 = vector.extract_strided_slice %2 {offsets = [0, 0], sizes = [16, 512], strides = [1, 1]} : vector<18x576xf32> to vector<16x512xf32>
    %6 = vector.extract_strided_slice %3 {offsets = [0, 0], sizes = [1, 512], strides = [1, 1]} : vector<9x512xf32> to vector<1x512xf32>
    %7 = vector.shape_cast %6 : vector<1x512xf32> to vector<512xf32>
    %8 = vector.shape_cast %7 : vector<512xf32> to vector<1x512xf32>
    %9 = vector.broadcast %8 : vector<1x512xf32> to vector<16x512xf32>
    %10 = arith.mulf %5, %9 : vector<16x512xf32>
    %11 = arith.addf %4, %10 : vector<16x512xf32>
    %12 = vector.extract_strided_slice %2 {offsets = [0, 32], sizes = [16, 512], strides = [1, 1]} : vector<18x576xf32> to vector<16x512xf32>
    %13 = vector.extract_strided_slice %3 {offsets = [1, 0], sizes = [1, 512], strides = [1, 1]} : vector<9x512xf32> to vector<1x512xf32>
    %14 = vector.shape_cast %13 : vector<1x512xf32> to vector<512xf32>
    %15 = vector.shape_cast %14 : vector<512xf32> to vector<1x512xf32>
    %16 = vector.broadcast %15 : vector<1x512xf32> to vector<16x512xf32>
    %17 = arith.mulf %12, %16 : vector<16x512xf32>
    %18 = arith.addf %11, %17 : vector<16x512xf32>
    %19 = vector.extract_strided_slice %2 {offsets = [0, 64], sizes = [16, 512], strides = [1, 1]} : vector<18x576xf32> to vector<16x512xf32>
    %20 = vector.extract_strided_slice %3 {offsets = [2, 0], sizes = [1, 512], strides = [1, 1]} : vector<9x512xf32> to vector<1x512xf32>
    %21 = vector.shape_cast %20 : vector<1x512xf32> to vector<512xf32>
    %22 = vector.shape_cast %21 : vector<512xf32> to vector<1x512xf32>
    %23 = vector.broadcast %22 : vector<1x512xf32> to vector<16x512xf32>
    %24 = arith.mulf %19, %23 : vector<16x512xf32>
    %25 = arith.addf %18, %24 : vector<16x512xf32>
    %26 = vector.extract_strided_slice %2 {offsets = [1, 0], sizes = [16, 512], strides = [1, 1]} : vector<18x576xf32> to vector<16x512xf32>
    %27 = vector.extract_strided_slice %3 {offsets = [3, 0], sizes = [1, 512], strides = [1, 1]} : vector<9x512xf32> to vector<1x512xf32>
    %28 = vector.shape_cast %27 : vector<1x512xf32> to vector<512xf32>
    %29 = vector.shape_cast %28 : vector<512xf32> to vector<1x512xf32>
    %30 = vector.broadcast %29 : vector<1x512xf32> to vector<16x512xf32>
    %31 = arith.mulf %26, %30 : vector<16x512xf32>
    %32 = arith.addf %25, %31 : vector<16x512xf32>
    %33 = vector.extract_strided_slice %2 {offsets = [1, 32], sizes = [16, 512], strides = [1, 1]} : vector<18x576xf32> to vector<16x512xf32>
    %34 = vector.extract_strided_slice %3 {offsets = [4, 0], sizes = [1, 512], strides = [1, 1]} : vector<9x512xf32> to vector<1x512xf32>
    %35 = vector.shape_cast %34 : vector<1x512xf32> to vector<512xf32>
    %36 = vector.shape_cast %35 : vector<512xf32> to vector<1x512xf32>
    %37 = vector.broadcast %36 : vector<1x512xf32> to vector<16x512xf32>
    %38 = arith.mulf %33, %37 : vector<16x512xf32>
    %39 = arith.addf %32, %38 : vector<16x512xf32>
    %40 = vector.extract_strided_slice %2 {offsets = [1, 64], sizes = [16, 512], strides = [1, 1]} : vector<18x576xf32> to vector<16x512xf32>
    %41 = vector.extract_strided_slice %3 {offsets = [5, 0], sizes = [1, 512], strides = [1, 1]} : vector<9x512xf32> to vector<1x512xf32>
    %42 = vector.shape_cast %41 : vector<1x512xf32> to vector<512xf32>
    %43 = vector.shape_cast %42 : vector<512xf32> to vector<1x512xf32>
    %44 = vector.broadcast %43 : vector<1x512xf32> to vector<16x512xf32>
    %45 = arith.mulf %40, %44 : vector<16x512xf32>
    %46 = arith.addf %39, %45 : vector<16x512xf32>
    %47 = vector.extract_strided_slice %2 {offsets = [2, 0], sizes = [16, 512], strides = [1, 1]} : vector<18x576xf32> to vector<16x512xf32>
    %48 = vector.extract_strided_slice %3 {offsets = [6, 0], sizes = [1, 512], strides = [1, 1]} : vector<9x512xf32> to vector<1x512xf32>
    %49 = vector.shape_cast %48 : vector<1x512xf32> to vector<512xf32>
    %50 = vector.shape_cast %49 : vector<512xf32> to vector<1x512xf32>
    %51 = vector.broadcast %50 : vector<1x512xf32> to vector<16x512xf32>
    %52 = arith.mulf %47, %51 : vector<16x512xf32>
    %53 = arith.addf %46, %52 : vector<16x512xf32>
    %54 = vector.extract_strided_slice %2 {offsets = [2, 32], sizes = [16, 512], strides = [1, 1]} : vector<18x576xf32> to vector<16x512xf32>
    %55 = vector.extract_strided_slice %3 {offsets = [7, 0], sizes = [1, 512], strides = [1, 1]} : vector<9x512xf32> to vector<1x512xf32>
    %56 = vector.shape_cast %55 : vector<1x512xf32> to vector<512xf32>
    %57 = vector.shape_cast %56 : vector<512xf32> to vector<1x512xf32>
    %58 = vector.broadcast %57 : vector<1x512xf32> to vector<16x512xf32>
    %59 = arith.mulf %54, %58 : vector<16x512xf32>
    %60 = arith.addf %53, %59 : vector<16x512xf32>
    %61 = vector.extract_strided_slice %2 {offsets = [2, 64], sizes = [16, 512], strides = [1, 1]} : vector<18x576xf32> to vector<16x512xf32>
    %62 = vector.extract_strided_slice %3 {offsets = [8, 0], sizes = [1, 512], strides = [1, 1]} : vector<9x512xf32> to vector<1x512xf32>
    %63 = vector.shape_cast %62 : vector<1x512xf32> to vector<512xf32>
    %64 = vector.shape_cast %63 : vector<512xf32> to vector<1x512xf32>
    %65 = vector.broadcast %64 : vector<1x512xf32> to vector<16x512xf32>
    %66 = arith.mulf %61, %65 : vector<16x512xf32>
    %67 = arith.addf %60, %66 : vector<16x512xf32>
    %c0_4 = arith.constant 0 : index
    %c0_5 = arith.constant 0 : index
    %68 = vector.load %arg3[%c0_4, %c0_5] : memref<1x512xf32, #tpu.memory_space<vmem>>, vector<1x512xf32>
    %69 = vector.broadcast %68 : vector<1x512xf32> to vector<16x512xf32>
    %70 = arith.addf %67, %69 : vector<16x512xf32>
    %71 = arith.truncf %70 : vector<16x512xf32> to vector<16x512xbf16>
    %c0_6 = arith.constant 0 : index
    %c0_7 = arith.constant 0 : index
    %c0_8 = arith.constant 0 : index
    %72 = vector.load %arg4[%c0_6, %c0_7, %c0_8] : memref<1x16x512xbf16, #tpu.memory_space<vmem>>, vector<1x16x512xbf16>
    %73 = vector.shape_cast %72 : vector<1x16x512xbf16> to vector<16x512xbf16>
    %74 = vector.shape_cast %71 : vector<16x512xbf16> to vector<1x16x512xbf16>
    tpu.vector_store %arg4[%c0_6, %c0_7, %c0_8], %74 {strides = array<i32>} : memref<1x16x512xbf16, #tpu.memory_space<vmem>>, vector<1x16x512xbf16>,
    return
  }
  func.func @transform_0(%arg0: i32) -> (i32, i32, i32) {
    %c0_i32 = arith.constant 0 : i32
    %c0_i32_0 = arith.constant 0 : i32
    %c0_i32_1 = arith.constant 0 : i32
    return %arg0, %c0_i32, %c0_i32_0 : i32, i32, i32
  }
  func.func @transform_1(%arg0: i32) -> (i32, i32) {
    %c0_i32 = arith.constant 0 : i32
    %c0_i32_0 = arith.constant 0 : i32
    %c0_i32_1 = arith.constant 0 : i32
    return %c0_i32, %c0_i32_0 : i32, i32
  }
  func.func @transform_2(%arg0: i32) -> (i32, i32) {
    %c0_i32 = arith.constant 0 : i32
    %c0_i32_0 = arith.constant 0 : i32
    %c0_i32_1 = arith.constant 0 : i32
    return %c0_i32, %c0_i32_0 : i32, i32
  }
  func.func @transform_3(%arg0: i32) -> (i32, i32, i32) {
    %c0_i32 = arith.constant 0 : i32
    %c0_i32_0 = arith.constant 0 : i32
    %c0_i32_1 = arith.constant 0 : i32
    return %arg0, %c0_i32, %c0_i32_0 : i32, i32, i32
  }
}

module attributes {stable_mosaic.version = 11 : i64} {
  func.func @_mm_multi_kernel(%arg0: i32, %arg1: memref<256x16xbf16, #tpu.memory_space<vmem>>, %arg2: memref<256x16xbf16, #tpu.memory_space<vmem>>, %arg3: memref<256x32xbf16, #tpu.memory_space<vmem>>, %arg4: memref<16x32xbf16, #tpu.memory_space<vmem>>, %arg5: memref<16x32xbf16, #tpu.memory_space<vmem>>, %arg6: memref<32x32xbf16, #tpu.memory_space<vmem>>, %arg7: memref<1x32xf32, #tpu.memory_space<vmem>>, %arg8: memref<256x32xbf16, #tpu.memory_space<vmem>>) attributes {dimension_semantics = [#tpu.dimension_semantics<parallel>], iteration_bounds = array<i64: 2>, scalar_prefetch = 0 : i64, scratch_operands = 0 : i64, tpu.core_type = #tpu.core_type<tc>, window_params = [{transform_indices = @transform_0, window_bounds = array<i64: 256, 16>}, {transform_indices = @transform_1, window_bounds = array<i64: 256, 16>}, {transform_indices = @transform_2, window_bounds = array<i64: 256, 32>}, {pipeline_mode = #tpu.pipeline_mode<synchronous>, transform_indices = @transform_3, window_bounds = array<i64: 16, 32>}, {pipeline_mode = #tpu.pipeline_mode<synchronous>, transform_indices = @transform_4, window_bounds = array<i64: 16, 32>}, {pipeline_mode = #tpu.pipeline_mode<synchronous>, transform_indices = @transform_5, window_bounds = array<i64: 32, 32>}, {pipeline_mode = #tpu.pipeline_mode<synchronous>, transform_indices = @transform_6, window_bounds = array<i64: 1, 32>}, {transform_indices = @transform_7, window_bounds = array<i64: 256, 32>}]} {
    %c0 = arith.constant 0 : index
    %c0_0 = arith.constant 0 : index
    %0 = vector.load %arg7[%c0, %c0_0] : memref<1x32xf32, #tpu.memory_space<vmem>>, vector<1x32xf32>
    %c0_1 = arith.constant 0 : index
    %c0_2 = arith.constant 0 : index
    %1 = vector.load %arg1[%c0_1, %c0_2] : memref<256x16xbf16, #tpu.memory_space<vmem>>, vector<256x16xbf16>
    %c0_3 = arith.constant 0 : index
    %c0_4 = arith.constant 0 : index
    %2 = vector.load %arg4[%c0_3, %c0_4] : memref<16x32xbf16, #tpu.memory_space<vmem>>, vector<16x32xbf16>
    %cst = arith.constant dense<0.000000e+00> : vector<256x32xf32>
    %3 = tpu.matmul %1, %2, %cst {dimension_numbers = #tpu.dot_dimension_numbers<[1], [0], [0], [1], [0, 0, 1, 1], [], []>} : vector<256x16xbf16>, vector<16x32xbf16>, vector<256x32xf32> -> vector<256x32xf32>
    %4 = vector.broadcast %0 : vector<1x32xf32> to vector<256x32xf32>
    %5 = arith.addf %4, %3 : vector<256x32xf32>
    %c0_5 = arith.constant 0 : index
    %c0_6 = arith.constant 0 : index
    %6 = vector.load %arg2[%c0_5, %c0_6] : memref<256x16xbf16, #tpu.memory_space<vmem>>, vector<256x16xbf16>
    %c0_7 = arith.constant 0 : index
    %c0_8 = arith.constant 0 : index
    %7 = vector.load %arg5[%c0_7, %c0_8] : memref<16x32xbf16, #tpu.memory_space<vmem>>, vector<16x32xbf16>
    %cst_9 = arith.constant dense<0.000000e+00> : vector<256x32xf32>
    %8 = tpu.matmul %6, %7, %cst_9 {dimension_numbers = #tpu.dot_dimension_numbers<[1], [0], [0], [1], [0, 0, 1, 1], [], []>} : vector<256x16xbf16>, vector<16x32xbf16>, vector<256x32xf32> -> vector<256x32xf32>
    %9 = arith.addf %5, %8 : vector<256x32xf32>
    %c0_10 = arith.constant 0 : index
    %c0_11 = arith.constant 0 : index
    %10 = vector.load %arg3[%c0_10, %c0_11] : memref<256x32xbf16, #tpu.memory_space<vmem>>, vector<256x32xbf16>
    %c0_12 = arith.constant 0 : index
    %c0_13 = arith.constant 0 : index
    %11 = vector.load %arg6[%c0_12, %c0_13] : memref<32x32xbf16, #tpu.memory_space<vmem>>, vector<32x32xbf16>
    %cst_14 = arith.constant dense<0.000000e+00> : vector<256x32xf32>
    %12 = tpu.matmul %10, %11, %cst_14 {dimension_numbers = #tpu.dot_dimension_numbers<[1], [0], [0], [1], [0, 0, 1, 1], [], []>} : vector<256x32xbf16>, vector<32x32xbf16>, vector<256x32xf32> -> vector<256x32xf32>
    %13 = arith.addf %9, %12 : vector<256x32xf32>
    %14 = arith.truncf %13 : vector<256x32xf32> to vector<256x32xbf16>
    %c0_15 = arith.constant 0 : index
    %c0_16 = arith.constant 0 : index
    %15 = vector.load %arg8[%c0_15, %c0_16] : memref<256x32xbf16, #tpu.memory_space<vmem>>, vector<256x32xbf16>
    tpu.vector_store %arg8[%c0_15, %c0_16], %14 {strides = array<i32>} : memref<256x32xbf16, #tpu.memory_space<vmem>>, vector<256x32xbf16>,
    return
  }
  func.func @transform_0(%arg0: i32) -> (i32, i32) {
    %c0_i32 = arith.constant 0 : i32
    %c0_i32_0 = arith.constant 0 : i32
    return %arg0, %c0_i32 : i32, i32
  }
  func.func @transform_1(%arg0: i32) -> (i32, i32) {
    %c0_i32 = arith.constant 0 : i32
    %c0_i32_0 = arith.constant 0 : i32
    return %arg0, %c0_i32 : i32, i32
  }
  func.func @transform_2(%arg0: i32) -> (i32, i32) {
    %c0_i32 = arith.constant 0 : i32
    %c0_i32_0 = arith.constant 0 : i32
    return %arg0, %c0_i32 : i32, i32
  }
  func.func @transform_3(%arg0: i32) -> (i32, i32) {
    %c0_i32 = arith.constant 0 : i32
    %c0_i32_0 = arith.constant 0 : i32
    %c0_i32_1 = arith.constant 0 : i32
    return %c0_i32, %c0_i32_0 : i32, i32
  }
  func.func @transform_4(%arg0: i32) -> (i32, i32) {
    %c0_i32 = arith.constant 0 : i32
    %c0_i32_0 = arith.constant 0 : i32
    %c0_i32_1 = arith.constant 0 : i32
    return %c0_i32, %c0_i32_0 : i32, i32
  }
  func.func @transform_5(%arg0: i32) -> (i32, i32) {
    %c0_i32 = arith.constant 0 : i32
    %c0_i32_0 = arith.constant 0 : i32
    %c0_i32_1 = arith.constant 0 : i32
    return %c0_i32, %c0_i32_0 : i32, i32
  }
  func.func @transform_6(%arg0: i32) -> (i32, i32) {
    %c0_i32 = arith.constant 0 : i32
    %c0_i32_0 = arith.constant 0 : i32
    %c0_i32_1 = arith.constant 0 : i32
    return %c0_i32, %c0_i32_0 : i32, i32
  }
  func.func @transform_7(%arg0: i32) -> (i32, i32) {
    %c0_i32 = arith.constant 0 : i32
    %c0_i32_0 = arith.constant 0 : i32
    return %arg0, %c0_i32 : i32, i32
  }
}

module attributes {stable_mosaic.version = 11 : i64} {
  func.func @_ffn_kernel(%arg0: i32, %arg1: memref<256x32xbf16, #tpu.memory_space<vmem>>, %arg2: memref<32x128xbf16, #tpu.memory_space<vmem>>, %arg3: memref<1x128xf32, #tpu.memory_space<vmem>>, %arg4: memref<128x32xbf16, #tpu.memory_space<vmem>>, %arg5: memref<1x32xf32, #tpu.memory_space<vmem>>, %arg6: memref<256x32xbf16, #tpu.memory_space<vmem>>) attributes {dimension_semantics = [#tpu.dimension_semantics<parallel>], iteration_bounds = array<i64: 2>, scalar_prefetch = 0 : i64, scratch_operands = 0 : i64, tpu.core_type = #tpu.core_type<tc>, window_params = [{transform_indices = @transform_0, window_bounds = array<i64: 256, 32>}, {pipeline_mode = #tpu.pipeline_mode<synchronous>, transform_indices = @transform_1, window_bounds = array<i64: 32, 128>}, {pipeline_mode = #tpu.pipeline_mode<synchronous>, transform_indices = @transform_2, window_bounds = array<i64: 1, 128>}, {pipeline_mode = #tpu.pipeline_mode<synchronous>, transform_indices = @transform_3, window_bounds = array<i64: 128, 32>}, {pipeline_mode = #tpu.pipeline_mode<synchronous>, transform_indices = @transform_4, window_bounds = array<i64: 1, 32>}, {transform_indices = @transform_5, window_bounds = array<i64: 256, 32>}]} {
    %c0 = arith.constant 0 : index
    %c0_0 = arith.constant 0 : index
    %0 = vector.load %arg1[%c0, %c0_0] : memref<256x32xbf16, #tpu.memory_space<vmem>>, vector<256x32xbf16>
    %c0_1 = arith.constant 0 : index
    %c0_2 = arith.constant 0 : index
    %1 = vector.load %arg2[%c0_1, %c0_2] : memref<32x128xbf16, #tpu.memory_space<vmem>>, vector<32x128xbf16>
    %cst = arith.constant dense<0.000000e+00> : vector<256x128xf32>
    %2 = tpu.matmul %0, %1, %cst {dimension_numbers = #tpu.dot_dimension_numbers<[1], [0], [0], [1], [0, 0, 1, 1], [], []>} : vector<256x32xbf16>, vector<32x128xbf16>, vector<256x128xf32> -> vector<256x128xf32>
    %c0_3 = arith.constant 0 : index
    %c0_4 = arith.constant 0 : index
    %3 = vector.load %arg3[%c0_3, %c0_4] : memref<1x128xf32, #tpu.memory_space<vmem>>, vector<1x128xf32>
    %4 = vector.broadcast %3 : vector<1x128xf32> to vector<256x128xf32>
    %5 = arith.addf %2, %4 : vector<256x128xf32>
    %6 = arith.mulf %5, %5 : vector<256x128xf32>
    %7 = arith.mulf %5, %6 : vector<256x128xf32>
    %cst_5 = arith.constant 4.471500e-02 : f32
    %8 = vector.broadcast %cst_5 : f32 to vector<256x128xf32>
    %9 = arith.mulf %8, %7 : vector<256x128xf32>
    %10 = arith.addf %5, %9 : vector<256x128xf32>
    %cst_6 = arith.constant 0.797884583 : f32
    %11 = vector.broadcast %cst_6 : f32 to vector<256x128xf32>
    %12 = arith.mulf %11, %10 : vector<256x128xf32>
    %13 = math.tanh %12 : vector<256x128xf32>
    %cst_7 = arith.constant 1.000000e+00 : f32
    %14 = vector.broadcast %cst_7 : f32 to vector<256x128xf32>
    %15 = arith.addf %14, %13 : vector<256x128xf32>
    %cst_8 = arith.constant 5.000000e-01 : f32
    %16 = vector.broadcast %cst_8 : f32 to vector<256x128xf32>
    %17 = arith.mulf %16, %15 : vector<256x128xf32>
    %18 = arith.mulf %5, %17 : vector<256x128xf32>
    %19 = arith.truncf %18 : vector<256x128xf32> to vector<256x128xbf16>
    %c0_9 = arith.constant 0 : index
    %c0_10 = arith.constant 0 : index
    %20 = vector.load %arg4[%c0_9, %c0_10] : memref<128x32xbf16, #tpu.memory_space<vmem>>, vector<128x32xbf16>
    %cst_11 = arith.constant dense<0.000000e+00> : vector<256x32xf32>
    %21 = tpu.matmul %19, %20, %cst_11 {dimension_numbers = #tpu.dot_dimension_numbers<[1], [0], [0], [1], [0, 0, 1, 1], [], []>} : vector<256x128xbf16>, vector<128x32xbf16>, vector<256x32xf32> -> vector<256x32xf32>
    %c0_12 = arith.constant 0 : index
    %c0_13 = arith.constant 0 : index
    %22 = vector.load %arg5[%c0_12, %c0_13] : memref<1x32xf32, #tpu.memory_space<vmem>>, vector<1x32xf32>
    %23 = vector.broadcast %22 : vector<1x32xf32> to vector<256x32xf32>
    %24 = arith.addf %21, %23 : vector<256x32xf32>
    %25 = arith.truncf %24 : vector<256x32xf32> to vector<256x32xbf16>
    %c0_14 = arith.constant 0 : index
    %c0_15 = arith.constant 0 : index
    %26 = vector.load %arg6[%c0_14, %c0_15] : memref<256x32xbf16, #tpu.memory_space<vmem>>, vector<256x32xbf16>
    tpu.vector_store %arg6[%c0_14, %c0_15], %25 {strides = array<i32>} : memref<256x32xbf16, #tpu.memory_space<vmem>>, vector<256x32xbf16>,
    return
  }
  func.func @transform_0(%arg0: i32) -> (i32, i32) {
    %c0_i32 = arith.constant 0 : i32
    %c0_i32_0 = arith.constant 0 : i32
    return %arg0, %c0_i32 : i32, i32
  }
  func.func @transform_1(%arg0: i32) -> (i32, i32) {
    %c0_i32 = arith.constant 0 : i32
    %c0_i32_0 = arith.constant 0 : i32
    %c0_i32_1 = arith.constant 0 : i32
    return %c0_i32, %c0_i32_0 : i32, i32
  }
  func.func @transform_2(%arg0: i32) -> (i32, i32) {
    %c0_i32 = arith.constant 0 : i32
    %c0_i32_0 = arith.constant 0 : i32
    %c0_i32_1 = arith.constant 0 : i32
    return %c0_i32, %c0_i32_0 : i32, i32
  }
  func.func @transform_3(%arg0: i32) -> (i32, i32) {
    %c0_i32 = arith.constant 0 : i32
    %c0_i32_0 = arith.constant 0 : i32
    %c0_i32_1 = arith.constant 0 : i32
    return %c0_i32, %c0_i32_0 : i32, i32
  }
  func.func @transform_4(%arg0: i32) -> (i32, i32) {
    %c0_i32 = arith.constant 0 : i32
    %c0_i32_0 = arith.constant 0 : i32
    %c0_i32_1 = arith.constant 0 : i32
    return %c0_i32, %c0_i32_0 : i32, i32
  }
  func.func @transform_5(%arg0: i32) -> (i32, i32) {
    %c0_i32 = arith.constant 0 : i32
    %c0_i32_0 = arith.constant 0 : i32
    return %arg0, %c0_i32 : i32, i32
  }
}

</mosaic_0001>

<bundles_post_ra>
// kernel: tile.35
= control target key start
LH: loop header
LB: loop body
LE: loop exit
PB: predicated region body
PF: predicated region fallthrough
CT: control target
= control target key end

     0   :  { %vm32_vm0 = vcmask 1043458   ;;  %s101_s6 = smov 3  ;;  %vm37_vm1 = vcmask 1045508   ;;  %s104_s9 = smov 12  ;;  %vm42_vm2 = vcmask 1047558   ;;  %vm3_vm3 = vcmask 261120   ;;  %s639_s0 = inlined_call_operand.vmem [shape: f32[7,16,1,1,32], index: 0, kind: input, shape index: {}]   ;;  %s640_s1 = inlined_call_operand.vmem [shape: f32[7,512], index: 1, kind: output, shape index: {}]  }
   0x1   :  { %v313_v0 = vld [vmem:[%s639_s0 + $0x3f] ss:$16 sm:%s101_s6]   ;;  %s27_s10 = smov 3  ;;  %s30_s15 = smov 12  ;;  %v2_v8 = vld [vmem:[%s639_s0] ss:$4 sm:$0xff]  }
   0x2   :  { %v314_v1 = vld [vmem:[%s639_s0 + $0x3f] ss:$16 sm:%s104_s9]   ;;  %v296_v2 = vld [vmem:[%s639_s0 + $0x3] ss:$16 sm:%s27_s10]   ;;  %s35_s16 = smov 48  ;;  %s40_s21 = smov 192 }
   0x3   :  { %v107_v3 = vsel %vm32_vm0, %v314_v1, %v313_v0  ;;  %v297_v4 = vld [vmem:[%s639_s0 + $0x3] ss:$16 sm:%s30_s15]   ;;  %s76_s22 = smov 3  ;;  %s359_s23 = smov 96   ;;  %v288_v18 = vld [vmem:[%s639_s0 + $0x20] ss:$4 sm:$0xff]  }
   0x4   :  { %v298_v5 = vld [vmem:[%s639_s0 + $0x3] ss:$16 sm:%s35_s16]   ;;  %108 = vrot.lane.b32.xlu1 %v107_v3, %s359_s23  ;;  %v33_v6 = vsel %vm32_vm0, %v297_v4, %v296_v2  ;;  %s79_s26 = smov 12  ;;  %s84_s27 = smov 48  ;;  %v291_v24 = vld [vmem:[%s639_s0 + $0x40] ss:$4 sm:$0xff]  }
   0x5   :  { %v299_v7 = vld [vmem:[%s639_s0 + $0x28b] ss:$-92 sm:%s40_s21]   ;;  %v38_v9 = vsel %vm37_vm1, %v298_v5, %v33_v6  ;;  %s89_s5 = smov 192  ;;  %s51_s6 = smov 3  ;;  %vm46_vm4 = vcmask 1048320   ;;  %vm133_vm5 = vcmask 785920  }
   0x6   :  { %v307_v10 = vld [vmem:[%s639_s0 + $0x2b] ss:$16 sm:%s76_s22]   ;;  %4 = vst.msk [vmem:[%s640_s1] ss:$8 sm:$0xf] %vm3_vm3, %v2_v8   ;;  %v43_v12 = vsel %vm42_vm2, %v299_v7, %v38_v9  ;;  %s54_s15 = smov 12 }
   0x7   :  { %v308_v11 = vld [vmem:[%s639_s0 + $0x2b] ss:$16 sm:%s79_s26]   ;;  %287 = vst.msk [vmem:[%s640_s1 - $0x1f] ss:$8 sm:$0xf0] %vm3_vm3, %v2_v8   ;;  %s59_s16 = smov 48  ;;  %44 = vrot.lane.b32.xlu0 %v43_v12, %s359_s23 }
   0x8   :  { %v82_v13 = vsel %vm32_vm0, %v308_v11, %v307_v10  ;;  %v309_v14 = vld [vmem:[%s639_s0 + $0x1db] ss:$-92 sm:%s84_s27]   ;;  %s64_s19 = smov 192  ;;  %s138_s27 = smov 3  ;;  %vm220_vm6 = vcmask 523520  }
   0x9   :  { %v310_v15 = vld [vmem:[%s639_s0 - $0x41] ss:$16 sm:%s89_s5]   ;;  %v87_v16 = vsel %vm37_vm1, %v309_v14, %v82_v13  ;;  %v301_v17 = vld [vmem:[%s639_s0 + $0x17] ss:$16 sm:%s51_s6]   ;;  %s141_s28 = smov 12  ;;  %s146_s6 = smov 48 }
   0xa   :  { %v92_v19 = vsel %vm42_vm2, %v310_v15, %v87_v16  ;;  %v302_v20 = vld [vmem:[%s639_s0 + $0x17] ss:$16 sm:%s54_s15]   ;;  %289 = vst.msk [vmem:[%s640_s1 + $0x2] ss:$8 sm:$0xf] %vm3_vm3, %v288_v18   ;;  %s151_s7 = smov 192 }
   0xb   :  { %v303_v21 = vld [vmem:[%s639_s0 + $0x17] ss:$16 sm:%s59_s16]   ;;  %290 = vst.msk [vmem:[%s640_s1 - $0x1d] ss:$8 sm:$0xf0] %vm3_vm3, %v288_v18   ;;  %93 = vrot.lane.b32.xlu1 %v92_v19, %s359_s23  ;;  %v57_v22 = vsel %vm32_vm0, %v302_v20, %v301_v17  ;;  %s114_s14 = smov 3 }
   0xc   :  { %v304_v23 = vld [vmem:[%s639_s0 - $0x55] ss:$16 sm:%s64_s19]   ;;  %v62_v25 = vsel %vm37_vm1, %v303_v21, %v57_v22  ;;  %v321_v26 = vld [vmem:[%s639_s0 + $0x16] ss:$16 sm:%s138_s27]   ;;  %s117_s15 = smov 12  ;;  %s122_s25 = smov 48 }
   0xd   :  { %v322_v27 = vld [vmem:[%s639_s0 + $0x16] ss:$16 sm:%s141_s28]   ;;  %292 = vst.msk [vmem:[%s640_s1 + $0x4] ss:$8 sm:$0xf] %vm3_vm3, %v291_v24   ;;  %v67_v28 = vsel %vm42_vm2, %v304_v23, %v62_v25  ;;  %s127_s26 = smov 192 }
   0xe   :  { %293 = vst.msk [vmem:[%s640_s1 - $0x1b] ss:$8 sm:$0xf0] %vm3_vm3, %v291_v24   ;;  %v144_v29 = vsel %vm32_vm0, %v322_v27, %v321_v26  ;;  %v323_v30 = vld [vmem:[%s639_s0 + $0x16] ss:$16 sm:%s146_s6]   ;;  %68 = vrot.lane.b32.xlu0 %v67_v28, %s359_s23  ;;  %s188_s28 = smov 3 }
   0xf   :  { %v324_v31 = vld [vmem:[%s639_s0 - $0x56] ss:$16 sm:%s151_s7]   ;;  %v149_v32 = vsel %vm37_vm1, %v323_v30, %v144_v29  ;;  %v316_v33 = vld [vmem:[%s639_s0 + $0x2] ss:$16 sm:%s114_s14]   ;;  %s191_s29 = smov 12  ;;  %s163_s5 = smov 3 }
  0x10   :  { %v154_v34 = vsel %vm42_vm2, %v324_v31, %v149_v32  ;;  %v317_v35 = vld [vmem:[%s639_s0 + $0x2] ss:$16 sm:%s117_s15]   ;;  %s166_s6 = smov 12  ;;  %s360_s7 = smov 64   ;;  %v333_v40 = vld [vmem:[%s639_s0 + $0x3e] ss:$16 sm:%s188_s28]  }
  0x11   :  { %v318_v36 = vld [vmem:[%s639_s0 + $0x2] ss:$16 sm:%s122_s25]   ;;  %155 = vrot.lane.b32.xlu1 %v154_v34, %s360_s7  ;;  %v120_v37 = vsel %vm32_vm0, %v317_v35, %v316_v33  ;;  %s171_s10 = smov 48  ;;  %s176_s15 = smov 192 }
  0x12   :  { %v319_v38 = vld [vmem:[%s639_s0 + $0x28a] ss:$-92 sm:%s127_s26]   ;;  %v125_v39 = vsel %vm37_vm1, %v318_v36, %v120_v37  ;;  %s225_s20 = smov 3  ;;  %s228_s21 = smov 12 }
  0x13   :  { %v334_v41 = vld [vmem:[%s639_s0 + $0x3e] ss:$16 sm:%s191_s29]   ;;  %v130_v42 = vsel %vm42_vm2, %v319_v38, %v125_v39  ;;  %v327_v44 = vld [vmem:[%s639_s0 + $0x2a] ss:$16 sm:%s163_s5]   ;;  %s233_s25 = smov 48  ;;  %s238_s26 = smov 192 }
  0x14   :  { %v194_v43 = vsel %vm32_vm0, %v334_v41, %v333_v40  ;;  %v328_v45 = vld [vmem:[%s639_s0 + $0x2a] ss:$16 sm:%s166_s6]   ;;  %131 = vrot.lane.b32.xlu0 %v130_v42, %s360_s7  ;;  %s201_s28 = smov 3  ;;  %s204_s4 = smov 12 }
  0x15   :  { %v169_v46 = vsel %vm32_vm0, %v328_v45, %v327_v44  ;;  %v329_v47 = vld [vmem:[%s639_s0 + $0x1da] ss:$-92 sm:%s171_s10]   ;;  %195 = vrot.lane.b32.xlu1 %v194_v43, %s360_s7  ;;  %s209_s5 = smov 48  ;;  %s214_s11 = smov 192 }
  0x16   :  { %v174_v48 = vsel %vm37_vm1, %v329_v47, %v169_v46  ;;  %v330_v49 = vld [vmem:[%s639_s0 - $0x42] ss:$16 sm:%s176_s15]   ;;  %v341_v51 = vld [vmem:[%s639_s0 + $0x15] ss:$16 sm:%s225_s20]   ;;  %s275_s13 = smov 3  ;;  %s278_s14 = smov 12 }
  0x17   :  { %v179_v50 = vsel %vm42_vm2, %v330_v49, %v174_v48  ;;  %v342_v52 = vld [vmem:[%s639_s0 + $0x15] ss:$16 sm:%s228_s21]   ;;  %v344_v55 = vld [vmem:[%s639_s0 - $0x57] ss:$16 sm:%s238_s26]   ;;  %s250_s19 = smov 3  ;;  %s253_s20 = smov 12 }
  0x18   :  { %v231_v53 = vsel %vm32_vm0, %v342_v52, %v341_v51  ;;  %v343_v54 = vld [vmem:[%s639_s0 + $0x15] ss:$16 sm:%s233_s25]   ;;  %180 = vrot.lane.b32.xlu0 %v179_v50, %s360_s7  ;;  %s361_s21 = smov 32   ;;  %s258_s25 = smov 48 }
  0x19   :  { %v236_v56 = vsel %vm37_vm1, %v343_v54, %v231_v53  ;;  %v336_v57 = vld [vmem:[%s639_s0 + $0x1] ss:$16 sm:%s201_s28]   ;;  %v294_v63 = vld [vmem:[%s639_s0 + $0x60] ss:$4 sm:$0xf]   ;;  %s263_s2 = smov 192 }
  0x1a   :  { %v241_v58 = vsel %vm42_vm2, %v344_v55, %v236_v56  ;;  %v337_v59 = vld [vmem:[%s639_s0 + $0x1] ss:$16 sm:%s204_s4]   ;;  %v353_v1 = vld [vmem:[%s639_s0 + $0x3d] ss:$16 sm:%s275_s13]  }
  0x1b   :  { %v338_v60 = vld [vmem:[%s639_s0 + $0x1] ss:$16 sm:%s209_s5]   ;;  %242 = vrot.lane.b32.xlu1 %v241_v58, %s361_s21  ;;  %v207_v61 = vsel %vm32_vm0, %v337_v59, %v336_v57  ;;  %295 = vst.msk [vmem:[%s640_s1 + $0x6] ss:$8 sm:$0xf] %vm3_vm3, %v294_v63  }
  0x1c   :  { %v339_v62 = vld [vmem:[%s639_s0 + $0x289] ss:$-92 sm:%s214_s11]   ;;  %v212_v0 = vsel %vm37_vm1, %v338_v60, %v207_v61 }
  0x1d   :  { %v354_v2 = vld [vmem:[%s639_s0 + $0x3d] ss:$16 sm:%s278_s14]   ;;  %v217_v3 = vsel %vm42_vm2, %v339_v62, %v212_v0  ;;  %v347_v5 = vld [vmem:[%s639_s0 + $0x29] ss:$16 sm:%s250_s19]  }
  0x1e   :  { %v281_v4 = vsel %vm32_vm0, %v354_v2, %v353_v1  ;;  %v348_v6 = vld [vmem:[%s639_s0 + $0x29] ss:$16 sm:%s253_s20]   ;;  %218 = vrot.lane.b32.xlu0 %v217_v3, %s361_s21 }
  0x1f   :  { %v256_v7 = vsel %vm32_vm0, %v348_v6, %v347_v5  ;;  %v349_v8 = vld [vmem:[%s639_s0 + $0x1d9] ss:$-92 sm:%s258_s25]   ;;  %282 = vrot.lane.b32.xlu1 %v281_v4, %s361_s21 }
  0x20   :  { %v261_v9 = vsel %vm37_vm1, %v349_v8, %v256_v7  ;;  %v350_v10 = vld [vmem:[%s639_s0 - $0x43] ss:$16 sm:%s263_s2]  }
  0x21   :  { %v266_v11 = vsel %vm42_vm2, %v350_v10, %v261_v9 }
  0x22   :  { %267 = vrot.lane.b32.xlu0 %v266_v11, %s361_s21 }
  0x76   :  { %v109_v12 = vpop.permute.xlu1 %108  }
  0x77   :  { %315 = vst.msk [vmem:[%s640_s1 + $0x1b] sm:$0xf] %vm46_vm4, %v109_v12  }
  0x79   :  { %v45_v13 = vpop.permute.xlu0 %44  }
  0x7a   :  { %300 = vst.msk [vmem:[%s640_s1 + $0x1] sm:$0x80] %vm46_vm4, %v45_v13   ;;  %47 = vst.msk [vmem:[%s640_s1] sm:$0x7f] %vm46_vm4, %v45_v13  }
  0x7d   :  { %v94_v14 = vpop.permute.xlu1 %93  }
  0x7e   :  { %311 = vst.msk [vmem:[%s640_s1 + $0x12] sm:$0x1f] %vm46_vm4, %v94_v14   ;;  %312 = vst.msk [vmem:[%s640_s1 + $0x13] sm:$0xe0] %vm46_vm4, %v94_v14  }
  0x80   :  { %v69_v15 = vpop.permute.xlu0 %68  }
  0x81   :  { %306 = vst.msk [vmem:[%s640_s1 + $0xa] sm:$0xc0] %vm46_vm4, %v69_v15   ;;  %305 = vst.msk [vmem:[%s640_s1 + $0x9] sm:$0x3f] %vm46_vm4, %v69_v15  }
  0x83   :  { %v156_v16 = vpop.permute.xlu1 %155  }
  0x84   :  { %325 = vst.msk [vmem:[%s640_s1 + $0x9] sm:$0x3f] %vm133_vm5, %v156_v16   ;;  %326 = vst.msk [vmem:[%s640_s1 + $0xa] sm:$0xc0] %vm133_vm5, %v156_v16  }
  0x86   :  { %v132_v17 = vpop.permute.xlu0 %131  }
  0x87   :  { %134 = vst.msk [vmem:[%s640_s1] sm:$0x7f] %vm133_vm5, %v132_v17   ;;  %320 = vst.msk [vmem:[%s640_s1 + $0x1] sm:$0x80] %vm133_vm5, %v132_v17   ;;  %v196_v18 = vpop.permute.xlu1 %195  }
  0x88   :  { %335 = vst.msk [vmem:[%s640_s1 + $0x1b] sm:$0xf] %vm133_vm5, %v196_v18  }
  0x8a   :  { %v181_v19 = vpop.permute.xlu0 %180  }
  0x8b   :  { %331 = vst.msk [vmem:[%s640_s1 + $0x12] sm:$0x1f] %vm133_vm5, %v181_v19   ;;  %332 = vst.msk [vmem:[%s640_s1 + $0x13] sm:$0xe0] %vm133_vm5, %v181_v19  }
  0x8d   :  { %v243_v20 = vpop.permute.xlu1 %242  }
  0x8e   :  { %345 = vst.msk [vmem:[%s640_s1 + $0x9] sm:$0x3f] %vm220_vm6, %v243_v20   ;;  %346 = vst.msk [vmem:[%s640_s1 + $0xa] sm:$0xc0] %vm220_vm6, %v243_v20  }
  0x90   :  { %v219_v21 = vpop.permute.xlu0 %218  }
  0x91   :  { %221 = vst.msk [vmem:[%s640_s1] sm:$0x7f] %vm220_vm6, %v219_v21   ;;  %340 = vst.msk [vmem:[%s640_s1 + $0x1] sm:$0x80] %vm220_vm6, %v219_v21   ;;  %v283_v22 = vpop.permute.xlu1 %282  }
  0x92   :  { %355 = vst.msk [vmem:[%s640_s1 + $0x1b] sm:$0xf] %vm220_vm6, %v283_v22  }
  0x94   :  { %v268_v23 = vpop.permute.xlu0 %267  }
  0x95   :  { %351 = vst.msk [vmem:[%s640_s1 + $0x12] sm:$0x1f] %vm220_vm6, %v268_v23   ;;  %352 = vst.msk [vmem:[%s640_s1 + $0x13] sm:$0xe0] %vm220_vm6, %v268_v23  }

// kernel: tvim_block_forward.11
= control target key start
LH: loop header
LB: loop body
LE: loop exit
PB: predicated region body
PF: predicated region fallthrough
CT: control target
= control target key end

     0   :  { %s924_s12 = smov 0   ;;  %s1194_s0 = inlined_call_operand.vmem [shape: bf16[2,22,512], index: 0, kind: input, shape index: {}]   ;;  %s1195_s1 = inlined_call_operand.vmem [shape: f32[7,512], index: 1, kind: input, shape index: {}]   ;;  %s1196_s2 = inlined_call_operand.vmem [shape: f32[1,512], index: 2, kind: input, shape index: {}]   ;;  %s1197_s3 = inlined_call_operand.vmem [shape: bf16[2,16,512], index: 3, kind: output, shape index: {}]  }
   0x1 LB: > { %s836_s13 = sadd.s32 4294967295, %s902_s12   ;;  %p840_p0 = scmp.ge.s32.totalorder %s902_s12, 1  ;;  %s902_s12 = sphi %s924_s12, %s13_s12  }
   0x2   : > { %p137_p1 = scmp.lt.s32.totalorder %s902_s12, 3 }
   0x4   : > { %p138_p2 = pnand %p840_p0, %p137_p1 }
   0x5   : > { %p161_p3 = scmp.lt.s32.totalorder (!%p138_p2), %s836_s13, 1  ;;  %v193_v0 = vlaneseq (!%p138_p2)  ;;  %v937_v2 = vld [vmem:[%s1195_s1] sm:$0x7f] (!%p138_p2)  ;;  %v942_v3 = vld [vmem:[%s1195_s1 + $0x8] sm:$0x7f] (!%p138_p2)  ;;  %vm265_vm0 = vcmask (!%p138_p2), 1046528  }
   0x6   : > { %141 = sbr.rel (%p138_p2) target bundleno = 129 (0x81), region = 32  ;;  %v947_v4 = vld [vmem:[%s1195_s1 + $0x10] sm:$0x7f] (!%p138_p2)  ;;  %v953_v5 = vld [vmem:[%s1195_s1 + $0x18] sm:$0x7f] (!%p138_p2)  ;;  %vm342_vm1 = vcmask (!%p138_p2), 1045504  }
   0x7   : > { %v194_v1 = vshrl.u32 (!%p138_p2), %v193_v0, 7  ;;  %vm419_vm2 = vcmask (!%p138_p2), 1044480   ;;  %vm496_vm3 = vcmask (!%p138_p2), 1043456   ;;  %vm573_vm4 = vcmask (!%p138_p2), 1042432  }
   0x8   : > { %vm650_vm5 = vcmask (!%p138_p2), 1041408  }
   0x9   : > { %v955_v6 = vsub.s32 (!%p138_p2), 0, %v194_v1  ;;  %v957_v7 = vsub.s32 (!%p138_p2), 1, %v194_v1  ;;  %v959_v8 = vsub.s32 (!%p138_p2), 2, %v194_v1  ;;  %v961_v9 = vsub.s32 (!%p138_p2), 3, %v194_v1 }
   0xa   : > { %v963_v10 = vsub.s32 (!%p138_p2), 4, %v194_v1  ;;  %v965_v11 = vsub.s32 (!%p138_p2), 5, %v194_v1  ;;  %v967_v12 = vsub.s32 (!%p138_p2), 6, %v194_v1 }
   0xb   : > { %v196_v13 = vrot.slane (!%p138_p2), %v937_v2, %v955_v6  ;;  %v200_v14 = vrot.slane (!%p138_p2), %v942_v3, %v955_v6  ;;  %v204_v15 = vrot.slane (!%p138_p2), %v947_v4, %v955_v6  ;;  %v208_v16 = vrot.slane (!%p138_p2), %v953_v5, %v955_v6 }
   0xc   : > { %v228_v20 = vrot.slane (!%p138_p2), %v937_v2, %v957_v7  ;;  %v232_v21 = vrot.slane (!%p138_p2), %v942_v3, %v957_v7  ;;  %v236_v22 = vrot.slane (!%p138_p2), %v947_v4, %v957_v7  ;;  %v240_v23 = vrot.slane (!%p138_p2), %v953_v5, %v957_v7 }
   0xd   : > { %s1199_s13 = smov (!%p161_p3, %s836_s13), 1 }
   0xe   : > { %s855_s20 = smul.u32 48, %s1199_s13  ;;  %s854_s28 = sshll.u32 %s1199_s13, 5 }
   0xf   : > { %s170_s4 = scalar_lea.vmem %s1197_s3, %s854_s28 }
  0x10   : > { %s165_s25 = scalar_lea.vmem %s1194_s0, %s855_s20 }
  0x11   : > { %v171_v17 = vld [vmem:[%s165_s25] sm:$0xff]  ;;  %v172_v18 = vld [vmem:[%s165_s25 + $0x8] sm:$0xff]  ;;  %v173_v19 = vld [vmem:[%s165_s25 + $0x10] sm:$0xff] }
  0x12   : > { %v174_v24 = vld [vmem:[%s165_s25 + $0x18] sm:$0xff]  ;;  %v175_v25 = vld [vmem:[%s165_s25 + $0x20] sm:$0x77]  ;;  %v176_v26 = vld [vmem:[%s165_s25 + $0x28] sm:$0x77]  ;;  %v988_v27 = vunpack.c.l.bf16 %v171_v17  ;;  %v990_v28 = vunpack.c.h.bf16 %v171_v17  ;;  %v992_v29 = vunpack.c.l.bf16 %v172_v18  ;;  %v994_v30 = vunpack.c.h.bf16 %v172_v18 }
  0x13   : > { %v996_v31 = vunpack.c.l.bf16 %v173_v19  ;;  %v998_v32 = vunpack.c.h.bf16 %v173_v19  ;;  %v1000_v33 = vunpack.c.l.bf16 %v174_v24  ;;  %v1002_v34 = vunpack.c.h.bf16 %v174_v24 }
  0x14   : > { %v1004_v35 = vunpack.c.l.bf16 %v175_v25  ;;  %v1006_v36 = vunpack.c.h.bf16 %v175_v25  ;;  %v1008_v37 = vunpack.c.l.bf16 %v176_v26  ;;  %v1010_v38 = vunpack.c.h.bf16 %v176_v26 }
  0x15   : > { %v209_v39 = vmul.f32 %v196_v13, %v988_v27  ;;  %v210_v40 = vmul.f32 %v200_v14, %v990_v28  ;;  %v211_v41 = vmul.f32 %v204_v15, %v992_v29  ;;  %v212_v42 = vmul.f32 %v208_v16, %v994_v30 }
  0x16   : > { %v213_v43 = vmul.f32 %v196_v13, %v996_v31  ;;  %v214_v44 = vmul.f32 %v200_v14, %v998_v32  ;;  %v215_v45 = vmul.f32 %v204_v15, %v1000_v33  ;;  %v216_v46 = vmul.f32 %v208_v16, %v1002_v34 }
  0x17   : > { %v241_v47 = vmul.f32 %v228_v20, %v988_v27  ;;  %v242_v48 = vmul.f32 %v232_v21, %v990_v28  ;;  %v243_v49 = vmul.f32 %v236_v22, %v992_v29  ;;  %v244_v50 = vmul.f32 %v240_v23, %v994_v30 }
  0x18   : > { %v245_v51 = vmul.f32 %v228_v20, %v996_v31  ;;  %v246_v52 = vmul.f32 %v232_v21, %v998_v32  ;;  %v247_v53 = vmul.f32 %v236_v22, %v1000_v33  ;;  %v248_v54 = vmul.f32 %v240_v23, %v1002_v34 }
  0x19   : > { %v249_v55 = vmul.f32 %v228_v20, %v1004_v35  ;;  %v250_v56 = vmul.f32 %v232_v21, %v1006_v36  ;;  %v251_v57 = vmul.f32 %v236_v22, %v1008_v37  ;;  %v252_v58 = vmul.f32 %v240_v23, %v1010_v38 }
  0x1a   : > { %v266_v59 = vrot.slane %v241_v47, 1  ;;  %v267_v60 = vrot.slane %v245_v51, 1  ;;  %v269_v61 = vrot.slane %v242_v48, 1  ;;  %v270_v62 = vrot.slane %v246_v52, 1 }
  0x1b   : > { %v272_v63 = vrot.slane %v243_v49, 1  ;;  %v273_v0 = vrot.slane %v247_v53, 1  ;;  %v275_v1 = vrot.slane %v244_v50, 1  ;;  %v276_v13 = vrot.slane %v248_v54, 1 }
  0x1c   : > { %v268_v14 = vsel %vm265_vm0, %v266_v59, %v267_v60  ;;  %v271_v15 = vsel %vm265_vm0, %v269_v61, %v270_v62  ;;  %v278_v16 = vrot.slane %v249_v55, 1  ;;  %v280_v17 = vrot.slane %v250_v56, 1 }
  0x1d   : > { %v274_v18 = vsel %vm265_vm0, %v272_v63, %v273_v0  ;;  %v277_v19 = vsel %vm265_vm0, %v275_v1, %v276_v13  ;;  %v282_v20 = vrot.slane %v251_v57, 1  ;;  %v284_v21 = vrot.slane %v252_v58, 1 }
  0x1e   : > { %v279_v22 = vsel %vm265_vm0, %v267_v60, %v278_v16  ;;  %v281_v23 = vsel %vm265_vm0, %v270_v62, %v280_v17  ;;  %v294_v24 = vadd.f32 %v268_v14, %v209_v39  ;;  %v295_v25 = vadd.f32 %v271_v15, %v210_v40 }
  0x1f   : > { %v283_v26 = vsel %vm265_vm0, %v273_v0, %v282_v20  ;;  %v285_v47 = vsel %vm265_vm0, %v276_v13, %v284_v21  ;;  %v296_v48 = vadd.f32 %v274_v18, %v211_v41  ;;  %v297_v49 = vadd.f32 %v277_v19, %v212_v42 }
  0x20   : > { %v298_v50 = vadd.f32 %v279_v22, %v213_v43  ;;  %v299_v51 = vadd.f32 %v281_v23, %v214_v44  ;;  %v300_v52 = vadd.f32 %v283_v26, %v215_v45  ;;  %v301_v53 = vadd.f32 %v285_v47, %v216_v46 }
  0x21   : > { %v305_v54 = vrot.slane %v937_v2, %v959_v8  ;;  %v309_v55 = vrot.slane %v942_v3, %v959_v8  ;;  %v313_v39 = vrot.slane %v947_v4, %v959_v8  ;;  %v317_v40 = vrot.slane %v953_v5, %v959_v8 }
  0x22   : > { %v382_v41 = vrot.slane %v937_v2, %v961_v9  ;;  %v386_v42 = vrot.slane %v942_v3, %v961_v9  ;;  %v390_v43 = vrot.slane %v947_v4, %v961_v9  ;;  %v394_v44 = vrot.slane %v953_v5, %v961_v9 }
  0x23   : > { %v318_v45 = vmul.f32 %v305_v54, %v988_v27  ;;  %v319_v46 = vmul.f32 %v309_v55, %v990_v28  ;;  %v320_v56 = vmul.f32 %v313_v39, %v992_v29  ;;  %v321_v57 = vmul.f32 %v317_v40, %v994_v30 }
  0x24   : > { %v322_v58 = vmul.f32 %v305_v54, %v996_v31  ;;  %v323_v59 = vmul.f32 %v309_v55, %v998_v32  ;;  %v324_v60 = vmul.f32 %v313_v39, %v1000_v33  ;;  %v325_v61 = vmul.f32 %v317_v40, %v1002_v34 }
  0x25   : > { %v326_v62 = vmul.f32 %v305_v54, %v1004_v35  ;;  %v327_v63 = vmul.f32 %v309_v55, %v1006_v36  ;;  %v328_v0 = vmul.f32 %v313_v39, %v1008_v37  ;;  %v329_v1 = vmul.f32 %v317_v40, %v1010_v38 }
  0x26   : > { %v343_v13 = vrot.slane %v318_v45, 2  ;;  %v344_v14 = vrot.slane %v322_v58, 2  ;;  %v346_v15 = vrot.slane %v319_v46, 2  ;;  %v347_v16 = vrot.slane %v323_v59, 2 }
  0x27   : > { %v349_v17 = vrot.slane %v320_v56, 2  ;;  %v350_v18 = vrot.slane %v324_v60, 2  ;;  %v352_v19 = vrot.slane %v321_v57, 2  ;;  %v353_v20 = vrot.slane %v325_v61, 2 }
  0x28   : > { %v345_v21 = vsel %vm342_vm1, %v343_v13, %v344_v14  ;;  %v348_v22 = vsel %vm342_vm1, %v346_v15, %v347_v16  ;;  %v355_v23 = vrot.slane %v326_v62, 2  ;;  %v357_v26 = vrot.slane %v327_v63, 2 }
  0x29   : > { %v351_v47 = vsel %vm342_vm1, %v349_v17, %v350_v18  ;;  %v354_v54 = vsel %vm342_vm1, %v352_v19, %v353_v20  ;;  %v359_v55 = vrot.slane %v328_v0, 2  ;;  %v361_v39 = vrot.slane %v329_v1, 2 }
  0x2a   : > { %v356_v40 = vsel %vm342_vm1, %v344_v14, %v355_v23  ;;  %v358_v45 = vsel %vm342_vm1, %v347_v16, %v357_v26  ;;  %v371_v46 = vadd.f32 %v345_v21, %v294_v24  ;;  %v372_v56 = vadd.f32 %v348_v22, %v295_v25 }
  0x2b   : > { %v360_v57 = vsel %vm342_vm1, %v350_v18, %v359_v55  ;;  %v362_v58 = vsel %vm342_vm1, %v353_v20, %v361_v39  ;;  %v373_v59 = vadd.f32 %v351_v47, %v296_v48  ;;  %v374_v60 = vadd.f32 %v354_v54, %v297_v49 }
  0x2c   : > { %v375_v61 = vadd.f32 %v356_v40, %v298_v50  ;;  %v376_v62 = vadd.f32 %v358_v45, %v299_v51  ;;  %v377_v63 = vadd.f32 %v360_v57, %v300_v52  ;;  %v378_v13 = vadd.f32 %v362_v58, %v301_v53 }
  0x2d   : > { %v395_v15 = vmul.f32 %v382_v41, %v988_v27  ;;  %v396_v0 = vmul.f32 %v386_v42, %v990_v28  ;;  %v397_v1 = vmul.f32 %v390_v43, %v992_v29  ;;  %v398_v14 = vmul.f32 %v394_v44, %v994_v30 }
  0x2e   : > { %v399_v24 = vmul.f32 %v382_v41, %v996_v31  ;;  %v400_v25 = vmul.f32 %v386_v42, %v998_v32  ;;  %v401_v16 = vmul.f32 %v390_v43, %v1000_v33  ;;  %v402_v48 = vmul.f32 %v394_v44, %v1002_v34 }
  0x2f   : > { %v403_v49 = vmul.f32 %v382_v41, %v1004_v35  ;;  %v404_v50 = vmul.f32 %v386_v42, %v1006_v36  ;;  %v405_v51 = vmul.f32 %v390_v43, %v1008_v37  ;;  %v406_v52 = vmul.f32 %v394_v44, %v1010_v38 }
  0x30   : > { %v420_v53 = vrot.slane %v395_v15, 3  ;;  %v421_v17 = vrot.slane %v399_v24, 3  ;;  %v423_v18 = vrot.slane %v396_v0, 3  ;;  %v424_v19 = vrot.slane %v400_v25, 3 }
  0x31   : > { %v426_v20 = vrot.slane %v397_v1, 3  ;;  %v427_v21 = vrot.slane %v401_v16, 3  ;;  %v429_v22 = vrot.slane %v398_v14, 3  ;;  %v430_v23 = vrot.slane %v402_v48, 3 }
  0x32   : > { %v422_v26 = vsel %vm419_vm2, %v420_v53, %v421_v17  ;;  %v425_v47 = vsel %vm419_vm2, %v423_v18, %v424_v19  ;;  %v432_v54 = vrot.slane %v403_v49, 3  ;;  %v434_v41 = vrot.slane %v404_v50, 3 }
  0x33   : > { %v428_v42 = vsel %vm419_vm2, %v426_v20, %v427_v21  ;;  %v431_v43 = vsel %vm419_vm2, %v429_v22, %v430_v23  ;;  %v436_v55 = vrot.slane %v405_v51, 3  ;;  %v438_v44 = vrot.slane %v406_v52, 3 }
  0x34   : > { %v433_v39 = vsel %vm419_vm2, %v421_v17, %v432_v54  ;;  %v435_v40 = vsel %vm419_vm2, %v424_v19, %v434_v41  ;;  %v448_v45 = vadd.f32 %v422_v26, %v371_v46  ;;  %v449_v57 = vadd.f32 %v425_v47, %v372_v56 }
  0x35   : > { %v437_v58 = vsel %vm419_vm2, %v427_v21, %v436_v55  ;;  %v439_v15 = vsel %vm419_vm2, %v430_v23, %v438_v44  ;;  %v450_v0 = vadd.f32 %v428_v42, %v373_v59  ;;  %v451_v1 = vadd.f32 %v431_v43, %v374_v60 }
  0x36   : > { %v452_v14 = vadd.f32 %v433_v39, %v375_v61  ;;  %v453_v24 = vadd.f32 %v435_v40, %v376_v62  ;;  %v454_v25 = vadd.f32 %v437_v58, %v377_v63  ;;  %v455_v16 = vadd.f32 %v439_v15, %v378_v13 }
  0x37   : > { %v459_v48 = vrot.slane %v937_v2, %v963_v10  ;;  %v463_v49 = vrot.slane %v942_v3, %v963_v10  ;;  %v467_v46 = vrot.slane %v947_v4, %v963_v10  ;;  %v471_v56 = vrot.slane %v953_v5, %v963_v10 }
  0x38   : > { %v536_v59 = vrot.slane %v937_v2, %v965_v11  ;;  %v540_v60 = vrot.slane %v942_v3, %v965_v11  ;;  %v544_v61 = vrot.slane %v947_v4, %v965_v11  ;;  %v548_v62 = vrot.slane %v953_v5, %v965_v11 }
  0x39   : > { %v472_v63 = vmul.f32 %v459_v48, %v988_v27  ;;  %v473_v13 = vmul.f32 %v463_v49, %v990_v28  ;;  %v474_v50 = vmul.f32 %v467_v46, %v992_v29  ;;  %v475_v10 = vmul.f32 %v471_v56, %v994_v30 }
  0x3a   : > { %v476_v51 = vmul.f32 %v459_v48, %v996_v31  ;;  %v477_v52 = vmul.f32 %v463_v49, %v998_v32  ;;  %v478_v53 = vmul.f32 %v467_v46, %v1000_v33  ;;  %v479_v17 = vmul.f32 %v471_v56, %v1002_v34 }
  0x3b   : > { %v480_v18 = vmul.f32 %v459_v48, %v1004_v35  ;;  %v481_v11 = vmul.f32 %v463_v49, %v1006_v36  ;;  %v482_v19 = vmul.f32 %v467_v46, %v1008_v37  ;;  %v483_v20 = vmul.f32 %v471_v56, %v1010_v38 }
  0x3c   : > { %v497_v21 = vrot.slane %v472_v63, 4  ;;  %v498_v22 = vrot.slane %v476_v51, 4  ;;  %v500_v23 = vrot.slane %v473_v13, 4  ;;  %v501_v26 = vrot.slane %v477_v52, 4 }
  0x3d   : > { %v503_v47 = vrot.slane %v474_v50, 4  ;;  %v504_v54 = vrot.slane %v478_v53, 4  ;;  %v506_v41 = vrot.slane %v475_v10, 4  ;;  %v507_v42 = vrot.slane %v479_v17, 4 }
  0x3e   : > { %v499_v43 = vsel %vm496_vm3, %v497_v21, %v498_v22  ;;  %v502_v55 = vsel %vm496_vm3, %v500_v23, %v501_v26  ;;  %v509_v44 = vrot.slane %v480_v18, 4  ;;  %v511_v39 = vrot.slane %v481_v11, 4 }
  0x3f   : > { %v505_v40 = vsel %vm496_vm3, %v503_v47, %v504_v54  ;;  %v508_v58 = vsel %vm496_vm3, %v506_v41, %v507_v42  ;;  %v513_v15 = vrot.slane %v482_v19, 4  ;;  %v515_v48 = vrot.slane %v483_v20, 4 }
  0x40   : > { %v510_v49 = vsel %vm496_vm3, %v498_v22, %v509_v44  ;;  %v512_v46 = vsel %vm496_vm3, %v501_v26, %v511_v39  ;;  %v525_v56 = vadd.f32 %v499_v43, %v448_v45  ;;  %v526_v63 = vadd.f32 %v502_v55, %v449_v57 }
  0x41   : > { %v514_v13 = vsel %vm496_vm3, %v504_v54, %v513_v15  ;;  %v516_v50 = vsel %vm496_vm3, %v507_v42, %v515_v48  ;;  %v527_v10 = vadd.f32 %v505_v40, %v450_v0  ;;  %v528_v51 = vadd.f32 %v508_v58, %v451_v1 }
  0x42   : > { %v529_v52 = vadd.f32 %v510_v49, %v452_v14  ;;  %v530_v53 = vadd.f32 %v512_v46, %v453_v24  ;;  %v531_v17 = vadd.f32 %v514_v13, %v454_v25  ;;  %v532_v18 = vadd.f32 %v516_v50, %v455_v16 }
  0x43   : > { %v549_v11 = vmul.f32 %v536_v59, %v988_v27  ;;  %v550_v19 = vmul.f32 %v540_v60, %v990_v28  ;;  %v551_v20 = vmul.f32 %v544_v61, %v992_v29  ;;  %v552_v21 = vmul.f32 %v548_v62, %v994_v30 }
  0x44   : > { %v553_v45 = vmul.f32 %v536_v59, %v996_v31  ;;  %v554_v57 = vmul.f32 %v540_v60, %v998_v32  ;;  %v555_v22 = vmul.f32 %v544_v61, %v1000_v33  ;;  %v556_v0 = vmul.f32 %v548_v62, %v1002_v34 }
  0x45   : > { %v557_v1 = vmul.f32 %v536_v59, %v1004_v35  ;;  %v558_v14 = vmul.f32 %v540_v60, %v1006_v36  ;;  %v559_v24 = vmul.f32 %v544_v61, %v1008_v37  ;;  %v560_v25 = vmul.f32 %v548_v62, %v1010_v38 }
  0x46   : > { %v574_v16 = vrot.slane %v549_v11, 5  ;;  %v575_v23 = vrot.slane %v553_v45, 5  ;;  %v577_v26 = vrot.slane %v550_v19, 5  ;;  %v578_v47 = vrot.slane %v554_v57, 5  ;;  %v687_v19 = vld [vmem:[%s1196_s2] sm:$0xf] }
  0x47   : > { %v580_v54 = vrot.slane %v551_v20, 5  ;;  %v581_v41 = vrot.slane %v555_v22, 5  ;;  %v583_v42 = vrot.slane %v552_v21, 5  ;;  %v584_v43 = vrot.slane %v556_v0, 5 }
  0x48   : > { %v576_v55 = vsel %vm573_vm4, %v574_v16, %v575_v23  ;;  %v579_v44 = vsel %vm573_vm4, %v577_v26, %v578_v47  ;;  %v586_v39 = vrot.slane %v557_v1, 5  ;;  %v588_v59 = vrot.slane %v558_v14, 5 }
  0x49   : > { %v582_v60 = vsel %vm573_vm4, %v580_v54, %v581_v41  ;;  %v585_v61 = vsel %vm573_vm4, %v583_v42, %v584_v43  ;;  %v590_v40 = vrot.slane %v559_v24, 5  ;;  %v592_v62 = vrot.slane %v560_v25, 5 }
  0x4a   : > { %v587_v58 = vsel %vm573_vm4, %v575_v23, %v586_v39  ;;  %v589_v15 = vsel %vm573_vm4, %v578_v47, %v588_v59  ;;  %v602_v48 = vadd.f32 %v576_v55, %v525_v56  ;;  %v603_v49 = vadd.f32 %v579_v44, %v526_v63 }
  0x4b   : > { %v591_v46 = vsel %vm573_vm4, %v581_v41, %v590_v40  ;;  %v593_v13 = vsel %vm573_vm4, %v584_v43, %v592_v62  ;;  %v604_v50 = vadd.f32 %v582_v60, %v527_v10  ;;  %v605_v11 = vadd.f32 %v585_v61, %v528_v51 }
  0x4c   : > { %v606_v20 = vadd.f32 %v587_v58, %v529_v52  ;;  %v607_v21 = vadd.f32 %v589_v15, %v530_v53  ;;  %v608_v45 = vadd.f32 %v591_v46, %v531_v17  ;;  %v609_v57 = vadd.f32 %v593_v13, %v532_v18 }
  0x4d   : > { %v613_v22 = vrot.slane %v937_v2, %v967_v12  ;;  %v617_v56 = vrot.slane %v942_v3, %v967_v12  ;;  %v621_v63 = vrot.slane %v947_v4, %v967_v12  ;;  %v625_v10 = vrot.slane %v953_v5, %v967_v12 }
  0x4e   : > { %v692_v51 = vrot.slane %v687_v19, %v955_v6  ;;  %v696_v0 = vrot.slane %v687_v19, %v957_v7  ;;  %v700_v52 = vrot.slane %v687_v19, %v959_v8  ;;  %v704_v53 = vrot.slane %v687_v19, %v961_v9 }
  0x4f   : > { %v626_v17 = vmul.f32 %v613_v22, %v988_v27  ;;  %v627_v2 = vmul.f32 %v617_v56, %v990_v28  ;;  %v628_v3 = vmul.f32 %v621_v63, %v992_v29  ;;  %v629_v18 = vmul.f32 %v625_v10, %v994_v30 }
  0x50   : > { %v630_v4 = vmul.f32 %v613_v22, %v996_v31  ;;  %v631_v5 = vmul.f32 %v617_v56, %v998_v32  ;;  %v632_v6 = vmul.f32 %v621_v63, %v1000_v33  ;;  %v633_v7 = vmul.f32 %v625_v10, %v1002_v34 }
  0x51   : > { %v634_v8 = vmul.f32 %v613_v22, %v1004_v35  ;;  %v635_v9 = vmul.f32 %v617_v56, %v1006_v36  ;;  %v636_v12 = vmul.f32 %v621_v63, %v1008_v37  ;;  %v637_v27 = vmul.f32 %v625_v10, %v1010_v38 }
  0x52   : > { %v651_v28 = vrot.slane %v626_v17, 6  ;;  %v652_v29 = vrot.slane %v630_v4, 6  ;;  %v654_v1 = vrot.slane %v627_v2, 6  ;;  %v655_v30 = vrot.slane %v631_v5, 6 }
  0x53   : > { %v657_v14 = vrot.slane %v628_v3, 6  ;;  %v658_v31 = vrot.slane %v632_v6, 6  ;;  %v660_v24 = vrot.slane %v629_v18, 6  ;;  %v661_v32 = vrot.slane %v633_v7, 6 }
  0x54   : > { %v653_v33 = vsel %vm650_vm5, %v651_v28, %v652_v29  ;;  %v656_v34 = vsel %vm650_vm5, %v654_v1, %v655_v30  ;;  %v663_v25 = vrot.slane %v634_v8, 6  ;;  %v665_v35 = vrot.slane %v635_v9, 6 }
  0x55   : > { %v659_v36 = vsel %vm650_vm5, %v657_v14, %v658_v31  ;;  %v662_v37 = vsel %vm650_vm5, %v660_v24, %v661_v32  ;;  %v667_v16 = vrot.slane %v636_v12, 6  ;;  %v669_v38 = vrot.slane %v637_v27, 6 }
  0x56   : > { %v664_v23 = vsel %vm650_vm5, %v652_v29, %v663_v25  ;;  %v666_v26 = vsel %vm650_vm5, %v655_v30, %v665_v35  ;;  %v679_v47 = vadd.f32 %v653_v33, %v602_v48  ;;  %v680_v54 = vadd.f32 %v656_v34, %v603_v49 }
  0x57   : > { %v668_v41 = vsel %vm650_vm5, %v658_v31, %v667_v16  ;;  %v670_v42 = vsel %vm650_vm5, %v661_v32, %v669_v38  ;;  %v681_v43 = vadd.f32 %v659_v36, %v604_v50  ;;  %v682_v55 = vadd.f32 %v662_v37, %v605_v11 }
  0x58   : > { %v683_v44 = vadd.f32 %v664_v23, %v606_v20  ;;  %v684_v39 = vadd.f32 %v666_v26, %v607_v21  ;;  %v685_v59 = vadd.f32 %v668_v41, %v608_v45  ;;  %v686_v60 = vadd.f32 %v670_v42, %v609_v57 }
  0x59   : > { %v709_v61 = vadd.f32 %v692_v51, %v679_v47  ;;  %v710_v40 = vadd.f32 %v696_v0, %v680_v54  ;;  %v711_v62 = vadd.f32 %v700_v52, %v681_v43  ;;  %v712_v58 = vadd.f32 %v704_v53, %v682_v55 }
  0x5a   : > { %v713_v15 = vadd.f32 %v692_v51, %v683_v44  ;;  %v714_v46 = vadd.f32 %v696_v0, %v684_v39  ;;  %v715_v13 = vadd.f32 %v700_v52, %v685_v59  ;;  %v716_v22 = vadd.f32 %v704_v53, %v686_v60 }
  0x5b   : > { %v844_v19 = vmul.f32 -1.442695, %v709_v61  ;;  %v845_v48 = vmul.f32 -1.442695, %v710_v40  ;;  %v846_v49 = vmul.f32 -1.442695, %v711_v62 }
  0x5c   : > { %v847_v56 = vmul.f32 -1.442695, %v712_v58  ;;  %v848_v63 = vmul.f32 -1.442695, %v713_v15  ;;  %v849_v50 = vmul.f32 -1.442695, %v714_v46 }
  0x5d   : > { %864 = vpow2.f32 %v844_v19  ;;  %v850_v11 = vmul.f32 -1.442695, %v715_v13  ;;  %v851_v20 = vmul.f32 -1.442695, %v716_v22 }
  0x5e   : > { %866 = vpow2.f32 %v845_v48 }
  0x5f   : > { %868 = vpow2.f32 %v846_v49 }
  0x60   : > { %870 = vpow2.f32 %v847_v56 }
  0x61   : > { %872 = vpow2.f32 %v848_v63 }
  0x62   : > { %874 = vpow2.f32 %v849_v50 }
  0x63   : > { %876 = vpow2.f32 %v850_v11 }
  0x64   : > { %878 = vpow2.f32 %v851_v20 }
  0x67   : > { %v865_v21 = vpop.eup %864 }
  0x68   : > { %v867_v45 = vpop.eup %866  ;;  %v741_v57 = vadd.f32 1.0, %v865_v21 }
  0x69   : > { %v869_v10 = vpop.eup %868  ;;  %v742_v51 = vadd.f32 1.0, %v867_v45 }
  0x6a   : > { %v871_v0 = vpop.eup %870  ;;  %v743_v52 = vadd.f32 1.0, %v869_v10  ;;  %880 = vrcp.f32 %v741_v57 }
  0x6b   : > { %v873_v53 = vpop.eup %872  ;;  %v744_v17 = vadd.f32 1.0, %v871_v0  ;;  %882 = vrcp.f32 %v742_v51 }
  0x6c   : > { %v875_v2 = vpop.eup %874  ;;  %v745_v3 = vadd.f32 1.0, %v873_v53  ;;  %884 = vrcp.f32 %v743_v52 }
  0x6d   : > { %v877_v18 = vpop.eup %876  ;;  %v746_v4 = vadd.f32 1.0, %v875_v2  ;;  %886 = vrcp.f32 %v744_v17 }
  0x6e   : > { %v879_v5 = vpop.eup %878  ;;  %v747_v6 = vadd.f32 1.0, %v877_v18  ;;  %888 = vrcp.f32 %v745_v3 }
  0x6f   : > { %v748_v7 = vadd.f32 1.0, %v879_v5  ;;  %890 = vrcp.f32 %v746_v4 }
  0x70   : > { %892 = vrcp.f32 %v747_v6 }
  0x71   : > { %894 = vrcp.f32 %v748_v7 }
  0x74   : > { %v881_v8 = vpop.eup %880 }
  0x75   : > { %v883_v9 = vpop.eup %882  ;;  %v765_v28 = vmul.f32 %v881_v8, %v709_v61 }
  0x76   : > { %v885_v12 = vpop.eup %884  ;;  %v766_v1 = vmul.f32 %v883_v9, %v710_v40 }
  0x77   : > { %v887_v27 = vpop.eup %886  ;;  %v767_v14 = vmul.f32 %v885_v12, %v711_v62 }
  0x78   : > { %v889_v29 = vpop.eup %888  ;;  %v768_v32 = vmul.f32 %v887_v27, %v712_v58 }
  0x79   : > { %v891_v30 = vpop.eup %890  ;;  %v769_v31 = vmul.f32 %v889_v29, %v713_v15 }
  0x7a   : > { %v893_v24 = vpop.eup %892  ;;  %v770_v33 = vmul.f32 %v891_v30, %v714_v46 }
  0x7b   : > { %v895_v34 = vpop.eup %894  ;;  %v771_v25 = vmul.f32 %v893_v24, %v715_v13  ;;  %v773_v35 = vpack.c.bf16 %v769_v31, %v765_v28 }
  0x7c   : > { %v772_v36 = vmul.f32 %v895_v34, %v716_v22  ;;  %v774_v37 = vpack.c.bf16 %v770_v33, %v766_v1 }
  0x7d   : > { %v775_v16 = vpack.c.bf16 %v771_v25, %v767_v14  ;;  %777 = vst [vmem:[%s170_s4] sm:$0xff] %v773_v35 }
  0x7e   : > { %v776_v38 = vpack.c.bf16 %v772_v36, %v768_v32  ;;  %778 = vst [vmem:[%s170_s4 + $0x8] sm:$0xff] %v774_v37 }
  0x7f   : > { %779 = vst [vmem:[%s170_s4 + $0x10] sm:$0xff] %v775_v16 }
  0x80   : > { %780 = vst [vmem:[%s170_s4 + $0x18] sm:$0xff] %v776_v38 }
  0x81 PF: > { %s13_s12 = sadd.s32 1, %s902_s12  }
  0x82   : > { %p10_p4 = scmp.ge.s32.totalorder %s13_s12, 4  }
  0x84   :  { %12 = sbr.rel (!%p10_p4) target bundleno = 1 (0x1), region = 62 }

// kernel: tvim_block_forward.10
= control target key start
LH: loop header
LB: loop body
LE: loop exit
PB: predicated region body
PF: predicated region fallthrough
CT: control target
= control target key end

     0   :  { %s1121_s12 = smov 0   ;;  %s1123_s13 = smov 0   ;;  %s1304_s0 = inlined_call_operand.vmem [shape: bf16[1,512,32], index: 0, kind: input, shape index: {}]   ;;  %s1305_s1 = inlined_call_operand.vmem [shape: bf16[1,32,64], index: 1, kind: input, shape index: {}]   ;;  %s1306_s2 = inlined_call_operand.vmem [shape: f32[1,1,64], index: 2, kind: input, shape index: {}]   ;;  %s1307_s3 = inlined_call_operand.vmem [shape: bf16[1,512,64], index: 3, kind: output, shape index: {}]  }
   0x1   :  { %s1125_s14 = smov 0  }
   0x2 LB: > { %s22_s15 = sadd.s32 1, %s1095_s13  ;;  %p871_p0 = scmp.ge.s32.totalorder %s1099_s14, 1  ;;  %s1099_s14 = sphi %s1125_s14, %s13_s14   ;;  %s1095_s13 = sphi %s1123_s13, %s1309_s13   ;;  %s1091_s12 = sphi %s1121_s12, %s1308_s12  }
   0x3   : > { %p23_p1 = scmp.ge.s32.totalorder %s22_s15, 2  ;;  %p176_p2 = scmp.lt.s32.totalorder %s1099_s14, 3 }
   0x5   : > { %s1311_s15 = smov (%p23_p1, %s22_s15), 0  ;;  %p177_p3 = pnand %p871_p0, %p176_p2 }
   0x6   : > { %v1059_v0 = vld [vmem:[%s1305_s1] sm:$0xff] (!%p177_p3)   ;;  %s872_s18 = sshll.u32 (!%p177_p3), %s1091_s12, 5  ;;  %v1060_v1 = vld [vmem:[%s1305_s1 + $0x8] sm:$0xff] (!%p177_p3)   ;;  %vm380_vm0 = vcmask (!%p177_p3), 261120   ;;  %vm718_vm1 = vcmask (!%p177_p3), 519168  }
   0x7   : > { %180 = sbr.rel (%p177_p3) target bundleno = 264 (0x108), region = 32  ;;  %p219_p4 = scmp.lt.s32.totalorder (!%p177_p3), %s872_s18, 63  ;;  %995 = vmatprep.subr.bf16.mxu0 (!%p177_p3), %v1059_v0  ;;  %1031 = vmatprep.subr.bf16.mxu1 (!%p177_p3), %v1059_v0  ;;  %v1190_v18 = vld [vmem:[%s1306_s2] ss:$0 sm:$0xff] (!%p177_p3) }
   0x8   : > { %996 = vmatpush3.bf16.msra.mxu0 (!%p177_p3), %v1059_v0  ;;  %1033 = vmatpush3.bf16.msra.mxu1 (!%p177_p3), %v1059_v0 }
   0x9   : > { %997 = vmatprep.subr.bf16.mxu0 (!%p177_p3), %v1060_v1  ;;  %1032 = vmatprep.subr.bf16.mxu1 (!%p177_p3), %v1060_v1 }
   0xc   : > { %998 = vmatpush3.bf16.msra.mxu0 (!%p177_p3), %v1060_v1  ;;  %1034 = vmatpush3.bf16.msra.mxu1 (!%p177_p3), %v1060_v1 }
   0xe   : > { %s1313_s18 = smov (!%p219_p4, %s872_s18), 63 }
   0xf   : > { %s873_s21 = sshll.u32 %s1313_s18, 2 }
  0x10   : > { %s1153_s24 = scalar_lea.vmem %s1304_s0, %s873_s21  ;;  %s1198_s29 = scalar_lea.vmem %s1307_s3, %s873_s21 }
  0x11   : > { %v1061_v2 = vld [vmem:[%s1153_s24] sm:$0xff]   ;;  %v1063_v4 = vld [vmem:[%s1153_s24 + $0x8] sm:$0xff]   ;;  %v1065_v6 = vld [vmem:[%s1153_s24 + $0x10] sm:$0xff]  }
  0x12   : > { %v1062_v3 = vld [vmem:[%s1153_s24 + $0x40] sm:$0xff]   ;;  %999 = vmatprep.mubr.msk.bf16.mxu0 %vm380_vm0, %v1061_v2  ;;  %v1064_v5 = vld [vmem:[%s1153_s24 + $0x48] sm:$0xff]   ;;  %v1066_v7 = vld [vmem:[%s1153_s24 + $0x50] sm:$0xff]  }
  0x13   : > { %1015 = vmatprep.mubr.msk.bf16.mxu1 %vm380_vm0, %v1062_v3  ;;  %1000 = vmatmul.mubr.msk.bf16.vlgmr.msra.gmra.mrb[0].mxu0 %vm380_vm0, %v1063_v4  ;;  %v1067_v8 = vld [vmem:[%s1153_s24 + $0x18] sm:$0xff]   ;;  %v1069_v10 = vld [vmem:[%s1153_s24 + $0x20] sm:$0xff]   ;;  %v1071_v12 = vld [vmem:[%s1153_s24 + $0x28] sm:$0xff]  }
  0x14   : > { %1016 = vmatmul.mubr.msk.bf16.vlgmr.msra.gmra.mrb[0].mxu1 %vm380_vm0, %v1064_v5  ;;  %1003 = vmatprep.mubr.msk.bf16.mxu0 %vm380_vm0, %v1065_v6  ;;  %v1068_v9 = vld [vmem:[%s1153_s24 + $0x58] sm:$0xff]   ;;  %v1070_v11 = vld [vmem:[%s1153_s24 + $0x60] sm:$0xff]   ;;  %v1072_v13 = vld [vmem:[%s1153_s24 + $0x68] sm:$0xff]  }
  0x15   : > { %1019 = vmatprep.mubr.msk.bf16.mxu1 %vm380_vm0, %v1066_v7  ;;  %v1073_v14 = vld [vmem:[%s1153_s24 + $0x30] sm:$0xff]   ;;  %v1075_v16 = vld [vmem:[%s1153_s24 + $0x38] sm:$0xff]  }
  0x16   : > { %v1074_v15 = vld [vmem:[%s1153_s24 + $0x70] sm:$0xff]   ;;  %v1076_v17 = vld [vmem:[%s1153_s24 + $0x78] sm:$0xff]  }
  0x1b   : > { %1004 = vmatmul.mubr.msk.bf16.gmra.mrb[4].mxu0 %vm380_vm0, %v1067_v8 }
  0x1c   : > { %1020 = vmatmul.mubr.msk.bf16.gmra.mrb[4].mxu1 %vm380_vm0, %v1068_v9  ;;  %1007 = vmatprep.mubr.msk.bf16.mxu0 %vm380_vm0, %v1069_v10 }
  0x1d   : > { %1023 = vmatprep.mubr.msk.bf16.mxu1 %vm380_vm0, %v1070_v11 }
  0x23   : > { %1008 = vmatmul.mubr.msk.bf16.gmra.mrb[8].mxu0 %vm380_vm0, %v1071_v12 }
  0x24   : > { %1024 = vmatmul.mubr.msk.bf16.gmra.mrb[8].mxu1 %vm380_vm0, %v1072_v13  ;;  %1011 = vmatprep.mubr.msk.bf16.mxu0 %vm380_vm0, %v1073_v14 }
  0x25   : > { %1027 = vmatprep.mubr.msk.bf16.mxu1 %vm380_vm0, %v1074_v15 }
  0x2b   : > { %1012 = vmatmul.mubr.msk.bf16.gmra.mrb[12].mxu0 %vm380_vm0, %v1075_v16 }
  0x2c   : > { %1028 = vmatmul.mubr.msk.bf16.gmra.mrb[12].mxu1 %vm380_vm0, %v1076_v17 }
  0xe6   : > { %v1001_v19 = vpop.f32.mrb[0].mxu0 }
  0xe7   : > { %v472_v20 = vadd.f32 %v1001_v19, %v1190_v18  ;;  %v1017_v21 = vpop.f32.mrb[0].mxu1  ;;  %v463_v22 = vpop.f32.mrb[1].mxu0 }
  0xe8   : > { %v536_v23 = vadd.f32 %v1017_v21, %v1190_v18  ;;  %v464_v24 = vadd.f32 %v1190_v18, %v463_v22  ;;  %v527_v25 = vpop.f32.mrb[1].mxu1  ;;  %v1002_v26 = vpop.f32.mrb[2].mxu0 }
  0xe9   : > { %v947_v27 = vpack.c.bf16 %v472_v20, %v472_v20  ;;  %v528_v28 = vadd.f32 %v1190_v18, %v527_v25  ;;  %v475_v29 = vadd.f32 %v1002_v26, %v1190_v18  ;;  %v1018_v30 = vpop.f32.mrb[2].mxu1  ;;  %v466_v31 = vpop.f32.mrb[3].mxu0 }
  0xea   : > { %v963_v32 = vpack.c.bf16 %v536_v23, %v536_v23  ;;  %v945_v33 = vpack.c.bf16 %v464_v24, %v464_v24  ;;  %v539_v34 = vadd.f32 %v1018_v30, %v1190_v18  ;;  %v467_v35 = vadd.f32 %v1190_v18, %v466_v31  ;;  %v530_v36 = vpop.f32.mrb[3].mxu1 }
  0xeb   : > { %721 = vst.msk [vmem:[%s1198_s29 + $0x8] sm:$0xf] %vm718_vm1, %v947_v27  ;;  %v961_v37 = vpack.c.bf16 %v528_v28, %v528_v28  ;;  %v948_v38 = vpack.c.bf16 %v475_v29, %v475_v29  ;;  %v531_v39 = vadd.f32 %v1190_v18, %v530_v36 }
  0xec   : > { %737 = vst.msk [vmem:[%s1198_s29 + $0x48] sm:$0xf] %vm718_vm1, %v963_v32  ;;  %719 = vst.msk [vmem:[%s1198_s29] sm:$0xf] %vm718_vm1, %v945_v33  ;;  %v964_v40 = vpack.c.bf16 %v539_v34, %v539_v34  ;;  %v946_v41 = vpack.c.bf16 %v467_v35, %v467_v35 }
  0xed   : > { %735 = vst.msk [vmem:[%s1198_s29 + $0x40] sm:$0xf] %vm718_vm1, %v961_v37  ;;  %722 = vst.msk [vmem:[%s1198_s29 + $0xc] sm:$0xf] %vm718_vm1, %v948_v38  ;;  %v962_v42 = vpack.c.bf16 %v531_v39, %v531_v39 }
  0xee   : > { %738 = vst.msk [vmem:[%s1198_s29 + $0x4c] sm:$0xf] %vm718_vm1, %v964_v40  ;;  %720 = vst.msk [vmem:[%s1198_s29 + $0x4] sm:$0xf] %vm718_vm1, %v946_v41  ;;  %v1005_v43 = vpop.f32.mrb[4].mxu0 }
  0xef   : > { %736 = vst.msk [vmem:[%s1198_s29 + $0x44] sm:$0xf] %vm718_vm1, %v962_v42  ;;  %v488_v44 = vadd.f32 %v1005_v43, %v1190_v18  ;;  %v1021_v45 = vpop.f32.mrb[4].mxu1  ;;  %v479_v46 = vpop.f32.mrb[5].mxu0 }
  0xf0   : > { %v552_v47 = vadd.f32 %v1021_v45, %v1190_v18  ;;  %v480_v48 = vadd.f32 %v1190_v18, %v479_v46  ;;  %v543_v49 = vpop.f32.mrb[5].mxu1  ;;  %v1006_v50 = vpop.f32.mrb[6].mxu0 }
  0xf1   : > { %v951_v51 = vpack.c.bf16 %v488_v44, %v488_v44  ;;  %v544_v52 = vadd.f32 %v1190_v18, %v543_v49  ;;  %v491_v53 = vadd.f32 %v1006_v50, %v1190_v18  ;;  %v1022_v54 = vpop.f32.mrb[6].mxu1  ;;  %v482_v55 = vpop.f32.mrb[7].mxu0 }
  0xf2   : > { %v967_v56 = vpack.c.bf16 %v552_v47, %v552_v47  ;;  %v949_v57 = vpack.c.bf16 %v480_v48, %v480_v48  ;;  %v555_v58 = vadd.f32 %v1022_v54, %v1190_v18  ;;  %v483_v59 = vadd.f32 %v1190_v18, %v482_v55  ;;  %v546_v60 = vpop.f32.mrb[7].mxu1 }
  0xf3   : > { %725 = vst.msk [vmem:[%s1198_s29 + $0x18] sm:$0xf] %vm718_vm1, %v951_v51  ;;  %v965_v61 = vpack.c.bf16 %v544_v52, %v544_v52  ;;  %v952_v62 = vpack.c.bf16 %v491_v53, %v491_v53  ;;  %v547_v63 = vadd.f32 %v1190_v18, %v546_v60 }
  0xf4   : > { %741 = vst.msk [vmem:[%s1198_s29 + $0x58] sm:$0xf] %vm718_vm1, %v967_v56  ;;  %723 = vst.msk [vmem:[%s1198_s29 + $0x10] sm:$0xf] %vm718_vm1, %v949_v57  ;;  %v968_v0 = vpack.c.bf16 %v555_v58, %v555_v58  ;;  %v950_v1 = vpack.c.bf16 %v483_v59, %v483_v59 }
  0xf5   : > { %739 = vst.msk [vmem:[%s1198_s29 + $0x50] sm:$0xf] %vm718_vm1, %v965_v61  ;;  %726 = vst.msk [vmem:[%s1198_s29 + $0x1c] sm:$0xf] %vm718_vm1, %v952_v62  ;;  %v966_v2 = vpack.c.bf16 %v547_v63, %v547_v63 }
  0xf6   : > { %742 = vst.msk [vmem:[%s1198_s29 + $0x5c] sm:$0xf] %vm718_vm1, %v968_v0  ;;  %724 = vst.msk [vmem:[%s1198_s29 + $0x14] sm:$0xf] %vm718_vm1, %v950_v1  ;;  %v1009_v3 = vpop.f32.mrb[8].mxu0 }
  0xf7   : > { %740 = vst.msk [vmem:[%s1198_s29 + $0x54] sm:$0xf] %vm718_vm1, %v966_v2  ;;  %v504_v4 = vadd.f32 %v1009_v3, %v1190_v18  ;;  %v1025_v5 = vpop.f32.mrb[8].mxu1  ;;  %v495_v6 = vpop.f32.mrb[9].mxu0 }
  0xf8   : > { %v568_v7 = vadd.f32 %v1025_v5, %v1190_v18  ;;  %v496_v8 = vadd.f32 %v1190_v18, %v495_v6  ;;  %v559_v9 = vpop.f32.mrb[9].mxu1  ;;  %v1010_v10 = vpop.f32.mrb[10].mxu0 }
  0xf9   : > { %v955_v11 = vpack.c.bf16 %v504_v4, %v504_v4  ;;  %v560_v12 = vadd.f32 %v1190_v18, %v559_v9  ;;  %v507_v13 = vadd.f32 %v1010_v10, %v1190_v18  ;;  %v1026_v14 = vpop.f32.mrb[10].mxu1  ;;  %v498_v15 = vpop.f32.mrb[11].mxu0 }
  0xfa   : > { %v971_v16 = vpack.c.bf16 %v568_v7, %v568_v7  ;;  %v953_v17 = vpack.c.bf16 %v496_v8, %v496_v8  ;;  %v571_v19 = vadd.f32 %v1026_v14, %v1190_v18  ;;  %v499_v20 = vadd.f32 %v1190_v18, %v498_v15  ;;  %v562_v21 = vpop.f32.mrb[11].mxu1 }
  0xfb   : > { %729 = vst.msk [vmem:[%s1198_s29 + $0x28] sm:$0xf] %vm718_vm1, %v955_v11  ;;  %v969_v22 = vpack.c.bf16 %v560_v12, %v560_v12  ;;  %v956_v23 = vpack.c.bf16 %v507_v13, %v507_v13  ;;  %v563_v24 = vadd.f32 %v1190_v18, %v562_v21 }
  0xfc   : > { %745 = vst.msk [vmem:[%s1198_s29 + $0x68] sm:$0xf] %vm718_vm1, %v971_v16  ;;  %727 = vst.msk [vmem:[%s1198_s29 + $0x20] sm:$0xf] %vm718_vm1, %v953_v17  ;;  %v972_v25 = vpack.c.bf16 %v571_v19, %v571_v19  ;;  %v954_v26 = vpack.c.bf16 %v499_v20, %v499_v20 }
  0xfd   : > { %743 = vst.msk [vmem:[%s1198_s29 + $0x60] sm:$0xf] %vm718_vm1, %v969_v22  ;;  %730 = vst.msk [vmem:[%s1198_s29 + $0x2c] sm:$0xf] %vm718_vm1, %v956_v23  ;;  %v970_v27 = vpack.c.bf16 %v563_v24, %v563_v24 }
  0xfe   : > { %746 = vst.msk [vmem:[%s1198_s29 + $0x6c] sm:$0xf] %vm718_vm1, %v972_v25  ;;  %728 = vst.msk [vmem:[%s1198_s29 + $0x24] sm:$0xf] %vm718_vm1, %v954_v26  ;;  %v1013_v28 = vpop.f32.mrb[12].mxu0 }
  0xff   : > { %744 = vst.msk [vmem:[%s1198_s29 + $0x64] sm:$0xf] %vm718_vm1, %v970_v27  ;;  %v520_v29 = vadd.f32 %v1013_v28, %v1190_v18  ;;  %v1029_v30 = vpop.f32.mrb[12].mxu1  ;;  %v511_v31 = vpop.f32.mrb[13].mxu0 }
 0x100   : > { %v584_v32 = vadd.f32 %v1029_v30, %v1190_v18  ;;  %v512_v33 = vadd.f32 %v1190_v18, %v511_v31  ;;  %v575_v34 = vpop.f32.mrb[13].mxu1  ;;  %v1014_v35 = vpop.f32.mrb[14].mxu0 }
 0x101   : > { %v959_v36 = vpack.c.bf16 %v520_v29, %v520_v29  ;;  %v576_v37 = vadd.f32 %v1190_v18, %v575_v34  ;;  %v523_v38 = vadd.f32 %v1014_v35, %v1190_v18  ;;  %v1030_v39 = vpop.f32.mrb[14].mxu1  ;;  %v514_v40 = vpop.f32.mrb[15].mxu0 }
 0x102   : > { %v975_v41 = vpack.c.bf16 %v584_v32, %v584_v32  ;;  %v957_v42 = vpack.c.bf16 %v512_v33, %v512_v33  ;;  %v587_v43 = vadd.f32 %v1030_v39, %v1190_v18  ;;  %v515_v44 = vadd.f32 %v1190_v18, %v514_v40  ;;  %v578_v45 = vpop.f32.mrb[15].mxu1 }
 0x103   : > { %733 = vst.msk [vmem:[%s1198_s29 + $0x38] sm:$0xf] %vm718_vm1, %v959_v36  ;;  %v973_v46 = vpack.c.bf16 %v576_v37, %v576_v37  ;;  %v960_v47 = vpack.c.bf16 %v523_v38, %v523_v38  ;;  %v579_v48 = vadd.f32 %v1190_v18, %v578_v45 }
 0x104   : > { %749 = vst.msk [vmem:[%s1198_s29 + $0x78] sm:$0xf] %vm718_vm1, %v975_v41  ;;  %731 = vst.msk [vmem:[%s1198_s29 + $0x30] sm:$0xf] %vm718_vm1, %v957_v42  ;;  %v976_v49 = vpack.c.bf16 %v587_v43, %v587_v43  ;;  %v958_v50 = vpack.c.bf16 %v515_v44, %v515_v44 }
 0x105   : > { %747 = vst.msk [vmem:[%s1198_s29 + $0x70] sm:$0xf] %vm718_vm1, %v973_v46  ;;  %734 = vst.msk [vmem:[%s1198_s29 + $0x3c] sm:$0xf] %vm718_vm1, %v960_v47  ;;  %v974_v51 = vpack.c.bf16 %v579_v48, %v579_v48 }
 0x106   : > { %750 = vst.msk [vmem:[%s1198_s29 + $0x7c] sm:$0xf] %vm718_vm1, %v976_v49  ;;  %732 = vst.msk [vmem:[%s1198_s29 + $0x34] sm:$0xf] %vm718_vm1, %v958_v50 }
 0x107   : > { %748 = vst.msk [vmem:[%s1198_s29 + $0x74] sm:$0xf] %vm718_vm1, %v974_v51 }
 0x108 PF: > { %s13_s14 = sadd.s32 1, %s1099_s14   ;;  %s1308_s12 = smov %s1095_s13 }
 0x109   : > { %p10_p5 = scmp.ge.s32.totalorder %s13_s14, 4   ;;  %s1309_s13 = smov %s1311_s15 }
 0x10b   :  { %12 = sbr.rel (!%p10_p5) target bundleno = 2 (0x2), region = 68 }

// kernel: tvim_block_forward.13
= control target key start
LH: loop header
LB: loop body
LE: loop exit
PB: predicated region body
PF: predicated region fallthrough
CT: control target
= control target key end

     0   :  { %s485_s12 = smov 0   ;;  %s487_s13 = smov 0   ;;  %s524_s0 = inlined_call_operand.vmem [shape: bf16[2,8,16], index: 0, kind: input, shape index: {}]   ;;  %s525_s1 = inlined_call_operand.vmem [shape: bf16[2,16,96], index: 1, kind: input, shape index: {}]   ;;  %s526_s2 = inlined_call_operand.vmem [shape: f32[2,1,96], index: 2, kind: input, shape index: {}]   ;;  %s527_s3 = inlined_call_operand.vmem [shape: f32[2,8,96], index: 3, kind: output, shape index: {}]  }
   0x1   :  { %s489_s14 = smov 0  }
   0x2 LB: > { %s25_s15 = sadd.s32 1, %s457_s13  ;;  %p393_p0 = scmp.ge.s32.totalorder %s461_s14, 1  ;;  %s461_s14 = sphi %s489_s14, %s13_s14   ;;  %s457_s13 = sphi %s487_s13, %s529_s13   ;;  %s453_s12 = sphi %s485_s12, %s528_s12  }
   0x3   : > { %p27_p1 = scmp.ge.s32.totalorder %s25_s15, 2  ;;  %p173_p2 = scmp.lt.s32.totalorder %s461_s14, 3 }
   0x5   : > { %s531_s15 = smov (%p27_p1, %s25_s15), 0  ;;  %p174_p3 = pnand %p393_p0, %p173_p2 }
   0x6   : > { %p209_p4 = scmp.lt.s32.totalorder (!%p174_p3), %s453_s12, 1  ;;  %v463_v0 = vmov (!%p174_p3), 0.0   ;;  %vm464_vm0 = vmmov (!%p174_p3), 0   ;;  %vm248_vm1 = vcmask (!%p174_p3), 130048   ;;  %vm292_vm2 = vcmask (!%p174_p3), 785408  }
   0x7   : > { %177 = sbr.rel (%p174_p3) target bundleno = 236 (0xec), region = 32  ;;  %406 = vmatprep.subr.bf16.mxu0 (!%p174_p3), %v463_v0  ;;  %408 = vmatprep.mubr.msk.bf16.mxu0 (!%p174_p3), %vm464_vm0, %v463_v0 }
   0xe   : > { %s533_s12 = smov (!%p209_p4, %s453_s12), 1 }
   0xf   : > { %s403_s16 = sshll.u32 %s533_s12, 3  ;;  %s394_s17 = sshll.u32 %s533_s12, 2 }
  0x10   : > { %s220_s20 = scalar_lea.vmem %s525_s1, %s403_s16  ;;  %s215_s23 = scalar_lea.vmem %s524_s0, %s394_s17 }
  0x11   : > { %v438_v1 = vld [vmem:[%s220_s20] sm:$0xff]   ;;  %s223_s26 = scalar_lea.vmem %s526_s2, %s533_s12  ;;  %s230_s29 = scalar_lea.vmem %s527_s3, %s403_s16 }
  0x12   : > { %407 = vmatpush3.bf16.msra.mxu0 %v438_v1  ;;  %v232_v2 = vld [vmem:[%s215_s23] sm:$0xf] }
  0x13   : > { %v398_v3 = vld [vmem:[%s223_s26] ss:$0 sm:$0xff] }
  0x15   : > { %409 = vmatmul.mubr.msk.bf16.vlgmr.msra.gmra.mrb[0].mxu0 %vm248_vm1, %v232_v2 }
  0xe8   : > { %v286_v4 = vpop.f32.mrb[0].mxu0 }
  0xe9   : > { %v287_v5 = vadd.f32 %v398_v3, %v286_v4  ;;  %v410_v6 = vpop.f32.mrb[1].mxu0 }
  0xea   : > { %v289_v7 = vpop.f32.mrb[2].mxu0 }
  0xeb   : > { %293 = vst.msk [vmem:[%s230_s29] sm:$0xff] %vm292_vm2, %v287_v5  ;;  %v411_v8 = vpop.f32.mrb[3].mxu0 }
  0xec PF: > { %s13_s14 = sadd.s32 1, %s461_s14   ;;  %s528_s12 = smov %s457_s13 }
  0xed   : > { %p10_p5 = scmp.ge.s32.totalorder %s13_s14, 4   ;;  %s529_s13 = smov %s531_s15 }
  0xef   :  { %12 = sbr.rel (!%p10_p5) target bundleno = 2 (0x2), region = 68 }

// kernel: tvim_block_forward.15
= control target key start
LH: loop header
LB: loop body
LE: loop exit
PB: predicated region body
PF: predicated region fallthrough
CT: control target
= control target key end

     0   :  { %vm15_vm0 = vcmask 130048   ;;  %vm47_vm1 = vcmask 125952   ;;  %s89_s0 = inlined_call_operand.vmem [shape: f32[8,16], index: 0, kind: input, shape index: {}]   ;;  %s90_s1 = inlined_call_operand.vmem [shape: f32[1,16], index: 1, kind: input, shape index: {}]   ;;  %s91_s2 = inlined_call_operand.vmem [shape: f32[1,16], index: 2, kind: input, shape index: {}]   ;;  %s92_s3 = inlined_call_operand.vmem [shape: bf16[8,16], index: 3, kind: output, shape index: {}]  }
   0x1   :  { %v14_v0 = vld [vmem:[%s89_s0] sm:$0xff] }
   0x2   :  { %v16_v1 = vsel %vm15_vm0, %v14_v0, 0.0  ;;  %v53_v11 = vld [vmem:[%s90_s1] ss:$0 sm:$0xff] }
   0x3   :  { %17 = vadd.xlane.f32.xlu0 %v16_v1  ;;  %v54_v13 = vld [vmem:[%s91_s2] ss:$0 sm:$0xff] }
  0x90   :  { %v18_v2 = vpop.xlane.xlu0 %17 }
  0x91   :  { %v20_v3 = vmul.f32 0.0625, %v18_v2 }
  0x93   :  { %v21_v4 = vsub.f32 %v14_v0, %v20_v3 }
  0x95   :  { %v22_v5 = vmul.f32 %v21_v4, %v21_v4 }
  0x97   :  { %v23_v6 = vsel %vm15_vm0, %v22_v5, 0.0 }
  0x98   :  { %24 = vadd.xlane.f32.xlu0 %v23_v6 }
 0x125   :  { %v25_v7 = vpop.xlane.xlu0 %24 }
 0x126   :  { %v26_v8 = vmul.f32 0.0625, %v25_v7 }
 0x128   :  { %v27_v9 = vadd.f32 1e-05, %v26_v8 }
 0x12a   :  { %55 = vrsqrt.f32 %v27_v9 }
 0x134   :  { %v56_v10 = vpop.eup %55 }
 0x135   :  { %v29_v12 = vmul.f32 %v56_v10, %v21_v4 }
 0x137   :  { %v37_v14 = vmul.f32 %v53_v11, %v29_v12 }
 0x139   :  { %v45_v15 = vadd.f32 %v54_v13, %v37_v14 }
 0x13b   :  { %v46_v16 = vpack.c.bf16 %v45_v15, %v45_v15 }
 0x13d   :  { %48 = vst.msk [vmem:[%s92_s3] sm:$0xf] %vm47_vm1, %v46_v16 }

// kernel: tvim_block_forward.14
= control target key start
LH: loop header
LB: loop body
LE: loop exit
PB: predicated region body
PF: predicated region fallthrough
CT: control target
= control target key end

     0   :  { %vm66_vm0 = vcmask 64512   ;;  %v333_v25 = vlaneseq  ;;  %vm532_vm1 = vcmask 1041409   ;;  %vm535_vm2 = vcmask 1042434   ;;  %s773_s0 = inlined_call_operand.vmem [shape: f32[8,128], index: 0, kind: input, shape index: {}]   ;;  %s774_s3 = inlined_call_operand.vmem [shape: f32[4,16,8], index: 3, kind: input, shape index: {}]   ;;  %s775_s4 = inlined_call_operand.vmem [shape: f32[4,16,8], index: 4, kind: input, shape index: {}]   ;;  %s776_s2 = inlined_call_operand.vmem [shape: f32[4,128], index: 2, kind: input, shape index: {}]   ;;  %s777_s7 = inlined_call_operand.vmem [shape: f32[1,128], index: 7, kind: input, shape index: {}]   ;;  %s778_s5 = inlined_call_operand.vmem [shape: f32[16,128], index: 5, kind: input, shape index: {}]   ;;  %s779_s1 = inlined_call_operand.vmem [shape: f32[4,128], index: 1, kind: input, shape index: {}]   ;;  %s780_s6 = inlined_call_operand.vmem [shape: f32[1,128], index: 6, kind: input, shape index: {}]   ;;  %s781_s8 = inlined_call_operand.vmem [shape: f32[4,128], index: 8, kind: output, shape index: {}]  }
   0x1   :  { %v55_v0 = vld [vmem:[%s773_s0] sm:$0xff]  ;;  %v59_v2 = vld [vmem:[%s774_s3 + $0x8] sm:$0xff]  ;;  %v60_v4 = vld [vmem:[%s774_s3 + $0x10] sm:$0xff]  ;;  %vm538_vm3 = vcmask 1043459  }
   0x2   :  { %v58_v1 = vld [vmem:[%s774_s3] sm:$0xff]  ;;  %582 = vmatprep.subr.mxu0 %v55_v0  ;;  %596 = vmatprep.subr.mxu1 %v55_v0  ;;  %v197_v5 = vld [vmem:[%s775_s4 + $0x8] sm:$0xff]  ;;  %v198_v6 = vld [vmem:[%s775_s4 + $0x10] sm:$0xff]  ;;  %v748_v29 = vshrl.u32 %v333_v25, 7 }
   0x3   :  { %584 = vmatprep.mubr.msk.f32.mxu0 %vm66_vm0, %v58_v1  ;;  %v196_v3 = vld [vmem:[%s775_s4] sm:$0xff]  ;;  %583 = vmatpush3.msra.mxu0 %v55_v0  ;;  %v61_v7 = vld [vmem:[%s774_s3 + $0x18] sm:$0xff]  ;;  %v63_v11 = vld [vmem:[%s774_s3 + $0x28] sm:$0xff] }
   0x4   :  { %585 = vmatmul.mubr.msk.f32.vlgmr.msra.gmra.mrb[0].mxu0 %vm66_vm0, %v59_v2  ;;  %597 = vmatpush3.msra.mxu1 %v55_v0  ;;  %v62_v8 = vld [vmem:[%s774_s3 + $0x20] sm:$0xff]  ;;  %v199_v9 = vld [vmem:[%s775_s4 + $0x18] sm:$0xff]  ;;  %v64_v12 = vld [vmem:[%s774_s3 + $0x30] sm:$0xff]  ;;  %v335_v31 = vsub.s32 0, %v748_v29  ;;  %v355_v35 = vsub.s32 1, %v748_v29  ;;  %v377_v39 = vsub.s32 2, %v748_v29 }
   0x5   :  { %598 = vmatprep.mubr.msk.f32.mxu1 %vm66_vm0, %v196_v3  ;;  %587 = vmatprep.mubr.msk.f32.mxu0 %vm66_vm0, %v60_v4  ;;  %v200_v10 = vld [vmem:[%s775_s4 + $0x20] sm:$0xff]  ;;  %v201_v13 = vld [vmem:[%s775_s4 + $0x28] sm:$0xff]  ;;  %v202_v14 = vld [vmem:[%s775_s4 + $0x30] sm:$0xff]  ;;  %v399_v44 = vsub.s32 3, %v748_v29 }
   0x6   :  { %599 = vmatmul.mubr.msk.f32.vlgmr.msra.gmra.mrb[0].mxu1 %vm66_vm0, %v197_v5  ;;  %v65_v15 = vld [vmem:[%s774_s3 + $0x38] sm:$0xff]  ;;  %v36_v17 = vld [vmem:[%s776_s2] sm:$0xf]  ;;  %v57_v33 = vld [vmem:[%s778_s5 + $0x8] sm:$0xff] }
   0x7   :  { %601 = vmatprep.mubr.msk.f32.mxu1 %vm66_vm0, %v198_v6  ;;  %v203_v16 = vld [vmem:[%s775_s4 + $0x38] sm:$0xff]  ;;  %v546_v18 = vld [vmem:[%s777_s7] ss:$0 sm:$0xff] }
   0x8   :  { %588 = vmatmul.mubr.msk.f32.gmra.mrb[2].mxu0 %vm66_vm0, %v61_v7  ;;  %v44_v19 = vadd.f32 %v546_v18, %v36_v17  ;;  %v56_v34 = vld [vmem:[%s778_s5] sm:$0xff] }
   0x9   :  { %590 = vmatprep.mubr.msk.f32.mxu0 %vm66_vm0, %v62_v8  ;;  %v763_v51 = vld [vmem:[%s779_s1] sm:$0xf] }
   0xa   :  { %602 = vmatmul.mubr.msk.f32.gmra.mrb[2].mxu1 %vm66_vm0, %v199_v9  ;;  %v46_v20 = vand.u32 2147483647, %v44_v19  ;;  %v45_v27 = vmax.f32 %v44_v19, 0.0 }
   0xb   :  { %604 = vmatprep.mubr.msk.f32.mxu1 %vm66_vm0, %v200_v10 }
   0xc   :  { %591 = vmatmul.mubr.msk.f32.gmra.mrb[4].mxu0 %vm66_vm0, %v63_v11  ;;  %v47_v21 = vsub.f32 0.0, %v46_v20 }
   0xd   :  { %593 = vmatprep.mubr.msk.f32.mxu0 %vm66_vm0, %v64_v12 }
   0xe   :  { %605 = vmatmul.mubr.msk.f32.gmra.mrb[4].mxu1 %vm66_vm0, %v201_v13  ;;  %v48_v22 = vmul.f32 1.442695, %v47_v21 }
   0xf   :  { %607 = vmatprep.mubr.msk.f32.mxu1 %vm66_vm0, %v202_v14 }
  0x10   :  { %594 = vmatmul.mubr.msk.f32.gmra.mrb[6].mxu0 %vm66_vm0, %v65_v15  ;;  %610 = vpow2.f32 %v48_v22 }
  0x12   :  { %608 = vmatmul.mubr.msk.f32.gmra.mrb[6].mxu1 %vm66_vm0, %v203_v16 }
  0x1a   :  { %v611_v23 = vpop.eup %610 }
  0x1b   :  { %v50_v24 = vadd.f32 1.0, %v611_v23 }
  0x1d   :  { %612 = vlog2.f32 %v50_v24 }
  0x27   :  { %v613_v26 = vpop.eup %612 }
  0x28   :  { %v52_v28 = vmul.f32 0.6931472, %v613_v26 }
  0x2a   :  { %v53_v30 = vadd.f32 %v52_v28, %v45_v27 }
  0x2c   :  { %v336_v32 = vrot.slane %v53_v30, %v335_v31  ;;  %v356_v38 = vrot.slane %v53_v30, %v355_v35  ;;  %v378_v43 = vrot.slane %v53_v30, %v377_v39  ;;  %v400_v48 = vrot.slane %v53_v30, %v399_v44 }
  0x2d   :  { %v54_v54 = vmul.f32 %v53_v30, %v763_v51 }
  0x2e   :  { %v338_v36 = vmul.f32 %v336_v32, %v57_v33  ;;  %v337_v37 = vmul.f32 %v336_v32, %v56_v34  ;;  %v358_v42 = vmul.f32 %v356_v38, %v57_v33  ;;  %v357_v45 = vmul.f32 %v356_v38, %v56_v34 }
  0x2f   :  { %v380_v47 = vmul.f32 %v378_v43, %v57_v33  ;;  %v379_v50 = vmul.f32 %v378_v43, %v56_v34  ;;  %v402_v53 = vmul.f32 %v400_v48, %v57_v33  ;;  %v401_v56 = vmul.f32 %v400_v48, %v56_v34 }
  0x30   :  { %v341_v40 = vmul.f32 1.442695, %v338_v36  ;;  %v339_v41 = vmul.f32 1.442695, %v337_v37  ;;  %v361_v46 = vmul.f32 1.442695, %v358_v42  ;;  %v348_v60 = vrot.slane %v54_v54, %v335_v31 }
  0x31   :  { %v359_v49 = vmul.f32 1.442695, %v357_v45  ;;  %v383_v52 = vmul.f32 1.442695, %v380_v47  ;;  %v381_v55 = vmul.f32 1.442695, %v379_v50  ;;  %v369_v3 = vrot.slane %v54_v54, %v355_v35 }
  0x32   :  { %614 = vpow2.f32 %v341_v40  ;;  %v405_v58 = vmul.f32 1.442695, %v402_v53  ;;  %v403_v61 = vmul.f32 1.442695, %v401_v56  ;;  %v391_v16 = vrot.slane %v54_v54, %v377_v39 }
  0x33   :  { %616 = vpow2.f32 %v339_v41  ;;  %v413_v32 = vrot.slane %v54_v54, %v399_v44 }
  0x34   :  { %618 = vpow2.f32 %v361_v46 }
  0x35   :  { %620 = vpow2.f32 %v359_v49 }
  0x36   :  { %622 = vpow2.f32 %v383_v52 }
  0x37   :  { %624 = vpow2.f32 %v381_v55 }
  0x38   :  { %626 = vpow2.f32 %v405_v58 }
  0x39   :  { %628 = vpow2.f32 %v403_v61 }
  0x3c   :  { %v615_v57 = vpop.eup %614 }
  0x3d   :  { %v617_v59 = vpop.eup %616  ;;  %v424_v62 = vmul.f32 0.0, %v615_v57 }
  0x3e   :  { %v423_v0 = vmul.f32 0.0, %v617_v59  ;;  %v619_v4 = vpop.eup %618 }
  0x3f   :  { %v621_v7 = vpop.eup %620 }
  0x40   :  { %v623_v17 = vpop.eup %622 }
  0x41   :  { %v625_v22 = vpop.eup %624 }
  0x42   :  { %v627_v33 = vpop.eup %626 }
  0x43   :  { %v629_v41 = vpop.eup %628 }
  0xd7   :  { %v586_v63 = vpop.f32.mrb[0].mxu0 }
  0xd8   :  { %v350_v1 = vmul.f32 %v586_v63, %v348_v60  ;;  %v157_v2 = vpop.f32.mrb[1].mxu0 }
  0xd9   :  { %v349_v5 = vmul.f32 %v348_v60, %v157_v2  ;;  %v600_v6 = vpop.f32.mrb[0].mxu1 }
  0xda   :  { %v428_v8 = vadd.f32 %v424_v62, %v350_v1  ;;  %v294_v9 = vpop.f32.mrb[1].mxu1  ;;  %v563_v62 = vld [vmem:[%s780_s6] ss:$0 sm:$0xff] }
  0xdb   :  { %v589_v10 = vpop.f32.mrb[2].mxu0  ;;  %v427_v11 = vadd.f32 %v423_v0, %v349_v5 }
  0xdc   :  { %v472_v12 = vmul.f32 %v600_v6, %v428_v8  ;;  %v371_v13 = vmul.f32 %v589_v10, %v369_v3  ;;  %v167_v14 = vpop.f32.mrb[3].mxu0  ;;  %v434_v15 = vmul.f32 %v619_v4, %v428_v8  ;;  %v514_v4 = vmul.f32 %v563_v62, %v763_v51 }
  0xdd   :  { %v471_v18 = vmul.f32 %v427_v11, %v294_v9  ;;  %v370_v19 = vmul.f32 %v369_v3, %v167_v14  ;;  %v603_v20 = vpop.f32.mrb[2].mxu1  ;;  %v433_v21 = vmul.f32 %v621_v7, %v427_v11 }
  0xde   :  { %v438_v23 = vadd.f32 %v434_v15, %v371_v13  ;;  %v304_v24 = vpop.f32.mrb[3].mxu1  ;;  %v516_v10 = vrot.slane %v514_v4, 1 }
  0xdf   :  { %v479_v25 = vadd.f32 %v472_v12, %v471_v18  ;;  %v592_v26 = vpop.f32.mrb[4].mxu0  ;;  %v437_v27 = vadd.f32 %v433_v21, %v370_v19  ;;  %v517_v19 = vrot.slane %v514_v4, 2 }
  0xe0   :  { %v474_v28 = vmul.f32 %v603_v20, %v438_v23  ;;  %v393_v29 = vmul.f32 %v592_v26, %v391_v16  ;;  %v177_v30 = vpop.f32.mrb[5].mxu0  ;;  %v444_v31 = vmul.f32 %v623_v17, %v438_v23 }
  0xe1   :  { %v480_v34 = vrot.slane %v479_v25, 4  ;;  %v473_v35 = vmul.f32 %v437_v27, %v304_v24  ;;  %v392_v36 = vmul.f32 %v391_v16, %v177_v30  ;;  %v606_v37 = vpop.f32.mrb[4].mxu1  ;;  %v443_v38 = vmul.f32 %v625_v22, %v437_v27 }
  0xe2   :  { %v448_v39 = vadd.f32 %v444_v31, %v393_v29  ;;  %v314_v40 = vpop.f32.mrb[5].mxu1  ;;  %v518_v27 = vrot.slane %v514_v4, 3 }
  0xe3   :  { %v481_v42 = vadd.f32 %v480_v34, %v479_v25  ;;  %v486_v43 = vadd.f32 %v474_v28, %v473_v35  ;;  %v595_v45 = vpop.f32.mrb[6].mxu0  ;;  %v447_v46 = vadd.f32 %v443_v38, %v392_v36 }
  0xe4   :  { %v476_v47 = vmul.f32 %v606_v37, %v448_v39  ;;  %v415_v48 = vmul.f32 %v595_v45, %v413_v32  ;;  %v187_v49 = vpop.f32.mrb[7].mxu0  ;;  %v454_v50 = vmul.f32 %v627_v33, %v448_v39 }
  0xe5   :  { %v482_v52 = vrot.slane %v481_v42, 2  ;;  %v487_v53 = vrot.slane %v486_v43, 4  ;;  %v475_v44 = vmul.f32 %v447_v46, %v314_v40  ;;  %v414_v54 = vmul.f32 %v413_v32, %v187_v49  ;;  %v609_v55 = vpop.f32.mrb[6].mxu1 }
  0xe6   :  { %v458_v56 = vadd.f32 %v454_v50, %v415_v48  ;;  %v324_v57 = vpop.f32.mrb[7].mxu1  ;;  %v453_v58 = vmul.f32 %v629_v41, %v447_v46 }
  0xe7   :  { %v483_v59 = vadd.f32 %v482_v52, %v481_v42  ;;  %v488_v60 = vadd.f32 %v487_v53, %v486_v43  ;;  %v493_v61 = vadd.f32 %v476_v47, %v475_v44 }
  0xe8   :  { %v478_v63 = vmul.f32 %v609_v55, %v458_v56  ;;  %v457_v0 = vadd.f32 %v453_v58, %v414_v54 }
  0xe9   :  { %v489_v1 = vrot.slane %v488_v60, 2  ;;  %v494_v2 = vrot.slane %v493_v61, 4  ;;  %v484_v5 = vrot.slane %v483_v59, 1 }
  0xea   :  { %v477_v3 = vmul.f32 %v457_v0, %v324_v57 }
  0xeb   :  { %v490_v6 = vadd.f32 %v489_v1, %v488_v60  ;;  %v495_v7 = vadd.f32 %v494_v2, %v493_v61  ;;  %v485_v13 = vadd.f32 %v484_v5, %v483_v59 }
  0xec   :  { %v500_v8 = vadd.f32 %v478_v63, %v477_v3 }
  0xed   :  { %v491_v9 = vrot.slane %v490_v6, 1  ;;  %v496_v11 = vrot.slane %v495_v7, 2  ;;  %v523_v21 = vadd.f32 %v514_v4, %v485_v13 }
  0xee   :  { %v501_v12 = vrot.slane %v500_v8, 4 }
  0xef   :  { %v492_v14 = vadd.f32 %v491_v9, %v490_v6  ;;  %v497_v15 = vadd.f32 %v496_v11, %v495_v7 }
  0xf0   :  { %v502_v16 = vadd.f32 %v501_v12, %v500_v8 }
  0xf1   :  { %v524_v17 = vadd.f32 %v516_v10, %v492_v14  ;;  %v498_v18 = vrot.slane %v497_v15, 1 }
  0xf2   :  { %v503_v20 = vrot.slane %v502_v16, 2 }
  0xf3   :  { %v531_v22 = vrot.slane %v524_v17, 7  ;;  %v499_v51 = vadd.f32 %v498_v18, %v497_v15 }
  0xf4   :  { %v504_v23 = vadd.f32 %v503_v20, %v502_v16 }
  0xf5   :  { %v533_v24 = vsel %vm532_vm1, %v531_v22, %v523_v21  ;;  %v525_v25 = vadd.f32 %v517_v19, %v499_v51 }
  0xf6   :  { %v505_v26 = vrot.slane %v504_v23, 1 }
  0xf7   :  { %v534_v28 = vrot.slane %v525_v25, 6 }
  0xf8   :  { %v506_v29 = vadd.f32 %v505_v26, %v504_v23 }
  0xf9   :  { %v536_v30 = vsel %vm535_vm2, %v534_v28, %v533_v24 }
  0xfa   :  { %v526_v31 = vadd.f32 %v518_v27, %v506_v29 }
  0xfc   :  { %v537_v32 = vrot.slane %v526_v31, 5 }
  0xfe   :  { %v539_v33 = vsel %vm538_vm3, %v537_v32, %v536_v30 }
  0xff   :  { %541 = vst [vmem:[%s781_s8] sm:$0xf] %v539_v33 }

// kernel: tile.51
= control target key start
LH: loop header
LB: loop body
LE: loop exit
PB: predicated region body
PF: predicated region fallthrough
CT: control target
= control target key end

     0   :  { %s36_s6 = smov 3  ;;  %s39_s7 = smov 12  ;;  %vm41_vm0 = vcmask 1043458   ;;  %vm46_vm1 = vcmask 1045508   ;;  %vm51_vm2 = vcmask 1047558   ;;  %vm4_vm3 = vcmask 1047556   ;;  %s865_s0 = inlined_call_operand.vmem [shape: f32[9,16,1,1,16], index: 0, kind: input, shape index: {}]   ;;  %s866_s1 = inlined_call_operand.vmem [shape: f32[9,256], index: 1, kind: output, shape index: {}]  }
   0x1   :  { %v417_v0 = vld [vmem:[%s865_s0 + $0x7] ss:$16 sm:%s36_s6]   ;;  %s44_s12 = smov 48  ;;  %s49_s13 = smov 192  ;;  %vm6_vm4 = vcmask 130048   ;;  %vm55_vm5 = vcmask 1048448  }
   0x2   :  { %v418_v1 = vld [vmem:[%s865_s0 + $0x7] ss:$16 sm:%s39_s7]   ;;  %s81_s18 = smov 3  ;;  %s58_s21 = smov 3  ;;  %vm108_vm6 = vcmask 917248   ;;  %vm161_vm7 = vcmask 786048  }
   0x3   :  { %v42_v2 = vsel %vm41_vm0, %v418_v1, %v417_v0  ;;  %v419_v3 = vld [vmem:[%s865_s0 + $0x7] ss:$16 sm:%s44_s12]   ;;  %s61_s22 = smov 12  ;;  %s501_s23 = smov 112   ;;  %v421_v8 = vld [vmem:[%s865_s0 + $0xf] ss:$16 sm:%s58_s21]  }
   0x4   :  { %v420_v4 = vld [vmem:[%s865_s0 + $0x7] ss:$16 sm:%s49_s13]   ;;  %v47_v5 = vsel %vm46_vm1, %v419_v3, %v42_v2  ;;  %s66_s26 = smov 48  ;;  %s71_s27 = smov 192  ;;  %v422_v9 = vld [vmem:[%s865_s0 + $0xf] ss:$16 sm:%s61_s22]  }
   0x5   :  { %v426_v6 = vld [vmem:[%s865_s0 + $0x87] ss:$8 sm:%s81_s18]   ;;  %v52_v7 = vsel %vm51_vm2, %v420_v4, %v47_v5  ;;  %s89_s30 = smov 3  ;;  %s92_s2 = smov 12  ;;  %v64_v10 = vsel %vm41_vm0, %v422_v9, %v421_v8  ;;  %vm214_vm8 = vcmask 654848   ;;  %vm267_vm9 = vcmask 523648  }
   0x6   :  { %83 = vrot.lane.b32.xlu1 %v426_v6, %s501_s23  ;;  %53 = vrot.lane.b32.xlu0 %v52_v7, %s501_s23  ;;  %v423_v11 = vld [vmem:[%s865_s0 + $0xf] ss:$16 sm:%s66_s26]   ;;  %s97_s7 = smov 48  ;;  %s102_s8 = smov 192  ;;  %vm320_vm10 = vcmask 392448   ;;  %vm373_vm11 = vcmask 261248  }
   0x7   :  { %v424_v12 = vld [vmem:[%s865_s0 + $0xf] ss:$16 sm:%s71_s27]   ;;  %v69_v13 = vsel %vm46_vm1, %v423_v11, %v64_v10  ;;  %v428_v14 = vld [vmem:[%s865_s0 + $0x6] ss:$16 sm:%s89_s30]   ;;  %s111_s13 = smov 3  ;;  %s114_s18 = smov 12 }
   0x8   :  { %v429_v15 = vld [vmem:[%s865_s0 + $0x6] ss:$16 sm:%s92_s2]   ;;  %v74_v16 = vsel %vm51_vm2, %v424_v12, %v69_v13  ;;  %s119_s19 = smov 48  ;;  %v432_v21 = vld [vmem:[%s865_s0 + $0xe] ss:$16 sm:%s111_s13]   ;;  %s124_s22 = smov 192 }
   0x9   :  { %v95_v17 = vsel %vm41_vm0, %v429_v15, %v428_v14  ;;  %v430_v18 = vld [vmem:[%s865_s0 + $0x6] ss:$16 sm:%s97_s7]   ;;  %v433_v23 = vld [vmem:[%s865_s0 + $0xe] ss:$16 sm:%s114_s18]   ;;  %s142_s28 = smov 3  ;;  %s145_s29 = smov 12 }
   0xa   :  { %v431_v19 = vld [vmem:[%s865_s0 + $0x6] ss:$16 sm:%s102_s8]   ;;  %75 = vrot.lane.b32.xlu0 %v74_v16, %s501_s23  ;;  %v100_v20 = vsel %vm46_vm1, %v430_v18, %v95_v17  ;;  %s134_s23 = smov 3  ;;  %s502_s30 = smov 96   ;;  %v117_v25 = vsel %vm41_vm0, %v433_v23, %v432_v21 }
   0xb   :  { %v105_v22 = vsel %vm51_vm2, %v431_v19, %v100_v20  ;;  %v434_v24 = vld [vmem:[%s865_s0 + $0xe] ss:$16 sm:%s119_s19]   ;;  %s150_s4 = smov 48  ;;  %s155_s5 = smov 192  ;;  %v439_v29 = vld [vmem:[%s865_s0 + $0x5] ss:$16 sm:%s142_s28]  }
   0xc   :  { %106 = vrot.lane.b32.xlu1 %v105_v22, %s502_s30  ;;  %v435_v26 = vld [vmem:[%s865_s0 + $0xe] ss:$16 sm:%s124_s22]   ;;  %v122_v27 = vsel %vm46_vm1, %v434_v24, %v117_v25  ;;  %s164_s10 = smov 3  ;;  %s167_s15 = smov 12 }
   0xd   :  { %v437_v28 = vld [vmem:[%s865_s0 + $0x86] ss:$8 sm:%s134_s23]   ;;  %v127_v30 = vsel %vm51_vm2, %v435_v26, %v122_v27  ;;  %v440_v31 = vld [vmem:[%s865_s0 + $0x5] ss:$16 sm:%s145_s29]   ;;  %s172_s16 = smov 48  ;;  %s177_s19 = smov 192 }
   0xe   :  { %v441_v32 = vld [vmem:[%s865_s0 + $0x5] ss:$16 sm:%s150_s4]   ;;  %128 = vrot.lane.b32.xlu0 %v127_v30, %s502_s30  ;;  %v148_v33 = vsel %vm41_vm0, %v440_v31, %v439_v29  ;;  %s187_s20 = smov 3  ;;  %s195_s23 = smov 3 }
   0xf   :  { %v442_v34 = vld [vmem:[%s865_s0 + $0x5] ss:$16 sm:%s155_s5]   ;;  %v153_v35 = vsel %vm46_vm1, %v441_v32, %v148_v33  ;;  %v443_v36 = vld [vmem:[%s865_s0 + $0xd] ss:$16 sm:%s164_s10]   ;;  %s198_s28 = smov 12  ;;  %s203_s29 = smov 48 }
  0x10   :  { %136 = vrot.lane.b32.xlu1 %v437_v28, %s502_s30  ;;  %v158_v37 = vsel %vm51_vm2, %v442_v34, %v153_v35  ;;  %v444_v38 = vld [vmem:[%s865_s0 + $0xd] ss:$16 sm:%s167_s15]   ;;  %s208_s5 = smov 192  ;;  %s503_s6 = smov 80  }
  0x11   :  { %v445_v39 = vld [vmem:[%s865_s0 + $0xd] ss:$16 sm:%s172_s16]   ;;  %v170_v40 = vsel %vm41_vm0, %v444_v38, %v443_v36  ;;  %v450_v44 = vld [vmem:[%s865_s0 + $0x4] ss:$16 sm:%s195_s23]   ;;  %s217_s9 = smov 3  ;;  %s220_s10 = smov 12 }
  0x12   :  { %v446_v41 = vld [vmem:[%s865_s0 + $0xd] ss:$16 sm:%s177_s19]   ;;  %159 = vrot.lane.b32.xlu0 %v158_v37, %s503_s6  ;;  %v175_v43 = vsel %vm46_vm1, %v445_v39, %v170_v40  ;;  %s225_s15 = smov 48  ;;  %s230_s18 = smov 192 }
  0x13   :  { %v448_v42 = vld [vmem:[%s865_s0 + $0x85] ss:$8 sm:%s187_s20]   ;;  %v180_v45 = vsel %vm51_vm2, %v446_v41, %v175_v43  ;;  %v451_v46 = vld [vmem:[%s865_s0 + $0x4] ss:$16 sm:%s198_s28]   ;;  %s240_s19 = smov 3  ;;  %s248_s24 = smov 3 }
  0x14   :  { %v452_v47 = vld [vmem:[%s865_s0 + $0x4] ss:$16 sm:%s203_s29]   ;;  %181 = vrot.lane.b32.xlu1 %v180_v45, %s503_s6  ;;  %v201_v48 = vsel %vm41_vm0, %v451_v46, %v450_v44  ;;  %s251_s27 = smov 12  ;;  %s256_s28 = smov 48 }
  0x15   :  { %v453_v49 = vld [vmem:[%s865_s0 + $0x4] ss:$16 sm:%s208_s5]   ;;  %v206_v50 = vsel %vm46_vm1, %v452_v47, %v201_v48  ;;  %v454_v51 = vld [vmem:[%s865_s0 + $0xc] ss:$16 sm:%s217_s9]   ;;  %s261_s4 = smov 192  ;;  %s504_s5 = smov 64  }
  0x16   :  { %v455_v52 = vld [vmem:[%s865_s0 + $0xc] ss:$16 sm:%s220_s10]   ;;  %189 = vrot.lane.b32.xlu0 %v448_v42, %s503_s6  ;;  %v211_v53 = vsel %vm51_vm2, %v453_v49, %v206_v50  ;;  %s270_s8 = smov 3  ;;  %s273_s9 = smov 12 }
  0x17   :  { %v223_v54 = vsel %vm41_vm0, %v455_v52, %v454_v51  ;;  %v456_v55 = vld [vmem:[%s865_s0 + $0xc] ss:$16 sm:%s225_s15]   ;;  %v461_v60 = vld [vmem:[%s865_s0 + $0x3] ss:$16 sm:%s248_s24]   ;;  %s278_s14 = smov 48  ;;  %s283_s17 = smov 192 }
  0x18   :  { %v228_v56 = vsel %vm46_vm1, %v456_v55, %v223_v54  ;;  %v457_v57 = vld [vmem:[%s865_s0 + $0xc] ss:$16 sm:%s230_s18]   ;;  %212 = vrot.lane.b32.xlu1 %v211_v53, %s504_s5  ;;  %s293_s18 = smov 3  ;;  %s301_s23 = smov 3 }
  0x19   :  { %v459_v58 = vld [vmem:[%s865_s0 + $0x84] ss:$8 sm:%s240_s19]   ;;  %v233_v59 = vsel %vm51_vm2, %v457_v57, %v228_v56  ;;  %v462_v61 = vld [vmem:[%s865_s0 + $0x3] ss:$16 sm:%s251_s27]   ;;  %s304_s26 = smov 12  ;;  %s309_s27 = smov 48 }
  0x1a   :  { %v463_v62 = vld [vmem:[%s865_s0 + $0x3] ss:$16 sm:%s256_s28]   ;;  %234 = vrot.lane.b32.xlu0 %v233_v59, %s504_s5  ;;  %v254_v63 = vsel %vm41_vm0, %v462_v61, %v461_v60  ;;  %s314_s3 = smov 192  ;;  %s323_s7 = smov 3 }
  0x1b   :  { %v464_v0 = vld [vmem:[%s865_s0 + $0x3] ss:$16 sm:%s261_s4]   ;;  %v259_v1 = vsel %vm46_vm1, %v463_v62, %v254_v63  ;;  %v465_v2 = vld [vmem:[%s865_s0 + $0xb] ss:$16 sm:%s270_s8]   ;;  %s505_s4 = smov 48   ;;  %s326_s8 = smov 12 }
  0x1c   :  { %v466_v3 = vld [vmem:[%s865_s0 + $0xb] ss:$16 sm:%s273_s9]   ;;  %242 = vrot.lane.b32.xlu1 %v459_v58, %s504_s5  ;;  %v264_v4 = vsel %vm51_vm2, %v464_v0, %v259_v1  ;;  %s331_s13 = smov 48  ;;  %s336_s16 = smov 192 }
  0x1d   :  { %v276_v5 = vsel %vm41_vm0, %v466_v3, %v465_v2  ;;  %v467_v6 = vld [vmem:[%s865_s0 + $0xb] ss:$16 sm:%s278_s14]   ;;  %v472_v11 = vld [vmem:[%s865_s0 + $0x2] ss:$16 sm:%s301_s23]   ;;  %s354_s22 = smov 3  ;;  %s357_s25 = smov 12 }
  0x1e   :  { %v281_v7 = vsel %vm46_vm1, %v467_v6, %v276_v5  ;;  %v468_v8 = vld [vmem:[%s865_s0 + $0xb] ss:$16 sm:%s283_s17]   ;;  %265 = vrot.lane.b32.xlu0 %v264_v4, %s505_s4  ;;  %s346_s17 = smov 3  ;;  %s367_s2 = smov 192 }
  0x1f   :  { %v470_v9 = vld [vmem:[%s865_s0 + $0x83] ss:$8 sm:%s293_s18]   ;;  %v286_v10 = vsel %vm51_vm2, %v468_v8, %v281_v7  ;;  %v473_v12 = vld [vmem:[%s865_s0 + $0x2] ss:$16 sm:%s304_s26]   ;;  %s362_s26 = smov 48  ;;  %s384_s14 = smov 48 }
  0x20   :  { %v474_v13 = vld [vmem:[%s865_s0 + $0x2] ss:$16 sm:%s309_s27]   ;;  %287 = vrot.lane.b32.xlu1 %v286_v10, %s505_s4  ;;  %v307_v14 = vsel %vm41_vm0, %v473_v12, %v472_v11  ;;  %v2_v27 = vld [vmem:[%s865_s0] ss:$8 sm:$0xf]   ;;  %s30_s24 = smov 3 }
  0x21   :  { %v475_v15 = vld [vmem:[%s865_s0 + $0x2] ss:$16 sm:%s314_s3]   ;;  %v312_v16 = vsel %vm46_vm1, %v474_v13, %v307_v14  ;;  %v476_v17 = vld [vmem:[%s865_s0 + $0xa] ss:$16 sm:%s323_s7]   ;;  %s376_s3 = smov 3  ;;  %s379_s7 = smov 12 }
  0x22   :  { %v477_v18 = vld [vmem:[%s865_s0 + $0xa] ss:$16 sm:%s326_s8]   ;;  %295 = vrot.lane.b32.xlu0 %v470_v9, %s505_s4  ;;  %v317_v19 = vsel %vm51_vm2, %v475_v15, %v312_v16  ;;  %s506_s4 = smov 32   ;;  %v3_v32 = vld [vmem:[%s865_s0] ss:$8 sm:$0xf0]  }
  0x23   :  { %v329_v20 = vsel %vm41_vm0, %v477_v18, %v476_v17  ;;  %v478_v21 = vld [vmem:[%s865_s0 + $0xa] ss:$16 sm:%s331_s13]   ;;  %v483_v26 = vld [vmem:[%s865_s0 + $0x1] ss:$16 sm:%s354_s22]   ;;  %v5_v36 = vsel %vm4_vm3, %v3_v32, %v2_v27  ;;  %s399_s27 = smov 3  ;;  %s507_s11 = smov 16  }
  0x24   :  { %v334_v22 = vsel %vm46_vm1, %v478_v21, %v329_v20  ;;  %v479_v23 = vld [vmem:[%s865_s0 + $0xa] ss:$16 sm:%s336_s16]   ;;  %318 = vrot.lane.b32.xlu1 %v317_v19, %s506_s4  ;;  %7 = vst.msk [vmem:[%s866_s1] ss:$8 sm:$0x3] %vm6_vm4, %v5_v36  }
  0x25   :  { %v481_v24 = vld [vmem:[%s865_s0 + $0x82] ss:$8 sm:%s346_s17]   ;;  %v339_v25 = vsel %vm51_vm2, %v479_v23, %v334_v22  ;;  %v484_v28 = vld [vmem:[%s865_s0 + $0x1] ss:$16 sm:%s357_s25]   ;;  %s389_s17 = smov 192 }
  0x26   :  { %v485_v29 = vld [vmem:[%s865_s0 + $0x1] ss:$16 sm:%s362_s26]   ;;  %340 = vrot.lane.b32.xlu0 %v339_v25, %s506_s4  ;;  %v360_v30 = vsel %vm41_vm0, %v484_v28, %v483_v26  ;;  %406 = vst.msk [vmem:[%s866_s1 - $0xf] ss:$8 sm:$0xc] %vm6_vm4, %v5_v36  }
  0x27   :  { %v486_v31 = vld [vmem:[%s865_s0 + $0x1] ss:$16 sm:%s367_s2]   ;;  %v365_v33 = vsel %vm46_vm1, %v485_v29, %v360_v30  ;;  %v487_v34 = vld [vmem:[%s865_s0 + $0x9] ss:$16 sm:%s376_s3]  }
  0x28   :  { %v488_v35 = vld [vmem:[%s865_s0 + $0x9] ss:$16 sm:%s379_s7]   ;;  %348 = vrot.lane.b32.xlu1 %v481_v24, %s506_s4  ;;  %v370_v37 = vsel %vm51_vm2, %v486_v31, %v365_v33  ;;  %407 = vst.msk [vmem:[%s866_s1 - $0x1e] ss:$8 sm:$0x30] %vm6_vm4, %v5_v36  }
  0x29   :  { %v382_v38 = vsel %vm41_vm0, %v488_v35, %v487_v34  ;;  %v489_v39 = vld [vmem:[%s865_s0 + $0x9] ss:$16 sm:%s384_s14]   ;;  %408 = vst.msk [vmem:[%s866_s1 - $0x2d] ss:$8 sm:$0xc0] %vm6_vm4, %v5_v36  }
  0x2a   :  { %v409_v40 = vld [vmem:[%s865_s0 + $0x40] ss:$8 sm:$0xf]   ;;  %v387_v41 = vsel %vm46_vm1, %v489_v39, %v382_v38  ;;  %v490_v42 = vld [vmem:[%s865_s0 + $0x9] ss:$16 sm:%s389_s17]   ;;  %371 = vrot.lane.b32.xlu0 %v370_v37, %s507_s11 }
  0x2b   :  { %v392_v43 = vsel %vm51_vm2, %v490_v42, %v387_v41  ;;  %v415_v44 = vld [vmem:[%s865_s0 + $0x80] ss:$8 sm:%s30_s24]   ;;  %v492_v46 = vld [vmem:[%s865_s0 + $0x81] ss:$8 sm:%s399_s27]  }
  0x2c   :  { %v410_v45 = vld [vmem:[%s865_s0 + $0x40] ss:$8 sm:$0xf0]   ;;  %416 = vst.msk [vmem:[%s866_s1 + $0x10] ss:$8 sm:$0x3] %vm6_vm4, %v415_v44   ;;  %393 = vrot.lane.b32.xlu1 %v392_v43, %s507_s11 }
  0x2d   :  { %v19_v47 = vsel %vm4_vm3, %v410_v45, %v409_v40 }
  0x2e   :  { %411 = vst.msk [vmem:[%s866_s1 + $0x4] ss:$8 sm:$0x3] %vm6_vm4, %v19_v47   ;;  %412 = vst.msk [vmem:[%s866_s1 - $0xb] ss:$8 sm:$0xc] %vm6_vm4, %v19_v47   ;;  %401 = vrot.lane.b32.xlu0 %v492_v46, %s507_s11 }
  0x2f   :  { %413 = vst.msk [vmem:[%s866_s1 - $0x1a] ss:$8 sm:$0x30] %vm6_vm4, %v19_v47   ;;  %414 = vst.msk [vmem:[%s866_s1 - $0x29] ss:$8 sm:$0xc0] %vm6_vm4, %v19_v47  }
  0x78   :  { %v84_v48 = vpop.permute.xlu1 %83   ;;  %v54_v49 = vpop.permute.xlu0 %53  }
  0x79   :  { %427 = vst.msk [vmem:[%s866_s1 + $0x10] ss:$8 sm:$0x3] %vm55_vm5, %v84_v48   ;;  %56 = vst.msk [vmem:[%s866_s1] sm:$0xff] %vm55_vm5, %v54_v49  }
  0x7c   :  { %v76_v50 = vpop.permute.xlu0 %75  }
  0x7d   :  { %425 = vst.msk [vmem:[%s866_s1 + $0x8] sm:$0xff] %vm55_vm5, %v76_v50  }
  0x7e   :  { %v107_v51 = vpop.permute.xlu1 %106  }
  0x7f   :  { %109 = vst.msk [vmem:[%s866_s1] sm:$0xff] %vm108_vm6, %v107_v51  }
  0x80   :  { %v129_v52 = vpop.permute.xlu0 %128  }
  0x81   :  { %436 = vst.msk [vmem:[%s866_s1 + $0x8] sm:$0xff] %vm108_vm6, %v129_v52  }
  0x82   :  { %v137_v53 = vpop.permute.xlu1 %136  }
  0x83   :  { %438 = vst.msk [vmem:[%s866_s1 + $0x10] ss:$8 sm:$0x3] %vm108_vm6, %v137_v53  }
  0x84   :  { %v160_v54 = vpop.permute.xlu0 %159  }
  0x85   :  { %162 = vst.msk [vmem:[%s866_s1] sm:$0xff] %vm161_vm7, %v160_v54  }
  0x86   :  { %v182_v55 = vpop.permute.xlu1 %181  }
  0x87   :  { %447 = vst.msk [vmem:[%s866_s1 + $0x8] sm:$0xff] %vm161_vm7, %v182_v55  }
  0x88   :  { %v190_v56 = vpop.permute.xlu0 %189  }
  0x89   :  { %449 = vst.msk [vmem:[%s866_s1 + $0x10] ss:$8 sm:$0x3] %vm161_vm7, %v190_v56  }
  0x8a   :  { %v213_v57 = vpop.permute.xlu1 %212  }
  0x8b   :  { %215 = vst.msk [vmem:[%s866_s1] sm:$0xff] %vm214_vm8, %v213_v57  }
  0x8c   :  { %v235_v58 = vpop.permute.xlu0 %234  }
  0x8d   :  { %458 = vst.msk [vmem:[%s866_s1 + $0x8] sm:$0xff] %vm214_vm8, %v235_v58  }
  0x8e   :  { %v243_v59 = vpop.permute.xlu1 %242  }
  0x8f   :  { %460 = vst.msk [vmem:[%s866_s1 + $0x10] ss:$8 sm:$0x3] %vm214_vm8, %v243_v59  }
  0x90   :  { %v266_v60 = vpop.permute.xlu0 %265  }
  0x91   :  { %268 = vst.msk [vmem:[%s866_s1] sm:$0xff] %vm267_vm9, %v266_v60  }
  0x92   :  { %v288_v61 = vpop.permute.xlu1 %287  }
  0x93   :  { %469 = vst.msk [vmem:[%s866_s1 + $0x8] sm:$0xff] %vm267_vm9, %v288_v61  }
  0x94   :  { %v296_v62 = vpop.permute.xlu0 %295  }
  0x95   :  { %471 = vst.msk [vmem:[%s866_s1 + $0x10] ss:$8 sm:$0x3] %vm267_vm9, %v296_v62  }
  0x96   :  { %v319_v63 = vpop.permute.xlu1 %318  }
  0x97   :  { %321 = vst.msk [vmem:[%s866_s1] sm:$0xff] %vm320_vm10, %v319_v63  }
  0x98   :  { %v341_v0 = vpop.permute.xlu0 %340  }
  0x99   :  { %480 = vst.msk [vmem:[%s866_s1 + $0x8] sm:$0xff] %vm320_vm10, %v341_v0  }
  0x9a   :  { %v349_v1 = vpop.permute.xlu1 %348  }
  0x9b   :  { %482 = vst.msk [vmem:[%s866_s1 + $0x10] ss:$8 sm:$0x3] %vm320_vm10, %v349_v1  }
  0x9c   :  { %v372_v2 = vpop.permute.xlu0 %371  }
  0x9d   :  { %374 = vst.msk [vmem:[%s866_s1] sm:$0xff] %vm373_vm11, %v372_v2  }
  0x9e   :  { %v394_v3 = vpop.permute.xlu1 %393  }
  0x9f   :  { %491 = vst.msk [vmem:[%s866_s1 + $0x8] sm:$0xff] %vm373_vm11, %v394_v3  }
  0xa0   :  { %v402_v4 = vpop.permute.xlu0 %401  }
  0xa1   :  { %493 = vst.msk [vmem:[%s866_s1 + $0x10] ss:$8 sm:$0x3] %vm373_vm11, %v402_v4  }

// kernel: tvim_block_forward.16
= control target key start
LH: loop header
LB: loop body
LE: loop exit
PB: predicated region body
PF: predicated region fallthrough
CT: control target
= control target key end

     0   :  { %s843_s12 = smov 0   ;;  %s1253_s0 = inlined_call_operand.vmem [shape: bf16[2,18,288], index: 0, kind: input, shape index: {}]   ;;  %s1254_s1 = inlined_call_operand.vmem [shape: f32[9,256], index: 1, kind: input, shape index: {}]   ;;  %s1255_s2 = inlined_call_operand.vmem [shape: f32[1,256], index: 2, kind: input, shape index: {}]   ;;  %s1256_s3 = inlined_call_operand.vmem [shape: bf16[2,16,256], index: 3, kind: output, shape index: {}]  }
   0x1 LB: > { %s781_s13 = sadd.s32 4294967295, %s817_s12   ;;  %p785_p0 = scmp.ge.s32.totalorder %s817_s12, 1  ;;  %s817_s12 = sphi %s843_s12, %s13_s12  }
   0x2   : > { %p137_p1 = scmp.lt.s32.totalorder %s817_s12, 3 }
   0x4   : > { %p138_p2 = pnand %p785_p0, %p137_p1 }
   0x5   : > { %v190_v0 = vlaneseq (!%p138_p2)  ;;  %v856_v2 = vld [vmem:[%s1254_s1] sm:$0xff] (!%p138_p2)  ;;  %v865_v5 = vld [vmem:[%s1254_s1 + $0x8] sm:$0xff] (!%p138_p2)  ;;  %s819_s18 = smov (!%p138_p2), 32   ;;  %s820_s19 = smov (!%p138_p2), 16   ;;  %v790_v19 = vld [vmem:[%s1254_s1 + $0x18] ss:$0 sm:$0xff] (!%p138_p2) }
   0x6   : > { %141 = sbr.rel (%p138_p2) target bundleno = 345 (0x159), region = 32  ;;  %v789_v20 = vld [vmem:[%s1254_s1 + $0x10] ss:$0 sm:$0xff] (!%p138_p2)  ;;  %p161_p3 = scmp.lt.s32.totalorder (!%p138_p2), %s781_s13, 1  ;;  %vm220_vm0 = vcmask (!%p138_p2), 130048   ;;  %vm276_vm1 = vcmask (!%p138_p2), 261120  }
   0x7   : > { %v851_v1 = vshrl.u32 (!%p138_p2), %v190_v0, 7  ;;  %vm527_vm2 = vcmask (!%p138_p2), 1045504   ;;  %s821_s28 = smov (!%p138_p2), 96   ;;  %s822_s29 = smov (!%p138_p2), 112   ;;  %vm338_vm3 = vcmask (!%p138_p2), 1046528   ;;  %vm305_vm4 = vcmask (!%p138_p2), 785408  }
   0x8   : > { %vm249_vm5 = vcmask (!%p138_p2), 916480  }
   0x9   : > { %v264_v3 = vsub.s32 (!%p138_p2), 2, %v851_v1  ;;  %v860_v4 = vsub.s32 (!%p138_p2), 1, %v851_v1  ;;  %v359_v10 = vsub.s32 (!%p138_p2), 4, %v851_v1  ;;  %v434_v13 = vsub.s32 (!%p138_p2), 5, %v851_v1 }
   0xa   : > { %v548_v16 = vsub.s32 (!%p138_p2), 7, %v851_v1 }
   0xb   : > { %v265_v6 = vrot.slane (!%p138_p2), %v856_v2, %v264_v3  ;;  %v209_v7 = vrot.slane (!%p138_p2), %v856_v2, %v860_v4  ;;  %v269_v8 = vrot.slane (!%p138_p2), %v865_v5, %v264_v3  ;;  %v213_v9 = vrot.slane (!%p138_p2), %v865_v5, %v860_v4 }
   0xc   : > { %v364_v11 = vrot.slane (!%p138_p2), %v865_v5, %v359_v10  ;;  %v360_v12 = vrot.slane (!%p138_p2), %v856_v2, %v359_v10  ;;  %v439_v14 = vrot.slane (!%p138_p2), %v865_v5, %v434_v13  ;;  %v435_v15 = vrot.slane (!%p138_p2), %v856_v2, %v434_v13 }
   0xd   : > { %272 = vrot.lane.b32.xlu1 %v265_v6, %s819_s18  ;;  %216 = vrot.lane.b32.xlu0 %v209_v7, %s820_s19  ;;  %v553_v17 = vrot.slane %v865_v5, %v548_v16  ;;  %v549_v18 = vrot.slane %v856_v2, %v548_v16  ;;  %s1258_s13 = smov (!%p161_p3, %s781_s13), 1 }
   0xe   : > { %s798_s24 = smul.u32 36, %s1258_s13  ;;  %s795_s5 = sshll.u32 %s1258_s13, 4 }
   0xf   : > { %s170_s8 = scalar_lea.vmem %s1256_s3, %s795_s5 }
  0x10   : > { %s165_s27 = scalar_lea.vmem %s1253_s0, %s798_s24 }
  0x11   : > { %274 = vrot.lane.b32.xlu1 %v269_v8, %s819_s18  ;;  %218 = vrot.lane.b32.xlu0 %v213_v9, %s820_s19  ;;  %v172_v31 = vld [vmem:[%s165_s27 + $0x8] ss:$12 sps:$4 sm:$0xff]   ;;  %v171_v34 = vld [vmem:[%s165_s27] sm:$0xff] }
  0x12   : > { %v173_v35 = vld [vmem:[%s165_s27 + $0xc] sm:$0xff]  ;;  %v175_v36 = vld [vmem:[%s165_s27 + $0x18] sm:$0x11]  ;;  %v931_v38 = vunpack.c.l.bf16 %v172_v31  ;;  %v933_v39 = vunpack.c.h.bf16 %v172_v31  ;;  %v935_v40 = vunpack.c.l.bf16 %v171_v34  ;;  %v937_v41 = vunpack.c.h.bf16 %v171_v34  ;;  %v176_v50 = vld [vmem:[%s165_s27 + $0x20] sm:$0x1] }
  0x13   : > { %v939_v42 = vunpack.c.l.bf16 %v173_v35  ;;  %v941_v43 = vunpack.c.l.bf16 %v175_v36  ;;  %v943_v46 = vunpack.c.h.bf16 %v173_v35  ;;  %v953_v61 = vunpack.c.l.bf16 %v176_v50 }
  0x14   : > { %v961_v8 = vunpack.c.h.bf16 %v175_v36 }
  0x15   : > { %369 = vrot.lane.b32.xlu1 %v364_v11, %s820_s19  ;;  %367 = vrot.lane.b32.xlu0 %v360_v12, %s820_s19 }
  0x19   : > { %444 = vrot.lane.b32.xlu1 %v439_v14, %s819_s18  ;;  %442 = vrot.lane.b32.xlu0 %v435_v15, %s819_s18 }
  0x1d   : > { %558 = vrot.lane.b32.xlu1 %v553_v17, %s820_s19  ;;  %556 = vrot.lane.b32.xlu0 %v549_v18, %s820_s19 }
  0x21   : > { %633 = vrot.lane.b32.xlu1 %v790_v19, %s819_s18  ;;  %631 = vrot.lane.b32.xlu0 %v789_v20, %s819_s18 }
  0x7f   : > { %v888_v21 = vpop.permute.xlu1 %272  ;;  %v890_v22 = vpop.permute.xlu0 %216 }
  0x80   : > { %v225_v17 = vmul.f32 %v890_v22, %v935_v40  ;;  %v228_v19 = vmul.f32 %v890_v22, %v939_v42 }
  0x83   : > { %v894_v23 = vpop.permute.xlu1 %274  ;;  %v896_v24 = vpop.permute.xlu0 %218 }
  0x84   : > { %v221_v50 = vsel %vm220_vm0, %v890_v22, %v896_v24 }
  0x87   : > { %v902_v25 = vpop.permute.xlu1 %369  ;;  %v904_v26 = vpop.permute.xlu0 %367 }
  0x88   : > { %v909_v27 = vsel %vm220_vm0, %v904_v26, %v902_v25  ;;  %v381_v22 = vmul.f32 %v904_v26, %v941_v43 }
  0x8b   : > { %v912_v28 = vpop.permute.xlu1 %444  ;;  %v914_v29 = vpop.permute.xlu0 %442 }
  0x8c   : > { %v919_v30 = vsel %vm276_vm1, %v914_v29, %v912_v28 }
  0x8f   : > { %v924_v32 = vpop.permute.xlu1 %558  ;;  %v926_v33 = vpop.permute.xlu0 %556 }
  0x90   : > { %v560_v37 = vsel %vm220_vm0, %v926_v33, %v924_v32 }
  0x91   : > { %v565_v9 = vmul.f32 %v560_v37, %v937_v41  ;;  %v568_v10 = vmul.f32 %v560_v37, %v943_v46  ;;  %v571_v13 = vmul.f32 %v560_v37, %v961_v8  ;;  %v227_v37 = vmul.f32 %v896_v24, %v931_v38 }
  0x93   : > { %v634_v44 = vpop.permute.xlu1 %633  ;;  %v632_v45 = vpop.permute.xlu0 %631  ;;  %v585_v12 = vrot.slane %v565_v9, 2  ;;  %v586_v14 = vrot.slane %v568_v10, 2  ;;  %v593_v18 = vrot.slane %v571_v13, 2  ;;  %v456_v10 = vmul.f32 %v914_v29, %v941_v43 }
  0x94   : > { %v641_v47 = vmul.f32 %v634_v44, %v931_v38  ;;  %v644_v48 = vmul.f32 %v634_v44, %v933_v39  ;;  %v635_v49 = vsel %vm276_vm1, %v632_v45, %v634_v44  ;;  %v639_v51 = vmul.f32 %v632_v45, %v935_v40 }
  0x95   : > { %v642_v52 = vmul.f32 %v632_v45, %v939_v42  ;;  %v645_v53 = vmul.f32 %v632_v45, %v941_v43  ;;  %v640_v54 = vmul.f32 %v635_v49, %v937_v41  ;;  %v643_v55 = vmul.f32 %v635_v49, %v943_v46 }
  0x96   : > { %v663_v56 = vrot.slane %v641_v47, 2  ;;  %v657_v59 = vrot.slane %v639_v51, 2  ;;  %v664_v60 = vrot.slane %v644_v48, 2  ;;  %v647_v6 = vmul.f32 %v634_v44, %v953_v61 }
  0x97   : > { %v658_v57 = vrot.slane %v642_v52, 2  ;;  %v666_v58 = vrot.slane %v645_v53, 2  ;;  %v660_v0 = vrot.slane %v640_v54, 2  ;;  %v661_v3 = vrot.slane %v643_v55, 2 }
  0x98   : > { %v665_v7 = vsel %vm527_vm2, %v663_v56, %v664_v60  ;;  %v670_v15 = vrot.slane %v647_v6, 2  ;;  %v646_v16 = vmul.f32 %v635_v49, %v961_v8  ;;  %v975_v20 = vsel %vm527_vm2, %v585_v12, %v586_v14 }
  0x99   : > { %v667_v62 = vsel %vm527_vm2, %v658_v57, %v666_v58  ;;  %v659_v63 = vsel %vm527_vm2, %v657_v59, %v658_v57  ;;  %v662_v11 = vsel %vm527_vm2, %v660_v0, %v661_v3  ;;  %v981_v35 = vsel %vm527_vm2, %v586_v14, %v593_v18 }
  0x9a   : > { %678 = vrot.lane.b32.xlu1 %v667_v62, %s821_s28  ;;  %672 = vrot.lane.b32.xlu0 %v659_v63, %s821_s28  ;;  %v978_v31 = vsel %vm527_vm2, %v664_v60, %v670_v15  ;;  %v668_v34 = vrot.slane %v646_v16, 2  ;;  %v230_v44 = vmul.f32 %v896_v24, %v933_v39  ;;  %v281_v45 = vmul.f32 %v888_v21, %v935_v40 }
  0x9b   : > { %v284_v47 = vmul.f32 %v888_v21, %v939_v42  ;;  %v283_v48 = vmul.f32 %v894_v23, %v931_v38  ;;  %v286_v49 = vmul.f32 %v894_v23, %v933_v39  ;;  %v226_v51 = vmul.f32 %v221_v50, %v937_v41 }
  0x9c   : > { %v986_v36 = vsel %vm527_vm2, %v661_v3, %v668_v34  ;;  %v229_v52 = vmul.f32 %v221_v50, %v943_v46  ;;  %v277_v53 = vsel %vm276_vm1, %v888_v21, %v894_v23  ;;  %v375_v54 = vmul.f32 %v904_v26, %v935_v40 }
  0x9d   : > { %v378_v55 = vmul.f32 %v904_v26, %v939_v42  ;;  %v380_v24 = vmul.f32 %v902_v25, %v933_v39  ;;  %v383_v56 = vmul.f32 %v902_v25, %v953_v61  ;;  %v320_v21 = vsub.s32 3, %v851_v1 }
  0x9e   : > { %674 = vrot.lane.b32.xlu1 %v662_v11, %s821_s28  ;;  %676 = vrot.lane.b32.xlu0 %v665_v7, %s821_s28  ;;  %v377_v23 = vmul.f32 %v902_v25, %v931_v38  ;;  %v282_v57 = vmul.f32 %v277_v53, %v937_v41  ;;  %v285_v58 = vmul.f32 %v277_v53, %v943_v46  ;;  %v402_v59 = vrot.slane %v381_v22, 1 }
  0x9f   : > { %v394_v26 = vrot.slane %v378_v55, 1  ;;  %v393_v60 = vrot.slane %v375_v54, 1  ;;  %v1034_v62 = vrot.slane %v865_v5, %v320_v21  ;;  %v400_v63 = vrot.slane %v380_v24, 1 }
  0xa0   : > { %v406_v0 = vrot.slane %v383_v56, 1  ;;  %v450_v3 = vmul.f32 %v914_v29, %v935_v40  ;;  %v453_v6 = vmul.f32 %v914_v29, %v939_v42  ;;  %v399_v7 = vrot.slane %v377_v23, 1 }
  0xa1   : > { %v1040_v25 = vmul.f32 %v1034_v62, %v943_v46  ;;  %v331_v9 = vmul.f32 %v1034_v62, %v961_v8  ;;  %v403_v11 = vsel %vm338_vm3, %v394_v26, %v402_v59  ;;  %v395_v12 = vsel %vm338_vm3, %v393_v60, %v394_v26 }
  0xa2   : > { %243 = vrot.lane.b32.xlu1 %v228_v19, %s822_s29  ;;  %237 = vrot.lane.b32.xlu0 %v225_v17, %s822_s29  ;;  %v452_v15 = vmul.f32 %v912_v28, %v931_v38  ;;  %v455_v16 = vmul.f32 %v912_v28, %v933_v39  ;;  %v458_v29 = vmul.f32 %v912_v28, %v953_v61  ;;  %v469_v34 = vrot.slane %v453_v6, 1 }
  0xa3   : > { %v343_v13 = vrot.slane %v1040_v25, 1  ;;  %v347_v14 = vrot.slane %v331_v9, 1  ;;  %v407_v17 = vsel %vm338_vm3, %v400_v63, %v406_v0  ;;  %v401_v19 = vsel %vm338_vm3, %v399_v7, %v400_v63 }
  0xa4   : > { %v567_v28 = vmul.f32 %v926_v33, %v939_v42  ;;  %v566_v53 = vmul.f32 %v924_v32, %v931_v38  ;;  %v569_v54 = vmul.f32 %v924_v32, %v933_v39  ;;  %v572_v55 = vmul.f32 %v924_v32, %v953_v61 }
  0xa5   : > { %v1065_v18 = vsel %vm338_vm3, %v343_v13, %v347_v14  ;;  %v376_v38 = vmul.f32 %v909_v27, %v937_v41  ;;  %v379_v39 = vmul.f32 %v909_v27, %v943_v46  ;;  %v382_v59 = vmul.f32 %v909_v27, %v961_v8 }
  0xa6   : > { %247 = vrot.lane.b32.xlu1 %v230_v44, %s822_s29  ;;  %241 = vrot.lane.b32.xlu0 %v227_v37, %s822_s29  ;;  %v477_v37 = vrot.slane %v456_v10, 1  ;;  %v468_v44 = vrot.slane %v450_v3, 1  ;;  %v583_v24 = vrot.slane %v567_v28, 2  ;;  %v588_v26 = vrot.slane %v566_v53, 2 }
  0xa7   : > { %v509_v60 = vsub.s32 6, %v851_v1  ;;  %v396_v63 = vrot.slane %v376_v38, 1  ;;  %v397_v3 = vrot.slane %v379_v39, 1  ;;  %v451_v6 = vmul.f32 %v919_v30, %v937_v41 }
  0xa8   : > { %v478_v50 = vsel %vm338_vm3, %v469_v34, %v477_v37  ;;  %v404_v9 = vrot.slane %v382_v59, 1  ;;  %v454_v10 = vmul.f32 %v919_v30, %v943_v46  ;;  %v1155_v38 = vsub.s32 0, %v851_v1 }
  0xa9   : > { %v1107_v7 = vrot.slane %v865_v5, %v509_v60  ;;  %v321_v39 = vrot.slane %v856_v2, %v320_v21  ;;  %v510_v21 = vrot.slane %v856_v2, %v509_v60 }
  0xaa   : > { %299 = vrot.lane.b32.xlu1 %v284_v47, %s821_s28  ;;  %293 = vrot.lane.b32.xlu0 %v281_v45, %s821_s28  ;;  %v564_v45 = vmul.f32 %v926_v33, %v935_v40  ;;  %v475_v47 = vrot.slane %v455_v16, 1  ;;  %v471_v16 = vrot.slane %v451_v6, 1 }
  0xab   : > { %v1119_v14 = vmul.f32 %v1107_v7, %v943_v46  ;;  %v330_v6 = vmul.f32 %v321_v39, %v941_v43 }
  0xac   : > { %v582_v23 = vrot.slane %v564_v45, 2 }
  0xae   : > { %303 = vrot.lane.b32.xlu1 %v286_v49, %s821_s28  ;;  %297 = vrot.lane.b32.xlu0 %v283_v48, %s821_s28  ;;  %v481_v48 = vrot.slane %v458_v29, 1  ;;  %v570_v49 = vmul.f32 %v926_v33, %v941_v43  ;;  %v584_v61 = vsel %vm527_vm2, %v582_v23, %v583_v24  ;;  %v472_v29 = vrot.slane %v454_v10, 1 }
  0xb0   : > { %v482_v33 = vsel %vm338_vm3, %v475_v47, %v481_v48  ;;  %v591_v56 = vrot.slane %v570_v49, 2 }
  0xb2   : > { %239 = vrot.lane.b32.xlu1 %v226_v51, %s822_s29  ;;  %245 = vrot.lane.b32.xlu0 %v229_v52, %s822_s29  ;;  %v470_v51 = vsel %vm338_vm3, %v468_v44, %v469_v34  ;;  %v474_v52 = vrot.slane %v452_v15, 1  ;;  %v592_v32 = vsel %vm527_vm2, %v583_v24, %v591_v56  ;;  %v405_v15 = vsel %vm338_vm3, %v397_v3, %v404_v9 }
  0xb3   : > { %v473_v34 = vsel %vm338_vm3, %v471_v16, %v472_v29 }
  0xb4   : > { %v476_v22 = vsel %vm338_vm3, %v474_v52, %v475_v47 }
  0xb6   : > { %295 = vrot.lane.b32.xlu1 %v282_v57, %s821_s28  ;;  %301 = vrot.lane.b32.xlu0 %v285_v58, %s821_s28  ;;  %v589_v57 = vrot.slane %v569_v54, 2  ;;  %v595_v58 = vrot.slane %v572_v55, 2 }
  0xb8   : > { %v596_v0 = vsel %vm527_vm2, %v589_v57, %v595_v58  ;;  %v590_v27 = vsel %vm527_vm2, %v588_v26, %v589_v57 }
  0xba   : > { %414 = vrot.lane.b32.xlu1 %v403_v11, %s822_s29  ;;  %408 = vrot.lane.b32.xlu0 %v395_v12, %s822_s29  ;;  %v457_v11 = vmul.f32 %v919_v30, %v961_v8  ;;  %v398_v12 = vsel %vm338_vm3, %v396_v63, %v397_v3  ;;  %v532_v30 = vrot.slane %v1119_v14, 2  ;;  %v327_v63 = vmul.f32 %v1034_v62, %v937_v41 }
  0xbb   : > { %v326_v3 = vmul.f32 %v321_v39, %v935_v40 }
  0xbd   : > { %v339_v16 = vrot.slane %v326_v3, 1 }
  0xbe   : > { %418 = vrot.lane.b32.xlu1 %v407_v17, %s822_s29  ;;  %412 = vrot.lane.b32.xlu0 %v401_v19, %s822_s29  ;;  %v479_v17 = vrot.slane %v457_v11, 1  ;;  %v520_v19 = vmul.f32 %v1107_v7, %v961_v8 }
  0xc0   : > { %v480_v37 = vsel %vm338_vm3, %v472_v29, %v479_v17  ;;  %v536_v44 = vrot.slane %v520_v19, 2  ;;  %v345_v29 = vrot.slane %v330_v6, 1  ;;  %v516_v19 = vmul.f32 %v1107_v7, %v937_v41 }
  0xc2   : > { %489 = vrot.lane.b32.xlu1 %v478_v50, %s821_s28  ;;  %483 = vrot.lane.b32.xlu0 %v470_v51, %s821_s28  ;;  %v1134_v45 = vsel %vm527_vm2, %v532_v30, %v536_v44 }
  0xc6   : > { %493 = vrot.lane.b32.xlu1 %v482_v33, %s821_s28  ;;  %487 = vrot.lane.b32.xlu0 %v476_v22, %s821_s28 }
  0xca   : > { %603 = vrot.lane.b32.xlu1 %v592_v32, %s822_s29  ;;  %597 = vrot.lane.b32.xlu0 %v584_v61, %s822_s29  ;;  %v193_v32 = vrot.slane %v856_v2, %v1155_v38  ;;  %v197_v61 = vrot.slane %v865_v5, %v1155_v38 }
  0xcc   : > { %v198_v5 = vmul.f32 %v193_v32, %v935_v40  ;;  %v200_v9 = vmul.f32 %v193_v32, %v939_v42  ;;  %v201_v62 = vmul.f32 %v197_v61, %v943_v46  ;;  %v517_v46 = vmul.f32 %v510_v21, %v939_v42 }
  0xce   : > { %607 = vrot.lane.b32.xlu1 %v596_v0, %s822_s29  ;;  %601 = vrot.lane.b32.xlu0 %v590_v27, %s822_s29  ;;  %v328_v0 = vmul.f32 %v321_v39, %v939_v42  ;;  %v199_v27 = vmul.f32 %v197_v61, %v937_v41 }
  0xd2   : > { %410 = vrot.lane.b32.xlu1 %v398_v12, %s822_s29  ;;  %416 = vrot.lane.b32.xlu0 %v405_v15, %s822_s29  ;;  %v340_v12 = vrot.slane %v328_v0, 1  ;;  %v342_v15 = vrot.slane %v327_v63, 1 }
  0xd4   : > { %v341_v42 = vsel %vm338_vm3, %v339_v16, %v340_v12 }
  0xd6   : > { %485 = vrot.lane.b32.xlu1 %v473_v34, %s821_s28  ;;  %491 = vrot.lane.b32.xlu0 %v480_v37, %s821_s28  ;;  %v515_v34 = vmul.f32 %v510_v21, %v935_v40  ;;  %v519_v37 = vmul.f32 %v510_v21, %v941_v43  ;;  %v344_v40 = vsel %vm338_vm3, %v342_v15, %v343_v13 }
  0xd7   : > { %v346_v43 = vsel %vm338_vm3, %v340_v12, %v345_v29 }
  0xd8   : > { %v534_v61 = vrot.slane %v519_v37, 2 }
  0xda   : > { %599 = vrot.lane.b32.xlu1 %v975_v20, %s822_s29  ;;  %605 = vrot.lane.b32.xlu0 %v981_v35, %s822_s29 }
  0xde   : > { %682 = vrot.lane.b32.xlu1 %v978_v31, %s821_s28  ;;  %680 = vrot.lane.b32.xlu0 %v986_v36, %s821_s28 }
 0x10c   : > { %v1144_v8 = vpop.permute.xlu1 %678  ;;  %v1146_v28 = vpop.permute.xlu0 %672 }
 0x110   : > { %v1148_v47 = vpop.permute.xlu1 %674  ;;  %v1150_v48 = vpop.permute.xlu0 %676 }
 0x114   : > { %v244_v49 = vpop.permute.xlu1 %243  ;;  %v238_v50 = vpop.permute.xlu0 %237 }
 0x118   : > { %v248_v20 = vpop.permute.xlu1 %247  ;;  %v242_v51 = vpop.permute.xlu0 %241 }
 0x11c   : > { %v300_v52 = vpop.permute.xlu1 %299  ;;  %v294_v35 = vpop.permute.xlu0 %293 }
 0x120   : > { %v304_v53 = vpop.permute.xlu1 %303  ;;  %v298_v54 = vpop.permute.xlu0 %297 }
 0x124   : > { %v240_v31 = vpop.permute.xlu1 %239  ;;  %v246_v55 = vpop.permute.xlu0 %245 }
 0x125   : > { %v250_v1 = vsel %vm249_vm5, %v238_v50, %v240_v31  ;;  %v251_v2 = vsel %vm249_vm5, %v240_v31, %v242_v51  ;;  %v252_v60 = vsel %vm249_vm5, %v244_v49, %v246_v55  ;;  %v253_v17 = vsel %vm249_vm5, %v246_v55, %v248_v20 }
 0x126   : > { %v258_v49 = vadd.f32 %v250_v1, %v198_v5  ;;  %v259_v31 = vadd.f32 %v251_v2, %v199_v27  ;;  %v260_v20 = vadd.f32 %v252_v60, %v200_v9  ;;  %v261_v55 = vadd.f32 %v253_v17, %v201_v62 }
 0x128   : > { %v296_v33 = vpop.permute.xlu1 %295  ;;  %v302_v36 = vpop.permute.xlu0 %301 }
 0x129   : > { %v306_v44 = vsel %vm305_vm4, %v294_v35, %v296_v33  ;;  %v307_v39 = vsel %vm305_vm4, %v296_v33, %v298_v54  ;;  %v308_v50 = vsel %vm305_vm4, %v300_v52, %v302_v36  ;;  %v309_v51 = vsel %vm305_vm4, %v302_v36, %v304_v53 }
 0x12a   : > { %v314_v7 = vadd.f32 %v306_v44, %v258_v49  ;;  %v315_v35 = vadd.f32 %v307_v39, %v259_v31  ;;  %v316_v54 = vadd.f32 %v308_v50, %v260_v20  ;;  %v317_v52 = vadd.f32 %v309_v51, %v261_v55 }
 0x12b   : > { %v529_v33 = vrot.slane %v517_v46, 2  ;;  %v531_v53 = vrot.slane %v516_v19, 2  ;;  %v528_v36 = vrot.slane %v515_v34, 2  ;;  %v696_v46 = vld [vmem:[%s1255_s2] sm:$0x3] }
 0x12c   : > { %v1152_v22 = vpop.permute.xlu1 %414  ;;  %v409_v24 = vpop.permute.xlu0 %408  ;;  %v353_v21 = vadd.f32 %v341_v42, %v314_v7  ;;  %v354_v5 = vadd.f32 %v344_v40, %v315_v35  ;;  %v355_v27 = vadd.f32 %v346_v43, %v316_v54  ;;  %v356_v9 = vadd.f32 %v1065_v18, %v317_v52 }
 0x12d   : > { %v533_v62 = vsel %vm527_vm2, %v531_v53, %v532_v30  ;;  %v530_v12 = vsel %vm527_vm2, %v528_v36, %v529_v33  ;;  %v701_v49 = vrot.slane %v696_v46, %v1155_v38  ;;  %v705_v31 = vrot.slane %v696_v46, %v860_v4 }
 0x130   : > { %v419_v56 = vpop.permute.xlu1 %418  ;;  %v413_v23 = vpop.permute.xlu0 %412 }
 0x134   : > { %v1157_v57 = vpop.permute.xlu1 %489  ;;  %v1159_v58 = vpop.permute.xlu0 %483 }
 0x138   : > { %v1168_v26 = vpop.permute.xlu1 %493  ;;  %v1170_v59 = vpop.permute.xlu0 %487 }
 0x13c   : > { %v1184_v10 = vpop.permute.xlu1 %603  ;;  %v1186_v11 = vpop.permute.xlu0 %597 }
 0x140   : > { %v608_v32 = vpop.permute.xlu1 %607  ;;  %v602_v41 = vpop.permute.xlu0 %601 }
 0x144   : > { %v411_v63 = vpop.permute.xlu1 %410  ;;  %v417_v0 = vpop.permute.xlu0 %416 }
 0x145   : > { %v420_v3 = vsel %vm249_vm5, %v409_v24, %v411_v63  ;;  %v421_v25 = vsel %vm249_vm5, %v411_v63, %v413_v23  ;;  %v422_v13 = vsel %vm249_vm5, %v1152_v22, %v417_v0  ;;  %v423_v6 = vsel %vm249_vm5, %v417_v0, %v419_v56 }
 0x146   : > { %v535_v24 = vsel %vm527_vm2, %v529_v33, %v534_v61  ;;  %v428_v15 = vadd.f32 %v420_v3, %v353_v21  ;;  %v429_v23 = vadd.f32 %v421_v25, %v354_v5  ;;  %v430_v16 = vadd.f32 %v422_v13, %v355_v27 }
 0x147   : > { %v431_v29 = vadd.f32 %v423_v6, %v356_v9 }
 0x148   : > { %v486_v22 = vpop.permute.xlu1 %485  ;;  %v492_v1 = vpop.permute.xlu0 %491 }
 0x149   : > { %v495_v56 = vsel %vm305_vm4, %v1159_v58, %v486_v22  ;;  %v496_v18 = vsel %vm305_vm4, %v486_v22, %v1170_v59  ;;  %v497_v14 = vsel %vm305_vm4, %v1157_v57, %v492_v1  ;;  %v498_v30 = vsel %vm305_vm4, %v492_v1, %v1168_v26 }
 0x14a   : > { %v503_v2 = vadd.f32 %v495_v56, %v428_v15  ;;  %v504_v60 = vadd.f32 %v496_v18, %v429_v23  ;;  %v505_v17 = vadd.f32 %v497_v14, %v430_v16  ;;  %v506_v19 = vadd.f32 %v498_v30, %v431_v29 }
 0x14c   : > { %v600_v34 = vpop.permute.xlu1 %599  ;;  %v542_v37 = vadd.f32 %v530_v12, %v503_v2  ;;  %v543_v58 = vadd.f32 %v533_v62, %v504_v60  ;;  %v544_v44 = vadd.f32 %v535_v24, %v505_v17  ;;  %v545_v59 = vadd.f32 %v1134_v45, %v506_v19  ;;  %v606_v39 = vpop.permute.xlu0 %605 }
 0x14d   : > { %v609_v57 = vsel %vm249_vm5, %v1186_v11, %v600_v34  ;;  %v610_v26 = vsel %vm249_vm5, %v600_v34, %v602_v41  ;;  %v611_v50 = vsel %vm249_vm5, %v1184_v10, %v606_v39  ;;  %v612_v51 = vsel %vm249_vm5, %v606_v39, %v608_v32 }
 0x14e   : > { %v617_v20 = vadd.f32 %v609_v57, %v542_v37  ;;  %v618_v55 = vadd.f32 %v610_v26, %v543_v58  ;;  %v684_v45 = vsel %vm305_vm4, %v1146_v28, %v1148_v47  ;;  %v685_v11 = vsel %vm305_vm4, %v1148_v47, %v1150_v48 }
 0x14f   : > { %v619_v42 = vadd.f32 %v611_v50, %v544_v44  ;;  %v620_v10 = vadd.f32 %v612_v51, %v545_v59 }
 0x150   : > { %v692_v41 = vadd.f32 %v684_v45, %v617_v20  ;;  %v693_v40 = vadd.f32 %v685_v11, %v618_v55  ;;  %v683_v43 = vpop.permute.xlu1 %682  ;;  %v681_v32 = vpop.permute.xlu0 %680 }
 0x151   : > { %v686_v4 = vsel %vm305_vm4, %v1144_v8, %v681_v32  ;;  %v687_v38 = vsel %vm305_vm4, %v681_v32, %v683_v43 }
 0x152   : > { %v708_v7 = vadd.f32 %v701_v49, %v692_v41  ;;  %v709_v35 = vadd.f32 %v705_v31, %v693_v40  ;;  %v694_v54 = vadd.f32 %v686_v4, %v619_v42  ;;  %v695_v28 = vadd.f32 %v687_v38, %v620_v10 }
 0x154   : > { %v796_v47 = vpack.c.bf16 %v709_v35, %v708_v7  ;;  %v710_v48 = vadd.f32 %v701_v49, %v694_v54  ;;  %v711_v52 = vadd.f32 %v705_v31, %v695_v28 }
 0x156   : > { %v797_v33 = vpack.c.bf16 %v711_v52, %v710_v48  ;;  %724 = vst [vmem:[%s170_s8] sm:$0xff] %v796_v47 }
 0x158   : > { %725 = vst [vmem:[%s170_s8 + $0x8] sm:$0xff] %v797_v33 }
 0x159 PF: > { %s13_s12 = sadd.s32 1, %s817_s12  }
 0x15a   : > { %p10_p4 = scmp.ge.s32.totalorder %s13_s12, 4  }
 0x15c   :  { %12 = sbr.rel (!%p10_p4) target bundleno = 1 (0x1), region = 62 }

// kernel: tvim_block_forward.12
= control target key start
LH: loop header
LB: loop body
LE: loop exit
PB: predicated region body
PF: predicated region fallthrough
CT: control target
= control target key end

     0   :  { %s1031_s12 = smov 0   ;;  %s1469_s0 = inlined_call_operand.vmem [shape: bf16[2,16,704], index: 0, kind: input, shape index: {}]   ;;  %s1470_s1 = inlined_call_operand.vmem [shape: f32[7,512], index: 1, kind: input, shape index: {}]   ;;  %s1471_s2 = inlined_call_operand.vmem [shape: f32[1,512], index: 2, kind: input, shape index: {}]   ;;  %s1472_s3 = inlined_call_operand.vmem [shape: bf16[2,16,512], index: 3, kind: output, shape index: {}]  }
   0x1 LB: > { %s929_s13 = sadd.s32 4294967295, %s1006_s12   ;;  %p933_p0 = scmp.ge.s32.totalorder %s1006_s12, 1  ;;  %s1006_s12 = sphi %s1031_s12, %s13_s12  }
   0x2   : > { %p137_p1 = scmp.lt.s32.totalorder %s1006_s12, 3 }
   0x4   : > { %p138_p2 = pnand %p933_p0, %p137_p1 }
   0x5   : > { %v193_v0 = vlaneseq (!%p138_p2)  ;;  %v1044_v2 = vld [vmem:[%s1470_s1 + $0x10] sm:$0x7f] (!%p138_p2)  ;;  %v1049_v3 = vld [vmem:[%s1470_s1] sm:$0x7f] (!%p138_p2)  ;;  %v1057_v5 = vld [vmem:[%s1470_s1 + $0x18] sm:$0x7f] (!%p138_p2) }
   0x6   : > { %141 = sbr.rel (%p138_p2) target bundleno = 380 (0x17c), region = 32  ;;  %v1062_v6 = vld [vmem:[%s1470_s1 + $0x8] sm:$0x7f] (!%p138_p2)  ;;  %s1008_s22 = smov (!%p138_p2), 32   ;;  %vm253_vm0 = vcmask (!%p138_p2), 261120   ;;  %vm355_vm1 = vcmask (!%p138_p2), 523264  }
   0x7   : > { %v1039_v1 = vshrl.u32 (!%p138_p2), %v193_v0, 7  ;;  %s1009_s23 = smov (!%p138_p2), 64   ;;  %s1010_s24 = smov (!%p138_p2), 96   ;;  %vm302_vm2 = vcmask (!%p138_p2), 785408  }
   0x8   : > { %p161_p3 = scmp.lt.s32.totalorder (!%p138_p2), %s929_s13, 1 }
   0x9   : > { %v1052_v4 = vsub.s32 (!%p138_p2), 1, %v1039_v1  ;;  %v1075_v11 = vsub.s32 (!%p138_p2), 2, %v1039_v1  ;;  %v1090_v16 = vsub.s32 (!%p138_p2), 3, %v1039_v1  ;;  %v562_v21 = vsub.s32 (!%p138_p2), 5, %v1039_v1 }
   0xa   : > { %v662_v26 = vsub.s32 (!%p138_p2), 6, %v1039_v1 }
   0xb   : > { %v236_v7 = vrot.slane (!%p138_p2), %v1044_v2, %v1052_v4  ;;  %v228_v8 = vrot.slane (!%p138_p2), %v1049_v3, %v1052_v4  ;;  %v240_v9 = vrot.slane (!%p138_p2), %v1057_v5, %v1052_v4  ;;  %v232_v10 = vrot.slane (!%p138_p2), %v1062_v6, %v1052_v4 }
   0xc   : > { %v334_v12 = vrot.slane (!%p138_p2), %v1062_v6, %v1075_v11  ;;  %v330_v13 = vrot.slane (!%p138_p2), %v1049_v3, %v1075_v11  ;;  %v342_v14 = vrot.slane (!%p138_p2), %v1057_v5, %v1075_v11  ;;  %v338_v15 = vrot.slane (!%p138_p2), %v1044_v2, %v1075_v11 }
   0xd   : > { %249 = vrot.lane.b32.xlu1 %v236_v7, %s1008_s22  ;;  %245 = vrot.lane.b32.xlu0 %v228_v8, %s1008_s22  ;;  %v435_v17 = vrot.slane %v1062_v6, %v1090_v16  ;;  %v431_v18 = vrot.slane %v1049_v3, %v1090_v16  ;;  %v443_v19 = vrot.slane %v1057_v5, %v1090_v16  ;;  %s1474_s13 = smov (!%p161_p3, %s929_s13), 1 }
   0xe   : > { %v439_v20 = vrot.slane %v1044_v2, %v1090_v16  ;;  %v567_v22 = vrot.slane %v1062_v6, %v562_v21  ;;  %v563_v23 = vrot.slane %v1049_v3, %v562_v21  ;;  %v575_v24 = vrot.slane %v1057_v5, %v562_v21  ;;  %s956_s25 = smul.u32 48, %s1474_s13  ;;  %s951_s4 = sshll.u32 %s1474_s13, 5 }
   0xf   : > { %v571_v25 = vrot.slane %v1044_v2, %v562_v21  ;;  %v667_v27 = vrot.slane %v1062_v6, %v662_v26  ;;  %v663_v28 = vrot.slane %v1049_v3, %v662_v26  ;;  %v671_v29 = vrot.slane %v1044_v2, %v662_v26  ;;  %s170_s7 = scalar_lea.vmem %s1472_s3, %s951_s4 }
  0x10   : > { %v675_v30 = vrot.slane %v1057_v5, %v662_v26  ;;  %s1134_s28 = scalar_lea.vmem %s1469_s0, %s956_s25 }
  0x11   : > { %251 = vrot.lane.b32.xlu1 %v240_v9, %s1008_s22  ;;  %247 = vrot.lane.b32.xlu0 %v232_v10, %s1008_s22  ;;  %v171_v31 = vld [vmem:[%s1134_s28] sm:$0xff]  ;;  %v174_v32 = vld [vmem:[%s1134_s28 + $0x18] sm:$0xff] }
  0x12   : > { %v1138_v33 = vunpack.c.l.bf16 %v171_v31  ;;  %v1140_v34 = vunpack.c.l.bf16 %v174_v32  ;;  %v1143_v35 = vld [vmem:[%s1134_s28 + $0x10] sm:$0xff]  ;;  %v1146_v36 = vld [vmem:[%s1134_s28 + $0x28] sm:$0xff]  ;;  %v1196_v63 = vunpack.c.h.bf16 %v171_v31  ;;  %v1198_v0 = vunpack.c.h.bf16 %v174_v32 }
  0x13   : > { %v1153_v41 = vunpack.c.l.bf16 %v1143_v35  ;;  %v1156_v42 = vunpack.c.l.bf16 %v1146_v36 }
  0x15   : > { %349 = vrot.lane.b32.xlu1 %v334_v12, %s1009_s23  ;;  %347 = vrot.lane.b32.xlu0 %v330_v13, %s1009_s23  ;;  %v182_v12 = vunpack.c.h.bf16 %v1143_v35  ;;  %v188_v13 = vunpack.c.h.bf16 %v1146_v36 }
  0x19   : > { %353 = vrot.lane.b32.xlu1 %v342_v14, %s1009_s23  ;;  %351 = vrot.lane.b32.xlu0 %v338_v15, %s1009_s23 }
  0x1d   : > { %450 = vrot.lane.b32.xlu1 %v435_v17, %s1010_s24  ;;  %448 = vrot.lane.b32.xlu0 %v431_v18, %s1010_s24 }
  0x21   : > { %454 = vrot.lane.b32.xlu1 %v443_v19, %s1010_s24  ;;  %452 = vrot.lane.b32.xlu0 %v439_v20, %s1010_s24  ;;  %v172_v19 = vld [vmem:[%s1134_s28 + $0x8] sm:$0xff] }
  0x25   : > { %582 = vrot.lane.b32.xlu1 %v567_v22, %s1008_s22  ;;  %580 = vrot.lane.b32.xlu0 %v563_v23, %s1008_s22  ;;  %v1230_v22 = vunpack.c.l.bf16 %v172_v19 }
  0x29   : > { %586 = vrot.lane.b32.xlu1 %v575_v24, %s1008_s22  ;;  %584 = vrot.lane.b32.xlu0 %v571_v25, %s1008_s22  ;;  %v1233_v24 = vunpack.c.h.bf16 %v172_v19 }
  0x2d   : > { %682 = vrot.lane.b32.xlu1 %v667_v27, %s1009_s23  ;;  %680 = vrot.lane.b32.xlu0 %v663_v28, %s1009_s23  ;;  %v175_v27 = vld [vmem:[%s1134_s28 + $0x20] sm:$0xff] }
  0x31   : > { %684 = vrot.lane.b32.xlu0 %v671_v29, %s1009_s23  ;;  %686 = vrot.lane.b32.xlu1 %v675_v30, %s1009_s23  ;;  %v1244_v29 = vunpack.c.l.bf16 %v175_v27 }
  0x7f   : > { %v1148_v37 = vpop.permute.xlu1 %249  ;;  %v246_v38 = vpop.permute.xlu0 %245 }
  0x80   : > { %v262_v39 = vmul.f32 %v246_v38, %v1138_v33  ;;  %v267_v40 = vmul.f32 %v246_v38, %v1140_v34 }
  0x82   : > { %292 = vrot.lane.b32.xlu1 %v267_v40, %s1010_s24  ;;  %282 = vrot.lane.b32.xlu0 %v262_v39, %s1010_s24 }
  0x83   : > { %v252_v43 = vpop.permute.xlu1 %251  ;;  %v248_v44 = vpop.permute.xlu0 %247 }
  0x84   : > { %v266_v45 = vmul.f32 %v252_v43, %v1153_v41  ;;  %v271_v46 = vmul.f32 %v252_v43, %v1156_v42  ;;  %v254_v20 = vsel %vm253_vm0, %v246_v38, %v248_v44  ;;  %v256_v26 = vsel %vm253_vm0, %v1148_v37, %v252_v43 }
  0x85   : > { %v263_v23 = vmul.f32 %v254_v20, %v1196_v63  ;;  %v255_v28 = vsel %vm253_vm0, %v248_v44, %v1148_v37  ;;  %v265_v31 = vmul.f32 %v256_v26, %v1233_v24  ;;  %v268_v32 = vmul.f32 %v254_v20, %v1198_v0 }
  0x86   : > { %300 = vrot.lane.b32.xlu1 %v271_v46, %s1010_s24  ;;  %290 = vrot.lane.b32.xlu0 %v266_v45, %s1010_s24  ;;  %v264_v30 = vmul.f32 %v255_v28, %v1230_v22  ;;  %v269_v38 = vmul.f32 %v255_v28, %v1244_v29  ;;  %v1252_v37 = vunpack.c.h.bf16 %v175_v27 }
  0x87   : > { %v1164_v47 = vpop.permute.xlu1 %349  ;;  %v348_v48 = vpop.permute.xlu0 %347 }
  0x88   : > { %v364_v49 = vmul.f32 %v348_v48, %v1138_v33  ;;  %v369_v50 = vmul.f32 %v348_v48, %v1140_v34  ;;  %v356_v39 = vsel %vm355_vm1, %v348_v48, %v1164_v47  ;;  %v270_v43 = vmul.f32 %v256_v26, %v1252_v37 }
  0x89   : > { %v365_v40 = vmul.f32 %v356_v39, %v1196_v63 }
  0x8a   : > { %394 = vrot.lane.b32.xlu1 %v369_v50, %s1009_s23  ;;  %384 = vrot.lane.b32.xlu0 %v364_v49, %s1009_s23 }
  0x8b   : > { %v1170_v51 = vpop.permute.xlu1 %353  ;;  %v352_v52 = vpop.permute.xlu0 %351 }
  0x8c   : > { %v368_v53 = vmul.f32 %v1170_v51, %v1153_v41  ;;  %v373_v54 = vmul.f32 %v1170_v51, %v1156_v42  ;;  %v357_v44 = vsel %vm355_vm1, %v1164_v47, %v352_v52  ;;  %v358_v45 = vsel %vm355_vm1, %v352_v52, %v1170_v51 }
  0x8d   : > { %v366_v46 = vmul.f32 %v357_v44, %v1230_v22  ;;  %v367_v48 = vmul.f32 %v358_v45, %v1233_v24  ;;  %v371_v49 = vmul.f32 %v357_v44, %v1244_v29  ;;  %v370_v47 = vmul.f32 %v356_v39, %v1198_v0 }
  0x8e   : > { %402 = vrot.lane.b32.xlu1 %v373_v54, %s1009_s23  ;;  %392 = vrot.lane.b32.xlu0 %v368_v53, %s1009_s23  ;;  %v372_v51 = vmul.f32 %v358_v45, %v1252_v37 }
  0x8f   : > { %v1178_v55 = vpop.permute.xlu1 %450  ;;  %v1180_v56 = vpop.permute.xlu0 %448 }
  0x90   : > { %v464_v57 = vmul.f32 %v1180_v56, %v1138_v33  ;;  %v469_v58 = vmul.f32 %v1180_v56, %v1140_v34  ;;  %v456_v50 = vsel %vm302_vm2, %v1180_v56, %v1178_v55 }
  0x91   : > { %v465_v52 = vmul.f32 %v456_v50, %v1196_v63 }
  0x92   : > { %494 = vrot.lane.b32.xlu1 %v469_v58, %s1008_s22  ;;  %484 = vrot.lane.b32.xlu0 %v464_v57, %s1008_s22 }
  0x93   : > { %v1188_v59 = vpop.permute.xlu1 %454  ;;  %v1190_v60 = vpop.permute.xlu0 %452 }
  0x94   : > { %v468_v61 = vmul.f32 %v1188_v59, %v1153_v41  ;;  %v473_v62 = vmul.f32 %v1188_v59, %v1156_v42  ;;  %v457_v53 = vsel %vm302_vm2, %v1178_v55, %v1190_v60  ;;  %v458_v54 = vsel %vm302_vm2, %v1190_v60, %v1188_v59 }
  0x95   : > { %v466_v56 = vmul.f32 %v457_v53, %v1230_v22  ;;  %v467_v57 = vmul.f32 %v458_v54, %v1233_v24  ;;  %v471_v58 = vmul.f32 %v457_v53, %v1244_v29  ;;  %v470_v55 = vmul.f32 %v456_v50, %v1198_v0 }
  0x96   : > { %502 = vrot.lane.b32.xlu1 %v473_v62, %s1008_s22  ;;  %492 = vrot.lane.b32.xlu0 %v468_v61, %s1008_s22  ;;  %v472_v60 = vmul.f32 %v458_v54, %v1252_v37 }
  0x97   : > { %v1202_v7 = vpop.permute.xlu1 %582  ;;  %v1204_v8 = vpop.permute.xlu0 %580 }
  0x98   : > { %v596_v9 = vmul.f32 %v1204_v8, %v1196_v63  ;;  %v601_v10 = vmul.f32 %v1204_v8, %v1198_v0  ;;  %v588_v59 = vsel %vm253_vm0, %v1204_v8, %v1202_v7 }
  0x99   : > { %v597_v61 = vmul.f32 %v588_v59, %v1230_v22 }
  0x9a   : > { %626 = vrot.lane.b32.xlu1 %v601_v10, %s1010_s24  ;;  %616 = vrot.lane.b32.xlu0 %v596_v9, %s1010_s24 }
  0x9b   : > { %v1214_v14 = vpop.permute.xlu1 %586  ;;  %v1216_v15 = vpop.permute.xlu0 %584 }
  0x9c   : > { %v600_v17 = vmul.f32 %v1214_v14, %v182_v12  ;;  %v605_v18 = vmul.f32 %v1214_v14, %v188_v13  ;;  %v589_v62 = vsel %vm253_vm0, %v1202_v7, %v1216_v15  ;;  %v590_v9 = vsel %vm253_vm0, %v1216_v15, %v1214_v14 }
  0x9d   : > { %v598_v8 = vmul.f32 %v589_v62, %v1233_v24  ;;  %v599_v10 = vmul.f32 %v590_v9, %v1153_v41  ;;  %v602_v7 = vmul.f32 %v588_v59, %v1244_v29 }
  0x9e   : > { %634 = vrot.lane.b32.xlu1 %v605_v18, %s1010_s24  ;;  %624 = vrot.lane.b32.xlu0 %v600_v17, %s1010_s24  ;;  %v603_v18 = vmul.f32 %v589_v62, %v1252_v37 }
  0x9f   : > { %v1228_v21 = vpop.permute.xlu0 %680  ;;  %v683_v17 = vpop.permute.xlu1 %682 }
  0xa0   : > { %v696_v25 = vmul.f32 %v1228_v21, %v1196_v63  ;;  %v688_v14 = vsel %vm355_vm1, %v1228_v21, %v683_v17 }
  0xa2   : > { %284 = vrot.lane.b32.xlu1 %v263_v23, %s1010_s24  ;;  %716 = vrot.lane.b32.xlu0 %v696_v25, %s1009_s23  ;;  %v604_v23 = vmul.f32 %v590_v9, %v1156_v42  ;;  %v697_v25 = vmul.f32 %v688_v14, %v1230_v22 }
  0xa3   : > { %v687_v19 = vpop.permute.xlu1 %686  ;;  %v685_v15 = vpop.permute.xlu0 %684 }
  0xa4   : > { %v690_v20 = vsel %vm355_vm1, %v685_v15, %v687_v19  ;;  %v689_v26 = vsel %vm355_vm1, %v683_v17, %v685_v15  ;;  %v705_v39 = vmul.f32 %v687_v19, %v188_v13  ;;  %v1350_v13 = vsub.s32 0, %v1039_v1 }
  0xa5   : > { %v699_v27 = vmul.f32 %v690_v20, %v1153_v41  ;;  %v698_v28 = vmul.f32 %v689_v26, %v1233_v24 }
  0xa6   : > { %288 = vrot.lane.b32.xlu1 %v265_v31, %s1010_s24  ;;  %286 = vrot.lane.b32.xlu0 %v264_v30, %s1010_s24  ;;  %v701_v30 = vmul.f32 %v1228_v21, %v1198_v0  ;;  %v700_v31 = vmul.f32 %v687_v19, %v182_v12  ;;  %v704_v21 = vmul.f32 %v690_v20, %v1156_v42 }
  0xa7   : > { %v196_v53 = vrot.slane %v1049_v3, %v1350_v13 }
  0xaa   : > { %296 = vrot.lane.b32.xlu1 %v269_v38, %s1010_s24  ;;  %294 = vrot.lane.b32.xlu0 %v268_v32, %s1010_s24  ;;  %v703_v32 = vmul.f32 %v689_v26, %v1252_v37  ;;  %v702_v38 = vmul.f32 %v688_v14, %v1244_v29 }
  0xae   : > { %386 = vrot.lane.b32.xlu1 %v365_v40, %s1009_s23  ;;  %298 = vrot.lane.b32.xlu0 %v270_v43, %s1010_s24 }
  0xb2   : > { %390 = vrot.lane.b32.xlu1 %v367_v48, %s1009_s23  ;;  %388 = vrot.lane.b32.xlu0 %v366_v46, %s1009_s23 }
  0xb6   : > { %398 = vrot.lane.b32.xlu1 %v371_v49, %s1009_s23  ;;  %396 = vrot.lane.b32.xlu0 %v370_v47, %s1009_s23 }
  0xba   : > { %486 = vrot.lane.b32.xlu1 %v465_v52, %s1008_s22  ;;  %400 = vrot.lane.b32.xlu0 %v372_v51, %s1009_s23 }
  0xbe   : > { %490 = vrot.lane.b32.xlu1 %v467_v57, %s1008_s22  ;;  %488 = vrot.lane.b32.xlu0 %v466_v56, %s1008_s22  ;;  %v209_v57 = vmul.f32 %v196_v53, %v1138_v33 }
  0xc2   : > { %498 = vrot.lane.b32.xlu1 %v471_v58, %s1008_s22  ;;  %496 = vrot.lane.b32.xlu0 %v470_v55, %s1008_s22  ;;  %v208_v58 = vrot.slane %v1057_v5, %v1350_v13 }
  0xc4   : > { %v212_v62 = vmul.f32 %v208_v58, %v1233_v24  ;;  %v216_v15 = vmul.f32 %v208_v58, %v1252_v37 }
  0xc6   : > { %618 = vrot.lane.b32.xlu1 %v597_v61, %s1010_s24  ;;  %500 = vrot.lane.b32.xlu0 %v472_v60, %s1008_s22 }
  0xca   : > { %622 = vrot.lane.b32.xlu1 %v599_v10, %s1010_s24  ;;  %620 = vrot.lane.b32.xlu0 %v598_v8, %s1010_s24 }
  0xce   : > { %630 = vrot.lane.b32.xlu1 %v603_v18, %s1010_s24  ;;  %628 = vrot.lane.b32.xlu0 %v602_v7, %s1010_s24  ;;  %v213_v18 = vmul.f32 %v196_v53, %v1140_v34 }
  0xd2   : > { %718 = vrot.lane.b32.xlu1 %v697_v25, %s1009_s23  ;;  %632 = vrot.lane.b32.xlu0 %v604_v23, %s1010_s24 }
  0xd6   : > { %722 = vrot.lane.b32.xlu1 %v699_v27, %s1009_s23  ;;  %720 = vrot.lane.b32.xlu0 %v698_v28, %s1009_s23 }
  0xda   : > { %726 = vrot.lane.b32.xlu1 %v701_v30, %s1009_s23  ;;  %724 = vrot.lane.b32.xlu0 %v700_v31, %s1009_s23 }
  0xde   : > { %730 = vrot.lane.b32.xlu1 %v703_v32, %s1009_s23  ;;  %728 = vrot.lane.b32.xlu0 %v702_v38, %s1009_s23  ;;  %v530_v32 = vsub.s32 4, %v1039_v1  ;;  %v200_v38 = vrot.slane %v1062_v6, %v1350_v13 }
  0xe0   : > { %v543_v58 = vrot.slane %v1057_v5, %v530_v32 }
  0xe2   : > { %734 = vrot.lane.b32.xlu1 %v705_v39, %s1009_s23  ;;  %732 = vrot.lane.b32.xlu0 %v704_v21, %s1009_s23  ;;  %v204_v39 = vrot.slane %v1044_v2, %v1350_v13 }
  0xe4   : > { %v211_v53 = vmul.f32 %v204_v39, %v1230_v22 }
  0xf4   : > { %v293_v35 = vpop.permute.xlu1 %292  ;;  %v283_v12 = vpop.permute.xlu0 %282 }
  0xf8   : > { %v301_v40 = vpop.permute.xlu1 %300  ;;  %v291_v43 = vpop.permute.xlu0 %290 }
  0xfc   : > { %v395_v44 = vpop.permute.xlu1 %394  ;;  %v385_v45 = vpop.permute.xlu0 %384 }
 0x100   : > { %v403_v46 = vpop.permute.xlu1 %402  ;;  %v393_v48 = vpop.permute.xlu0 %392 }
 0x104   : > { %v1343_v49 = vpop.permute.xlu1 %494  ;;  %v485_v47 = vpop.permute.xlu0 %484 }
 0x108   : > { %v1345_v50 = vpop.permute.xlu1 %502  ;;  %v1347_v36 = vpop.permute.xlu0 %492 }
 0x10c   : > { %v1352_v51 = vpop.permute.xlu1 %626  ;;  %v1354_v52 = vpop.permute.xlu0 %616 }
 0x110   : > { %v1358_v54 = vpop.permute.xlu1 %634  ;;  %v1360_v56 = vpop.permute.xlu0 %624 }
 0x114   : > { %v285_v55 = vpop.permute.xlu1 %284  ;;  %v1365_v59 = vpop.permute.xlu0 %716 }
 0x115   : > { %v303_v60 = vsel %vm302_vm2, %v283_v12, %v285_v55 }
 0x116   : > { %v319_v61 = vadd.f32 %v303_v60, %v209_v57  ;;  %v535_v60 = vrot.slane %v1062_v6, %v530_v32 }
 0x118   : > { %v289_v9 = vpop.permute.xlu1 %288  ;;  %v287_v8 = vpop.permute.xlu0 %286 }
 0x119   : > { %v306_v10 = vsel %vm302_vm2, %v289_v9, %v291_v43  ;;  %v531_v43 = vrot.slane %v1049_v3, %v530_v32  ;;  %v305_v57 = vsel %vm302_vm2, %v287_v8, %v289_v9 }
 0x11a   : > { %v322_v17 = vadd.f32 %v306_v10, %v212_v62  ;;  %v321_v5 = vadd.f32 %v305_v57, %v211_v53 }
 0x11b   : > { %v544_v3 = vmul.f32 %v531_v43, %v1196_v63 }
 0x11c   : > { %v297_v7 = vpop.permute.xlu1 %296  ;;  %v295_v33 = vpop.permute.xlu0 %294 }
 0x11d   : > { %v307_v19 = vsel %vm302_vm2, %v293_v35, %v295_v33 }
 0x11e   : > { %v323_v14 = vadd.f32 %v307_v19, %v213_v18 }
 0x120   : > { %v387_v20 = vpop.permute.xlu1 %386  ;;  %v299_v23 = vpop.permute.xlu0 %298 }
 0x121   : > { %v404_v25 = vsel %vm355_vm1, %v385_v45, %v387_v20  ;;  %v310_v26 = vsel %vm302_vm2, %v299_v23, %v301_v40  ;;  %v210_v45 = vmul.f32 %v200_v38, %v1196_v63  ;;  %v547_v63 = vmul.f32 %v543_v58, %v1153_v41 }
 0x122   : > { %v420_v27 = vadd.f32 %v404_v25, %v319_v61  ;;  %v326_v28 = vadd.f32 %v310_v26, %v216_v15  ;;  %v214_v61 = vmul.f32 %v200_v38, %v1198_v0  ;;  %v215_v15 = vmul.f32 %v204_v39, %v1244_v29 }
 0x123   : > { %v309_v38 = vsel %vm302_vm2, %v297_v7, %v299_v23  ;;  %v548_v39 = vmul.f32 %v531_v43, %v1198_v0 }
 0x124   : > { %v391_v30 = vpop.permute.xlu1 %390  ;;  %v389_v31 = vpop.permute.xlu0 %388 }
 0x125   : > { %v407_v34 = vsel %vm355_vm1, %v391_v30, %v393_v48  ;;  %v304_v48 = vsel %vm302_vm2, %v285_v55, %v287_v8  ;;  %v406_v18 = vsel %vm355_vm1, %v389_v31, %v391_v30 }
 0x126   : > { %v423_v21 = vadd.f32 %v407_v34, %v322_v17  ;;  %v405_v17 = vsel %vm355_vm1, %v387_v20, %v389_v31  ;;  %v320_v8 = vadd.f32 %v304_v48, %v210_v45  ;;  %v422_v20 = vadd.f32 %v406_v18, %v321_v5 }
 0x127   : > { %v551_v18 = vmul.f32 %v543_v58, %v1156_v42  ;;  %v760_v42 = vld [vmem:[%s1471_s2] sm:$0xf] }
 0x128   : > { %v399_v35 = vpop.permute.xlu1 %398  ;;  %v397_v12 = vpop.permute.xlu0 %396  ;;  %v421_v25 = vadd.f32 %v405_v17, %v320_v8 }
 0x129   : > { %v408_v40 = vsel %vm355_vm1, %v395_v44, %v397_v12  ;;  %v539_v44 = vrot.slane %v1044_v2, %v530_v32  ;;  %v545_v2 = vmul.f32 %v535_v60, %v1230_v22 }
 0x12a   : > { %v424_v1 = vadd.f32 %v408_v40, %v323_v14  ;;  %v308_v14 = vsel %vm302_vm2, %v295_v33, %v297_v7  ;;  %v549_v40 = vmul.f32 %v535_v60, %v1244_v29 }
 0x12b   : > { %v324_v32 = vadd.f32 %v308_v14, %v214_v61  ;;  %v550_v0 = vmul.f32 %v539_v44, %v1252_v37 }
 0x12c   : > { %v487_v62 = vpop.permute.xlu1 %486  ;;  %v401_v10 = vpop.permute.xlu0 %400 }
 0x12d   : > { %v504_v55 = vsel %vm253_vm0, %v485_v47, %v487_v62  ;;  %v411_v9 = vsel %vm355_vm1, %v401_v10, %v403_v46  ;;  %v546_v47 = vmul.f32 %v539_v44, %v1233_v24  ;;  %v409_v46 = vsel %vm355_vm1, %v397_v12, %v399_v35 }
 0x12e   : > { %v520_v19 = vadd.f32 %v504_v55, %v420_v27  ;;  %v427_v6 = vadd.f32 %v411_v9, %v326_v28  ;;  %v425_v24 = vadd.f32 %v409_v46, %v324_v32  ;;  %v410_v57 = vsel %vm355_vm1, %v399_v35, %v401_v10 }
 0x130   : > { %v491_v26 = vpop.permute.xlu1 %490  ;;  %v489_v30 = vpop.permute.xlu0 %488  ;;  %v552_v31 = vadd.f32 %v544_v3, %v520_v19 }
 0x131   : > { %v507_v27 = vsel %vm253_vm0, %v491_v26, %v1347_v36  ;;  %v505_v33 = vsel %vm253_vm0, %v487_v62, %v489_v30  ;;  %v506_v28 = vsel %vm253_vm0, %v489_v30, %v491_v26  ;;  %v325_v62 = vadd.f32 %v309_v38, %v215_v15 }
 0x132   : > { %v523_v41 = vadd.f32 %v507_v27, %v423_v21  ;;  %v521_v34 = vadd.f32 %v505_v33, %v421_v25  ;;  %v522_v22 = vadd.f32 %v506_v28, %v422_v20  ;;  %v769_v30 = vrot.slane %v760_v42, %v1052_v4 }
 0x133   : > { %v426_v23 = vadd.f32 %v410_v57, %v325_v62  ;;  %v773_v27 = vrot.slane %v760_v42, %v1075_v11  ;;  %v777_v4 = vrot.slane %v760_v42, %v1090_v16 }
 0x134   : > { %v499_v45 = vpop.permute.xlu1 %498  ;;  %v497_v12 = vpop.permute.xlu0 %496  ;;  %v555_v53 = vadd.f32 %v547_v63, %v523_v41  ;;  %v553_v48 = vadd.f32 %v545_v2, %v521_v34  ;;  %v554_v36 = vadd.f32 %v546_v47, %v522_v22 }
 0x135   : > { %v508_v61 = vsel %vm253_vm0, %v1343_v49, %v497_v12  ;;  %v509_v21 = vsel %vm253_vm0, %v497_v12, %v499_v45 }
 0x136   : > { %v524_v3 = vadd.f32 %v508_v61, %v424_v1  ;;  %v525_v7 = vadd.f32 %v509_v21, %v425_v24 }
 0x138   : > { %v619_v29 = vpop.permute.xlu1 %618  ;;  %v501_v43 = vpop.permute.xlu0 %500  ;;  %v556_v60 = vadd.f32 %v548_v39, %v524_v3  ;;  %v557_v17 = vadd.f32 %v549_v40, %v525_v7 }
 0x139   : > { %v510_v55 = vsel %vm253_vm0, %v499_v45, %v501_v43  ;;  %v511_v35 = vsel %vm253_vm0, %v501_v43, %v1345_v50  ;;  %v636_v44 = vsel %vm302_vm2, %v1354_v52, %v619_v29 }
 0x13a   : > { %v526_v49 = vadd.f32 %v510_v55, %v426_v23  ;;  %v527_v10 = vadd.f32 %v511_v35, %v427_v6  ;;  %v652_v50 = vadd.f32 %v636_v44, %v552_v31  ;;  %v765_v6 = vrot.slane %v760_v42, %v1350_v13 }
 0x13c   : > { %v623_v9 = vpop.permute.xlu1 %622  ;;  %v621_v8 = vpop.permute.xlu0 %620  ;;  %v558_v1 = vadd.f32 %v550_v0, %v526_v49  ;;  %v559_v5 = vadd.f32 %v551_v18, %v527_v10 }
 0x13d   : > { %v637_v2 = vsel %vm302_vm2, %v619_v29, %v621_v8  ;;  %v638_v25 = vsel %vm302_vm2, %v621_v8, %v623_v9  ;;  %v639_v28 = vsel %vm302_vm2, %v623_v9, %v1360_v56 }
 0x13e   : > { %v653_v47 = vadd.f32 %v637_v2, %v553_v48  ;;  %v654_v31 = vadd.f32 %v638_v25, %v554_v36  ;;  %v655_v22 = vadd.f32 %v639_v28, %v555_v53 }
 0x140   : > { %v631_v19 = vpop.permute.xlu1 %630  ;;  %v629_v37 = vpop.permute.xlu0 %628 }
 0x141   : > { %v640_v14 = vsel %vm302_vm2, %v1352_v51, %v629_v37  ;;  %v641_v56 = vsel %vm302_vm2, %v629_v37, %v631_v19 }
 0x142   : > { %v656_v58 = vadd.f32 %v640_v14, %v556_v60  ;;  %v657_v36 = vadd.f32 %v641_v56, %v557_v17 }
 0x144   : > { %v719_v15 = vpop.permute.xlu1 %718  ;;  %v633_v63 = vpop.permute.xlu0 %632 }
 0x145   : > { %v736_v52 = vsel %vm355_vm1, %v1365_v59, %v719_v15  ;;  %v643_v51 = vsel %vm302_vm2, %v633_v63, %v1358_v54  ;;  %v642_v61 = vsel %vm302_vm2, %v631_v19, %v633_v63 }
 0x146   : > { %v752_v20 = vadd.f32 %v736_v52, %v652_v50  ;;  %v659_v26 = vadd.f32 %v643_v51, %v559_v5  ;;  %v658_v23 = vadd.f32 %v642_v61, %v558_v1 }
 0x148   : > { %v1433_v46 = vadd.f32 %v765_v6, %v752_v20  ;;  %v723_v13 = vpop.permute.xlu1 %722  ;;  %v721_v33 = vpop.permute.xlu0 %720 }
 0x149   : > { %v737_v59 = vsel %vm355_vm1, %v719_v15, %v721_v33  ;;  %v738_v32 = vsel %vm355_vm1, %v721_v33, %v723_v13 }
 0x14a   : > { %v937_v54 = vmul.f32 -1.442695, %v1433_v46  ;;  %v753_v41 = vadd.f32 %v737_v59, %v653_v47  ;;  %v754_v34 = vadd.f32 %v738_v32, %v654_v31 }
 0x14c   : > { %968 = vpow2.f32 %v937_v54  ;;  %v1442_v38 = vadd.f32 %v769_v30, %v753_v41  ;;  %v1444_v39 = vadd.f32 %v773_v27, %v754_v34  ;;  %v727_v11 = vpop.permute.xlu1 %726  ;;  %v725_v40 = vpop.permute.xlu0 %724 }
 0x14d   : > { %v739_v24 = vsel %vm355_vm1, %v723_v13, %v725_v40 }
 0x14e   : > { %v938_v45 = vmul.f32 -1.442695, %v1442_v38  ;;  %v939_v12 = vmul.f32 -1.442695, %v1444_v39  ;;  %v755_v48 = vadd.f32 %v739_v24, %v655_v22 }
 0x150   : > { %970 = vpow2.f32 %v938_v45  ;;  %v1450_v16 = vadd.f32 %v777_v4, %v755_v48  ;;  %v731_v53 = vpop.permute.xlu1 %730  ;;  %v729_v57 = vpop.permute.xlu0 %728 }
 0x151   : > { %972 = vpow2.f32 %v939_v12  ;;  %v740_v21 = vsel %vm355_vm1, %v727_v11, %v729_v57  ;;  %v741_v62 = vsel %vm355_vm1, %v729_v57, %v731_v53 }
 0x152   : > { %v940_v3 = vmul.f32 -1.442695, %v1450_v16  ;;  %v756_v7 = vadd.f32 %v740_v21, %v656_v58  ;;  %v757_v0 = vadd.f32 %v741_v62, %v657_v36 }
 0x154   : > { %974 = vpow2.f32 %v940_v3  ;;  %v786_v29 = vadd.f32 %v765_v6, %v756_v7  ;;  %v787_v43 = vadd.f32 %v769_v30, %v757_v0  ;;  %v735_v60 = vpop.permute.xlu1 %734  ;;  %v733_v17 = vpop.permute.xlu0 %732 }
 0x155   : > { %v742_v18 = vsel %vm355_vm1, %v731_v53, %v733_v17  ;;  %v743_v55 = vsel %vm355_vm1, %v733_v17, %v735_v60 }
 0x156   : > { %v969_v35 = vpop.eup %968  ;;  %v941_v49 = vmul.f32 -1.442695, %v786_v29  ;;  %v942_v10 = vmul.f32 -1.442695, %v787_v43  ;;  %v758_v9 = vadd.f32 %v742_v18, %v658_v23  ;;  %v759_v8 = vadd.f32 %v743_v55, %v659_v26 }
 0x157   : > { %v814_v5 = vadd.f32 1.0, %v969_v35 }
 0x158   : > { %976 = vpow2.f32 %v941_v49  ;;  %v788_v19 = vadd.f32 %v773_v27, %v758_v9  ;;  %v789_v37 = vadd.f32 %v777_v4, %v759_v8 }
 0x159   : > { %978 = vpow2.f32 %v942_v10 }
 0x15a   : > { %v971_v44 = vpop.eup %970  ;;  %v943_v1 = vmul.f32 -1.442695, %v788_v19  ;;  %980 = vrcp.f32 %v814_v5  ;;  %v944_v58 = vmul.f32 -1.442695, %v789_v37 }
 0x15b   : > { %v973_v14 = vpop.eup %972  ;;  %v815_v42 = vadd.f32 1.0, %v971_v44 }
 0x15c   : > { %v816_v50 = vadd.f32 1.0, %v973_v14  ;;  %982 = vpow2.f32 %v943_v1 }
 0x15d   : > { %984 = vrcp.f32 %v815_v42 }
 0x15e   : > { %v975_v6 = vpop.eup %974  ;;  %986 = vrcp.f32 %v816_v50 }
 0x15f   : > { %v817_v15 = vadd.f32 1.0, %v975_v6  ;;  %988 = vpow2.f32 %v944_v58 }
 0x161   : > { %990 = vrcp.f32 %v817_v15 }
 0x162   : > { %v977_v63 = vpop.eup %976 }
 0x163   : > { %v818_v2 = vadd.f32 1.0, %v977_v63  ;;  %v979_v25 = vpop.eup %978 }
 0x164   : > { %v981_v52 = vpop.eup %980  ;;  %v819_v51 = vadd.f32 1.0, %v979_v25 }
 0x165   : > { %992 = vrcp.f32 %v818_v2  ;;  %v838_v31 = vmul.f32 %v981_v52, %v1433_v46 }
 0x166   : > { %v983_v20 = vpop.eup %982  ;;  %994 = vrcp.f32 %v819_v51 }
 0x167   : > { %v985_v26 = vpop.eup %984  ;;  %v820_v30 = vadd.f32 1.0, %v983_v20 }
 0x168   : > { %v987_v47 = vpop.eup %986  ;;  %v839_v13 = vmul.f32 %v985_v26, %v1442_v38 }
 0x169   : > { %v989_v27 = vpop.eup %988  ;;  %996 = vrcp.f32 %v820_v30  ;;  %v840_v32 = vmul.f32 %v987_v47, %v1444_v39 }
 0x16a   : > { %v952_v33 = vpack.c.bf16 %v839_v13, %v838_v31  ;;  %v821_v28 = vadd.f32 1.0, %v989_v27 }
 0x16b   : > { %v991_v59 = vpop.eup %990 }
 0x16c   : > { %870 = vst [vmem:[%s170_s7] sm:$0xff] %v952_v33  ;;  %v841_v54 = vmul.f32 %v991_v59, %v1450_v16  ;;  %998 = vrcp.f32 %v821_v28 }
 0x16e   : > { %v953_v41 = vpack.c.bf16 %v841_v54, %v840_v32 }
 0x16f   : > { %v993_v34 = vpop.eup %992 }
 0x170   : > { %871 = vst [vmem:[%s170_s7 + $0x8] sm:$0xff] %v953_v41  ;;  %v842_v46 = vmul.f32 %v993_v34, %v786_v29  ;;  %v995_v4 = vpop.eup %994 }
 0x171   : > { %v843_v22 = vmul.f32 %v995_v4, %v787_v43 }
 0x173   : > { %v997_v38 = vpop.eup %996  ;;  %v954_v11 = vpack.c.bf16 %v843_v22, %v842_v46 }
 0x174   : > { %v844_v40 = vmul.f32 %v997_v38, %v788_v19 }
 0x175   : > { %872 = vst [vmem:[%s170_s7 + $0x10] sm:$0xff] %v954_v11 }
 0x176   : > { %v999_v56 = vpop.eup %998 }
 0x177   : > { %v845_v24 = vmul.f32 %v999_v56, %v789_v37 }
 0x179   : > { %v955_v45 = vpack.c.bf16 %v845_v24, %v844_v40 }
 0x17b   : > { %873 = vst [vmem:[%s170_s7 + $0x18] sm:$0xff] %v955_v45 }
 0x17c PF: > { %s13_s12 = sadd.s32 1, %s1006_s12  }
 0x17d   : > { %p10_p4 = scmp.ge.s32.totalorder %s13_s12, 4  }
 0x17f   :  { %12 = sbr.rel (!%p10_p4) target bundleno = 1 (0x1), region = 62 }

// kernel: tile.59
= control target key start
LH: loop header
LB: loop body
LE: loop exit
PB: predicated region body
PF: predicated region fallthrough
CT: control target
= control target key end

     0   :  { %s34_s6 = smov 3  ;;  %s37_s7 = smov 12  ;;  %vm39_vm0 = vcmask 1043458   ;;  %vm44_vm1 = vcmask 1045508   ;;  %vm49_vm2 = vcmask 1047558   ;;  %vm110_vm3 = vcmask 1042433   ;;  %s847_s0 = inlined_call_operand.vmem [shape: f32[9,16,1,1,32], index: 0, kind: input, shape index: {}]   ;;  %s848_s1 = inlined_call_operand.vmem [shape: f32[9,512], index: 1, kind: output, shape index: {}]  }
   0x1   :  { %v390_v0 = vld [vmem:[%s847_s0 + $0x3] ss:$16 sm:%s34_s6]   ;;  %s42_s12 = smov 48  ;;  %s47_s13 = smov 192  ;;  %v406_v10 = vld [vmem:[%s847_s0 + $0x8b] sm:$0x1]  }
   0x2   :  { %v391_v1 = vld [vmem:[%s847_s0 + $0x3] ss:$16 sm:%s37_s7]   ;;  %s81_s18 = smov 3  ;;  %s84_s21 = smov 12  ;;  %vm115_vm4 = vcmask 1044483   ;;  %vm120_vm5 = vcmask 1046533  }
   0x3   :  { %v40_v2 = vsel %vm39_vm0, %v391_v1, %v390_v0  ;;  %v392_v3 = vld [vmem:[%s847_s0 + $0x3] ss:$16 sm:%s42_s12]   ;;  %v400_v6 = vld [vmem:[%s847_s0 + $0x87] ss:$-16 sm:%s81_s18]   ;;  %s89_s22 = smov 48  ;;  %s94_s27 = smov 192 }
   0x4   :  { %v393_v4 = vld [vmem:[%s847_s0 + $0x3] ss:$16 sm:%s47_s13]   ;;  %v45_v5 = vsel %vm44_vm1, %v392_v3, %v40_v2  ;;  %v401_v8 = vld [vmem:[%s847_s0 - $0x15] ss:$16 sm:%s84_s21]   ;;  %s56_s28 = smov 3  ;;  %s474_s2 = smov 96  }
   0x5   :  { %v50_v7 = vsel %vm49_vm2, %v393_v4, %v45_v5  ;;  %v402_v9 = vld [vmem:[%s847_s0 - $0x15] ss:$16 sm:%s89_s22]   ;;  %v87_v11 = vsel %vm39_vm0, %v401_v8, %v400_v6  ;;  %s59_s5 = smov 12  ;;  %s64_s6 = smov 48  ;;  %v410_v22 = vld [vmem:[%s847_s0 + $0x48] sm:$0x80]  }
   0x6   :  { %51 = vrot.lane.b32.xlu0 %v50_v7, %s474_s2  ;;  %v403_v12 = vld [vmem:[%s847_s0 - $0x15] ss:$16 sm:%s94_s27]   ;;  %v92_v13 = vsel %vm44_vm1, %v402_v9, %v87_v11  ;;  %s69_s11 = smov 192  ;;  %s108_s12 = smov 6  ;;  %vm124_vm6 = vcmask 1047559   ;;  %vm3_vm7 = vcmask 261120  }
   0x7   :  { %v394_v14 = vld [vmem:[%s847_s0 + $0x83] ss:$-124 sm:%s56_s28]   ;;  %v97_v16 = vsel %vm49_vm2, %v403_v12, %v92_v13  ;;  %s113_s17 = smov 24  ;;  %s118_s18 = smov 96  ;;  %v433_v48 = vld [vmem:[%s847_s0 + $0x8a] sm:$0x1]  }
   0x8   :  { %v395_v15 = vld [vmem:[%s847_s0 - $0x9] ss:$16 sm:%s59_s5]   ;;  %98 = vrot.lane.b32.xlu1 %v97_v16, %s474_s2  ;;  %s134_s23 = smov 3  ;;  %s137_s28 = smov 12  ;;  %v437_v53 = vld [vmem:[%s847_s0 + $0x47] sm:$0x80]  }
   0x9   :  { %v62_v17 = vsel %vm39_vm0, %v395_v15, %v394_v14  ;;  %v396_v18 = vld [vmem:[%s847_s0 - $0x9] ss:$16 sm:%s64_s6]   ;;  %v407_v21 = vld [vmem:[%s847_s0 + $0x5b] ss:$16 sm:%s108_s12]   ;;  %s149_s29 = smov 3  ;;  %s152_s4 = smov 12 }
   0xa   :  { %v397_v19 = vld [vmem:[%s847_s0 - $0x9] ss:$16 sm:%s69_s11]   ;;  %v67_v20 = vsel %vm44_vm1, %v396_v18, %v62_v17  ;;  %v111_v24 = vsel %vm110_vm3, %v407_v21, %v406_v10  ;;  %v408_v25 = vld [vmem:[%s847_s0 - $0x21] ss:$16 sm:%s113_s17]   ;;  %s157_s5 = smov 48  ;;  %s162_s10 = smov 192 }
   0xb   :  { %v72_v23 = vsel %vm49_vm2, %v397_v19, %v67_v20  ;;  %v409_v26 = vld [vmem:[%s847_s0 - $0x21] ss:$16 sm:%s118_s18]   ;;  %v116_v27 = vsel %vm115_vm4, %v408_v25, %v111_v24  ;;  %v417_v31 = vld [vmem:[%s847_s0 + $0x2] ss:$16 sm:%s149_s29]   ;;  %s171_s15 = smov 3  ;;  %s174_s16 = smov 12 }
   0xc   :  { %73 = vrot.lane.b32.xlu0 %v72_v23, %s474_s2  ;;  %v413_v28 = vld [vmem:[%s847_s0 + $0x8f] ss:$-48 sm:%s134_s23]   ;;  %v121_v29 = vsel %vm120_vm5, %v409_v26, %v116_v27  ;;  %s179_s19 = smov 48  ;;  %s184_s20 = smov 192  ;;  %v385_v62 = vld [vmem:[%s847_s0 + $0x60] ss:$4 sm:$0xff]  }
   0xd   :  { %v414_v30 = vld [vmem:[%s847_s0 + $0x4f] ss:$16 sm:%s137_s28]   ;;  %v125_v32 = vsel %vm124_vm6, %v410_v22, %v121_v29  ;;  %v418_v34 = vld [vmem:[%s847_s0 + $0x2] ss:$16 sm:%s152_s4]   ;;  %s196_s22 = smov 3  ;;  %s199_s23 = smov 12 }
   0xe   :  { %v140_v33 = vsel %vm39_vm0, %v414_v30, %v413_v28  ;;  %v419_v35 = vld [vmem:[%s847_s0 + $0x2] ss:$16 sm:%s157_s5]   ;;  %126 = vrot.lane.b32.xlu1 %v125_v32, %s474_s2  ;;  %v155_v36 = vsel %vm39_vm0, %v418_v34, %v417_v31  ;;  %s204_s28 = smov 48  ;;  %s209_s29 = smov 192  ;;  %v2_v8 = vld [vmem:[%s847_s0] ss:$4 sm:$0xff]  }
   0xf   :  { %v420_v37 = vld [vmem:[%s847_s0 + $0x2] ss:$16 sm:%s162_s10]   ;;  %v160_v38 = vsel %vm44_vm1, %v419_v35, %v155_v36  ;;  %v422_v41 = vld [vmem:[%s847_s0 - $0xa] ss:$16 sm:%s174_s16]   ;;  %s223_s6 = smov 6  ;;  %s475_s7 = smov 64  }
  0x10   :  { %141 = vrot.lane.b32.xlu0 %v140_v33, %s474_s2  ;;  %v421_v39 = vld [vmem:[%s847_s0 + $0x82] ss:$-124 sm:%s171_s15]   ;;  %v165_v40 = vsel %vm49_vm2, %v420_v37, %v160_v38  ;;  %s228_s12 = smov 24  ;;  %s233_s13 = smov 96  ;;  %v382_v11 = vld [vmem:[%s847_s0 + $0x40] ss:$4 sm:$0xff]  }
  0x11   :  { %v423_v42 = vld [vmem:[%s847_s0 - $0xa] ss:$16 sm:%s179_s19]   ;;  %v177_v43 = vsel %vm39_vm0, %v422_v41, %v421_v39  ;;  %v428_v47 = vld [vmem:[%s847_s0 - $0x16] ss:$16 sm:%s199_s23]   ;;  %s264_s23 = smov 3  ;;  %s277_s4 = smov 192 }
  0x12   :  { %v424_v44 = vld [vmem:[%s847_s0 - $0xa] ss:$16 sm:%s184_s20]   ;;  %166 = vrot.lane.b32.xlu1 %v165_v40, %s475_s7  ;;  %v182_v46 = vsel %vm44_vm1, %v423_v42, %v177_v43  ;;  %s249_s20 = smov 3  ;;  %387 = vst.msk [vmem:[%s848_s1 - $0x19] ss:$8 sm:$0xf0] %vm3_vm7, %v385_v62  }
  0x13   :  { %v427_v45 = vld [vmem:[%s847_s0 + $0x86] ss:$-16 sm:%s196_s22]   ;;  %v187_v49 = vsel %vm49_vm2, %v424_v44, %v182_v46  ;;  %v429_v51 = vld [vmem:[%s847_s0 - $0x16] ss:$16 sm:%s204_s28]   ;;  %s252_s22 = smov 12  ;;  %s267_s28 = smov 12 }
  0x14   :  { %v202_v50 = vsel %vm39_vm0, %v428_v47, %v427_v45  ;;  %v430_v52 = vld [vmem:[%s847_s0 - $0x16] ss:$16 sm:%s209_s29]   ;;  %188 = vrot.lane.b32.xlu0 %v187_v49, %s475_s7  ;;  %s272_s29 = smov 48  ;;  %386 = vst.msk [vmem:[%s848_s1 + $0x6] ss:$8 sm:$0xf] %vm3_vm7, %v385_v62  }
  0x15   :  { %v207_v54 = vsel %vm44_vm1, %v429_v51, %v202_v50  ;;  %v434_v55 = vld [vmem:[%s847_s0 + $0x5a] ss:$16 sm:%s223_s6]   ;;  %v435_v58 = vld [vmem:[%s847_s0 - $0x22] ss:$16 sm:%s228_s12]   ;;  %s286_s12 = smov 3  ;;  %s289_s2 = smov 12 }
  0x16   :  { %v212_v56 = vsel %vm49_vm2, %v430_v52, %v207_v54  ;;  %v226_v57 = vsel %vm110_vm3, %v434_v55, %v433_v48  ;;  %v436_v59 = vld [vmem:[%s847_s0 - $0x22] ss:$16 sm:%s233_s13]   ;;  %v444_v1 = vld [vmem:[%s847_s0 + $0x1] ss:$16 sm:%s264_s23]   ;;  %s294_s21 = smov 48  ;;  %s299_s24 = smov 192 }
  0x17   :  { %213 = vrot.lane.b32.xlu1 %v212_v56, %s475_s7  ;;  %v231_v60 = vsel %vm115_vm4, %v435_v58, %v226_v57  ;;  %v440_v61 = vld [vmem:[%s847_s0 + $0x8e] ss:$-48 sm:%s249_s20]   ;;  %s311_s25 = smov 3  ;;  %4 = vst.msk [vmem:[%s848_s1] ss:$8 sm:$0xf] %vm3_vm7, %v2_v8  }
  0x18   :  { %v236_v63 = vsel %vm120_vm5, %v436_v59, %v231_v60  ;;  %v441_v0 = vld [vmem:[%s847_s0 + $0x4e] ss:$16 sm:%s252_s22]   ;;  %v445_v4 = vld [vmem:[%s847_s0 + $0x1] ss:$16 sm:%s267_s28]   ;;  %s319_s13 = smov 48  ;;  %s324_s14 = smov 192 }
  0x19   :  { %v240_v2 = vsel %vm124_vm6, %v437_v53, %v236_v63  ;;  %v255_v3 = vsel %vm39_vm0, %v441_v0, %v440_v61  ;;  %v446_v5 = vld [vmem:[%s847_s0 + $0x1] ss:$16 sm:%s272_s29]   ;;  %v270_v6 = vsel %vm39_vm0, %v445_v4, %v444_v1  ;;  %s314_s29 = smov 12  ;;  %378 = vst.msk [vmem:[%s848_s1 - $0x1f] ss:$8 sm:$0xf0] %vm3_vm7, %v2_v8  }
  0x1a   :  { %241 = vrot.lane.b32.xlu0 %v240_v2, %s475_s7  ;;  %v447_v7 = vld [vmem:[%s847_s0 + $0x1] ss:$16 sm:%s277_s4]   ;;  %v275_v9 = vsel %vm44_vm1, %v446_v5, %v270_v6  ;;  %v460_v15 = vld [vmem:[%s847_s0 + $0x89] sm:$0x1]   ;;  %s476_s26 = smov 32   ;;  %s348_s28 = smov 96 }
  0x1b   :  { %256 = vrot.lane.b32.xlu1 %v255_v3, %s475_s7  ;;  %v448_v10 = vld [vmem:[%s847_s0 + $0x81] ss:$-124 sm:%s286_s12]   ;;  %v280_v12 = vsel %vm49_vm2, %v447_v7, %v275_v9  ;;  %383 = vst.msk [vmem:[%s848_s1 + $0x4] ss:$8 sm:$0xf] %vm3_vm7, %v382_v11   ;;  %s364_s10 = smov 3 }
  0x1c   :  { %v449_v13 = vld [vmem:[%s847_s0 - $0xb] ss:$16 sm:%s289_s2]   ;;  %384 = vst.msk [vmem:[%s848_s1 - $0x1b] ss:$8 sm:$0xf0] %vm3_vm7, %v382_v11   ;;  %s367_s15 = smov 12 }
  0x1d   :  { %v450_v14 = vld [vmem:[%s847_s0 - $0xb] ss:$16 sm:%s294_s21]   ;;  %v292_v16 = vsel %vm39_vm0, %v449_v13, %v448_v10  ;;  %v455_v20 = vld [vmem:[%s847_s0 - $0x17] ss:$16 sm:%s314_s29]   ;;  %vm53_vm8 = vcmask 1048320   ;;  %vm168_vm9 = vcmask 785920  }
  0x1e   :  { %v451_v17 = vld [vmem:[%s847_s0 - $0xb] ss:$16 sm:%s299_s24]   ;;  %s338_s24 = smov 6  ;;  %281 = vrot.lane.b32.xlu0 %v280_v12, %s476_s26  ;;  %v297_v19 = vsel %vm44_vm1, %v450_v14, %v292_v16  ;;  %v388_v21 = vld [vmem:[%s847_s0 + $0x80] ss:$4 sm:$0xf]  }
  0x1f   :  { %v454_v18 = vld [vmem:[%s847_s0 + $0x85] ss:$-16 sm:%s311_s25]   ;;  %s343_s25 = smov 24  ;;  %v302_v22 = vsel %vm49_vm2, %v451_v17, %v297_v19  ;;  %v456_v24 = vld [vmem:[%s847_s0 - $0x17] ss:$16 sm:%s319_s13]   ;;  %vm283_vm10 = vcmask 523520  }
  0x20   :  { %v317_v23 = vsel %vm39_vm0, %v455_v20, %v454_v18  ;;  %v457_v25 = vld [vmem:[%s847_s0 - $0x17] ss:$16 sm:%s324_s14]   ;;  %v464_v26 = vld [vmem:[%s847_s0 + $0x46] sm:$0x80]   ;;  %303 = vrot.lane.b32.xlu1 %v302_v22, %s476_s26 }
  0x21   :  { %389 = vst.msk [vmem:[%s848_s1 + $0x20] ss:$8 sm:$0xf] %vm3_vm7, %v388_v21   ;;  %v322_v27 = vsel %vm44_vm1, %v456_v24, %v317_v23  ;;  %v461_v28 = vld [vmem:[%s847_s0 + $0x59] ss:$16 sm:%s338_s24]  }
  0x22   :  { %v379_v29 = vld [vmem:[%s847_s0 + $0x20] ss:$4 sm:$0xff]   ;;  %v327_v30 = vsel %vm49_vm2, %v457_v25, %v322_v27  ;;  %v341_v31 = vsel %vm110_vm3, %v461_v28, %v460_v15  ;;  %v462_v32 = vld [vmem:[%s847_s0 - $0x23] ss:$16 sm:%s343_s25]  }
  0x23   :  { %v463_v33 = vld [vmem:[%s847_s0 - $0x23] ss:$16 sm:%s348_s28]   ;;  %380 = vst.msk [vmem:[%s848_s1 + $0x2] ss:$8 sm:$0xf] %vm3_vm7, %v379_v29   ;;  %328 = vrot.lane.b32.xlu0 %v327_v30, %s476_s26  ;;  %v346_v34 = vsel %vm115_vm4, %v462_v32, %v341_v31 }
  0x24   :  { %381 = vst.msk [vmem:[%s848_s1 - $0x1d] ss:$8 sm:$0xf0] %vm3_vm7, %v379_v29   ;;  %v467_v35 = vld [vmem:[%s847_s0 + $0x8d] ss:$-48 sm:%s364_s10]   ;;  %v351_v36 = vsel %vm120_vm5, %v463_v33, %v346_v34 }
  0x25   :  { %v468_v37 = vld [vmem:[%s847_s0 + $0x4d] ss:$16 sm:%s367_s15]   ;;  %v355_v38 = vsel %vm124_vm6, %v464_v26, %v351_v36 }
  0x26   :  { %v370_v39 = vsel %vm39_vm0, %v468_v37, %v467_v35  ;;  %356 = vrot.lane.b32.xlu1 %v355_v38, %s476_s26 }
  0x27   :  { %371 = vrot.lane.b32.xlu0 %v370_v39, %s476_s26 }
  0x78   :  { %v52_v40 = vpop.permute.xlu0 %51  }
  0x79   :  { %54 = vst.msk [vmem:[%s848_s1] sm:$0xff] %vm53_vm8, %v52_v40  }
  0x7a   :  { %v99_v41 = vpop.permute.xlu1 %98  }
  0x7b   :  { %404 = vst.msk [vmem:[%s848_s1 + $0x28] ss:$-25 sm:$0x3] %vm53_vm8, %v99_v41   ;;  %405 = vst.msk [vmem:[%s848_s1 + $0xe] sm:$0xfc] %vm53_vm8, %v99_v41  }
  0x7e   :  { %v74_v42 = vpop.permute.xlu0 %73  }
  0x7f   :  { %398 = vst.msk [vmem:[%s848_s1 + $0x20] ss:$-24 sm:$0x3] %vm53_vm8, %v74_v42   ;;  %399 = vst.msk [vmem:[%s848_s1 + $0x7] sm:$0xfc] %vm53_vm8, %v74_v42  }
  0x80   :  { %v127_v43 = vpop.permute.xlu1 %126  }
  0x81   :  { %411 = vst.msk [vmem:[%s848_s1 + $0x30] ss:$-26 sm:$0x3] %vm53_vm8, %v127_v43   ;;  %412 = vst.msk [vmem:[%s848_s1 + $0x15] sm:$0xfc] %vm53_vm8, %v127_v43  }
  0x82   :  { %v142_v44 = vpop.permute.xlu0 %141  }
  0x83   :  { %415 = vst.msk [vmem:[%s848_s1 + $0x38] ss:$-27 sm:$0x3] %vm53_vm8, %v142_v44   ;;  %416 = vst.msk [vmem:[%s848_s1 + $0x1c] sm:$0xc] %vm53_vm8, %v142_v44  }
  0x84   :  { %v167_v45 = vpop.permute.xlu1 %166  }
  0x85   :  { %169 = vst.msk [vmem:[%s848_s1] sm:$0xff] %vm168_vm9, %v167_v45  }
  0x86   :  { %v189_v46 = vpop.permute.xlu0 %188  }
  0x87   :  { %425 = vst.msk [vmem:[%s848_s1 + $0x20] ss:$-24 sm:$0x3] %vm168_vm9, %v189_v46   ;;  %426 = vst.msk [vmem:[%s848_s1 + $0x7] sm:$0xfc] %vm168_vm9, %v189_v46  }
  0x89   :  { %v214_v47 = vpop.permute.xlu1 %213  }
  0x8a   :  { %431 = vst.msk [vmem:[%s848_s1 + $0x28] ss:$-25 sm:$0x3] %vm168_vm9, %v214_v47   ;;  %432 = vst.msk [vmem:[%s848_s1 + $0xe] sm:$0xfc] %vm168_vm9, %v214_v47  }
  0x8c   :  { %v242_v48 = vpop.permute.xlu0 %241  }
  0x8d   :  { %438 = vst.msk [vmem:[%s848_s1 + $0x30] ss:$-26 sm:$0x3] %vm168_vm9, %v242_v48   ;;  %439 = vst.msk [vmem:[%s848_s1 + $0x15] sm:$0xfc] %vm168_vm9, %v242_v48   ;;  %v257_v49 = vpop.permute.xlu1 %256  }
  0x8e   :  { %442 = vst.msk [vmem:[%s848_s1 + $0x38] ss:$-27 sm:$0x3] %vm168_vm9, %v257_v49   ;;  %443 = vst.msk [vmem:[%s848_s1 + $0x1c] sm:$0xc] %vm168_vm9, %v257_v49  }
  0x90   :  { %v282_v50 = vpop.permute.xlu0 %281  }
  0x91   :  { %284 = vst.msk [vmem:[%s848_s1] sm:$0xff] %vm283_vm10, %v282_v50  }
  0x92   :  { %v304_v51 = vpop.permute.xlu1 %303  }
  0x93   :  { %452 = vst.msk [vmem:[%s848_s1 + $0x20] ss:$-24 sm:$0x3] %vm283_vm10, %v304_v51   ;;  %453 = vst.msk [vmem:[%s848_s1 + $0x7] sm:$0xfc] %vm283_vm10, %v304_v51  }
  0x95   :  { %v329_v52 = vpop.permute.xlu0 %328  }
  0x96   :  { %458 = vst.msk [vmem:[%s848_s1 + $0x28] ss:$-25 sm:$0x3] %vm283_vm10, %v329_v52   ;;  %459 = vst.msk [vmem:[%s848_s1 + $0xe] sm:$0xfc] %vm283_vm10, %v329_v52  }
  0x98   :  { %v357_v53 = vpop.permute.xlu1 %356  }
  0x99   :  { %465 = vst.msk [vmem:[%s848_s1 + $0x30] ss:$-26 sm:$0x3] %vm283_vm10, %v357_v53   ;;  %466 = vst.msk [vmem:[%s848_s1 + $0x15] sm:$0xfc] %vm283_vm10, %v357_v53   ;;  %v372_v54 = vpop.permute.xlu0 %371  }
  0x9a   :  { %469 = vst.msk [vmem:[%s848_s1 + $0x38] ss:$-27 sm:$0x3] %vm283_vm10, %v372_v54   ;;  %470 = vst.msk [vmem:[%s848_s1 + $0x1c] sm:$0xc] %vm283_vm10, %v372_v54  }

// kernel: tvim_block_forward.17
= control target key start
LH: loop header
LB: loop body
LE: loop exit
PB: predicated region body
PF: predicated region fallthrough
CT: control target
= control target key end

     0   :  { %s1311_s12 = smov 0   ;;  %s2110_s0 = inlined_call_operand.vmem [shape: bf16[2,18,576], index: 0, kind: input, shape index: {}]   ;;  %s2111_s1 = inlined_call_operand.vmem [shape: f32[9,512], index: 1, kind: input, shape index: {}]   ;;  %s2112_s2 = inlined_call_operand.vmem [shape: f32[1,512], index: 2, kind: input, shape index: {}]   ;;  %s2113_s3 = inlined_call_operand.vmem [shape: bf16[2,16,512], index: 3, kind: output, shape index: {}]  }
   0x1 LB: > { %s1245_s13 = sadd.s32 4294967295, %s1286_s12   ;;  %p1249_p0 = scmp.ge.s32.totalorder %s1286_s12, 1  ;;  %s1286_s12 = sphi %s1311_s12, %s13_s12  }
   0x2   : > { %p137_p1 = scmp.lt.s32.totalorder %s1286_s12, 3 }
   0x4   : > { %p138_p2 = pnand %p1249_p0, %p137_p1 }
   0x6   : > { %141 = sbr.rel (%p138_p2) target bundleno = 377 (0x179), region = 32 }
   0xd   : > { %v203_v0 = vlaneseq  ;;  %v1324_v2 = vld [vmem:[%s2111_s1 + $0x10] sm:$0xff]  ;;  %v1329_v3 = vld [vmem:[%s2111_s1] sm:$0xff]  ;;  %v1337_v5 = vld [vmem:[%s2111_s1 + $0x18] sm:$0xff]  ;;  %s1288_s22 = smov 32   ;;  %s1289_s23 = smov 64   ;;  %vm263_vm0 = vcmask 261120  }
   0xe   : > { %2141 = vst [vmem:[#allocation3_spill] sm:$0xff] %v1337_v5  ;;  %v1342_v6 = vld [vmem:[%s2111_s1 + $0x8] sm:$0xff]  ;;  %v1253_v31 = vld [vmem:[%s2111_s1 + $0x20] ss:$0 sm:$0xff]  ;;  %v1255_v33 = vld [vmem:[%s2111_s1 + $0x30] ss:$0 sm:$0xff] }
   0xf   : > { %v1319_v1 = vshrl.u32 %v203_v0, 7  ;;  %v1254_v32 = vld [vmem:[%s2111_s1 + $0x28] ss:$0 sm:$0xff]  ;;  %v1256_v34 = vld [vmem:[%s2111_s1 + $0x38] ss:$0 sm:$0xff]  ;;  %p161_p3 = scmp.lt.s32.totalorder %s1245_s13, 1 }
  0x10   : > { %s1290_s9 = smov 96   ;;  %vm365_vm1 = vcmask 523264   ;;  %vm478_vm2 = vcmask 1046528   ;;  %vm825_vm3 = vcmask 1045504   ;;  %vm312_vm4 = vcmask 785408  }
  0x11   : > { %v1332_v4 = vsub.s32 1, %v1319_v1  ;;  %v1355_v11 = vsub.s32 2, %v1319_v1  ;;  %v517_v16 = vsub.s32 4, %v1319_v1  ;;  %v652_v21 = vsub.s32 5, %v1319_v1  ;;  %s2208_s13 = smov (!%p161_p3, %s1245_s13), 1 }
  0x12   : > { %v864_v26 = vsub.s32 7, %v1319_v1  ;;  %s1268_s5 = smul.u32 60, %s2208_s13  ;;  %s1263_s14 = sshll.u32 %s2208_s13, 5 }
  0x13   : > { %2140 = vst [vmem:[#allocation2_spill] sm:$0xff] %v1332_v4  ;;  %v246_v7 = vrot.slane %v1324_v2, %v1332_v4  ;;  %v238_v8 = vrot.slane %v1329_v3, %v1332_v4  ;;  %v250_v9 = vrot.slane %v1337_v5, %v1332_v4  ;;  %v242_v10 = vrot.slane %v1342_v6, %v1332_v4  ;;  %s2094_s17 = scalar_lea.vmem %s2113_s3, %s1263_s14 }
  0x14   : > { %2142 = vst [vmem:[#allocation4_spill] sm:$0xff] %v1355_v11  ;;  %v344_v12 = vrot.slane %v1342_v6, %v1355_v11  ;;  %v340_v13 = vrot.slane %v1329_v3, %v1355_v11  ;;  %v352_v14 = vrot.slane %v1337_v5, %v1355_v11  ;;  %v348_v15 = vrot.slane %v1324_v2, %v1355_v11  ;;  %s1424_s8 = scalar_lea.vmem %s2110_s0, %s1268_s5 }
  0x15   : > { %259 = vrot.lane.b32.xlu1 %v246_v7, %s1288_s22  ;;  %255 = vrot.lane.b32.xlu0 %v238_v8, %s1288_s22  ;;  %v518_v17 = vrot.slane %v1329_v3, %v517_v16  ;;  %v522_v18 = vrot.slane %v1342_v6, %v517_v16  ;;  %v526_v19 = vrot.slane %v1324_v2, %v517_v16  ;;  %v171_v35 = vld [vmem:[%s1424_s8] sm:$0xff]  ;;  %v174_v36 = vld [vmem:[%s1424_s8 + $0x14] sm:$0xff] }
  0x16   : > { %v530_v20 = vrot.slane %v1337_v5, %v517_v16  ;;  %v653_v22 = vrot.slane %v1329_v3, %v652_v21  ;;  %v657_v23 = vrot.slane %v1342_v6, %v652_v21  ;;  %v661_v24 = vrot.slane %v1324_v2, %v652_v21  ;;  %v173_v39 = vld [vmem:[%s1424_s8 + $0x10] ss:$20 sps:$4 sm:$0xff]   ;;  %v172_v54 = vld [vmem:[%s1424_s8 + $0x8] sm:$0xff] }
  0x17   : > { %v665_v25 = vrot.slane %v1337_v5, %v652_v21  ;;  %v869_v27 = vrot.slane %v1342_v6, %v864_v26  ;;  %v865_v28 = vrot.slane %v1329_v3, %v864_v26  ;;  %v873_v29 = vrot.slane %v1324_v2, %v864_v26 }
  0x18   : > { %v877_v30 = vrot.slane %v1337_v5, %v864_v26  ;;  %v1428_v37 = vunpack.c.l.bf16 %v171_v35  ;;  %v1430_v38 = vunpack.c.l.bf16 %v174_v36  ;;  %v1435_v44 = vunpack.c.l.bf16 %v173_v39 }
  0x19   : > { %261 = vrot.lane.b32.xlu1 %v250_v9, %s1288_s22  ;;  %257 = vrot.lane.b32.xlu0 %v242_v10, %s1288_s22  ;;  %v1437_v45 = vunpack.c.h.bf16 %v173_v39  ;;  %v1450_v57 = vunpack.c.h.bf16 %v171_v35  ;;  %v1452_v58 = vunpack.c.l.bf16 %v172_v54  ;;  %v1460_v7 = vunpack.c.h.bf16 %v174_v36 }
  0x1a   : > { %2143 = vst [vmem:[#allocation5_spill] sm:$0xff] %v1428_v37  ;;  %v1464_v10 = vunpack.c.h.bf16 %v172_v54 }
  0x1d   : > { %359 = vrot.lane.b32.xlu1 %v344_v12, %s1289_s23  ;;  %357 = vrot.lane.b32.xlu0 %v340_v13, %s1289_s23  ;;  %v175_v13 = vld [vmem:[%s1424_s8 + $0x1c] sm:$0xff] }
  0x1e   : > { %v1470_v16 = vunpack.c.l.bf16 %v175_v13 }
  0x21   : > { %363 = vrot.lane.b32.xlu1 %v352_v14, %s1289_s23  ;;  %361 = vrot.lane.b32.xlu0 %v348_v15, %s1289_s23 }
  0x25   : > { %535 = vrot.lane.b32.xlu0 %v518_v17, %s1288_s22  ;;  %537 = vrot.lane.b32.xlu1 %v522_v18, %s1288_s22  ;;  %v1473_v18 = vunpack.c.h.bf16 %v175_v13 }
  0x29   : > { %539 = vrot.lane.b32.xlu0 %v526_v19, %s1288_s22  ;;  %541 = vrot.lane.b32.xlu1 %v530_v20, %s1288_s22  ;;  %v177_v20 = vld [vmem:[%s1424_s8 + $0x28] sm:$0x11] }
  0x2a   : > { %v1502_v35 = vunpack.c.h.bf16 %v177_v20 }
  0x2d   : > { %670 = vrot.lane.b32.xlu0 %v653_v22, %s1289_s23  ;;  %672 = vrot.lane.b32.xlu1 %v657_v23, %s1289_s23 }
  0x31   : > { %674 = vrot.lane.b32.xlu0 %v661_v24, %s1289_s23  ;;  %676 = vrot.lane.b32.xlu1 %v665_v25, %s1289_s23 }
  0x35   : > { %884 = vrot.lane.b32.xlu1 %v869_v27, %s1288_s22  ;;  %882 = vrot.lane.b32.xlu0 %v865_v28, %s1288_s22  ;;  %v1489_v27 = vunpack.c.l.bf16 %v177_v20  ;;  %v178_v28 = vld [vmem:[%s1424_s8 + $0x30] sm:$0x11] }
  0x39   : > { %886 = vrot.lane.b32.xlu0 %v873_v29, %s1288_s22  ;;  %888 = vrot.lane.b32.xlu1 %v877_v30, %s1288_s22  ;;  %v179_v29 = vld [vmem:[%s1424_s8 + $0x38] sm:$0x1] }
  0x3d   : > { %1017 = vrot.lane.b32.xlu0 %v1253_v31, %s1289_s23  ;;  %1019 = vrot.lane.b32.xlu1 %v1254_v32, %s1289_s23  ;;  %v1498_v32 = vsub.s32 3, %v1319_v1 }
  0x3f   : > { %2144 = vst [vmem:[#allocation6_spill] sm:$0xff] %v1498_v32  ;;  %v1546_v13 = vrot.slane %v1337_v5, %v1498_v32 }
  0x41   : > { %1021 = vrot.lane.b32.xlu0 %v1255_v33, %s1289_s23  ;;  %1023 = vrot.lane.b32.xlu1 %v1256_v34, %s1289_s23 }
  0x87   : > { %v260_v40 = vpop.permute.xlu1 %259  ;;  %v256_v41 = vpop.permute.xlu0 %255 }
  0x88   : > { %v272_v42 = vmul.f32 %v256_v41, %v1428_v37  ;;  %v277_v43 = vmul.f32 %v256_v41, %v1430_v38 }
  0x8a   : > { %302 = vrot.lane.b32.xlu1 %v277_v43, %s1290_s9  ;;  %292 = vrot.lane.b32.xlu0 %v272_v42, %s1290_s9  ;;  %v1510_v42 = vunpack.c.l.bf16 %v179_v29 }
  0x8b   : > { %v262_v46 = vpop.permute.xlu1 %261  ;;  %v258_v47 = vpop.permute.xlu0 %257 }
  0x8c   : > { %v276_v48 = vmul.f32 %v262_v46, %v1435_v44  ;;  %v281_v49 = vmul.f32 %v262_v46, %v1437_v45  ;;  %v264_v61 = vsel %vm263_vm0, %v256_v41, %v258_v47  ;;  %v265_v62 = vsel %vm263_vm0, %v258_v47, %v260_v40 }
  0x8d   : > { %v273_v8 = vmul.f32 %v264_v61, %v1450_v57  ;;  %v274_v9 = vmul.f32 %v265_v62, %v1452_v58  ;;  %v266_v12 = vsel %vm263_vm0, %v260_v40, %v262_v46  ;;  %v278_v17 = vmul.f32 %v264_v61, %v1460_v7 }
  0x8e   : > { %310 = vrot.lane.b32.xlu1 %v281_v49, %s1290_s9  ;;  %300 = vrot.lane.b32.xlu0 %v276_v48, %s1290_s9  ;;  %v275_v19 = vmul.f32 %v266_v12, %v1464_v10  ;;  %v279_v23 = vmul.f32 %v265_v62, %v1470_v16  ;;  %v280_v24 = vmul.f32 %v266_v12, %v1473_v18  ;;  %v1506_v40 = vunpack.c.l.bf16 %v178_v28 }
  0x8f   : > { %v360_v50 = vpop.permute.xlu1 %359  ;;  %v358_v51 = vpop.permute.xlu0 %357  ;;  %v1508_v41 = vunpack.c.h.bf16 %v178_v28 }
  0x90   : > { %v374_v52 = vmul.f32 %v358_v51, %v1428_v37  ;;  %v379_v53 = vmul.f32 %v358_v51, %v1430_v38  ;;  %v366_v25 = vsel %vm365_vm1, %v358_v51, %v360_v50 }
  0x91   : > { %v375_v34 = vmul.f32 %v366_v25, %v1450_v57  ;;  %v380_v48 = vmul.f32 %v366_v25, %v1460_v7 }
  0x92   : > { %404 = vrot.lane.b32.xlu1 %v379_v53, %s1289_s23  ;;  %394 = vrot.lane.b32.xlu0 %v374_v52, %s1289_s23  ;;  %v1528_v52 = vrot.slane %v1329_v3, %v1498_v32 }
  0x93   : > { %v364_v55 = vpop.permute.xlu1 %363  ;;  %v362_v56 = vpop.permute.xlu0 %361 }
  0x94   : > { %v378_v59 = vmul.f32 %v364_v55, %v1435_v44  ;;  %v383_v60 = vmul.f32 %v364_v55, %v1437_v45  ;;  %v367_v26 = vsel %vm365_vm1, %v360_v50, %v362_v56  ;;  %v368_v39 = vsel %vm365_vm1, %v362_v56, %v364_v55 }
  0x95   : > { %v376_v33 = vmul.f32 %v367_v26, %v1452_v58  ;;  %v377_v53 = vmul.f32 %v368_v39, %v1464_v10  ;;  %v381_v54 = vmul.f32 %v367_v26, %v1470_v16  ;;  %v382_v55 = vmul.f32 %v368_v39, %v1473_v18 }
  0x96   : > { %412 = vrot.lane.b32.xlu1 %v383_v60, %s1289_s23  ;;  %402 = vrot.lane.b32.xlu0 %v378_v59, %s1289_s23 }
  0x97   : > { %v536_v63 = vpop.permute.xlu0 %535  ;;  %v538_v0 = vpop.permute.xlu1 %537 }
  0x98   : > { %v543_v36 = vsel %vm263_vm0, %v536_v63, %v538_v0  ;;  %v551_v43 = vmul.f32 %v536_v63, %v1428_v37  ;;  %v556_v46 = vmul.f32 %v536_v63, %v1430_v38  ;;  %v561_v47 = vmul.f32 %v536_v63, %v1489_v27 }
  0x99   : > { %v1519_v49 = vmul.f32 %v543_v36, %v1450_v57  ;;  %v1522_v50 = vmul.f32 %v543_v36, %v1460_v7  ;;  %v1535_v59 = vmul.f32 %v543_v36, %v1502_v35 }
  0x9a   : > { %294 = vrot.lane.b32.xlu1 %v273_v8, %s1290_s9  ;;  %296 = vrot.lane.b32.xlu0 %v274_v9, %s1290_s9  ;;  %v582_v8 = vrot.slane %v556_v46, 1  ;;  %v596_v9 = vrot.slane %v561_v47, 1  ;;  %v581_v12 = vrot.slane %v551_v43, 1 }
  0x9b   : > { %v540_v14 = vpop.permute.xlu0 %539  ;;  %v542_v15 = vpop.permute.xlu1 %541 }
  0x9c   : > { %v560_v56 = vmul.f32 %v542_v15, %v1437_v45  ;;  %v544_v60 = vsel %vm263_vm0, %v538_v0, %v540_v14  ;;  %v555_v61 = vmul.f32 %v542_v15, %v1435_v44  ;;  %v565_v62 = vmul.f32 %v542_v15, %v1510_v42 }
  0x9d   : > { %v1563_v25 = vmul.f32 %v544_v60, %v1470_v16  ;;  %v1566_v26 = vmul.f32 %v544_v60, %v1506_v40  ;;  %v597_v43 = vsel %vm478_vm2, %v582_v8, %v596_v9 }
  0x9e   : > { %298 = vrot.lane.b32.xlu1 %v275_v19, %s1290_s9  ;;  %304 = vrot.lane.b32.xlu0 %v278_v17, %s1290_s9  ;;  %v1551_v19 = vsel %vm263_vm0, %v540_v14, %v542_v15  ;;  %v594_v28 = vrot.slane %v560_v56, 1  ;;  %v604_v15 = vrot.slane %v565_v62, 1  ;;  %v593_v29 = vrot.slane %v555_v61, 1 }
  0x9f   : > { %v1479_v21 = vpop.permute.xlu0 %670  ;;  %v1481_v22 = vpop.permute.xlu1 %672 }
  0xa0   : > { %v678_v14 = vsel %vm365_vm1, %v1479_v21, %v1481_v22  ;;  %v691_v39 = vmul.f32 %v1479_v21, %v1430_v38  ;;  %v686_v47 = vmul.f32 %v1479_v21, %v1428_v37 }
  0xa1   : > { %v1598_v56 = vmul.f32 %v678_v14, %v1450_v57 }
  0xa2   : > { %306 = vrot.lane.b32.xlu1 %v279_v23, %s1290_s9  ;;  %308 = vrot.lane.b32.xlu0 %v280_v24, %s1290_s9  ;;  %v1557_v23 = vmul.f32 %v1528_v52, %v1430_v38  ;;  %v1560_v24 = vmul.f32 %v544_v60, %v1452_v58  ;;  %v1601_v60 = vmul.f32 %v678_v14, %v1460_v7  ;;  %v716_v0 = vrot.slane %v686_v47, 1 }
  0xa3   : > { %v1493_v30 = vpop.permute.xlu0 %674  ;;  %v1495_v31 = vpop.permute.xlu1 %676 }
  0xa4   : > { %v695_v36 = vmul.f32 %v1495_v31, %v1437_v45 }
  0xa6   : > { %396 = vrot.lane.b32.xlu1 %v375_v34, %s1289_s23  ;;  %398 = vrot.lane.b32.xlu0 %v376_v33, %s1289_s23 }
  0xa7   : > { %v1524_v51 = vpop.permute.xlu0 %882  ;;  %v1540_v63 = vpop.permute.xlu1 %884 }
  0xaa   : > { %400 = vrot.lane.b32.xlu1 %v377_v53, %s1289_s23  ;;  %406 = vrot.lane.b32.xlu0 %v380_v48, %s1289_s23  ;;  %v696_v48 = vmul.f32 %v1479_v21, %v1489_v27  ;;  %v583_v53 = vsel %vm478_vm2, %v581_v12, %v582_v8  ;;  %v605_v21 = vsel %vm478_vm2, %v594_v28, %v604_v15 }
  0xab   : > { %v1553_v20 = vpop.permute.xlu0 %886  ;;  %v1576_v34 = vpop.permute.xlu1 %888  ;;  %v595_v8 = vsel %vm478_vm2, %v593_v29, %v594_v28  ;;  %v700_v15 = vmul.f32 %v1495_v31, %v1510_v42  ;;  %v717_v28 = vrot.slane %v691_v39, 1 }
  0xac   : > { %v1574_v33 = vsel %vm263_vm0, %v1540_v63, %v1553_v20  ;;  %v902_v62 = vmul.f32 %v1576_v34, %v1435_v44  ;;  %v1610_v12 = vmul.f32 %v1576_v34, %v1437_v45  ;;  %v731_v29 = vrot.slane %v696_v48, 1 }
  0xad   : > { %2145 = vst [vmem:[#allocation7_spill] sm:$0xff] %v1574_v33  ;;  %v900_v46 = vmul.f32 %v1574_v33, %v1452_v58  ;;  %v679_v48 = vsel %vm365_vm1, %v1481_v22, %v1493_v30  ;;  %v739_v4 = vrot.slane %v700_v15, 1  ;;  %v1647_v22 = vmul.f32 %v1524_v51, %v1430_v38 }
  0xae   : > { %408 = vrot.lane.b32.xlu1 %v381_v54, %s1289_s23  ;;  %410 = vrot.lane.b32.xlu0 %v382_v55, %s1289_s23  ;;  %v1593_v54 = vmul.f32 %v1574_v33, %v1470_v16  ;;  %2148 = vst [vmem:[#allocation10_spill] sm:$0xff] %v1610_v12  ;;  %v1629_v33 = vmul.f32 %v678_v14, %v1502_v35 }
  0xaf   : > { %v1595_v55 = vpop.permute.xlu0 %1017  ;;  %v934_v61 = vrot.slane %v900_v46, 2  ;;  %v690_v46 = vmul.f32 %v1495_v31, %v1435_v44  ;;  %v1020_v5 = vpop.permute.xlu1 %1019  ;;  %v898_v14 = vmul.f32 %v1524_v51, %v1428_v37  ;;  %v732_v47 = vsel %vm478_vm2, %v717_v28, %v731_v29 }
  0xb0   : > { %2146 = vst [vmem:[#allocation8_spill] sm:$0xff] %v1593_v54  ;;  %2147 = vst [vmem:[#allocation9_spill] sm:$0xff] %v1595_v55  ;;  %v2119_v9 = vrot.slane %v1593_v54, 2  ;;  %v1666_v15 = vsel %vm365_vm1, %v1595_v55, %v1020_v5  ;;  %v688_v29 = vmul.f32 %v679_v48, %v1452_v58 }
  0xb1   : > { %v728_v39 = vrot.slane %v690_v46, 1  ;;  %v2151_v46 = vrot.slane %v1519_v49, 1  ;;  %2152 = vst [vmem:[#allocation12_spill] sm:$0xff] %v1666_v15 }
  0xb2   : > { %616 = vrot.lane.b32.xlu1 %v597_v43, %s1290_s9  ;;  %606 = vrot.lane.b32.xlu0 %v583_v53, %s1290_s9  ;;  %v1623_v17 = vsel %vm825_vm3, %v934_v61, %v2119_v9  ;;  %v940_v43 = vrot.slane %v902_v62, 2  ;;  %v2120_v61 = vrot.slane %v1610_v12, 2  ;;  %v729_v9 = vrot.slane %v695_v36, 1 }
  0xb3   : > { %v1637_v62 = vpop.permute.xlu0 %1021  ;;  %v718_v53 = vsel %vm478_vm2, %v716_v0, %v717_v28  ;;  %v2150_v36 = vrot.slane %v1522_v50, 1  ;;  %v722_v11 = vrot.slane %v688_v29, 1  ;;  %v2158_v29 = vrot.slane %v1563_v25, 1 }
  0xb4   : > { %2149 = vst [vmem:[#allocation11_spill] sm:$0xff] %v1637_v62  ;;  %v1670_v28 = vsel %vm365_vm1, %v1020_v5, %v1637_v62  ;;  %v730_v5 = vsel %vm478_vm2, %v728_v39, %v729_v9  ;;  %v564_v39 = vmul.f32 %v1551_v19, %v1508_v41 }
  0xb5   : > { %v586_v0 = vsel %vm478_vm2, %v2151_v46, %v2150_v36  ;;  %2153 = vst [vmem:[#allocation13_spill] sm:$0xff] %v1670_v28  ;;  %v1035_v49 = vmul.f32 %v1670_v28, %v1452_v58  ;;  %v928_v36 = vrot.slane %v898_v14, 2  ;;  %v1687_v46 = vmul.f32 %v1670_v28, %v1470_v16 }
  0xb6   : > { %624 = vrot.lane.b32.xlu1 %v605_v21, %s1290_s9  ;;  %614 = vrot.lane.b32.xlu0 %v595_v8, %s1290_s9  ;;  %v1652_v21 = vsel %vm825_vm3, %v940_v43, %v2120_v61  ;;  %v1657_v8 = vsel %vm365_vm1, %v1493_v30, %v1495_v31  ;;  %v1034_v30 = vmul.f32 %v1666_v15, %v1450_v57  ;;  %v1689_v61 = vpop.permute.xlu1 %1023 }
  0xb7   : > { %v1677_v31 = vmul.f32 %v1666_v15, %v1460_v7  ;;  %v740_v43 = vsel %vm478_vm2, %v729_v9, %v739_v4  ;;  %2155 = vst [vmem:[#allocation15_spill] sm:$0xff] %v1689_v61  ;;  %v1069_v54 = vrot.slane %v1035_v49, 2  ;;  %v554_v4 = vmul.f32 %v1551_v19, %v1464_v10 }
  0xb8   : > { %v1066_v15 = vrot.slane %v1034_v30, 2  ;;  %v559_v9 = vmul.f32 %v1551_v19, %v1473_v18  ;;  %v689_v14 = vmul.f32 %v1657_v8, %v1464_v10  ;;  %v1037_v30 = vmul.f32 %v1689_v61, %v1435_v44 }
  0xb9   : > { %2154 = vst [vmem:[#allocation14_spill] sm:$0xff] %v1677_v31  ;;  %v2132_v12 = vrot.slane %v1677_v31, 2  ;;  %v1042_v49 = vmul.f32 %v1689_v61, %v1437_v45  ;;  %v1047_v19 = vmul.f32 %v1689_v61, %v1510_v42  ;;  %v1724_v45 = vmul.f32 %v679_v48, %v1506_v40 }
  0xba   : > { %751 = vrot.lane.b32.xlu1 %v732_v47, %s1289_s23  ;;  %741 = vrot.lane.b32.xlu0 %v718_v53, %s1289_s23  ;;  %v1694_v47 = vmul.f32 %v679_v48, %v1470_v16  ;;  %v1714_v53 = vmul.f32 %v1657_v8, %v1473_v18  ;;  %v2157_v28 = vrot.slane %v1687_v46, 2  ;;  %v590_v55 = vrot.slane %v554_v4, 1 }
  0xbb   : > { %v1721_v44 = vsel %vm825_vm3, %v1066_v15, %v2132_v12  ;;  %v591_v61 = vrot.slane %v559_v9, 1  ;;  %v1075_v37 = vrot.slane %v1037_v30, 2  ;;  %v1076_v31 = vrot.slane %v1042_v49, 2 }
  0xbc   : > { %v1732_v62 = vsel %vm825_vm3, %v1069_v54, %v2157_v28  ;;  %v2134_v15 = vrot.slane %v1694_v47, 1  ;;  %v1738_v48 = vsel %vm263_vm0, %v1524_v51, %v1540_v63  ;;  %v602_v12 = vrot.slane %v564_v39, 1 }
  0xbd   : > { %v725_v54 = vrot.slane %v689_v14, 1  ;;  %v2133_v28 = vrot.slane %v1714_v53, 1  ;;  %v1749_v4 = vsel %vm825_vm3, %v1075_v37, %v1076_v31  ;;  %v1086_v9 = vrot.slane %v1047_v19, 2 }
  0xbe   : > { %759 = vrot.lane.b32.xlu1 %v740_v43, %s1289_s23  ;;  %749 = vrot.lane.b32.xlu0 %v730_v5, %s1289_s23  ;;  %v2156_v43 = vrot.slane %v1647_v22, 2  ;;  %v2160_v63 = vrot.slane %v1566_v26, 1  ;;  %v2161_v30 = vmov %v2158_v29  ;;  %v2162_v49 = vrot.slane %v1535_v59, 1 }
  0xbf   : > { %v2163_v39 = vrot.slane %v1522_v50, 1  ;;  %v2164_v14 = vrot.slane %v1601_v60, 1  ;;  %v1768_v19 = vmul.f32 %v1546_v13, %v1473_v18  ;;  %v592_v25 = vsel %vm478_vm2, %v590_v55, %v591_v61 }
  0xc0   : > { %v930_v5 = vsel %vm825_vm3, %v928_v36, %v2156_v43  ;;  %v2159_v36 = vrot.slane %v1560_v24, 1  ;;  %v601_v24 = vsel %vm478_vm2, %v2161_v30, %v2160_v63  ;;  %v1772_v26 = vsel %vm825_vm3, %v1076_v31, %v1086_v9 }
  0xc1   : > { %v445_v50 = vrot.slane %v1342_v6, %v1498_v32  ;;  %v449_v59 = vrot.slane %v1324_v2, %v1498_v32  ;;  %v462_v55 = vmul.f32 %v1528_v52, %v1489_v27  ;;  %v787_v31 = vsub.s32 6, %v1319_v1 }
  0xc2   : > { %v589_v43 = vsel %vm478_vm2, %v2159_v36, %v2158_v29  ;;  %608 = vrot.lane.b32.xlu1 %v586_v0, %s1290_s9  ;;  %953 = vrot.lane.b32.xlu0 %v930_v5, %s1290_s9  ;;  %v599_v0 = vsel %vm478_vm2, %v2163_v39, %v2162_v49  ;;  %v2165_v5 = vrot.slane %v1598_v56, 1  ;;  %v603_v29 = vsel %vm478_vm2, %v591_v61, %v602_v12 }
  0xc3   : > { %v724_v56 = vsel %vm478_vm2, %v722_v11, %v2134_v15  ;;  %v1785_v36 = vsel %vm263_vm0, %v1553_v20, %v1576_v34  ;;  %v727_v12 = vsel %vm478_vm2, %v725_v54, %v2133_v28  ;;  %v455_v61 = vmul.f32 %v445_v50, %v1450_v57 }
  0xc4   : > { %v721_v37 = vsel %vm478_vm2, %v2165_v5, %v2164_v14  ;;  %v456_v11 = vmul.f32 %v449_v59, %v1452_v58  ;;  %v2136_v20 = vrot.slane %v1557_v23, 1  ;;  %v2135_v9 = vrot.slane %v1768_v19, 1 }
  0xc5   : > { %v459_v63 = vmul.f32 %v445_v50, %v1460_v7  ;;  %v460_v30 = vmul.f32 %v449_v59, %v1470_v16  ;;  %v482_v49 = vrot.slane %v455_v61, 1  ;;  %v463_v39 = vmul.f32 %v445_v50, %v1502_v35 }
  0xc6   : > { %612 = vrot.lane.b32.xlu1 %v592_v25, %s1290_s9  ;;  %610 = vrot.lane.b32.xlu0 %v589_v43, %s1290_s9  ;;  %v485_v43 = vrot.slane %v456_v11, 1  ;;  %v491_v14 = vrot.slane %v462_v55, 1  ;;  %v464_v25 = vmul.f32 %v449_v59, %v1506_v40  ;;  %v465_v28 = vmul.f32 %v1546_v13, %v1508_v41 }
  0xc7   : > { %v483_v54 = vrot.slane %v459_v63, 1  ;;  %v486_v5 = vrot.slane %v460_v30, 1  ;;  %v493_v61 = vrot.slane %v463_v39, 1  ;;  %v1813_v50 = vrot.slane %v1329_v3, %v787_v31 }
  0xc8   : > { %v1810_v15 = vsel %vm478_vm2, %v2136_v20, %v491_v14  ;;  %v792_v55 = vrot.slane %v1342_v6, %v787_v31  ;;  %v497_v63 = vrot.slane %v465_v28, 1  ;;  %v796_v14 = vrot.slane %v1324_v2, %v787_v31  ;;  %v2171_v20 = vld [vmem:[#allocation3_spill] sm:$0xff] }
  0xc9   : > { %2166 = vst [vmem:[#allocation16_spill] sm:$0xff] %v1810_v15  ;;  %v1817_v59 = vsel %vm478_vm2, %v482_v49, %v483_v54  ;;  %v1820_v11 = vsel %vm478_vm2, %v485_v43, %v486_v5  ;;  %v1825_v30 = vsel %vm478_vm2, %v483_v54, %v493_v61  ;;  %v1829_v39 = vmul.f32 %v1813_v50, %v1430_v38 }
  0xca   : > { %620 = vrot.lane.b32.xlu1 %v601_v24, %s1290_s9  ;;  %618 = vrot.lane.b32.xlu0 %v599_v0, %s1290_s9  ;;  %v495_v24 = vrot.slane %v464_v25, 1  ;;  %v899_v0 = vmul.f32 %v1738_v48, %v1450_v57  ;;  %2167 = vst [vmem:[#allocation17_spill] sm:$0xff] %v1825_v30  ;;  %v1838_v43 = vsel %vm478_vm2, %v2135_v9, %v497_v63  ;;  %v735_v54 = vrot.slane %v1724_v45, 1 }
  0xcb   : > { %2168 = vst [vmem:[#allocation18_spill] sm:$0xff] %v1829_v39  ;;  %2170 = vst [vmem:[#allocation20_spill] sm:$0xff] %v1838_v43  ;;  %v802_v28 = vmul.f32 %v792_v55, %v1450_v57  ;;  %v806_v25 = vmul.f32 %v792_v55, %v1460_v7  ;;  %v1847_v61 = vmul.f32 %v1738_v48, %v1460_v7  ;;  %v827_v30 = vrot.slane %v1829_v39, 2 }
  0xcc   : > { %v1833_v49 = vsel %vm478_vm2, %v486_v5, %v495_v24  ;;  %v803_v5 = vmul.f32 %v796_v14, %v1452_v58  ;;  %v807_v24 = vmul.f32 %v796_v14, %v1470_v16  ;;  %v1852_v32 = vrot.slane %v2171_v20, %v787_v31 }
  0xcd   : > { %2169 = vst [vmem:[#allocation19_spill] sm:$0xff] %v1833_v49  ;;  %v829_v63 = vrot.slane %v802_v28, 2  ;;  %v830_v9 = vrot.slane %v806_v25, 2  ;;  %v809_v45 = vmul.f32 %v1813_v50, %v1489_v27  ;;  %v810_v49 = vmul.f32 %v792_v55, %v1502_v35 }
  0xce   : > { %743 = vrot.lane.b32.xlu1 %v721_v37, %s1289_s23  ;;  %622 = vrot.lane.b32.xlu0 %v603_v29, %s1290_s9  ;;  %2172 = vst [vmem:[#allocation3_spill] sm:$0xff] %v1852_v32  ;;  %v699_v37 = vmul.f32 %v1657_v8, %v1508_v41  ;;  %v832_v29 = vrot.slane %v803_v5, 2  ;;  %v833_v43 = vrot.slane %v807_v24, 2  ;;  %v1865_v28 = vmul.f32 %v1852_v32, %v1473_v18 }
  0xcf   : > { %v1861_v15 = vsel %vm825_vm3, %v829_v63, %v830_v9  ;;  %v838_v31 = vrot.slane %v809_v45, 2  ;;  %v840_v25 = vrot.slane %v810_v49, 2  ;;  %v811_v55 = vmul.f32 %v796_v14, %v1506_v40 }
  0xd0   : > { %2173 = vst [vmem:[#allocation21_spill] sm:$0xff] %v1861_v15  ;;  %v1870_v8 = vsel %vm825_vm3, %v832_v29, %v833_v43  ;;  %v812_v5 = vmul.f32 %v1852_v32, %v1508_v41  ;;  %v2175_v24 = vrot.slane %v1694_v47, 1  ;;  %v901_v45 = vmul.f32 %v1785_v36, %v1464_v10 }
  0xd1   : > { %2174 = vst [vmem:[#allocation22_spill] sm:$0xff] %v1870_v8  ;;  %v836_v14 = vrot.slane %v1865_v28, 2  ;;  %v1889_v49 = vsel %vm825_vm3, %v830_v9, %v840_v25  ;;  %v842_v29 = vrot.slane %v811_v55, 2  ;;  %v931_v15 = vrot.slane %v899_v0, 2 }
  0xd2   : > { %747 = vrot.lane.b32.xlu1 %v727_v12, %s1289_s23  ;;  %745 = vrot.lane.b32.xlu0 %v724_v56, %s1289_s23  ;;  %v736_v63 = vsel %vm478_vm2, %v2175_v24, %v735_v54  ;;  %v906_v12 = vmul.f32 %v1785_v36, %v1473_v18  ;;  %v1885_v56 = vsel %vm825_vm3, %v827_v30, %v838_v31  ;;  %v844_v47 = vrot.slane %v812_v5, 2 }
  0xd3   : > { %v2176_v54 = vrot.slane %v1629_v33, 1  ;;  %v2177_v24 = vrot.slane %v1601_v60, 1  ;;  %v932_v32 = vrot.slane %v1847_v61, 2  ;;  %v737_v39 = vrot.slane %v699_v37, 1 }
  0xd4   : > { %v1900_v31 = vsel %vm825_vm3, %v833_v43, %v842_v29  ;;  %v1905_v9 = vsel %vm825_vm3, %v836_v14, %v844_v47  ;;  %v937_v33 = vrot.slane %v901_v45, 2  ;;  %v938_v60 = vrot.slane %v906_v12, 2  ;;  %v2182_v29 = vld [vmem:[#allocation9_spill] sm:$0xff] }
  0xd5   : > { %v734_v8 = vsel %vm478_vm2, %v2177_v24, %v2176_v54  ;;  %v908_v0 = vmul.f32 %v1524_v51, %v1489_v27  ;;  %v933_v61 = vsel %vm825_vm3, %v931_v15, %v932_v32  ;;  %v2178_v37 = vrot.slane %v1714_v53, 1  ;;  %v2185_v54 = vld [vmem:[#allocation8_spill] sm:$0xff] }
  0xd6   : > { %755 = vrot.lane.b32.xlu1 %v736_v63, %s1289_s23  ;;  %753 = vrot.lane.b32.xlu0 %v734_v8, %s1289_s23  ;;  %v939_v43 = vsel %vm825_vm3, %v937_v33, %v938_v60  ;;  %v2179_v8 = vld [vmem:[#allocation7_spill] sm:$0xff]  ;;  %v909_v63 = vmul.f32 %v1738_v48, %v1502_v35  ;;  %v912_v53 = vmul.f32 %v1576_v34, %v1510_v42  ;;  %v2180_v15 = vrot.slane %v1647_v22, 2  ;;  %v2181_v48 = vld [vmem:[#allocation5_spill] sm:$0xff] }
  0xd7   : > { %v738_v25 = vsel %vm478_vm2, %v2178_v37, %v737_v39  ;;  %v910_v55 = vmul.f32 %v2179_v8, %v1506_v40  ;;  %v943_v5 = vrot.slane %v908_v0, 2  ;;  %v911_v12 = vmul.f32 %v1785_v36, %v1508_v41  ;;  %v2183_v42 = vld [vmem:[#allocation15_spill] sm:$0xff]  ;;  %v2187_v8 = vld [vmem:[#allocation10_spill] sm:$0xff] }
  0xd8   : > { %v945_v45 = vrot.slane %v909_v63, 2  ;;  %v1038_v47 = vmul.f32 %v2182_v29, %v1430_v38  ;;  %v2184_v34 = vld [vmem:[#allocation11_spill] sm:$0xff]  ;;  %v2186_v24 = vrot.slane %v2185_v54, 2  ;;  %v951_v0 = vrot.slane %v912_v53, 2 }
  0xd9   : > { %v947_v51 = vrot.slane %v910_v55, 2  ;;  %v944_v39 = vsel %vm825_vm3, %v2180_v15, %v943_v5  ;;  %v1027_v22 = vsel %vm365_vm1, %v2184_v34, %v2183_v42  ;;  %v2188_v55 = vrot.slane %v2187_v8, 2  ;;  %v2192_v34 = vld [vmem:[#allocation14_spill] sm:$0xff] }
  0xda   : > { %955 = vrot.lane.b32.xlu1 %v933_v61, %s1290_s9  ;;  %757 = vrot.lane.b32.xlu0 %v738_v25, %s1289_s23  ;;  %v946_v36 = vsel %vm825_vm3, %v932_v32, %v945_v45  ;;  %v949_v61 = vrot.slane %v911_v12, 2  ;;  %v1064_v37 = vrot.slane %v1038_v47, 2  ;;  %v1036_v25 = vmul.f32 %v1027_v22, %v1464_v10  ;;  %v2190_v12 = vld [vmem:[#allocation13_spill] sm:$0xff] }
  0xdb   : > { %v948_v33 = vsel %vm825_vm3, %v2186_v24, %v947_v51  ;;  %v952_v5 = vsel %vm825_vm3, %v2188_v55, %v951_v0  ;;  %v1043_v15 = vmul.f32 %v2182_v29, %v1489_v27  ;;  %v1046_v42 = vmul.f32 %v1027_v22, %v1508_v41 }
  0xdc   : > { %v950_v63 = vsel %vm825_vm3, %v938_v60, %v949_v61  ;;  %v1072_v51 = vrot.slane %v1036_v25, 2  ;;  %v2189_v60 = vld [vmem:[#allocation12_spill] sm:$0xff]  ;;  %v2193_v54 = vrot.slane %v2192_v34, 2 }
  0xdd   : > { %v1044_v45 = vmul.f32 %v2189_v60, %v1502_v35  ;;  %v1078_v47 = vrot.slane %v1043_v15, 2  ;;  %v2191_v35 = vrot.slane %v1687_v46, 2 }
  0xde   : > { %959 = vrot.lane.b32.xlu1 %v939_v43, %s1290_s9  ;;  %957 = vrot.lane.b32.xlu0 %v1623_v17, %s1290_s9  ;;  %v1033_v17 = vmul.f32 %v2182_v29, %v2181_v48  ;;  %v1041_v43 = vmul.f32 %v1027_v22, %v1473_v18 }
  0xdf   : > { %v1080_v27 = vrot.slane %v1044_v45, 2 }
  0xe0   : > { %v1073_v53 = vrot.slane %v1041_v43, 2 }
  0xe1   : > { %v1081_v24 = vsel %vm825_vm3, %v2193_v54, %v1080_v27  ;;  %v457_v27 = vmul.f32 %v1546_v13, %v1464_v10 }
  0xe2   : > { %963 = vrot.lane.b32.xlu1 %v944_v39, %s1290_s9  ;;  %961 = vrot.lane.b32.xlu0 %v1652_v21, %s1290_s9  ;;  %v1063_v21 = vrot.slane %v1033_v17, 2  ;;  %v1074_v39 = vsel %vm825_vm3, %v1072_v51, %v1073_v53  ;;  %v1045_v17 = vmul.f32 %v2190_v12, %v1506_v40 }
  0xe4   : > { %v1065_v32 = vsel %vm825_vm3, %v1063_v21, %v1064_v37  ;;  %v1082_v29 = vrot.slane %v1045_v17, 2 }
  0xe6   : > { %967 = vrot.lane.b32.xlu1 %v948_v33, %s1290_s9  ;;  %965 = vrot.lane.b32.xlu0 %v946_v36, %s1290_s9  ;;  %v1083_v40 = vsel %vm825_vm3, %v2191_v35, %v1082_v29  ;;  %v1986_v36 = vsub.s32 0, %v1319_v1 }
  0xe8   : > { %v210_v21 = vrot.slane %v1342_v6, %v1986_v36  ;;  %v206_v6 = vrot.slane %v1329_v3, %v1986_v36  ;;  %v218_v3 = vrot.slane %v2171_v20, %v1986_v36 }
  0xea   : > { %971 = vrot.lane.b32.xlu1 %v952_v5, %s1290_s9  ;;  %969 = vrot.lane.b32.xlu0 %v950_v63, %s1290_s9  ;;  %v220_v43 = vmul.f32 %v210_v21, %v1450_v57  ;;  %v224_v45 = vmul.f32 %v210_v21, %v1460_v7  ;;  %v223_v34 = vmul.f32 %v206_v6, %v1430_v38 }
  0xee   : > { %1090 = vrot.lane.b32.xlu1 %v1721_v44, %s1289_s23  ;;  %1088 = vrot.lane.b32.xlu0 %v1065_v32, %s1289_s23  ;;  %v1079_v44 = vsel %vm825_vm3, %v1064_v37, %v1078_v47 }
  0xf2   : > { %1094 = vrot.lane.b32.xlu1 %v1074_v39, %s1289_s23  ;;  %1092 = vrot.lane.b32.xlu0 %v1732_v62, %s1289_s23  ;;  %v1084_v62 = vrot.slane %v1046_v42, 2  ;;  %v454_v39 = vmul.f32 %v1528_v52, %v2181_v48 }
  0xf4   : > { %v1085_v22 = vsel %vm825_vm3, %v1073_v53, %v1084_v62  ;;  %v479_v42 = vrot.slane %v454_v39, 1  ;;  %v2194_v62 = vrot.slane %v1557_v23, 1 }
  0xf6   : > { %1098 = vrot.lane.b32.xlu1 %v1079_v44, %s1289_s23  ;;  %1096 = vrot.lane.b32.xlu0 %v1749_v4, %s1289_s23 }
  0xfa   : > { %1102 = vrot.lane.b32.xlu1 %v1083_v40, %s1289_s23  ;;  %1100 = vrot.lane.b32.xlu0 %v1081_v24, %s1289_s23  ;;  %v222_v40 = vmul.f32 %v218_v3, %v1464_v10 }
  0xfc   : > { %v303_v33 = vpop.permute.xlu1 %302  ;;  %v293_v41 = vpop.permute.xlu0 %292 }
  0xfe   : > { %1106 = vrot.lane.b32.xlu1 %v1772_v26, %s1289_s23  ;;  %1104 = vrot.lane.b32.xlu0 %v1085_v22, %s1289_s23  ;;  %v214_v26 = vrot.slane %v1324_v2, %v1986_v36 }
 0x100   : > { %v311_v46 = vpop.permute.xlu1 %310  ;;  %v301_v4 = vpop.permute.xlu0 %300  ;;  %v221_v32 = vmul.f32 %v214_v26, %v1452_v58  ;;  %v225_v12 = vmul.f32 %v214_v26, %v1470_v16  ;;  %v219_v58 = vmul.f32 %v206_v6, %v2181_v48 }
 0x104   : > { %v405_v0 = vpop.permute.xlu1 %404  ;;  %v395_v61 = vpop.permute.xlu0 %394 }
 0x108   : > { %v1990_v37 = vpop.permute.xlu1 %412  ;;  %v403_v25 = vpop.permute.xlu0 %402 }
 0x10c   : > { %v295_v8 = vpop.permute.xlu1 %294  ;;  %v297_v55 = vpop.permute.xlu0 %296 }
 0x10d   : > { %v313_v5 = vsel %vm312_vm4, %v293_v41, %v295_v8  ;;  %v314_v1 = vsel %vm312_vm4, %v295_v8, %v297_v55  ;;  %v488_v41 = vrot.slane %v457_v27, 1  ;;  %v2198_v27 = vld [vmem:[#allocation19_spill] sm:$0xff] }
 0x10e   : > { %v330_v63 = vadd.f32 %v314_v1, %v220_v43  ;;  %v329_v16 = vadd.f32 %v313_v5, %v219_v58  ;;  %v2195_v1 = vrot.slane %v1768_v19, 1 }
 0x110   : > { %v299_v51 = vpop.permute.xlu1 %298  ;;  %v305_v53 = vpop.permute.xlu0 %304 }
 0x111   : > { %v315_v15 = vsel %vm312_vm4, %v297_v55, %v299_v51  ;;  %v316_v57 = vsel %vm312_vm4, %v299_v51, %v301_v4  ;;  %v317_v2 = vsel %vm312_vm4, %v303_v33, %v305_v53  ;;  %v481_v33 = vsel %vm478_vm2, %v479_v42, %v2194_v62 }
 0x112   : > { %v331_v60 = vadd.f32 %v315_v15, %v221_v32  ;;  %v226_v4 = vmul.f32 %v218_v3, %v1473_v18  ;;  %v332_v21 = vadd.f32 %v316_v57, %v222_v40  ;;  %v333_v43 = vadd.f32 %v317_v2, %v223_v34 }
 0x113   : > { %v490_v32 = vsel %vm478_vm2, %v488_v41, %v2195_v1 }
 0x114   : > { %v307_v17 = vpop.permute.xlu1 %306  ;;  %v309_v47 = vpop.permute.xlu0 %308 }
 0x115   : > { %v318_v29 = vsel %vm312_vm4, %v305_v53, %v307_v17  ;;  %v319_v44 = vsel %vm312_vm4, %v307_v17, %v309_v47  ;;  %v320_v52 = vsel %vm312_vm4, %v309_v47, %v311_v46  ;;  %v2197_v17 = vld [vmem:[#allocation17_spill] sm:$0xff] }
 0x116   : > { %v334_v7 = vadd.f32 %v318_v29, %v224_v45  ;;  %v335_v35 = vadd.f32 %v319_v44, %v225_v12  ;;  %v336_v51 = vadd.f32 %v320_v52, %v226_v4  ;;  %v2199_v44 = vld [vmem:[#allocation20_spill] sm:$0xff] }
 0x118   : > { %v397_v20 = vpop.permute.xlu1 %396  ;;  %v399_v54 = vpop.permute.xlu0 %398 }
 0x119   : > { %v414_v24 = vsel %vm365_vm1, %v395_v61, %v397_v20  ;;  %v415_v13 = vsel %vm365_vm1, %v397_v20, %v399_v54 }
 0x11a   : > { %v430_v22 = vadd.f32 %v414_v24, %v329_v16  ;;  %v431_v46 = vadd.f32 %v415_v13, %v330_v63  ;;  %v2200_v13 = vld [vmem:[#allocation3_spill] sm:$0xff] }
 0x11b   : > { %v804_v62 = vmul.f32 %v2200_v13, %v1464_v10 }
 0x11c   : > { %v401_v26 = vpop.permute.xlu1 %400  ;;  %v407_v8 = vpop.permute.xlu0 %406  ;;  %v507_v38 = vadd.f32 %v481_v33, %v430_v22  ;;  %v508_v55 = vadd.f32 %v1817_v59, %v431_v46  ;;  %v2196_v59 = vld [vmem:[#allocation16_spill] sm:$0xff] }
 0x11d   : > { %v416_v61 = vsel %vm365_vm1, %v399_v54, %v401_v26  ;;  %v417_v5 = vsel %vm365_vm1, %v401_v26, %v403_v25  ;;  %v418_v23 = vsel %vm365_vm1, %v405_v0, %v407_v8 }
 0x11e   : > { %v432_v63 = vadd.f32 %v416_v61, %v331_v60  ;;  %v433_v6 = vadd.f32 %v417_v5, %v332_v21  ;;  %v434_v18 = vadd.f32 %v418_v23, %v333_v43  ;;  %v835_v43 = vrot.slane %v804_v62, 2 }
 0x120   : > { %v409_v53 = vpop.permute.xlu1 %408  ;;  %v411_v15 = vpop.permute.xlu0 %410  ;;  %v510_v57 = vadd.f32 %v490_v32, %v433_v6  ;;  %v509_v2 = vadd.f32 %v1820_v11, %v432_v63  ;;  %v511_v39 = vadd.f32 %v2196_v59, %v434_v18 }
 0x121   : > { %v419_v45 = vsel %vm365_vm1, %v407_v8, %v409_v53  ;;  %v420_v25 = vsel %vm365_vm1, %v409_v53, %v411_v15  ;;  %v421_v19 = vsel %vm365_vm1, %v411_v15, %v1990_v37 }
 0x122   : > { %v435_v0 = vadd.f32 %v419_v45, %v334_v7  ;;  %v436_v12 = vadd.f32 %v420_v25, %v335_v35  ;;  %v437_v60 = vadd.f32 %v421_v19, %v336_v51  ;;  %v801_v35 = vmul.f32 %v1813_v50, %v2181_v48 }
 0x124   : > { %v617_v58 = vpop.permute.xlu1 %616  ;;  %v607_v3 = vpop.permute.xlu0 %606  ;;  %v512_v47 = vadd.f32 %v2197_v17, %v435_v0  ;;  %v513_v29 = vadd.f32 %v2198_v27, %v436_v12  ;;  %v514_v11 = vadd.f32 %v2199_v44, %v437_v60  ;;  %v826_v22 = vrot.slane %v801_v35, 2 }
 0x126   : > { %v828_v50 = vsel %vm825_vm3, %v826_v22, %v827_v30 }
 0x128   : > { %v625_v52 = vpop.permute.xlu1 %624  ;;  %v615_v42 = vpop.permute.xlu0 %614 }
 0x12c   : > { %v752_v16 = vpop.permute.xlu1 %751  ;;  %v742_v40 = vpop.permute.xlu0 %741 }
 0x130   : > { %v760_v34 = vpop.permute.xlu1 %759  ;;  %v750_v20 = vpop.permute.xlu0 %749 }
 0x134   : > { %v609_v54 = vpop.permute.xlu1 %608  ;;  %v2039_v24 = vpop.permute.xlu0 %953 }
 0x135   : > { %v626_v46 = vsel %vm312_vm4, %v607_v3, %v609_v54 }
 0x136   : > { %v642_v26 = vadd.f32 %v626_v46, %v507_v38  ;;  %v837_v38 = vsel %vm825_vm3, %v835_v43, %v836_v14 }
 0x138   : > { %v613_v37 = vpop.permute.xlu1 %612  ;;  %v611_v7 = vpop.permute.xlu0 %610 }
 0x139   : > { %v629_v8 = vsel %vm312_vm4, %v613_v37, %v615_v42  ;;  %v627_v10 = vsel %vm312_vm4, %v609_v54, %v611_v7  ;;  %v628_v48 = vsel %vm312_vm4, %v611_v7, %v613_v37 }
 0x13a   : > { %v645_v18 = vadd.f32 %v629_v8, %v510_v57  ;;  %v643_v51 = vadd.f32 %v627_v10, %v508_v55  ;;  %v644_v53 = vadd.f32 %v628_v48, %v509_v2  ;;  %v2202_v57 = vld [vmem:[#allocation21_spill] sm:$0xff]  ;;  %v2203_v2 = vld [vmem:[#allocation22_spill] sm:$0xff] }
 0x13c   : > { %v621_v33 = vpop.permute.xlu1 %620  ;;  %v619_v41 = vpop.permute.xlu0 %618 }
 0x13d   : > { %v630_v4 = vsel %vm312_vm4, %v617_v58, %v619_v41 }
 0x13e   : > { %v646_v21 = vadd.f32 %v630_v4, %v511_v39  ;;  %v631_v39 = vsel %vm312_vm4, %v619_v41, %v621_v33 }
 0x13f   : > { %v647_v28 = vadd.f32 %v631_v39, %v512_v47 }
 0x140   : > { %v744_v61 = vpop.permute.xlu1 %743  ;;  %v623_v5 = vpop.permute.xlu0 %622 }
 0x141   : > { %v761_v1 = vsel %vm365_vm1, %v742_v40, %v744_v61  ;;  %v633_v32 = vsel %vm312_vm4, %v623_v5, %v625_v52  ;;  %v632_v27 = vsel %vm312_vm4, %v621_v33, %v623_v5 }
 0x142   : > { %v777_v63 = vadd.f32 %v761_v1, %v642_v26  ;;  %v649_v6 = vadd.f32 %v633_v32, %v514_v11  ;;  %v648_v40 = vadd.f32 %v632_v27, %v513_v29 }
 0x144   : > { %v748_v15 = vpop.permute.xlu1 %747  ;;  %v746_v59 = vpop.permute.xlu0 %745  ;;  %v854_v30 = vadd.f32 %v828_v50, %v777_v63 }
 0x145   : > { %v764_v45 = vsel %vm365_vm1, %v748_v15, %v750_v20  ;;  %v762_v25 = vsel %vm365_vm1, %v744_v61, %v746_v59  ;;  %v763_v19 = vsel %vm365_vm1, %v746_v59, %v748_v15  ;;  %v2206_v59 = vld [vmem:[#allocation6_spill] sm:$0xff] }
 0x146   : > { %v780_v0 = vadd.f32 %v764_v45, %v645_v18  ;;  %v778_v12 = vadd.f32 %v762_v25, %v643_v51  ;;  %v779_v60 = vadd.f32 %v763_v19, %v644_v53  ;;  %v2205_v53 = vld [vmem:[#allocation4_spill] sm:$0xff] }
 0x148   : > { %v756_v58 = vpop.permute.xlu1 %755  ;;  %v754_v14 = vpop.permute.xlu0 %753  ;;  %v855_v55 = vadd.f32 %v2202_v57, %v778_v12  ;;  %v856_v3 = vadd.f32 %v2203_v2, %v779_v60  ;;  %v857_v17 = vadd.f32 %v837_v38, %v780_v0 }
 0x149   : > { %v765_v44 = vsel %vm365_vm1, %v752_v16, %v754_v14  ;;  %v766_v11 = vsel %vm365_vm1, %v754_v14, %v756_v58 }
 0x14a   : > { %v781_v52 = vadd.f32 %v765_v44, %v646_v21  ;;  %v782_v42 = vadd.f32 %v766_v11, %v647_v28 }
 0x14c   : > { %v956_v20 = vpop.permute.xlu1 %955  ;;  %v758_v54 = vpop.permute.xlu0 %757  ;;  %v858_v47 = vadd.f32 %v1885_v56, %v781_v52  ;;  %v859_v37 = vadd.f32 %v1889_v49, %v782_v42 }
 0x14d   : > { %v767_v7 = vsel %vm365_vm1, %v756_v58, %v758_v54  ;;  %v768_v35 = vsel %vm365_vm1, %v758_v54, %v760_v34  ;;  %v973_v49 = vsel %vm312_vm4, %v2039_v24, %v956_v20  ;;  %v2204_v24 = vld [vmem:[#allocation2_spill] sm:$0xff] }
 0x14e   : > { %v783_v13 = vadd.f32 %v767_v7, %v648_v40  ;;  %v784_v62 = vadd.f32 %v768_v35, %v649_v6  ;;  %v989_v61 = vadd.f32 %v973_v49, %v854_v30 }
 0x150   : > { %v960_v33 = vpop.permute.xlu1 %959  ;;  %v958_v41 = vpop.permute.xlu0 %957  ;;  %v860_v16 = vadd.f32 %v1900_v31, %v783_v13  ;;  %v861_v22 = vadd.f32 %v1905_v9, %v784_v62  ;;  %v1132_v31 = vld [vmem:[%s2112_s2] sm:$0xf] }
 0x151   : > { %v974_v34 = vsel %vm312_vm4, %v956_v20, %v958_v41  ;;  %v975_v5 = vsel %vm312_vm4, %v958_v41, %v960_v33  ;;  %v1137_v50 = vrot.slane %v1132_v31, %v1986_v36  ;;  %v1141_v1 = vrot.slane %v1132_v31, %v2204_v24 }
 0x152   : > { %v990_v23 = vadd.f32 %v974_v34, %v855_v55  ;;  %v991_v18 = vadd.f32 %v975_v5, %v856_v3  ;;  %v1145_v15 = vrot.slane %v1132_v31, %v2205_v53  ;;  %v1149_v30 = vrot.slane %v1132_v31, %v2206_v59 }
 0x154   : > { %v964_v46 = vpop.permute.xlu1 %963  ;;  %v962_v29 = vpop.permute.xlu0 %961 }
 0x155   : > { %v976_v63 = vsel %vm312_vm4, %v960_v33, %v962_v29 }
 0x156   : > { %v992_v39 = vadd.f32 %v976_v63, %v857_v17 }
 0x158   : > { %v968_v4 = vpop.permute.xlu1 %967  ;;  %v966_v21 = vpop.permute.xlu0 %965 }
 0x159   : > { %v977_v12 = vsel %vm312_vm4, %v964_v46, %v966_v21  ;;  %v978_v60 = vsel %vm312_vm4, %v966_v21, %v968_v4 }
 0x15a   : > { %v993_v57 = vadd.f32 %v977_v12, %v858_v47  ;;  %v994_v55 = vadd.f32 %v978_v60, %v859_v37 }
 0x15c   : > { %v972_v43 = vpop.permute.xlu1 %971  ;;  %v970_v56 = vpop.permute.xlu0 %969 }
 0x15d   : > { %v979_v44 = vsel %vm312_vm4, %v968_v4, %v970_v56  ;;  %v980_v11 = vsel %vm312_vm4, %v970_v56, %v972_v43 }
 0x15e   : > { %v995_v47 = vadd.f32 %v979_v44, %v860_v16  ;;  %v996_v37 = vadd.f32 %v980_v11, %v861_v22 }
 0x160   : > { %v1091_v26 = vpop.permute.xlu1 %1090  ;;  %v1089_v8 = vpop.permute.xlu0 %1088 }
 0x161   : > { %v1108_v9 = vsel %vm365_vm1, %v1089_v8, %v1091_v26 }
 0x162   : > { %v1124_v10 = vadd.f32 %v1108_v9, %v989_v61 }
 0x164   : > { %v1095_v48 = vpop.permute.xlu1 %1094  ;;  %v1093_v32 = vpop.permute.xlu0 %1092  ;;  %v1154_v36 = vadd.f32 %v1137_v50, %v1124_v10 }
 0x165   : > { %v1109_v6 = vsel %vm365_vm1, %v1091_v26, %v1093_v32  ;;  %v1110_v38 = vsel %vm365_vm1, %v1093_v32, %v1095_v48 }
 0x166   : > { %v1125_v51 = vadd.f32 %v1109_v6, %v990_v23  ;;  %v1126_v45 = vadd.f32 %v1110_v38, %v991_v18 }
 0x168   : > { %v1155_v25 = vadd.f32 %v1141_v1, %v1125_v51  ;;  %v1099_v19 = vpop.permute.xlu1 %1098  ;;  %v1097_v0 = vpop.permute.xlu0 %1096  ;;  %v1156_v2 = vadd.f32 %v1145_v15, %v1126_v45 }
 0x169   : > { %v1111_v28 = vsel %vm365_vm1, %v1095_v48, %v1097_v0 }
 0x16a   : > { %v1264_v58 = vpack.c.bf16 %v1155_v25, %v1154_v36  ;;  %v1127_v14 = vadd.f32 %v1111_v28, %v992_v39 }
 0x16c   : > { %1186 = vst [vmem:[%s2094_s17] sm:$0xff] %v1264_v58  ;;  %v1157_v3 = vadd.f32 %v1149_v30, %v1127_v14  ;;  %v1103_v17 = vpop.permute.xlu1 %1102  ;;  %v1101_v27 = vpop.permute.xlu0 %1100 }
 0x16d   : > { %v1112_v52 = vsel %vm365_vm1, %v1099_v19, %v1101_v27  ;;  %v1113_v42 = vsel %vm365_vm1, %v1101_v27, %v1103_v17 }
 0x16e   : > { %v1265_v40 = vpack.c.bf16 %v1157_v3, %v1156_v2  ;;  %v1128_v20 = vadd.f32 %v1112_v52, %v993_v57  ;;  %v1129_v54 = vadd.f32 %v1113_v42, %v994_v55 }
 0x170   : > { %1187 = vst [vmem:[%s2094_s17 + $0x8] sm:$0xff] %v1265_v40  ;;  %v1158_v7 = vadd.f32 %v1137_v50, %v1128_v20  ;;  %v1159_v35 = vadd.f32 %v1141_v1, %v1129_v54  ;;  %v1107_v13 = vpop.permute.xlu1 %1106  ;;  %v1105_v62 = vpop.permute.xlu0 %1104 }
 0x171   : > { %v1114_v33 = vsel %vm365_vm1, %v1103_v17, %v1105_v62  ;;  %v1115_v41 = vsel %vm365_vm1, %v1105_v62, %v1107_v13 }
 0x172   : > { %v1266_v46 = vpack.c.bf16 %v1159_v35, %v1158_v7  ;;  %v1130_v29 = vadd.f32 %v1114_v33, %v995_v47  ;;  %v1131_v4 = vadd.f32 %v1115_v41, %v996_v37 }
 0x174   : > { %1188 = vst [vmem:[%s2094_s17 + $0x10] sm:$0xff] %v1266_v46  ;;  %v1160_v21 = vadd.f32 %v1145_v15, %v1130_v29  ;;  %v1161_v43 = vadd.f32 %v1149_v30, %v1131_v4 }
 0x176   : > { %v1267_v56 = vpack.c.bf16 %v1161_v43, %v1160_v21 }
 0x178   : > { %1189 = vst [vmem:[%s2094_s17 + $0x18] sm:$0xff] %v1267_v56 }
 0x179 PF: > { %s13_s12 = sadd.s32 1, %s1286_s12  }
 0x17a   : > { %p10_p4 = scmp.ge.s32.totalorder %s13_s12, 4  }
 0x17c   :  { %12 = sbr.rel (!%p10_p4) target bundleno = 1 (0x1), region = 62 }

// kernel: tvim_block_forward.18
= control target key start
LH: loop header
LB: loop body
LE: loop exit
PB: predicated region body
PF: predicated region fallthrough
CT: control target
= control target key end

     0   :  { %s2210_s24 = smov 0   ;;  %s2468_s0 = inlined_call_operand.vmem [shape: bf16[512,16], index: 0, kind: input, shape index: {}]   ;;  %s2469_s1 = inlined_call_operand.vmem [shape: bf16[512,16], index: 1, kind: input, shape index: {}]   ;;  %s2470_s2 = inlined_call_operand.vmem [shape: bf16[512,32], index: 2, kind: input, shape index: {}]   ;;  %s2471_s3 = inlined_call_operand.vmem [shape: bf16[16,32], index: 3, kind: input, shape index: {}]   ;;  %s2472_s4 = inlined_call_operand.vmem [shape: bf16[16,32], index: 4, kind: input, shape index: {}]   ;;  %s2473_s5 = inlined_call_operand.vmem [shape: bf16[32,32], index: 5, kind: input, shape index: {}]   ;;  %s2474_s6 = inlined_call_operand.vmem [shape: f32[1,32], index: 6, kind: input, shape index: {}]   ;;  %s2475_s7 = inlined_call_operand.vmem [shape: bf16[512,32], index: 7, kind: output, shape index: {}]  }
   0x1 LB: > { %s1668_s25 = sadd.s32 4294967295, %s2168_s24   ;;  %p1672_p0 = scmp.ge.s32.totalorder %s2168_s24, 1  ;;  %s2168_s24 = sphi %s2210_s24, %s17_s24  }
   0x2   : > { %p260_p1 = scmp.lt.s32.totalorder %s2168_s24, 3 }
   0x4   : > { %p261_p2 = pnand %p1672_p0, %p260_p1 }
   0x5   : > { %v2110_v0 = vld [vmem:[%s2471_s3] sm:$0xff] (!%p261_p2)   ;;  %s1673_s28 = sshll.u32 (!%p261_p2), %s1668_s25, 5  ;;  %vm448_vm0 = vcmask (!%p261_p2), 130048   ;;  %v2125_v5 = vld [vmem:[%s2473_s5 + $0x8] sm:$0xff] (!%p261_p2)   ;;  %vm1185_vm1 = vcmask (!%p261_p2), 261120   ;;  %vm1555_vm2 = vcmask (!%p261_p2), 257024  }
   0x6   : > { %264 = sbr.rel (%p261_p2) target bundleno = 328 (0x148), region = 48  ;;  %v2111_v1 = vld [vmem:[%s2472_s4] sm:$0xff] (!%p261_p2)   ;;  %p303_p3 = scmp.lt.s32.totalorder (!%p261_p2), %s1673_s28, 63  ;;  %1900 = vmatprep.subr.bf16.mxu1 (!%p261_p2), %v2110_v0 }
   0x7   : > { %v2116_v2 = vld [vmem:[%s2473_s5] sm:$0xff] (!%p261_p2)   ;;  %1901 = vmatpush3.bf16.msra.mxu1 (!%p261_p2), %v2110_v0  ;;  %1934 = vmatprep.subr.bf16.mxu0 (!%p261_p2), %v2111_v1 }
   0x8   : > { %1935 = vmatpush3.bf16.msra.mxu0 (!%p261_p2), %v2111_v1  ;;  %2004 = vmatprep.subr.bf16.mxu1 (!%p261_p2), %v2111_v1 }
   0x9   : > { %1968 = vmatprep.subr.bf16.mxu0 (!%p261_p2), %v2116_v2 }
   0xd   : > { %s2477_s28 = smov (!%p303_p3, %s1673_s28), 63 }
   0xe   : > { %s2227_s10 = sshll.u32 %s2477_s28, 2 }
   0xf   : > { %s2233_s13 = scalar_lea.vmem %s2468_s0, %s2227_s10  ;;  %s2239_s16 = scalar_lea.vmem %s2469_s1, %s2227_s10 }
  0x10   : > { %v2112_v3 = vld [vmem:[%s2233_s13] sm:$0xff]   ;;  %v2114_v6 = vld [vmem:[%s2233_s13 + $0x8] sm:$0xff]   ;;  %v2117_v8 = vld [vmem:[%s2233_s13 + $0x10] sm:$0xff]   ;;  %s2270_s21 = scalar_lea.vmem %s2470_s2, %s2227_s10  ;;  %s2367_s27 = scalar_lea.vmem %s2475_s7, %s2227_s10 }
  0x11   : > { %v2113_v4 = vld [vmem:[%s2239_s16] sm:$0xff]   ;;  %1902 = vmatprep.mubr.msk.bf16.mxu1 %vm448_vm0, %v2112_v3  ;;  %v2115_v7 = vld [vmem:[%s2239_s16 + $0x8] sm:$0xff]   ;;  %v2118_v9 = vld [vmem:[%s2239_s16 + $0x10] sm:$0xff]  }
  0x12   : > { %1936 = vmatprep.mubr.msk.bf16.mxu0 %vm448_vm0, %v2113_v4  ;;  %1903 = vmatmul.mubr.msk.bf16.vlgmr.msra.gmra.mrb[0].mxu1 %vm448_vm0, %v2114_v6  ;;  %v2119_v10 = vld [vmem:[%s2233_s13 + $0x18] sm:$0xff]   ;;  %v2121_v12 = vld [vmem:[%s2233_s13 + $0x20] sm:$0xff]   ;;  %v2123_v14 = vld [vmem:[%s2233_s13 + $0x28] sm:$0xff]  }
  0x13   : > { %2005 = vmatpush3.bf16.msra.mxu1 %v2111_v1  ;;  %1937 = vmatmul.mubr.msk.bf16.vlgmr.msra.gmra.mrb[0].mxu0 %vm448_vm0, %v2115_v7  ;;  %v2120_v11 = vld [vmem:[%s2239_s16 + $0x18] sm:$0xff]   ;;  %v2122_v13 = vld [vmem:[%s2239_s16 + $0x20] sm:$0xff]   ;;  %v2124_v15 = vld [vmem:[%s2239_s16 + $0x28] sm:$0xff]  }
  0x14   : > { %1969 = vmatpush3.bf16.msra.mxu0 %v2116_v2  ;;  %1906 = vmatprep.mubr.msk.bf16.mxu1 %vm448_vm0, %v2117_v8  ;;  %v2126_v16 = vld [vmem:[%s2233_s13 + $0x30] sm:$0xff]   ;;  %v2128_v18 = vld [vmem:[%s2233_s13 + $0x38] sm:$0xff]   ;;  %v2130_v20 = vld [vmem:[%s2233_s13 + $0x40] sm:$0xff]  }
  0x15   : > { %1940 = vmatprep.mubr.msk.bf16.mxu0 %vm448_vm0, %v2118_v9  ;;  %1970 = vmatprep.subr.bf16.mxu0 %v2125_v5  ;;  %v2127_v17 = vld [vmem:[%s2239_s16 + $0x30] sm:$0xff]   ;;  %v2129_v19 = vld [vmem:[%s2239_s16 + $0x38] sm:$0xff]   ;;  %v2131_v21 = vld [vmem:[%s2270_s21] sm:$0xff]  }
  0x16   : > { %v2132_v22 = vld [vmem:[%s2233_s13 + $0x48] sm:$0xff]   ;;  %v2134_v24 = vld [vmem:[%s2233_s13 + $0x50] sm:$0xff]   ;;  %v2136_v26 = vld [vmem:[%s2233_s13 + $0x58] sm:$0xff]  }
  0x17   : > { %v2133_v23 = vld [vmem:[%s2270_s21 + $0x8] sm:$0xff]   ;;  %v2135_v25 = vld [vmem:[%s2270_s21 + $0x10] sm:$0xff]   ;;  %v2137_v27 = vld [vmem:[%s2270_s21 + $0x18] sm:$0xff]  }
  0x18   : > { %1971 = vmatpush3.bf16.msra.mxu0 %v2125_v5  ;;  %v2138_v28 = vld [vmem:[%s2233_s13 + $0x60] sm:$0xff]   ;;  %v2140_v30 = vld [vmem:[%s2233_s13 + $0x68] sm:$0xff]   ;;  %v2142_v32 = vld [vmem:[%s2233_s13 + $0x70] sm:$0xff]  }
  0x19   : > { %v2139_v29 = vld [vmem:[%s2270_s21 + $0x20] sm:$0xff]   ;;  %v2141_v31 = vld [vmem:[%s2270_s21 + $0x28] sm:$0xff]   ;;  %v2143_v33 = vld [vmem:[%s2270_s21 + $0x30] sm:$0xff]  }
  0x1a   : > { %1907 = vmatmul.mubr.msk.bf16.gmra.mrb[4].mxu1 %vm448_vm0, %v2119_v10  ;;  %v2144_v34 = vld [vmem:[%s2233_s13 + $0x78] sm:$0xff]   ;;  %v2146_v36 = vld [vmem:[%s2239_s16 + $0x40] sm:$0xff]   ;;  %v2148_v38 = vld [vmem:[%s2239_s16 + $0x48] sm:$0xff]  }
  0x1b   : > { %1941 = vmatmul.mubr.msk.bf16.gmra.mrb[4].mxu0 %vm448_vm0, %v2120_v11  ;;  %1910 = vmatprep.mubr.msk.bf16.mxu1 %vm448_vm0, %v2121_v12  ;;  %v2145_v35 = vld [vmem:[%s2270_s21 + $0x38] sm:$0xff]   ;;  %v2147_v37 = vld [vmem:[%s2270_s21 + $0x40] sm:$0xff]   ;;  %v2149_v39 = vld [vmem:[%s2270_s21 + $0x48] sm:$0xff]  }
  0x1c   : > { %1944 = vmatprep.mubr.msk.bf16.mxu0 %vm448_vm0, %v2122_v13  ;;  %v2150_v40 = vld [vmem:[%s2239_s16 + $0x50] sm:$0xff]   ;;  %v2152_v42 = vld [vmem:[%s2239_s16 + $0x58] sm:$0xff]   ;;  %v2154_v44 = vld [vmem:[%s2239_s16 + $0x60] sm:$0xff]  }
  0x1d   : > { %v2151_v41 = vld [vmem:[%s2270_s21 + $0x50] sm:$0xff]   ;;  %v2153_v43 = vld [vmem:[%s2270_s21 + $0x58] sm:$0xff]   ;;  %v2155_v45 = vld [vmem:[%s2270_s21 + $0x60] sm:$0xff]  }
  0x1e   : > { %v2156_v46 = vld [vmem:[%s2239_s16 + $0x68] sm:$0xff]   ;;  %v2158_v48 = vld [vmem:[%s2239_s16 + $0x70] sm:$0xff]   ;;  %v2160_v50 = vld [vmem:[%s2239_s16 + $0x78] sm:$0xff]  }
  0x1f   : > { %v2157_v47 = vld [vmem:[%s2270_s21 + $0x68] sm:$0xff]   ;;  %v2159_v49 = vld [vmem:[%s2270_s21 + $0x70] sm:$0xff]   ;;  %v2161_v51 = vld [vmem:[%s2270_s21 + $0x78] sm:$0xff]  }
  0x20   : > { %v2357_v4 = vld [vmem:[%s2474_s6] ss:$0 sm:$0xff] }
  0x22   : > { %1911 = vmatmul.mubr.msk.bf16.gmra.mrb[8].mxu1 %vm448_vm0, %v2123_v14 }
  0x23   : > { %1945 = vmatmul.mubr.msk.bf16.gmra.mrb[8].mxu0 %vm448_vm0, %v2124_v15  ;;  %1914 = vmatprep.mubr.msk.bf16.mxu1 %vm448_vm0, %v2126_v16 }
  0x24   : > { %1948 = vmatprep.mubr.msk.bf16.mxu0 %vm448_vm0, %v2127_v17 }
  0x2a   : > { %1915 = vmatmul.mubr.msk.bf16.gmra.mrb[12].mxu1 %vm448_vm0, %v2128_v18 }
  0x2b   : > { %1949 = vmatmul.mubr.msk.bf16.gmra.mrb[12].mxu0 %vm448_vm0, %v2129_v19  ;;  %1918 = vmatprep.mubr.msk.bf16.mxu1 %vm448_vm0, %v2130_v20 }
  0x2c   : > { %1972 = vmatprep.mubr.msk.bf16.mxu0 %vm1185_vm1, %v2131_v21 }
  0x32   : > { %1919 = vmatmul.mubr.msk.bf16.gmra.mrb[16].mxu1 %vm448_vm0, %v2132_v22 }
  0x33   : > { %1973 = vmatmul.mubr.msk.bf16.vlgmr.msra.gmra.mrb[0].mxu0 %vm1185_vm1, %v2133_v23  ;;  %1922 = vmatprep.mubr.msk.bf16.mxu1 %vm448_vm0, %v2134_v24 }
  0x34   : > { %1976 = vmatprep.mubr.msk.bf16.mxu0 %vm1185_vm1, %v2135_v25 }
  0x3a   : > { %1923 = vmatmul.mubr.msk.bf16.gmra.mrb[20].mxu1 %vm448_vm0, %v2136_v26 }
  0x3b   : > { %1977 = vmatmul.mubr.msk.bf16.gmra.mrb[4].mxu0 %vm1185_vm1, %v2137_v27  ;;  %1926 = vmatprep.mubr.msk.bf16.mxu1 %vm448_vm0, %v2138_v28 }
  0x3c   : > { %1980 = vmatprep.mubr.msk.bf16.mxu0 %vm1185_vm1, %v2139_v29 }
  0x42   : > { %1927 = vmatmul.mubr.msk.bf16.gmra.mrb[24].mxu1 %vm448_vm0, %v2140_v30 }
  0x43   : > { %1981 = vmatmul.mubr.msk.bf16.gmra.mrb[8].mxu0 %vm1185_vm1, %v2141_v31  ;;  %1930 = vmatprep.mubr.msk.bf16.mxu1 %vm448_vm0, %v2142_v32 }
  0x44   : > { %1984 = vmatprep.mubr.msk.bf16.mxu0 %vm1185_vm1, %v2143_v33 }
  0x4a   : > { %1931 = vmatmul.mubr.msk.bf16.gmra.mrb[28].mxu1 %vm448_vm0, %v2144_v34 }
  0x4b   : > { %1985 = vmatmul.mubr.msk.bf16.gmra.mrb[12].mxu0 %vm1185_vm1, %v2145_v35  ;;  %1952 = vmatprep.mubr.msk.bf16.mxu1 %vm448_vm0, %v2146_v36 }
  0x4c   : > { %1988 = vmatprep.mubr.msk.bf16.mxu0 %vm1185_vm1, %v2147_v37 }
  0x52   : > { %1953 = vmatmul.mubr.msk.bf16.vlgmr.msra.gmra.mrb[16].mxu1 %vm448_vm0, %v2148_v38 }
  0x53   : > { %1989 = vmatmul.mubr.msk.bf16.gmra.mrb[16].mxu0 %vm1185_vm1, %v2149_v39  ;;  %1956 = vmatprep.mubr.msk.bf16.mxu1 %vm448_vm0, %v2150_v40 }
  0x54   : > { %1992 = vmatprep.mubr.msk.bf16.mxu0 %vm1185_vm1, %v2151_v41 }
  0x5a   : > { %1957 = vmatmul.mubr.msk.bf16.gmra.mrb[20].mxu1 %vm448_vm0, %v2152_v42 }
  0x5b   : > { %1993 = vmatmul.mubr.msk.bf16.gmra.mrb[20].mxu0 %vm1185_vm1, %v2153_v43  ;;  %1960 = vmatprep.mubr.msk.bf16.mxu1 %vm448_vm0, %v2154_v44 }
  0x5c   : > { %1996 = vmatprep.mubr.msk.bf16.mxu0 %vm1185_vm1, %v2155_v45 }
  0x62   : > { %1961 = vmatmul.mubr.msk.bf16.gmra.mrb[24].mxu1 %vm448_vm0, %v2156_v46 }
  0x63   : > { %1997 = vmatmul.mubr.msk.bf16.gmra.mrb[24].mxu0 %vm1185_vm1, %v2157_v47  ;;  %1964 = vmatprep.mubr.msk.bf16.mxu1 %vm448_vm0, %v2158_v48 }
  0x64   : > { %2000 = vmatprep.mubr.msk.bf16.mxu0 %vm1185_vm1, %v2159_v49 }
  0x6a   : > { %1965 = vmatmul.mubr.msk.bf16.gmra.mrb[28].mxu1 %vm448_vm0, %v2160_v50 }
  0x6b   : > { %2001 = vmatmul.mubr.msk.bf16.gmra.mrb[28].mxu0 %vm1185_vm1, %v2161_v51 }
  0xe5   : > { %v1904_v52 = vpop.f32.mrb[0].mxu1 }
  0xe6   : > { %v531_v53 = vpop.f32.mrb[1].mxu1  ;;  %v666_v5 = vadd.f32 %v1904_v52, %v2357_v4 }
  0xe7   : > { %v1905_v54 = vpop.f32.mrb[2].mxu1  ;;  %v664_v6 = vadd.f32 %v2357_v4, %v531_v53 }
  0xe8   : > { %v534_v55 = vpop.f32.mrb[3].mxu1  ;;  %v667_v8 = vadd.f32 %v1905_v54, %v2357_v4 }
  0xe9   : > { %v665_v11 = vadd.f32 %v2357_v4, %v534_v55 }
  0xed   : > { %v1908_v56 = vpop.f32.mrb[4].mxu1 }
  0xee   : > { %v547_v57 = vpop.f32.mrb[5].mxu1  ;;  %v670_v21 = vadd.f32 %v1908_v56, %v2357_v4 }
  0xef   : > { %v1909_v58 = vpop.f32.mrb[6].mxu1  ;;  %v668_v22 = vadd.f32 %v2357_v4, %v547_v57 }
  0xf0   : > { %v550_v59 = vpop.f32.mrb[7].mxu1  ;;  %v671_v24 = vadd.f32 %v1909_v58, %v2357_v4 }
  0xf1   : > { %v669_v27 = vadd.f32 %v2357_v4, %v550_v59 }
  0xf5   : > { %v1912_v60 = vpop.f32.mrb[8].mxu1 }
  0xf6   : > { %v563_v61 = vpop.f32.mrb[9].mxu1  ;;  %v674_v37 = vadd.f32 %v1912_v60, %v2357_v4 }
  0xf7   : > { %v1913_v62 = vpop.f32.mrb[10].mxu1  ;;  %v672_v38 = vadd.f32 %v2357_v4, %v563_v61 }
  0xf8   : > { %v566_v63 = vpop.f32.mrb[11].mxu1  ;;  %v675_v40 = vadd.f32 %v1913_v62, %v2357_v4 }
  0xf9   : > { %v673_v43 = vadd.f32 %v2357_v4, %v566_v63 }
  0xfd   : > { %v2346_v0 = vpop.f32.mrb[12].mxu1 }
  0xfe   : > { %v2348_v1 = vpop.f32.mrb[13].mxu1  ;;  %v678_v53 = vadd.f32 %v2346_v0, %v2357_v4 }
  0xff   : > { %v2350_v2 = vpop.f32.mrb[14].mxu1  ;;  %v676_v54 = vadd.f32 %v2357_v4, %v2348_v1 }
 0x100   : > { %v2352_v3 = vpop.f32.mrb[15].mxu1  ;;  %v679_v56 = vadd.f32 %v2350_v2, %v2357_v4 }
 0x101   : > { %v677_v59 = vadd.f32 %v2357_v4, %v2352_v3 }
 0x106   : > { %v1974_v7 = vpop.f32.mrb[0].mxu0 }
 0x107   : > { %v2007_v9 = vadd.f32 %v1974_v7, %v666_v5  ;;  %v1268_v10 = vpop.f32.mrb[1].mxu0 }
 0x108   : > { %v2009_v12 = vadd.f32 %v1268_v10, %v664_v6  ;;  %v1975_v13 = vpop.f32.mrb[2].mxu0 }
 0x109   : > { %v1818_v14 = vpack.c.bf16 %v2007_v9, %v2007_v9  ;;  %v2011_v15 = vadd.f32 %v1975_v13, %v667_v8  ;;  %v1271_v16 = vpop.f32.mrb[3].mxu0 }
 0x10a   : > { %v1816_v17 = vpack.c.bf16 %v2009_v12, %v2009_v12  ;;  %v2013_v18 = vadd.f32 %v1271_v16, %v665_v11 }
 0x10b   : > { %1558 = vst.msk [vmem:[%s2367_s27 + $0x8] sm:$0xf] %vm1555_vm2, %v1818_v14  ;;  %v1819_v19 = vpack.c.bf16 %v2011_v15, %v2011_v15 }
 0x10c   : > { %1556 = vst.msk [vmem:[%s2367_s27] sm:$0xf] %vm1555_vm2, %v1816_v17  ;;  %v1817_v20 = vpack.c.bf16 %v2013_v18, %v2013_v18 }
 0x10d   : > { %1559 = vst.msk [vmem:[%s2367_s27 + $0xc] sm:$0xf] %vm1555_vm2, %v1819_v19 }
 0x10e   : > { %1557 = vst.msk [vmem:[%s2367_s27 + $0x4] sm:$0xf] %vm1555_vm2, %v1817_v20  ;;  %v1978_v23 = vpop.f32.mrb[4].mxu0 }
 0x10f   : > { %v2015_v25 = vadd.f32 %v1978_v23, %v670_v21  ;;  %v1284_v26 = vpop.f32.mrb[5].mxu0 }
 0x110   : > { %v2017_v28 = vadd.f32 %v1284_v26, %v668_v22  ;;  %v1979_v29 = vpop.f32.mrb[6].mxu0 }
 0x111   : > { %v1822_v30 = vpack.c.bf16 %v2015_v25, %v2015_v25  ;;  %v2019_v31 = vadd.f32 %v1979_v29, %v671_v24  ;;  %v1287_v32 = vpop.f32.mrb[7].mxu0 }
 0x112   : > { %v1820_v33 = vpack.c.bf16 %v2017_v28, %v2017_v28  ;;  %v2021_v34 = vadd.f32 %v1287_v32, %v669_v27 }
 0x113   : > { %1562 = vst.msk [vmem:[%s2367_s27 + $0x18] sm:$0xf] %vm1555_vm2, %v1822_v30  ;;  %v1823_v35 = vpack.c.bf16 %v2019_v31, %v2019_v31 }
 0x114   : > { %1560 = vst.msk [vmem:[%s2367_s27 + $0x10] sm:$0xf] %vm1555_vm2, %v1820_v33  ;;  %v1821_v36 = vpack.c.bf16 %v2021_v34, %v2021_v34 }
 0x115   : > { %1563 = vst.msk [vmem:[%s2367_s27 + $0x1c] sm:$0xf] %vm1555_vm2, %v1823_v35 }
 0x116   : > { %1561 = vst.msk [vmem:[%s2367_s27 + $0x14] sm:$0xf] %vm1555_vm2, %v1821_v36  ;;  %v1982_v39 = vpop.f32.mrb[8].mxu0 }
 0x117   : > { %v2023_v41 = vadd.f32 %v1982_v39, %v674_v37  ;;  %v1300_v42 = vpop.f32.mrb[9].mxu0 }
 0x118   : > { %v2025_v44 = vadd.f32 %v1300_v42, %v672_v38  ;;  %v1983_v45 = vpop.f32.mrb[10].mxu0 }
 0x119   : > { %v1826_v46 = vpack.c.bf16 %v2023_v41, %v2023_v41  ;;  %v2027_v47 = vadd.f32 %v1983_v45, %v675_v40  ;;  %v1303_v48 = vpop.f32.mrb[11].mxu0 }
 0x11a   : > { %v1824_v49 = vpack.c.bf16 %v2025_v44, %v2025_v44  ;;  %v2029_v50 = vadd.f32 %v1303_v48, %v673_v43 }
 0x11b   : > { %1566 = vst.msk [vmem:[%s2367_s27 + $0x28] sm:$0xf] %vm1555_vm2, %v1826_v46  ;;  %v1827_v51 = vpack.c.bf16 %v2027_v47, %v2027_v47 }
 0x11c   : > { %1564 = vst.msk [vmem:[%s2367_s27 + $0x20] sm:$0xf] %vm1555_vm2, %v1824_v49  ;;  %v1825_v52 = vpack.c.bf16 %v2029_v50, %v2029_v50 }
 0x11d   : > { %1567 = vst.msk [vmem:[%s2367_s27 + $0x2c] sm:$0xf] %vm1555_vm2, %v1827_v51 }
 0x11e   : > { %1565 = vst.msk [vmem:[%s2367_s27 + $0x24] sm:$0xf] %vm1555_vm2, %v1825_v52  ;;  %v1986_v55 = vpop.f32.mrb[12].mxu0 }
 0x11f   : > { %v2031_v57 = vadd.f32 %v1986_v55, %v678_v53  ;;  %v1316_v58 = vpop.f32.mrb[13].mxu0 }
 0x120   : > { %v2033_v60 = vadd.f32 %v1316_v58, %v676_v54  ;;  %v1987_v61 = vpop.f32.mrb[14].mxu0 }
 0x121   : > { %v1830_v62 = vpack.c.bf16 %v2031_v57, %v2031_v57  ;;  %v2035_v63 = vadd.f32 %v1987_v61, %v679_v56  ;;  %v1319_v0 = vpop.f32.mrb[15].mxu0 }
 0x122   : > { %v1828_v1 = vpack.c.bf16 %v2033_v60, %v2033_v60  ;;  %v2037_v5 = vadd.f32 %v1319_v0, %v677_v59 }
 0x123   : > { %1570 = vst.msk [vmem:[%s2367_s27 + $0x38] sm:$0xf] %vm1555_vm2, %v1830_v62  ;;  %v1831_v6 = vpack.c.bf16 %v2035_v63, %v2035_v63 }
 0x124   : > { %1568 = vst.msk [vmem:[%s2367_s27 + $0x30] sm:$0xf] %vm1555_vm2, %v1828_v1  ;;  %v1829_v7 = vpack.c.bf16 %v2037_v5, %v2037_v5 }
 0x125   : > { %1571 = vst.msk [vmem:[%s2367_s27 + $0x3c] sm:$0xf] %vm1555_vm2, %v1831_v6  ;;  %v1954_v2 = vpop.f32.mrb[16].mxu1 }
 0x126   : > { %1569 = vst.msk [vmem:[%s2367_s27 + $0x34] sm:$0xf] %vm1555_vm2, %v1829_v7  ;;  %v2038_v3 = vadd.f32 %v1954_v2, %v2357_v4  ;;  %v1990_v8 = vpop.f32.mrb[16].mxu0  ;;  %v962_v9 = vpop.f32.mrb[17].mxu1 }
 0x127   : > { %v2040_v10 = vadd.f32 %v2357_v4, %v962_v9  ;;  %v1332_v11 = vpop.f32.mrb[17].mxu0  ;;  %v1955_v12 = vpop.f32.mrb[18].mxu1 }
 0x128   : > { %v2039_v13 = vadd.f32 %v2038_v3, %v1990_v8  ;;  %v2042_v14 = vadd.f32 %v1955_v12, %v2357_v4  ;;  %v1991_v15 = vpop.f32.mrb[18].mxu0  ;;  %v965_v16 = vpop.f32.mrb[19].mxu1 }
 0x129   : > { %v2041_v17 = vadd.f32 %v2040_v10, %v1332_v11  ;;  %v2044_v18 = vadd.f32 %v2357_v4, %v965_v16  ;;  %v1335_v19 = vpop.f32.mrb[19].mxu0 }
 0x12a   : > { %v1834_v20 = vpack.c.bf16 %v2039_v13, %v2039_v13  ;;  %v2043_v21 = vadd.f32 %v2042_v14, %v1991_v15 }
 0x12b   : > { %v1832_v22 = vpack.c.bf16 %v2041_v17, %v2041_v17  ;;  %v2045_v23 = vadd.f32 %v2044_v18, %v1335_v19 }
 0x12c   : > { %1574 = vst.msk [vmem:[%s2367_s27 + $0x48] sm:$0xf] %vm1555_vm2, %v1834_v20  ;;  %v1835_v24 = vpack.c.bf16 %v2043_v21, %v2043_v21 }
 0x12d   : > { %1572 = vst.msk [vmem:[%s2367_s27 + $0x40] sm:$0xf] %vm1555_vm2, %v1832_v22  ;;  %v1833_v25 = vpack.c.bf16 %v2045_v23, %v2045_v23  ;;  %v1958_v26 = vpop.f32.mrb[20].mxu1 }
 0x12e   : > { %1575 = vst.msk [vmem:[%s2367_s27 + $0x4c] sm:$0xf] %vm1555_vm2, %v1835_v24  ;;  %v2046_v27 = vadd.f32 %v1958_v26, %v2357_v4  ;;  %v1994_v28 = vpop.f32.mrb[20].mxu0  ;;  %v978_v29 = vpop.f32.mrb[21].mxu1 }
 0x12f   : > { %1573 = vst.msk [vmem:[%s2367_s27 + $0x44] sm:$0xf] %vm1555_vm2, %v1833_v25  ;;  %v2048_v30 = vadd.f32 %v2357_v4, %v978_v29  ;;  %v1348_v31 = vpop.f32.mrb[21].mxu0  ;;  %v1959_v32 = vpop.f32.mrb[22].mxu1 }
 0x130   : > { %v2047_v33 = vadd.f32 %v2046_v27, %v1994_v28  ;;  %v2050_v34 = vadd.f32 %v1959_v32, %v2357_v4  ;;  %v1995_v35 = vpop.f32.mrb[22].mxu0  ;;  %v981_v36 = vpop.f32.mrb[23].mxu1 }
 0x131   : > { %v2049_v37 = vadd.f32 %v2048_v30, %v1348_v31  ;;  %v2052_v38 = vadd.f32 %v2357_v4, %v981_v36  ;;  %v1351_v39 = vpop.f32.mrb[23].mxu0 }
 0x132   : > { %v1838_v40 = vpack.c.bf16 %v2047_v33, %v2047_v33  ;;  %v2051_v41 = vadd.f32 %v2050_v34, %v1995_v35 }
 0x133   : > { %v1836_v42 = vpack.c.bf16 %v2049_v37, %v2049_v37  ;;  %v2053_v43 = vadd.f32 %v2052_v38, %v1351_v39 }
 0x134   : > { %1578 = vst.msk [vmem:[%s2367_s27 + $0x58] sm:$0xf] %vm1555_vm2, %v1838_v40  ;;  %v1839_v44 = vpack.c.bf16 %v2051_v41, %v2051_v41 }
 0x135   : > { %1576 = vst.msk [vmem:[%s2367_s27 + $0x50] sm:$0xf] %vm1555_vm2, %v1836_v42  ;;  %v1837_v45 = vpack.c.bf16 %v2053_v43, %v2053_v43  ;;  %v1962_v46 = vpop.f32.mrb[24].mxu1 }
 0x136   : > { %1579 = vst.msk [vmem:[%s2367_s27 + $0x5c] sm:$0xf] %vm1555_vm2, %v1839_v44  ;;  %v2054_v47 = vadd.f32 %v1962_v46, %v2357_v4  ;;  %v1998_v48 = vpop.f32.mrb[24].mxu0  ;;  %v994_v49 = vpop.f32.mrb[25].mxu1 }
 0x137   : > { %1577 = vst.msk [vmem:[%s2367_s27 + $0x54] sm:$0xf] %vm1555_vm2, %v1837_v45  ;;  %v2056_v50 = vadd.f32 %v2357_v4, %v994_v49  ;;  %v1364_v51 = vpop.f32.mrb[25].mxu0  ;;  %v1963_v52 = vpop.f32.mrb[26].mxu1 }
 0x138   : > { %v2055_v53 = vadd.f32 %v2054_v47, %v1998_v48  ;;  %v2058_v54 = vadd.f32 %v1963_v52, %v2357_v4  ;;  %v1999_v55 = vpop.f32.mrb[26].mxu0  ;;  %v997_v56 = vpop.f32.mrb[27].mxu1 }
 0x139   : > { %v2057_v57 = vadd.f32 %v2056_v50, %v1364_v51  ;;  %v2060_v58 = vadd.f32 %v2357_v4, %v997_v56  ;;  %v1367_v59 = vpop.f32.mrb[27].mxu0 }
 0x13a   : > { %v1842_v60 = vpack.c.bf16 %v2055_v53, %v2055_v53  ;;  %v2059_v61 = vadd.f32 %v2058_v54, %v1999_v55 }
 0x13b   : > { %v1840_v62 = vpack.c.bf16 %v2057_v57, %v2057_v57  ;;  %v2061_v63 = vadd.f32 %v2060_v58, %v1367_v59 }
 0x13c   : > { %1582 = vst.msk [vmem:[%s2367_s27 + $0x68] sm:$0xf] %vm1555_vm2, %v1842_v60  ;;  %v1843_v0 = vpack.c.bf16 %v2059_v61, %v2059_v61 }
 0x13d   : > { %1580 = vst.msk [vmem:[%s2367_s27 + $0x60] sm:$0xf] %vm1555_vm2, %v1840_v62  ;;  %v1841_v1 = vpack.c.bf16 %v2061_v63, %v2061_v63  ;;  %v1966_v5 = vpop.f32.mrb[28].mxu1 }
 0x13e   : > { %1583 = vst.msk [vmem:[%s2367_s27 + $0x6c] sm:$0xf] %vm1555_vm2, %v1843_v0  ;;  %v2062_v6 = vadd.f32 %v1966_v5, %v2357_v4  ;;  %v2002_v7 = vpop.f32.mrb[28].mxu0  ;;  %v1010_v2 = vpop.f32.mrb[29].mxu1 }
 0x13f   : > { %1581 = vst.msk [vmem:[%s2367_s27 + $0x64] sm:$0xf] %vm1555_vm2, %v1841_v1  ;;  %v2064_v3 = vadd.f32 %v2357_v4, %v1010_v2  ;;  %v1380_v8 = vpop.f32.mrb[29].mxu0  ;;  %v1967_v9 = vpop.f32.mrb[30].mxu1 }
 0x140   : > { %v2063_v10 = vadd.f32 %v2062_v6, %v2002_v7  ;;  %v2066_v11 = vadd.f32 %v1967_v9, %v2357_v4  ;;  %v2003_v12 = vpop.f32.mrb[30].mxu0  ;;  %v1013_v13 = vpop.f32.mrb[31].mxu1 }
 0x141   : > { %v2065_v14 = vadd.f32 %v2064_v3, %v1380_v8  ;;  %v2068_v15 = vadd.f32 %v2357_v4, %v1013_v13  ;;  %v1383_v16 = vpop.f32.mrb[31].mxu0 }
 0x142   : > { %v1846_v17 = vpack.c.bf16 %v2063_v10, %v2063_v10  ;;  %v2067_v18 = vadd.f32 %v2066_v11, %v2003_v12 }
 0x143   : > { %v1844_v19 = vpack.c.bf16 %v2065_v14, %v2065_v14  ;;  %v2069_v20 = vadd.f32 %v2068_v15, %v1383_v16 }
 0x144   : > { %1586 = vst.msk [vmem:[%s2367_s27 + $0x78] sm:$0xf] %vm1555_vm2, %v1846_v17  ;;  %v1847_v21 = vpack.c.bf16 %v2067_v18, %v2067_v18 }
 0x145   : > { %1584 = vst.msk [vmem:[%s2367_s27 + $0x70] sm:$0xf] %vm1555_vm2, %v1844_v19  ;;  %v1845_v22 = vpack.c.bf16 %v2069_v20, %v2069_v20 }
 0x146   : > { %1587 = vst.msk [vmem:[%s2367_s27 + $0x7c] sm:$0xf] %vm1555_vm2, %v1847_v21 }
 0x147   : > { %1585 = vst.msk [vmem:[%s2367_s27 + $0x74] sm:$0xf] %vm1555_vm2, %v1845_v22 }
 0x148 PF: > { %s17_s24 = sadd.s32 1, %s2168_s24  }
 0x149   : > { %p14_p4 = scmp.ge.s32.totalorder %s17_s24, 4  }
 0x14b   :  { %16 = sbr.rel (!%p14_p4) target bundleno = 1 (0x1), region = 84 }

// kernel: tvim_block_forward.19
= control target key start
LH: loop header
LB: loop body
LE: loop exit
PB: predicated region body
PF: predicated region fallthrough
CT: control target
= control target key end

     0   :  { %s1724_s18 = smov 0   ;;  %s2242_s0 = inlined_call_operand.vmem [shape: bf16[512,32], index: 0, kind: input, shape index: {}]   ;;  %s2243_s1 = inlined_call_operand.vmem [shape: bf16[32,128], index: 1, kind: input, shape index: {}]   ;;  %s2244_s2 = inlined_call_operand.vmem [shape: f32[1,128], index: 2, kind: input, shape index: {}]   ;;  %s2245_s3 = inlined_call_operand.vmem [shape: bf16[128,32], index: 3, kind: input, shape index: {}]   ;;  %s2246_s4 = inlined_call_operand.vmem [shape: f32[1,32], index: 4, kind: input, shape index: {}]   ;;  %s2247_s5 = inlined_call_operand.vmem [shape: bf16[512,32], index: 5, kind: output, shape index: {}]  }
   0x1 LB: > { %s1327_s19 = sadd.s32 4294967295, %s1692_s18   ;;  %p1331_p0 = scmp.ge.s32.totalorder %s1692_s18, 1  ;;  %s1692_s18 = sphi %s1724_s18, %s15_s18  }
   0x2   : > { %p188_p1 = scmp.lt.s32.totalorder %s1692_s18, 3 }
   0x4   : > { %p189_p2 = pnand %p1331_p0, %p188_p1 }
   0x5   : > { %v1596_v0 = vld [vmem:[%s2243_s1] sm:$0xff] (!%p189_p2)   ;;  %s1332_s22 = sshll.u32 (!%p189_p2), %s1327_s19, 5  ;;  %v1597_v1 = vld [vmem:[%s2243_s1 + $0x8] sm:$0xff] (!%p189_p2)   ;;  %vm364_vm0 = vcmask (!%p189_p2), 261120   ;;  %v1616_v20 = vld [vmem:[%s2245_s3 + $0x10] sm:$0xff] (!%p189_p2)   ;;  %vm1238_vm1 = vcmask (!%p189_p2), 257024  }
   0x6   : > { %192 = sbr.rel (%p189_p2) target bundleno = 560 (0x230), region = 40  ;;  %p217_p3 = scmp.lt.s32.totalorder (!%p189_p2), %s1332_s22, 63  ;;  %1488 = vmatprep.subr.bf16.mxu0 (!%p189_p2), %v1596_v0  ;;  %v1614_v18 = vld [vmem:[%s2245_s3] sm:$0xff] (!%p189_p2)   ;;  %v1615_v19 = vld [vmem:[%s2245_s3 + $0x8] sm:$0xff] (!%p189_p2)   ;;  %v1617_v21 = vld [vmem:[%s2245_s3 + $0x18] sm:$0xff] (!%p189_p2)  }
   0x7   : > { %1489 = vmatpush3.bf16.msra.mxu0 (!%p189_p2), %v1596_v0  ;;  %1572 = vmatprep.subr.bf16.mxu1 (!%p189_p2), %v1614_v18  ;;  %v1618_v22 = vld [vmem:[%s2245_s3 + $0x20] sm:$0xff] (!%p189_p2)   ;;  %v1619_v23 = vld [vmem:[%s2245_s3 + $0x28] sm:$0xff] (!%p189_p2)   ;;  %v1620_v24 = vld [vmem:[%s2245_s3 + $0x30] sm:$0xff] (!%p189_p2)  }
   0x8   : > { %1490 = vmatprep.subr.bf16.mxu0 (!%p189_p2), %v1597_v1  ;;  %1580 = vmatpush3.bf16.msra.mxu1 (!%p189_p2), %v1614_v18  ;;  %v1621_v25 = vld [vmem:[%s2245_s3 + $0x38] sm:$0xff] (!%p189_p2)   ;;  %v1807_v26 = vld [vmem:[%s2244_s2] ss:$0 sm:$0xff] (!%p189_p2) }
   0x9   : > { %1573 = vmatprep.subr.bf16.mxu1 (!%p189_p2), %v1615_v19 }
   0xb   : > { %1491 = vmatpush3.bf16.msra.mxu0 (!%p189_p2), %v1597_v1 }
   0xc   : > { %1524 = vmatprep.subr.bf16.mxu0 (!%p189_p2), %v1614_v18  ;;  %1581 = vmatpush3.bf16.msra.mxu1 (!%p189_p2), %v1615_v19 }
   0xd   : > { %s2249_s22 = smov (!%p217_p3, %s1332_s22), 63  ;;  %1574 = vmatprep.subr.bf16.mxu1 %v1616_v20 }
   0xe   : > { %s1333_s25 = sshll.u32 %s2249_s22, 2 }
   0xf   : > { %s1746_s28 = scalar_lea.vmem %s2242_s0, %s1333_s25  ;;  %s2142_s29 = scalar_lea.vmem %s2247_s5, %s1333_s25 }
  0x10   : > { %v1598_v2 = vld [vmem:[%s1746_s28] sm:$0xff]   ;;  %v1599_v3 = vld [vmem:[%s1746_s28 + $0x8] sm:$0xff]   ;;  %v1600_v4 = vld [vmem:[%s1746_s28 + $0x10] sm:$0xff]   ;;  %1582 = vmatpush3.bf16.msra.mxu1 %v1616_v20 }
  0x11   : > { %1492 = vmatprep.mubr.msk.bf16.mxu0 %vm364_vm0, %v1598_v2  ;;  %v1601_v5 = vld [vmem:[%s1746_s28 + $0x18] sm:$0xff]   ;;  %v1602_v6 = vld [vmem:[%s1746_s28 + $0x20] sm:$0xff]   ;;  %v1603_v7 = vld [vmem:[%s1746_s28 + $0x28] sm:$0xff]   ;;  %1575 = vmatprep.subr.bf16.mxu1 %v1617_v21 }
  0x12   : > { %1493 = vmatmul.mubr.msk.bf16.vlgmr.msra.gmra.mrb[0].mxu0 %vm364_vm0, %v1599_v3  ;;  %v1604_v8 = vld [vmem:[%s1746_s28 + $0x30] sm:$0xff]   ;;  %v1605_v9 = vld [vmem:[%s1746_s28 + $0x38] sm:$0xff]   ;;  %v1606_v10 = vld [vmem:[%s1746_s28 + $0x40] sm:$0xff]  }
  0x13   : > { %1496 = vmatprep.mubr.msk.bf16.mxu0 %vm364_vm0, %v1600_v4  ;;  %v1607_v11 = vld [vmem:[%s1746_s28 + $0x48] sm:$0xff]   ;;  %v1608_v12 = vld [vmem:[%s1746_s28 + $0x50] sm:$0xff]   ;;  %v1609_v13 = vld [vmem:[%s1746_s28 + $0x58] sm:$0xff]   ;;  %1525 = vmatpush3.bf16.msra.mxu0 %v1614_v18 }
  0x14   : > { %v1610_v14 = vld [vmem:[%s1746_s28 + $0x60] sm:$0xff]   ;;  %v1611_v15 = vld [vmem:[%s1746_s28 + $0x68] sm:$0xff]   ;;  %v1612_v16 = vld [vmem:[%s1746_s28 + $0x70] sm:$0xff]   ;;  %1526 = vmatprep.subr.bf16.mxu0 %v1615_v19  ;;  %1583 = vmatpush3.bf16.msra.mxu1 %v1617_v21 }
  0x15   : > { %v1613_v17 = vld [vmem:[%s1746_s28 + $0x78] sm:$0xff]   ;;  %1576 = vmatprep.subr.bf16.mxu1 %v1618_v22 }
  0x17   : > { %1527 = vmatpush3.bf16.msra.mxu0 %v1615_v19 }
  0x18   : > { %1528 = vmatprep.subr.bf16.mxu0 %v1616_v20  ;;  %1584 = vmatpush3.bf16.msra.mxu1 %v1618_v22 }
  0x19   : > { %1577 = vmatprep.subr.bf16.mxu1 %v1619_v23 }
  0x1a   : > { %1497 = vmatmul.mubr.msk.bf16.gmra.mrb[4].mxu0 %vm364_vm0, %v1601_v5 }
  0x1b   : > { %1500 = vmatprep.mubr.msk.bf16.mxu0 %vm364_vm0, %v1602_v6  ;;  %1529 = vmatpush3.bf16.msra.mxu0 %v1616_v20 }
  0x1c   : > { %1530 = vmatprep.subr.bf16.mxu0 %v1617_v21  ;;  %1585 = vmatpush3.bf16.msra.mxu1 %v1619_v23 }
  0x1d   : > { %1578 = vmatprep.subr.bf16.mxu1 %v1620_v24 }
  0x1f   : > { %1531 = vmatpush3.bf16.msra.mxu0 %v1617_v21 }
  0x20   : > { %1532 = vmatprep.subr.bf16.mxu0 %v1618_v22  ;;  %1586 = vmatpush3.bf16.msra.mxu1 %v1620_v24 }
  0x21   : > { %1579 = vmatprep.subr.bf16.mxu1 %v1621_v25 }
  0x22   : > { %1501 = vmatmul.mubr.msk.bf16.gmra.mrb[8].mxu0 %vm364_vm0, %v1603_v7 }
  0x23   : > { %1504 = vmatprep.mubr.msk.bf16.mxu0 %vm364_vm0, %v1604_v8  ;;  %1533 = vmatpush3.bf16.msra.mxu0 %v1618_v22 }
  0x24   : > { %1534 = vmatprep.subr.bf16.mxu0 %v1619_v23  ;;  %1587 = vmatpush3.bf16.msra.mxu1 %v1621_v25 }
  0x27   : > { %1535 = vmatpush3.bf16.msra.mxu0 %v1619_v23 }
  0x28   : > { %1536 = vmatprep.subr.bf16.mxu0 %v1620_v24 }
  0x2a   : > { %1505 = vmatmul.mubr.msk.bf16.gmra.mrb[12].mxu0 %vm364_vm0, %v1605_v9 }
  0x2b   : > { %1508 = vmatprep.mubr.msk.bf16.mxu0 %vm364_vm0, %v1606_v10  ;;  %1537 = vmatpush3.bf16.msra.mxu0 %v1620_v24 }
  0x2c   : > { %1538 = vmatprep.subr.bf16.mxu0 %v1621_v25 }
  0x2f   : > { %1539 = vmatpush3.bf16.msra.mxu0 %v1621_v25 }
  0x32   : > { %1509 = vmatmul.mubr.msk.bf16.gmra.mrb[16].mxu0 %vm364_vm0, %v1607_v11 }
  0x33   : > { %1512 = vmatprep.mubr.msk.bf16.mxu0 %vm364_vm0, %v1608_v12 }
  0x3a   : > { %1513 = vmatmul.mubr.msk.bf16.gmra.mrb[20].mxu0 %vm364_vm0, %v1609_v13 }
  0x3b   : > { %1516 = vmatprep.mubr.msk.bf16.mxu0 %vm364_vm0, %v1610_v14 }
  0x42   : > { %1517 = vmatmul.mubr.msk.bf16.gmra.mrb[24].mxu0 %vm364_vm0, %v1611_v15 }
  0x43   : > { %1520 = vmatprep.mubr.msk.bf16.mxu0 %vm364_vm0, %v1612_v16 }
  0x4a   : > { %1521 = vmatmul.mubr.msk.bf16.gmra.mrb[28].mxu0 %vm364_vm0, %v1613_v17 }
  0xe5   : > { %v1494_v27 = vpop.f32.mrb[0].mxu0 }
  0xe6   : > { %v1810_v28 = vadd.f32 %v1494_v27, %v1807_v26  ;;  %v447_v29 = vpop.f32.mrb[1].mxu0 }
  0xe7   : > { %v1813_v30 = vadd.f32 %v1807_v26, %v447_v29  ;;  %v1495_v31 = vpop.f32.mrb[2].mxu0 }
  0xe8   : > { %v576_v32 = vmul.f32 %v1810_v28, %v1810_v28  ;;  %v1818_v33 = vadd.f32 %v1495_v31, %v1807_v26  ;;  %v450_v34 = vpop.f32.mrb[3].mxu0 }
  0xe9   : > { %v574_v35 = vmul.f32 %v1813_v30, %v1813_v30  ;;  %v1823_v36 = vadd.f32 %v1807_v26, %v450_v34 }
  0xea   : > { %v608_v37 = vmul.f32 %v576_v32, %v1810_v28  ;;  %v577_v38 = vmul.f32 %v1818_v33, %v1818_v33 }
  0xeb   : > { %v606_v39 = vmul.f32 %v574_v35, %v1813_v30  ;;  %v575_v40 = vmul.f32 %v1823_v36, %v1823_v36 }
  0xec   : > { %v640_v41 = vmul.f32 0.044715, %v608_v37  ;;  %v609_v42 = vmul.f32 %v577_v38, %v1818_v33 }
  0xed   : > { %v638_v43 = vmul.f32 0.044715, %v606_v39  ;;  %v607_v44 = vmul.f32 %v575_v40, %v1823_v36  ;;  %v1498_v45 = vpop.f32.mrb[4].mxu0 }
  0xee   : > { %v672_v46 = vadd.f32 %v640_v41, %v1810_v28  ;;  %v641_v47 = vmul.f32 0.044715, %v609_v42  ;;  %v1835_v48 = vadd.f32 %v1498_v45, %v1807_v26  ;;  %v463_v49 = vpop.f32.mrb[5].mxu0 }
  0xef   : > { %v670_v50 = vadd.f32 %v638_v43, %v1813_v30  ;;  %v639_v51 = vmul.f32 0.044715, %v607_v44  ;;  %v1839_v52 = vadd.f32 %v1807_v26, %v463_v49  ;;  %v1499_v53 = vpop.f32.mrb[6].mxu0 }
  0xf0   : > { %v704_v54 = vmul.f32 0.7978846, %v672_v46  ;;  %v673_v55 = vadd.f32 %v641_v47, %v1818_v33  ;;  %v580_v56 = vmul.f32 %v1835_v48, %v1835_v48  ;;  %v1845_v57 = vadd.f32 %v1499_v53, %v1807_v26  ;;  %v466_v58 = vpop.f32.mrb[7].mxu0 }
  0xf1   : > { %v702_v59 = vmul.f32 0.7978846, %v670_v50  ;;  %v671_v60 = vadd.f32 %v639_v51, %v1823_v36  ;;  %v578_v61 = vmul.f32 %v1839_v52, %v1839_v52  ;;  %v1851_v62 = vadd.f32 %v1807_v26, %v466_v58 }
  0xf2   : > { %1622 = vtanh.f32 %v704_v54  ;;  %v705_v63 = vmul.f32 0.7978846, %v673_v55  ;;  %v612_v0 = vmul.f32 %v580_v56, %v1835_v48  ;;  %v581_v1 = vmul.f32 %v1845_v57, %v1845_v57 }
  0xf3   : > { %1624 = vtanh.f32 %v702_v59  ;;  %v703_v2 = vmul.f32 0.7978846, %v671_v60  ;;  %v610_v3 = vmul.f32 %v578_v61, %v1839_v52  ;;  %v579_v4 = vmul.f32 %v1851_v62, %v1851_v62 }
  0xf4   : > { %1626 = vtanh.f32 %v705_v63  ;;  %v644_v5 = vmul.f32 0.044715, %v612_v0  ;;  %v613_v6 = vmul.f32 %v581_v1, %v1845_v57 }
  0xf5   : > { %v642_v7 = vmul.f32 0.044715, %v610_v3  ;;  %v611_v8 = vmul.f32 %v579_v4, %v1851_v62  ;;  %v1502_v9 = vpop.f32.mrb[8].mxu0  ;;  %1628 = vtanh.f32 %v703_v2 }
  0xf6   : > { %v676_v10 = vadd.f32 %v644_v5, %v1835_v48  ;;  %v645_v11 = vmul.f32 0.044715, %v613_v6  ;;  %v1863_v12 = vadd.f32 %v1502_v9, %v1807_v26  ;;  %v479_v13 = vpop.f32.mrb[9].mxu0 }
  0xf7   : > { %v643_v14 = vmul.f32 0.044715, %v611_v8  ;;  %v1866_v15 = vadd.f32 %v1807_v26, %v479_v13  ;;  %v1503_v16 = vpop.f32.mrb[10].mxu0  ;;  %v674_v17 = vadd.f32 %v642_v7, %v1839_v52 }
  0xf8   : > { %v708_v18 = vmul.f32 0.7978846, %v676_v10  ;;  %v677_v19 = vadd.f32 %v645_v11, %v1845_v57  ;;  %v584_v20 = vmul.f32 %v1863_v12, %v1863_v12  ;;  %v1873_v21 = vadd.f32 %v1503_v16, %v1807_v26  ;;  %v482_v22 = vpop.f32.mrb[11].mxu0 }
  0xf9   : > { %v582_v23 = vmul.f32 %v1866_v15, %v1866_v15  ;;  %v1878_v24 = vadd.f32 %v1807_v26, %v482_v22  ;;  %v675_v25 = vadd.f32 %v643_v14, %v1851_v62  ;;  %v706_v27 = vmul.f32 0.7978846, %v674_v17 }
  0xfa   : > { %1630 = vtanh.f32 %v708_v18  ;;  %v709_v29 = vmul.f32 0.7978846, %v677_v19  ;;  %v616_v31 = vmul.f32 %v584_v20, %v1863_v12  ;;  %v585_v32 = vmul.f32 %v1873_v21, %v1873_v21 }
  0xfb   : > { %v614_v34 = vmul.f32 %v582_v23, %v1866_v15  ;;  %v583_v35 = vmul.f32 %v1878_v24, %v1878_v24  ;;  %v707_v37 = vmul.f32 0.7978846, %v675_v25  ;;  %1632 = vtanh.f32 %v706_v27 }
  0xfc   : > { %v1623_v38 = vpop.eup %1622  ;;  %1634 = vtanh.f32 %v709_v29  ;;  %v648_v39 = vmul.f32 0.044715, %v616_v31  ;;  %v617_v40 = vmul.f32 %v585_v32, %v1873_v21 }
  0xfd   : > { %v1625_v41 = vpop.eup %1624  ;;  %v768_v42 = vadd.f32 1.0, %v1623_v38  ;;  %v646_v43 = vmul.f32 0.044715, %v614_v34  ;;  %v615_v44 = vmul.f32 %v583_v35, %v1878_v24  ;;  %v1506_v45 = vpop.f32.mrb[12].mxu0  ;;  %1636 = vtanh.f32 %v707_v37 }
  0xfe   : > { %v1627_v46 = vpop.eup %1626  ;;  %v680_v47 = vadd.f32 %v648_v39, %v1863_v12  ;;  %v649_v49 = vmul.f32 0.044715, %v617_v40  ;;  %v1891_v50 = vadd.f32 %v1506_v45, %v1807_v26  ;;  %v495_v51 = vpop.f32.mrb[13].mxu0  ;;  %v766_v53 = vadd.f32 1.0, %v1625_v41 }
  0xff   : > { %v800_v54 = vmul.f32 0.5, %v768_v42  ;;  %v769_v55 = vadd.f32 1.0, %v1627_v46  ;;  %v678_v56 = vadd.f32 %v646_v43, %v1866_v15  ;;  %v647_v58 = vmul.f32 0.044715, %v615_v44  ;;  %v1507_v59 = vpop.f32.mrb[14].mxu0  ;;  %v1629_v2 = vpop.eup %1628 }
 0x100   : > { %v712_v60 = vmul.f32 0.7978846, %v680_v47  ;;  %v681_v61 = vadd.f32 %v649_v49, %v1873_v21  ;;  %v588_v63 = vmul.f32 %v1891_v50, %v1891_v50  ;;  %v1898_v0 = vadd.f32 %v1807_v26, %v495_v51  ;;  %v498_v1 = vpop.f32.mrb[15].mxu0 }
 0x101   : > { %v1901_v3 = vmul.f32 %v800_v54, %v1810_v28  ;;  %v801_v4 = vmul.f32 0.5, %v769_v55  ;;  %v710_v5 = vmul.f32 0.7978846, %v678_v56  ;;  %v679_v6 = vadd.f32 %v647_v58, %v1878_v24 }
 0x102   : > { %1638 = vtanh.f32 %v712_v60  ;;  %v713_v7 = vmul.f32 0.7978846, %v681_v61  ;;  %v620_v8 = vmul.f32 %v588_v63, %v1891_v50  ;;  %v586_v9 = vmul.f32 %v1898_v0, %v1898_v0 }
 0x103   : > { %v1908_v10 = vmul.f32 %v801_v4, %v1818_v33  ;;  %1640 = vtanh.f32 %v710_v5  ;;  %v711_v11 = vmul.f32 0.7978846, %v679_v6  ;;  %v1911_v13 = vadd.f32 %v1507_v59, %v1807_v26 }
 0x104   : > { %v1913_v28 = vpop.eup %1630  ;;  %1642 = vtanh.f32 %v713_v7  ;;  %v652_v14 = vmul.f32 0.044715, %v620_v8  ;;  %v618_v16 = vmul.f32 %v586_v9, %v1898_v0  ;;  %v1917_v17 = vadd.f32 %v1807_v26, %v498_v1 }
 0x105   : > { %v1919_v18 = vpop.eup %1632  ;;  %v863_v33 = vpack.c.bf16 %v1908_v10, %v1901_v3  ;;  %1644 = vtanh.f32 %v711_v11  ;;  %v589_v19 = vmul.f32 %v1911_v13, %v1911_v13  ;;  %v1510_v20 = vpop.f32.mrb[16].mxu0  ;;  %v767_v22 = vadd.f32 1.0, %v1629_v2 }
 0x106   : > { %v1925_v23 = vpop.eup %1634  ;;  %v684_v25 = vadd.f32 %v652_v14, %v1891_v50  ;;  %v650_v27 = vmul.f32 0.044715, %v618_v16  ;;  %v587_v29 = vmul.f32 %v1917_v17, %v1917_v17  ;;  %v1931_v31 = vadd.f32 %v1510_v20, %v1807_v26  ;;  %v511_v32 = vpop.f32.mrb[17].mxu0 }
 0x107   : > { %v1933_v34 = vpop.eup %1636  ;;  %v621_v35 = vmul.f32 %v589_v19, %v1911_v13  ;;  %v1937_v37 = vadd.f32 %v1807_v26, %v511_v32  ;;  %v1511_v38 = vpop.f32.mrb[18].mxu0  ;;  %v798_v39 = vmul.f32 0.5, %v766_v53  ;;  %v799_v40 = vmul.f32 0.5, %v767_v22 }
 0x108   : > { %v716_v41 = vmul.f32 0.7978846, %v684_v25  ;;  %v682_v42 = vadd.f32 %v650_v27, %v1898_v0  ;;  %v619_v43 = vmul.f32 %v587_v29, %v1917_v17  ;;  %v592_v44 = vmul.f32 %v1931_v31, %v1931_v31  ;;  %v514_v45 = vpop.f32.mrb[19].mxu0 }
 0x109   : > { %v653_v46 = vmul.f32 0.044715, %v621_v35  ;;  %v590_v47 = vmul.f32 %v1937_v37, %v1937_v37  ;;  %v1946_v49 = vadd.f32 %v1511_v38, %v1807_v26  ;;  %v1949_v51 = vadd.f32 %v1807_v26, %v514_v45 }
 0x10a   : > { %1646 = vtanh.f32 %v716_v41  ;;  %v714_v53 = vmul.f32 0.7978846, %v682_v42  ;;  %v651_v54 = vmul.f32 0.044715, %v619_v43  ;;  %v624_v55 = vmul.f32 %v592_v44, %v1931_v31 }
 0x10b   : > { %v685_v56 = vadd.f32 %v653_v46, %v1911_v13  ;;  %v622_v58 = vmul.f32 %v590_v47, %v1937_v37  ;;  %v593_v59 = vmul.f32 %v1946_v49, %v1946_v49  ;;  %v591_v60 = vmul.f32 %v1949_v51, %v1949_v51 }
 0x10c   : > { %v1958_v61 = vpop.eup %1638  ;;  %1648 = vtanh.f32 %v714_v53  ;;  %v683_v63 = vadd.f32 %v651_v54, %v1917_v17  ;;  %v656_v1 = vmul.f32 0.044715, %v624_v55  ;;  %v830_v2 = vmul.f32 %v798_v39, %v1813_v30 }
 0x10d   : > { %v1962_v4 = vpop.eup %1640  ;;  %v717_v5 = vmul.f32 0.7978846, %v685_v56  ;;  %v654_v6 = vmul.f32 0.044715, %v622_v58  ;;  %v625_v7 = vmul.f32 %v593_v59, %v1946_v49  ;;  %v623_v8 = vmul.f32 %v591_v60, %v1949_v51  ;;  %v1514_v9 = vpop.f32.mrb[20].mxu0 }
 0x10e   : > { %v1966_v11 = vpop.eup %1642  ;;  %v715_v14 = vmul.f32 0.7978846, %v683_v63  ;;  %v688_v16 = vadd.f32 %v656_v1, %v1931_v31  ;;  %v831_v19 = vmul.f32 %v799_v40, %v1823_v36  ;;  %v1971_v20 = vadd.f32 %v1514_v9, %v1807_v26  ;;  %v527_v30 = vpop.f32.mrb[21].mxu0 }
 0x10f   : > { %v1973_v22 = vpop.eup %1644  ;;  %1650 = vtanh.f32 %v717_v5  ;;  %v686_v25 = vadd.f32 %v654_v6, %v1937_v37  ;;  %v657_v27 = vmul.f32 0.044715, %v625_v7  ;;  %v655_v29 = vmul.f32 0.044715, %v623_v8  ;;  %v1515_v32 = vpop.f32.mrb[22].mxu0 }
 0x110   : > { %1652 = vtanh.f32 %v715_v14  ;;  %v720_v35 = vmul.f32 0.7978846, %v688_v16  ;;  %v862_v38 = vpack.c.bf16 %v831_v19, %v830_v2  ;;  %v596_v39 = vmul.f32 %v1971_v20, %v1971_v20  ;;  %v530_v41 = vpop.f32.mrb[23].mxu0 }
 0x111   : > { %v718_v36 = vmul.f32 0.7978846, %v686_v25  ;;  %v689_v40 = vadd.f32 %v657_v27, %v1946_v49  ;;  %v687_v42 = vadd.f32 %v655_v29, %v1949_v51  ;;  %v1981_v43 = vadd.f32 %v1807_v26, %v527_v30 }
 0x112   : > { %1654 = vtanh.f32 %v720_v35  ;;  %1540 = vmatprep.mubr.bf16.mxu0 %v862_v38  ;;  %v628_v44 = vmul.f32 %v596_v39, %v1971_v20  ;;  %v1985_v45 = vadd.f32 %v1515_v32, %v1807_v26  ;;  %v1988_v46 = vadd.f32 %v1807_v26, %v530_v41 }
 0x113   : > { %1656 = vtanh.f32 %v718_v36  ;;  %v721_v47 = vmul.f32 0.7978846, %v689_v40  ;;  %v719_v53 = vmul.f32 0.7978846, %v687_v42  ;;  %1541 = vmatmul.mubr.bf16.vlgmr.msra.gmra.mrb[32].mxu0 %v863_v33  ;;  %v594_v54 = vmul.f32 %v1981_v43, %v1981_v43 }
 0x114   : > { %v1995_v55 = vpop.eup %1646  ;;  %v660_v56 = vmul.f32 0.044715, %v628_v44  ;;  %v597_v58 = vmul.f32 %v1985_v45, %v1985_v45  ;;  %v595_v59 = vmul.f32 %v1988_v46, %v1988_v46  ;;  %v770_v60 = vadd.f32 1.0, %v1919_v18 }
 0x115   : > { %1658 = vtanh.f32 %v721_v47  ;;  %v626_v63 = vmul.f32 %v594_v54, %v1981_v43  ;;  %v771_v3 = vadd.f32 1.0, %v1933_v34  ;;  %v772_v10 = vadd.f32 1.0, %v1913_v28  ;;  %v1518_v33 = vpop.f32.mrb[24].mxu0 }
 0x116   : > { %v2005_v1 = vpop.eup %1648  ;;  %1660 = vtanh.f32 %v719_v53  ;;  %v692_v2 = vadd.f32 %v660_v56, %v1971_v20  ;;  %v629_v5 = vmul.f32 %v597_v58, %v1985_v45  ;;  %v627_v6 = vmul.f32 %v595_v59, %v1988_v46  ;;  %v543_v7 = vpop.f32.mrb[25].mxu0 }
 0x117   : > { %v658_v8 = vmul.f32 0.044715, %v626_v63  ;;  %v802_v18 = vmul.f32 0.5, %v770_v60  ;;  %v803_v9 = vmul.f32 0.5, %v771_v3  ;;  %v773_v14 = vadd.f32 1.0, %v1925_v23  ;;  %v1519_v16 = vpop.f32.mrb[26].mxu0 }
 0x118   : > { %v724_v34 = vmul.f32 0.7978846, %v692_v2  ;;  %v661_v19 = vmul.f32 0.044715, %v629_v5  ;;  %v659_v28 = vmul.f32 0.044715, %v627_v6  ;;  %v2012_v30 = vadd.f32 %v1518_v33, %v1807_v26 }
 0x119   : > { %v2014_v25 = vpop.eup %1650  ;;  %v690_v27 = vadd.f32 %v658_v8, %v1981_v43  ;;  %v834_v29 = vmul.f32 %v802_v18, %v1839_v52  ;;  %v835_v32 = vmul.f32 %v803_v9, %v1851_v62  ;;  %v804_v35 = vmul.f32 0.5, %v772_v10  ;;  %v546_v38 = vpop.f32.mrb[27].mxu0 }
 0x11a   : > { %v2019_v39 = vpop.eup %1652  ;;  %1662 = vtanh.f32 %v724_v34  ;;  %v693_v23 = vadd.f32 %v661_v19, %v1985_v45  ;;  %v691_v41 = vadd.f32 %v659_v28, %v1988_v46  ;;  %v805_v36 = vmul.f32 0.5, %v773_v14 }
 0x11b   : > { %v722_v40 = vmul.f32 0.7978846, %v690_v27  ;;  %v864_v42 = vpack.c.bf16 %v835_v32, %v834_v29  ;;  %v836_v44 = vmul.f32 %v804_v35, %v1835_v48  ;;  %v600_v47 = vmul.f32 %v2012_v30, %v2012_v30 }
 0x11c   : > { %v2026_v52 = vpop.eup %1654  ;;  %v725_v62 = vmul.f32 0.7978846, %v693_v23  ;;  %v723_v53 = vmul.f32 0.7978846, %v691_v41  ;;  %v837_v54 = vmul.f32 %v805_v36, %v1845_v57  ;;  %v2030_v56 = vadd.f32 %v1807_v26, %v543_v7 }
 0x11d   : > { %v2032_v58 = vpop.eup %1656  ;;  %1664 = vtanh.f32 %v722_v40  ;;  %1544 = vmatprep.mubr.bf16.mxu1 %v864_v42  ;;  %v632_v59 = vmul.f32 %v600_v47, %v2012_v30  ;;  %v2036_v48 = vadd.f32 %v1519_v16, %v1807_v26  ;;  %v2039_v60 = vadd.f32 %v1807_v26, %v546_v38  ;;  %v1522_v63 = vpop.f32.mrb[28].mxu0 }
 0x11e   : > { %1666 = vtanh.f32 %v725_v62  ;;  %v865_v3 = vpack.c.bf16 %v837_v54, %v836_v44  ;;  %v598_v57 = vmul.f32 %v2030_v56, %v2030_v56  ;;  %v774_v10 = vadd.f32 1.0, %v1962_v4  ;;  %v559_v33 = vpop.f32.mrb[29].mxu0 }
 0x11f   : > { %v2044_v2 = vpop.eup %1658  ;;  %1668 = vtanh.f32 %v723_v53  ;;  %v664_v5 = vmul.f32 0.044715, %v632_v59  ;;  %v601_v6 = vmul.f32 %v2036_v48, %v2036_v48  ;;  %v599_v7 = vmul.f32 %v2039_v60, %v2039_v60  ;;  %v1523_v8 = vpop.f32.mrb[30].mxu0 }
 0x120   : > { %v2050_v18 = vpop.eup %1660  ;;  %1545 = vmatmul.mubr.bf16.vlgmr.msra.gmra.mrb[0].mxu1 %v865_v3  ;;  %v630_v9 = vmul.f32 %v598_v57, %v2030_v56  ;;  %v775_v14 = vadd.f32 1.0, %v1973_v22  ;;  %v806_v4 = vmul.f32 0.5, %v774_v10  ;;  %v776_v16 = vadd.f32 1.0, %v1958_v61  ;;  %v562_v34 = vpop.f32.mrb[31].mxu0 }
 0x121   : > { %v696_v19 = vadd.f32 %v664_v5, %v2012_v30  ;;  %v633_v28 = vmul.f32 %v601_v6, %v2036_v48  ;;  %v631_v27 = vmul.f32 %v599_v7, %v2039_v60  ;;  %v777_v29 = vadd.f32 1.0, %v1966_v11 }
 0x122   : > { %v662_v32 = vmul.f32 0.044715, %v630_v9  ;;  %v807_v35 = vmul.f32 0.5, %v775_v14  ;;  %v838_v38 = vmul.f32 %v806_v4, %v1866_v15  ;;  %v808_v23 = vmul.f32 0.5, %v776_v16 }
 0x123   : > { %v728_v41 = vmul.f32 0.7978846, %v696_v19  ;;  %v665_v36 = vmul.f32 0.044715, %v633_v28  ;;  %v663_v22 = vmul.f32 0.044715, %v631_v27  ;;  %v2061_v40 = vadd.f32 %v1522_v63, %v1807_v26 }
 0x124   : > { %v2063_v61 = vpop.eup %1662  ;;  %v694_v42 = vadd.f32 %v662_v32, %v2030_v56  ;;  %v839_v44 = vmul.f32 %v807_v35, %v1878_v24  ;;  %v809_v47 = vmul.f32 0.5, %v777_v29  ;;  %v840_v11 = vmul.f32 %v808_v23, %v1863_v12 }
 0x125   : > { %1670 = vtanh.f32 %v728_v41  ;;  %v697_v62 = vadd.f32 %v665_v36, %v2036_v48  ;;  %v695_v15 = vadd.f32 %v663_v22, %v2039_v60  ;;  %v604_v53 = vmul.f32 %v2061_v40, %v2061_v40 }
 0x126   : > { %v726_v54 = vmul.f32 0.7978846, %v694_v42  ;;  %v866_v59 = vpack.c.bf16 %v839_v44, %v838_v38  ;;  %v841_v63 = vmul.f32 %v809_v47, %v1873_v21  ;;  %v2074_v3 = vadd.f32 %v1807_v26, %v559_v33 }
 0x127   : > { %v2076_v57 = vpop.eup %1664  ;;  %v729_v24 = vmul.f32 0.7978846, %v697_v62  ;;  %v727_v10 = vmul.f32 0.7978846, %v695_v15  ;;  %v636_v12 = vmul.f32 %v604_v53, %v2061_v40  ;;  %v2080_v5 = vadd.f32 %v1523_v8, %v1807_v26 }
 0x128   : > { %v2082_v6 = vpop.eup %1666  ;;  %1672 = vtanh.f32 %v726_v54  ;;  %1548 = vmatprep.mubr.bf16.mxu1 %v866_v59  ;;  %v867_v7 = vpack.c.bf16 %v841_v63, %v840_v11  ;;  %v602_v21 = vmul.f32 %v2074_v3, %v2074_v3  ;;  %v2087_v33 = vadd.f32 %v1807_v26, %v562_v34 }
 0x129   : > { %v1669_v9 = vpop.eup %1668  ;;  %1674 = vtanh.f32 %v729_v24  ;;  %v668_v14 = vmul.f32 0.044715, %v636_v12  ;;  %v605_v4 = vmul.f32 %v2080_v5, %v2080_v5  ;;  %v778_v8 = vadd.f32 1.0, %v2005_v1 }
 0x12a   : > { %1676 = vtanh.f32 %v727_v10  ;;  %1549 = vmatmul.mubr.bf16.gmra.mrb[4].mxu1 %v867_v7  ;;  %v634_v16 = vmul.f32 %v602_v21, %v2074_v3  ;;  %v603_v19 = vmul.f32 %v2087_v33, %v2087_v33  ;;  %v779_v28 = vadd.f32 1.0, %v2019_v39 }
 0x12b   : > { %v700_v26 = vadd.f32 %v668_v14, %v2061_v40  ;;  %v637_v34 = vmul.f32 %v605_v4, %v2080_v5  ;;  %v810_v27 = vmul.f32 0.5, %v778_v8  ;;  %v780_v29 = vadd.f32 1.0, %v1995_v55 }
 0x12c   : > { %v666_v32 = vmul.f32 0.044715, %v634_v16  ;;  %v635_v35 = vmul.f32 %v603_v19, %v2087_v33  ;;  %v811_v1 = vmul.f32 0.5, %v779_v28  ;;  %v781_v38 = vadd.f32 1.0, %v2014_v25 }
 0x12d   : > { %v732_v23 = vmul.f32 0.7978846, %v700_v26  ;;  %v669_v41 = vmul.f32 0.044715, %v637_v34  ;;  %v842_v36 = vmul.f32 %v810_v27, %v1898_v0  ;;  %v812_v22 = vmul.f32 0.5, %v780_v29 }
 0x12e   : > { %v698_v39 = vadd.f32 %v666_v32, %v2074_v3  ;;  %v667_v42 = vmul.f32 0.044715, %v635_v35  ;;  %v843_v44 = vmul.f32 %v811_v1, %v1917_v17  ;;  %v813_v47 = vmul.f32 0.5, %v781_v38 }
 0x12f   : > { %v1671_v11 = vpop.eup %1670  ;;  %1678 = vtanh.f32 %v732_v23  ;;  %v701_v55 = vadd.f32 %v669_v41, %v2080_v5  ;;  %v844_v62 = vmul.f32 %v812_v22, %v1891_v50  ;;  %v782_v15 = vadd.f32 1.0, %v2032_v58 }
 0x130   : > { %v730_v25 = vmul.f32 0.7978846, %v698_v39  ;;  %v699_v53 = vadd.f32 %v667_v42, %v2087_v33  ;;  %v868_v54 = vpack.c.bf16 %v843_v44, %v842_v36  ;;  %v845_v0 = vmul.f32 %v813_v47, %v1911_v13 }
 0x131   : > { %v733_v59 = vmul.f32 0.7978846, %v701_v55  ;;  %v783_v63 = vadd.f32 1.0, %v2050_v18  ;;  %v814_v24 = vmul.f32 0.5, %v782_v15  ;;  %v784_v17 = vadd.f32 1.0, %v2026_v52 }
 0x132   : > { %v1673_v10 = vpop.eup %1672  ;;  %1680 = vtanh.f32 %v730_v25  ;;  %v731_v12 = vmul.f32 0.7978846, %v699_v53  ;;  %1552 = vmatprep.mubr.bf16.mxu1 %v868_v54  ;;  %v869_v7 = vpack.c.bf16 %v845_v0, %v844_v62  ;;  %v785_v50 = vadd.f32 1.0, %v2044_v2 }
 0x133   : > { %v1675_v58 = vpop.eup %1674  ;;  %1682 = vtanh.f32 %v733_v59  ;;  %v815_v21 = vmul.f32 0.5, %v783_v63  ;;  %v846_v14 = vmul.f32 %v814_v24, %v1937_v37  ;;  %v816_v4 = vmul.f32 0.5, %v784_v17 }
 0x134   : > { %v1677_v13 = vpop.eup %1676  ;;  %1684 = vtanh.f32 %v731_v12  ;;  %1553 = vmatmul.mubr.bf16.gmra.mrb[8].mxu1 %v869_v7  ;;  %v817_v18 = vmul.f32 0.5, %v785_v50  ;;  %v786_v8 = vadd.f32 1.0, %v2076_v57  ;;  %v787_v52 = vadd.f32 1.0, %v1669_v9  ;;  %v2134_v12 = vld [vmem:[%s2246_s4] ss:$0 sm:$0xff] }
 0x135   : > { %v847_v16 = vmul.f32 %v815_v21, %v1949_v51  ;;  %v848_v19 = vmul.f32 %v816_v4, %v1931_v31  ;;  %v788_v28 = vadd.f32 1.0, %v2063_v61  ;;  %v789_v2 = vadd.f32 1.0, %v2082_v6 }
 0x136   : > { %v849_v26 = vmul.f32 %v817_v18, %v1946_v49  ;;  %v818_v34 = vmul.f32 0.5, %v786_v8  ;;  %v819_v37 = vmul.f32 0.5, %v787_v52  ;;  %v790_v27 = vadd.f32 1.0, %v1673_v10 }
 0x137   : > { %v870_v29 = vpack.c.bf16 %v847_v16, %v846_v14  ;;  %v820_v32 = vmul.f32 0.5, %v788_v28  ;;  %v821_v35 = vmul.f32 0.5, %v789_v2  ;;  %v791_v1 = vadd.f32 1.0, %v1677_v13 }
 0x138   : > { %v871_v38 = vpack.c.bf16 %v849_v26, %v848_v19  ;;  %v850_v57 = vmul.f32 %v818_v34, %v1981_v43  ;;  %v851_v51 = vmul.f32 %v819_v37, %v1988_v46  ;;  %v822_v9 = vmul.f32 0.5, %v790_v27 }
 0x139   : > { %v1679_v31 = vpop.eup %1678  ;;  %1556 = vmatprep.mubr.bf16.mxu1 %v870_v29  ;;  %v852_v61 = vmul.f32 %v820_v32, %v1971_v20  ;;  %v853_v6 = vmul.f32 %v821_v35, %v1985_v45  ;;  %v823_v49 = vmul.f32 0.5, %v791_v1  ;;  %v792_v23 = vadd.f32 1.0, %v1671_v11 }
 0x13a   : > { %v872_v41 = vpack.c.bf16 %v851_v51, %v850_v57  ;;  %v793_v36 = vadd.f32 1.0, %v1675_v58  ;;  %v796_v22 = vadd.f32 1.0, %v1679_v31  ;;  %v854_v42 = vmul.f32 %v822_v9, %v2030_v56 }
 0x13b   : > { %v873_v39 = vpack.c.bf16 %v853_v6, %v852_v61  ;;  %v855_v44 = vmul.f32 %v823_v49, %v2039_v60  ;;  %v824_v43 = vmul.f32 0.5, %v792_v23 }
 0x13c   : > { %v1681_v47 = vpop.eup %1680  ;;  %1557 = vmatmul.mubr.bf16.gmra.mrb[12].mxu1 %v871_v38  ;;  %v825_v46 = vmul.f32 0.5, %v793_v36  ;;  %v828_v53 = vmul.f32 0.5, %v796_v22 }
 0x13d   : > { %v1683_v55 = vpop.eup %1682  ;;  %1560 = vmatprep.mubr.bf16.mxu1 %v872_v41  ;;  %v874_v62 = vpack.c.bf16 %v855_v44, %v854_v42  ;;  %v794_v20 = vadd.f32 1.0, %v1681_v47  ;;  %v856_v45 = vmul.f32 %v824_v43, %v2012_v30 }
 0x13e   : > { %v1685_v15 = vpop.eup %1684  ;;  %v857_v11 = vmul.f32 %v825_v46, %v2036_v48  ;;  %v797_v25 = vadd.f32 1.0, %v1683_v55  ;;  %v860_v63 = vmul.f32 %v828_v53, %v2061_v40 }
 0x13f   : > { %v795_v54 = vadd.f32 1.0, %v1685_v15  ;;  %v826_v0 = vmul.f32 0.5, %v794_v20 }
 0x140   : > { %v875_v56 = vpack.c.bf16 %v857_v11, %v856_v45  ;;  %v829_v59 = vmul.f32 0.5, %v797_v25 }
 0x141   : > { %v827_v60 = vmul.f32 0.5, %v795_v54  ;;  %v858_v17 = vmul.f32 %v826_v0, %v2074_v3 }
 0x142   : > { %v861_v24 = vmul.f32 %v829_v59, %v2080_v5 }
 0x143   : > { %v859_v10 = vmul.f32 %v827_v60, %v2087_v33 }
 0x144   : > { %1561 = vmatmul.mubr.bf16.gmra.mrb[16].mxu1 %v873_v39  ;;  %v877_v30 = vpack.c.bf16 %v861_v24, %v860_v63 }
 0x145   : > { %1564 = vmatprep.mubr.bf16.mxu1 %v874_v62  ;;  %v876_v48 = vpack.c.bf16 %v859_v10, %v858_v17 }
 0x14c   : > { %1565 = vmatmul.mubr.bf16.gmra.mrb[20].mxu1 %v875_v56 }
 0x14d   : > { %1568 = vmatprep.mubr.bf16.mxu1 %v876_v48 }
 0x154   : > { %1569 = vmatmul.mubr.bf16.gmra.mrb[24].mxu1 %v877_v30 }
 0x1e6   : > { %v1542_v7 = vpop.f32.mrb[32].mxu0 }
 0x1e7   : > { %v992_v40 = vadd.f32 %v1542_v7, %v2134_v12  ;;  %v983_v5 = vpop.f32.mrb[33].mxu0 }
 0x1e8   : > { %v984_v3 = vadd.f32 %v2134_v12, %v983_v5  ;;  %v1543_v33 = vpop.f32.mrb[34].mxu0 }
 0x1e9   : > { %v1416_v50 = vpack.c.bf16 %v992_v40, %v992_v40  ;;  %v995_v58 = vadd.f32 %v1543_v33, %v2134_v12  ;;  %v986_v21 = vpop.f32.mrb[35].mxu0 }
 0x1ea   : > { %v1414_v14 = vpack.c.bf16 %v984_v3, %v984_v3  ;;  %v987_v4 = vadd.f32 %v2134_v12, %v986_v21 }
 0x1eb   : > { %1241 = vst.msk [vmem:[%s2142_s29 + $0x8] sm:$0xf] %vm1238_vm1, %v1416_v50  ;;  %v1417_v13 = vpack.c.bf16 %v995_v58, %v995_v58 }
 0x1ec   : > { %1239 = vst.msk [vmem:[%s2142_s29] sm:$0xf] %vm1238_vm1, %v1414_v14  ;;  %v1415_v18 = vpack.c.bf16 %v987_v4, %v987_v4 }
 0x1ed   : > { %1242 = vst.msk [vmem:[%s2142_s29 + $0xc] sm:$0xf] %vm1238_vm1, %v1417_v13 }
 0x1ee   : > { %1240 = vst.msk [vmem:[%s2142_s29 + $0x4] sm:$0xf] %vm1238_vm1, %v1415_v18 }
 0x1f3   : > { %v1546_v8 = vpop.f32.mrb[0].mxu1 }
 0x1f4   : > { %v1008_v52 = vadd.f32 %v1546_v8, %v2134_v12  ;;  %v999_v16 = vpop.f32.mrb[1].mxu1 }
 0x1f5   : > { %v1000_v19 = vadd.f32 %v2134_v12, %v999_v16  ;;  %v1547_v28 = vpop.f32.mrb[2].mxu1 }
 0x1f6   : > { %v1420_v2 = vpack.c.bf16 %v1008_v52, %v1008_v52  ;;  %v1011_v26 = vadd.f32 %v1547_v28, %v2134_v12  ;;  %v1002_v34 = vpop.f32.mrb[3].mxu1 }
 0x1f7   : > { %v1418_v37 = vpack.c.bf16 %v1000_v19, %v1000_v19  ;;  %v1003_v27 = vadd.f32 %v2134_v12, %v1002_v34 }
 0x1f8   : > { %1245 = vst.msk [vmem:[%s2142_s29 + $0x18] sm:$0xf] %vm1238_vm1, %v1420_v2  ;;  %v1421_v29 = vpack.c.bf16 %v1011_v26, %v1011_v26 }
 0x1f9   : > { %1243 = vst.msk [vmem:[%s2142_s29 + $0x10] sm:$0xf] %vm1238_vm1, %v1418_v37  ;;  %v1419_v32 = vpack.c.bf16 %v1003_v27, %v1003_v27 }
 0x1fa   : > { %1246 = vst.msk [vmem:[%s2142_s29 + $0x1c] sm:$0xf] %vm1238_vm1, %v1421_v29 }
 0x1fb   : > { %1244 = vst.msk [vmem:[%s2142_s29 + $0x14] sm:$0xf] %vm1238_vm1, %v1419_v32 }
 0x1fd   : > { %v1550_v35 = vpop.f32.mrb[4].mxu1 }
 0x1fe   : > { %v1024_v1 = vadd.f32 %v1550_v35, %v2134_v12  ;;  %v1015_v38 = vpop.f32.mrb[5].mxu1 }
 0x1ff   : > { %v1016_v57 = vadd.f32 %v2134_v12, %v1015_v38  ;;  %v1551_v51 = vpop.f32.mrb[6].mxu1 }
 0x200   : > { %v1424_v9 = vpack.c.bf16 %v1024_v1, %v1024_v1  ;;  %v1027_v31 = vadd.f32 %v1551_v51, %v2134_v12  ;;  %v1018_v61 = vpop.f32.mrb[7].mxu1 }
 0x201   : > { %v1422_v6 = vpack.c.bf16 %v1016_v57, %v1016_v57  ;;  %v1019_v49 = vadd.f32 %v2134_v12, %v1018_v61 }
 0x202   : > { %1249 = vst.msk [vmem:[%s2142_s29 + $0x28] sm:$0xf] %vm1238_vm1, %v1424_v9  ;;  %v1425_v23 = vpack.c.bf16 %v1027_v31, %v1027_v31 }
 0x203   : > { %1247 = vst.msk [vmem:[%s2142_s29 + $0x20] sm:$0xf] %vm1238_vm1, %v1422_v6  ;;  %v1423_v41 = vpack.c.bf16 %v1019_v49, %v1019_v49 }
 0x204   : > { %1250 = vst.msk [vmem:[%s2142_s29 + $0x2c] sm:$0xf] %vm1238_vm1, %v1425_v23 }
 0x205   : > { %1248 = vst.msk [vmem:[%s2142_s29 + $0x24] sm:$0xf] %vm1238_vm1, %v1423_v41 }
 0x207   : > { %v1554_v36 = vpop.f32.mrb[8].mxu1 }
 0x208   : > { %v1040_v22 = vadd.f32 %v1554_v36, %v2134_v12  ;;  %v1031_v39 = vpop.f32.mrb[9].mxu1 }
 0x209   : > { %v1032_v42 = vadd.f32 %v2134_v12, %v1031_v39  ;;  %v1555_v44 = vpop.f32.mrb[10].mxu1 }
 0x20a   : > { %v1428_v43 = vpack.c.bf16 %v1040_v22, %v1040_v22  ;;  %v1043_v47 = vadd.f32 %v1555_v44, %v2134_v12  ;;  %v1034_v46 = vpop.f32.mrb[11].mxu1 }
 0x20b   : > { %v1426_v55 = vpack.c.bf16 %v1032_v42, %v1032_v42  ;;  %v1035_v62 = vadd.f32 %v2134_v12, %v1034_v46 }
 0x20c   : > { %1253 = vst.msk [vmem:[%s2142_s29 + $0x38] sm:$0xf] %vm1238_vm1, %v1428_v43  ;;  %v1429_v20 = vpack.c.bf16 %v1043_v47, %v1043_v47 }
 0x20d   : > { %1251 = vst.msk [vmem:[%s2142_s29 + $0x30] sm:$0xf] %vm1238_vm1, %v1426_v55  ;;  %v1427_v15 = vpack.c.bf16 %v1035_v62, %v1035_v62 }
 0x20e   : > { %1254 = vst.msk [vmem:[%s2142_s29 + $0x3c] sm:$0xf] %vm1238_vm1, %v1429_v20 }
 0x20f   : > { %1252 = vst.msk [vmem:[%s2142_s29 + $0x34] sm:$0xf] %vm1238_vm1, %v1427_v15  ;;  %v1558_v45 = vpop.f32.mrb[12].mxu1 }
 0x210   : > { %v1056_v11 = vadd.f32 %v1558_v45, %v2134_v12  ;;  %v1047_v25 = vpop.f32.mrb[13].mxu1 }
 0x211   : > { %v1048_v53 = vadd.f32 %v2134_v12, %v1047_v25  ;;  %v1559_v54 = vpop.f32.mrb[14].mxu1 }
 0x212   : > { %v1432_v0 = vpack.c.bf16 %v1056_v11, %v1056_v11  ;;  %v1059_v56 = vadd.f32 %v1559_v54, %v2134_v12  ;;  %v1050_v59 = vpop.f32.mrb[15].mxu1 }
 0x213   : > { %v1430_v60 = vpack.c.bf16 %v1048_v53, %v1048_v53  ;;  %v1051_v63 = vadd.f32 %v2134_v12, %v1050_v59 }
 0x214   : > { %1257 = vst.msk [vmem:[%s2142_s29 + $0x48] sm:$0xf] %vm1238_vm1, %v1432_v0  ;;  %v1433_v24 = vpack.c.bf16 %v1059_v56, %v1059_v56 }
 0x215   : > { %1255 = vst.msk [vmem:[%s2142_s29 + $0x40] sm:$0xf] %vm1238_vm1, %v1430_v60  ;;  %v1431_v17 = vpack.c.bf16 %v1051_v63, %v1051_v63 }
 0x216   : > { %1258 = vst.msk [vmem:[%s2142_s29 + $0x4c] sm:$0xf] %vm1238_vm1, %v1433_v24 }
 0x217   : > { %1256 = vst.msk [vmem:[%s2142_s29 + $0x44] sm:$0xf] %vm1238_vm1, %v1431_v17  ;;  %v1562_v10 = vpop.f32.mrb[16].mxu1 }
 0x218   : > { %v1072_v30 = vadd.f32 %v1562_v10, %v2134_v12  ;;  %v1063_v48 = vpop.f32.mrb[17].mxu1 }
 0x219   : > { %v1064_v7 = vadd.f32 %v2134_v12, %v1063_v48  ;;  %v1563_v40 = vpop.f32.mrb[18].mxu1 }
 0x21a   : > { %v1436_v5 = vpack.c.bf16 %v1072_v30, %v1072_v30  ;;  %v1075_v3 = vadd.f32 %v1563_v40, %v2134_v12  ;;  %v1066_v33 = vpop.f32.mrb[19].mxu1 }
 0x21b   : > { %v1434_v50 = vpack.c.bf16 %v1064_v7, %v1064_v7  ;;  %v1067_v58 = vadd.f32 %v2134_v12, %v1066_v33 }
 0x21c   : > { %1261 = vst.msk [vmem:[%s2142_s29 + $0x58] sm:$0xf] %vm1238_vm1, %v1436_v5  ;;  %v1437_v21 = vpack.c.bf16 %v1075_v3, %v1075_v3 }
 0x21d   : > { %1259 = vst.msk [vmem:[%s2142_s29 + $0x50] sm:$0xf] %vm1238_vm1, %v1434_v50  ;;  %v1435_v14 = vpack.c.bf16 %v1067_v58, %v1067_v58 }
 0x21e   : > { %1262 = vst.msk [vmem:[%s2142_s29 + $0x5c] sm:$0xf] %vm1238_vm1, %v1437_v21 }
 0x21f   : > { %1260 = vst.msk [vmem:[%s2142_s29 + $0x54] sm:$0xf] %vm1238_vm1, %v1435_v14  ;;  %v1566_v4 = vpop.f32.mrb[20].mxu1 }
 0x220   : > { %v1088_v13 = vadd.f32 %v1566_v4, %v2134_v12  ;;  %v1079_v18 = vpop.f32.mrb[21].mxu1 }
 0x221   : > { %v1080_v8 = vadd.f32 %v2134_v12, %v1079_v18  ;;  %v1567_v52 = vpop.f32.mrb[22].mxu1 }
 0x222   : > { %v1440_v16 = vpack.c.bf16 %v1088_v13, %v1088_v13  ;;  %v1091_v19 = vadd.f32 %v1567_v52, %v2134_v12  ;;  %v1082_v28 = vpop.f32.mrb[23].mxu1 }
 0x223   : > { %v1438_v2 = vpack.c.bf16 %v1080_v8, %v1080_v8  ;;  %v1083_v26 = vadd.f32 %v2134_v12, %v1082_v28 }
 0x224   : > { %1265 = vst.msk [vmem:[%s2142_s29 + $0x68] sm:$0xf] %vm1238_vm1, %v1440_v16  ;;  %v1441_v34 = vpack.c.bf16 %v1091_v19, %v1091_v19 }
 0x225   : > { %1263 = vst.msk [vmem:[%s2142_s29 + $0x60] sm:$0xf] %vm1238_vm1, %v1438_v2  ;;  %v1439_v37 = vpack.c.bf16 %v1083_v26, %v1083_v26 }
 0x226   : > { %1266 = vst.msk [vmem:[%s2142_s29 + $0x6c] sm:$0xf] %vm1238_vm1, %v1441_v34 }
 0x227   : > { %1264 = vst.msk [vmem:[%s2142_s29 + $0x64] sm:$0xf] %vm1238_vm1, %v1439_v37  ;;  %v1570_v27 = vpop.f32.mrb[24].mxu1 }
 0x228   : > { %v1104_v29 = vadd.f32 %v1570_v27, %v2134_v12  ;;  %v1095_v32 = vpop.f32.mrb[25].mxu1 }
 0x229   : > { %v1096_v35 = vadd.f32 %v2134_v12, %v1095_v32  ;;  %v1571_v1 = vpop.f32.mrb[26].mxu1 }
 0x22a   : > { %v1444_v38 = vpack.c.bf16 %v1104_v29, %v1104_v29  ;;  %v1107_v57 = vadd.f32 %v1571_v1, %v2134_v12  ;;  %v1098_v51 = vpop.f32.mrb[27].mxu1 }
 0x22b   : > { %v1442_v9 = vpack.c.bf16 %v1096_v35, %v1096_v35  ;;  %v1099_v31 = vadd.f32 %v2134_v12, %v1098_v51 }
 0x22c   : > { %1269 = vst.msk [vmem:[%s2142_s29 + $0x78] sm:$0xf] %vm1238_vm1, %v1444_v38  ;;  %v1445_v61 = vpack.c.bf16 %v1107_v57, %v1107_v57 }
 0x22d   : > { %1267 = vst.msk [vmem:[%s2142_s29 + $0x70] sm:$0xf] %vm1238_vm1, %v1442_v9  ;;  %v1443_v6 = vpack.c.bf16 %v1099_v31, %v1099_v31 }
 0x22e   : > { %1270 = vst.msk [vmem:[%s2142_s29 + $0x7c] sm:$0xf] %vm1238_vm1, %v1445_v61 }
 0x22f   : > { %1268 = vst.msk [vmem:[%s2142_s29 + $0x74] sm:$0xf] %vm1238_vm1, %v1443_v6 }
 0x230 PF: > { %s15_s18 = sadd.s32 1, %s1692_s18  }
 0x231   : > { %p12_p4 = scmp.ge.s32.totalorder %s15_s18, 4  }
 0x233   :  { %14 = sbr.rel (!%p12_p4) target bundleno = 1 (0x1), region = 70 }

</bundles_post_ra>
